<compile_context>
chip_gen: v7x
topology: tpu7x:2x2x1
jax: 0.10.0
libtpu: 0.0.40
codegen_flags: <defaults>
</compile_context>

<pallas_src>
import functools

import jax
import jax.numpy as jnp
import numpy as np
from jax.experimental import pallas as pl
from jax.experimental.pallas import tpu as pltpu


def _round_up(x, m):
    return (x + m - 1) // m * m


def _layer_norm(x, g, b, eps=1e-5):
    mu = jnp.mean(x, axis=-1, keepdims=True)
    var = jnp.mean((x - mu) ** 2, axis=-1, keepdims=True)
    return (x - mu) * jax.lax.rsqrt(var + eps) * g + b


# --------------------------------------------------------------------------
# Pallas kernel: the whole SPD_attention + bi_MLP hot path for one batch tile
# --------------------------------------------------------------------------
def spd_attention_kernel(
    ent_l_ref, ent_r_ref,                      # (BT, D)
    rel_l_ref, em_l_ref, rel_r_ref, em_r_ref,  # (BT, M, D)
    el_ref, er_ref, wflat_ref,                 # bilinear: (D, D*D), (D, D*D), (D*D, 2D)
    gw_ref,                                    # gate_w^T           (2D, D)
    lt_ref, lh_ref,                            # Linear_tail^T / Linear_head^T (D, D)
    wqbk1_ref, wvo1_ref,                       # folded task-aware attention   (D, D)
    wqbk2_ref, wvo2_ref,                       # folded entity-pair attention  (D, D)
    m1w_ref, m2w_ref,                          # MLPW1^T / MLPW2^T  (2D, 2D)
    vec_ref,                                   # packed bias / LN vectors (8, 2D)
    out_ref,                                   # (BT, 2D)
):
    f32 = jnp.float32
    dot = functools.partial(jnp.dot, preferred_element_type=f32)

    ent_l = ent_l_ref[...]
    ent_r = ent_r_ref[...]
    rel_l = rel_l_ref[...]
    em_l = em_l_ref[...]
    rel_r = rel_r_ref[...]
    em_r = em_r_ref[...]

    BT, D = ent_l.shape
    M = rel_l.shape[1]

    # ---- unpack the small packed vectors (one (8, 2D) ref) -------------------
    vecs = vec_ref[...]
    gb = vecs[0:1, :D]          # gate_w bias
    lng = vecs[1:2, :D]         # layer_norm gamma
    lnb = vecs[2:3, :D]         # layer_norm beta
    bo1 = vecs[3:4, :D]         # task-aware attention output bias
    bo2 = vecs[4:5, :D]         # entity-pair attention output bias
    b1 = vecs[5:6, :]           # MLPW1 bias
    ln1g = vecs[6:7, :]         # layer_norm1 gamma
    ln1b = vecs[7:8, :]         # layer_norm1 beta

    # ---- rel_emb = nn.Bilinear(entity_left, entity_right) --------------------
    # outer product (ent_l ⊗ ent_r) built lane-flattened via constant one-hot
    # expansion matmuls, then a single (BT, D*D) @ (D*D, 2D) contraction.
    zl = dot(ent_l, el_ref[...])                 # zl[b, i*D+j] = ent_l[b, i]
    zr = dot(ent_r, er_ref[...])                 # zr[b, i*D+j] = ent_r[b, j]
    rel_emb = dot(zl * zr, wflat_ref[...])       # (BT, 2D)

    # ---- stack head / tail along the batch axis ------------------------------
    # rows [0, BT)  = head slot ;  rows [BT, 2BT) = tail slot
    ent_lr = jnp.concatenate([ent_l, ent_r], axis=0)                   # (2BT, D)
    k_rel = jnp.concatenate([rel_l, rel_r], axis=0)                    # (2BT, M, D)
    k_ent = jnp.concatenate([em_l, em_r], axis=0)                      # (2BT, M, D)
    q1 = jnp.concatenate([rel_emb[:, :D], rel_emb[:, D:]], axis=0)     # (2BT, D)

    # ---- V = relu(gate_w(cat([rel_nn, ent_nn], -1))) : ONE fused matmul ------
    x_gate = jnp.concatenate(
        [k_rel.reshape(2 * BT * M, D), k_ent.reshape(2 * BT * M, D)], axis=-1)
    v_all = jnp.maximum(dot(x_gate, gw_ref[...]) + gb, 0.0)            # (2BT*M, D)
    v_all = v_all.reshape(2 * BT, M, D)

    lt = lt_ref[...]
    lh = lh_ref[...]

    # ---- single-head attention (folded weights, dropout=identity, no scale) --
    def attention(q2d, k3d, wqbk, wvo, bo):
        qf = dot(q2d, wqbk)                                 # (2BT, D)
        s = jnp.sum(k3d * qf[:, None, :], axis=-1)          # (2BT, M)
        s = s - jnp.max(s, axis=-1, keepdims=True)
        e = jnp.exp(s)
        p = e * pl.reciprocal(jnp.sum(e, axis=-1, keepdims=True), approx=True)
        cv = jnp.sum(p[:, :, None] * v_all, axis=1)         # (2BT, D)
        return dot(cv, wvo) + bo                            # (2BT, D)

    def enhance(att_out):
        h = jnp.maximum(dot(att_out, lt) + dot(ent_lr, lh), 0.0)
        return _layer_norm(h + ent_lr, lng, lnb)

    # task-aware attention (queries = rel_fwd for head, rel_bwd for tail)
    e1 = enhance(attention(q1, k_rel, wqbk1_ref[...], wvo1_ref[...], bo1))
    # entity-pair attention (head queries enhanced_tail_, tail queries enhanced_head_)
    q2 = jnp.concatenate([e1[BT:], e1[:BT]], axis=0)
    e2 = enhance(attention(q2, k_ent, wqbk2_ref[...], wvo2_ref[...], bo2))

    pair = jnp.concatenate([e2[:BT], e2[BT:]], axis=-1)     # (BT, 2D)

    # ---- bi_MLP with residual layer norm --------------------------------------
    h = jnp.maximum(dot(pair, m1w_ref[...]) + b1, 0.0)
    h = dot(h, m2w_ref[...])
    out_ref[...] = _layer_norm(h + pair, ln1g, ln1b).astype(out_ref.dtype)


# --------------------------------------------------------------------------
# Wrapper: pallas_call with a parallel grid over batch tiles
# --------------------------------------------------------------------------
def spd_attention_pallas(ent_l, ent_r, rel_l, em_l, rel_r, em_r,
                         kernel_weights, block_b=128):
    assert block_b % 8 == 0
    B, D = ent_l.shape
    M = rel_l.shape[1]

    bt = min(block_b, _round_up(B, 8))
    Bp = _round_up(B, bt)
    nb = Bp // bt

    def pad_batch(x):
        if x.shape[0] == Bp:
            return x
        widths = [(0, Bp - x.shape[0])] + [(0, 0)] * (x.ndim - 1)
        return jnp.pad(x, widths)

    ent_l, ent_r = pad_batch(ent_l), pad_batch(ent_r)
    rel_l, em_l = pad_batch(rel_l), pad_batch(em_l)
    rel_r, em_r = pad_batch(rel_r), pad_batch(em_r)

    act2_spec = pl.BlockSpec((bt, D), lambda i: (i, 0))
    act3_spec = pl.BlockSpec((bt, M, D), lambda i: (i, 0, 0))
    # weights: full block, constant index_map -> stays VMEM resident across steps
    w_specs = [pl.BlockSpec(tuple(w.shape), lambda i: (0, 0)) for w in kernel_weights]

    in_specs = ([act2_spec, act2_spec, act3_spec, act3_spec, act3_spec, act3_spec]
                + w_specs)
    out_spec = pl.BlockSpec((bt, 2 * D), lambda i: (i, 0))

    out = pl.pallas_call(
        spd_attention_kernel,
        out_shape=jax.ShapeDtypeStruct((Bp, 2 * D), jnp.float32),
        grid=(nb,),
        in_specs=in_specs,
        out_specs=out_spec,
        compiler_params=pltpu.CompilerParams(dimension_semantics=("parallel",)),
    )(ent_l, ent_r, rel_l, em_l, rel_r, em_r, *kernel_weights)
    return out[:B]


# --------------------------------------------------------------------------
# Parameters (deterministic, synthetic) and host-side weight folding
# --------------------------------------------------------------------------
def init_raw_params(key, num_symbols, D):
    keys = iter(jax.random.split(key, 40))

    def w(shape, scale=0.2):
        return scale * jax.random.normal(next(keys), shape, dtype=jnp.float32)

    emb = w((num_symbols + 1, D), 0.5)
    emb = emb.at[num_symbols].set(0.0)  # padding_idx row

    def attn_weights():
        return dict(wq=w((D, D)), wk=w((D, D)), wv=w((D, D)), wb=w((D, D)),
                    wo=w((D, D)), bo=w((D,), 0.05))

    return dict(
        emb=emb,
        rel_w=w((2 * D, D, D)),                           # nn.Bilinear weight
        gw=w((D, 2 * D)), gb=w((D,), 0.05),               # gate_w
        lt=w((D, D)), lh=w((D, D)),                       # Linear_tail / Linear_head
        ln_g=jnp.ones((D,), jnp.float32), ln_b=jnp.zeros((D,), jnp.float32),
        a1=attn_weights(),                                # task_aware_attention_module
        a2=attn_weights(),                                # entity_pair_attention_module
        w1=w((2 * D, 2 * D)), b1=w((2 * D,), 0.05),       # MLPW1
        w2=w((2 * D, 2 * D)),                             # MLPW2
        ln1_g=jnp.ones((2 * D,), jnp.float32), ln1_b=jnp.zeros((2 * D,), jnp.float32),
    )


def kernel_params(raw, D):
    f32 = jnp.float32

    # constant expansion matrices for the outer product of the bilinear
    E_l = jnp.repeat(jnp.eye(D, dtype=f32), D, axis=1)    # (D, D*D): col k -> i = k//D
    E_r = jnp.tile(jnp.eye(D, dtype=f32), (1, D))         # (D, D*D): col k -> j = k%D
    # W_flat[i*D + j, o] = rel_w[o, i, j]
    W_flat = raw['rel_w'].transpose(1, 2, 0).reshape(D * D, 2 * D)

    def fold(a):
        wqbk = a['wq'].T @ a['wb'].T @ a['wk']             # query chain folded
        wvo = a['wv'].T @ a['wo'].T                        # value->output folded
        return wqbk, wvo

    wqbk1, wvo1 = fold(raw['a1'])
    wqbk2, wvo2 = fold(raw['a2'])

    def pad_row(v):
        return jnp.pad(v, (0, 2 * D - v.shape[0]))

    vecs = jnp.stack([
        pad_row(raw['gb']), pad_row(raw['ln_g']), pad_row(raw['ln_b']),
        pad_row(raw['a1']['bo']), pad_row(raw['a2']['bo']),
        raw['b1'], raw['ln1_g'], raw['ln1_b'],
    ], axis=0)                                             # (8, 2D)

    return [E_l, E_r, W_flat,
            raw['gw'].T, raw['lt'].T, raw['lh'].T,
            wqbk1, wvo1, wqbk2, wvo2,
            raw['w1'].T, raw['w2'].T, vecs]


def attention_module_forward(raw, kweights, entity_pairs, entity_meta, block_b=128):
    """Glue: embedding gathers + split; heavy math runs in the Pallas kernel."""
    emb = raw['emb']
    entity = emb[entity_pairs]                 # (B, 2, D)
    ent_l = entity[:, 0, :]
    ent_r = entity[:, 1, :]
    elc, _eld, erc, _erd = entity_meta
    rel_l = emb[elc[:, :, 0]]                  # (B, M, D)
    em_l = emb[elc[:, :, 1]]
    rel_r = emb[erc[:, :, 0]]
    em_r = emb[erc[:, :, 1]]
    # dropout layers are identity at inference
    return spd_attention_pallas(ent_l, ent_r, rel_l, em_l, rel_r, em_r,
                                kweights, block_b=block_b)


# --------------------------------------------------------------------------
# Pure-JAX reference (mirrors the PyTorch forward) for a correctness check
# --------------------------------------------------------------------------
def _ref_attention(a, q, k, v):
    qp = q @ a['wq'].T
    kp = jnp.einsum('bmd,ed->bme', k, a['wk'])
    vp = jnp.einsum('bmd,ed->bme', v, a['wv'])
    qb = qp @ a['wb'].T
    s = jnp.einsum('be,bme->bm', qb, kp)
    p = jax.nn.softmax(s, axis=-1)
    ctx = jnp.einsum('bm,bme->be', p, vp)
    return ctx @ a['wo'].T + a['bo']


def _ref_ln(x, g, b, eps=1e-5):
    mu = x.mean(-1, keepdims=True)
    var = ((x - mu) ** 2).mean(-1, keepdims=True)
    return (x - mu) / jnp.sqrt(var + eps) * g + b


def ref_forward(raw, entity_pairs, entity_meta):
    emb = raw['emb']
    D = emb.shape[1]
    entity = emb[entity_pairs]
    ent_l, ent_r = entity[:, 0, :], entity[:, 1, :]
    elc, _, erc, _ = entity_meta
    rel_l, em_l = emb[elc[:, :, 0]], emb[elc[:, :, 1]]
    rel_r, em_r = emb[erc[:, :, 0]], emb[erc[:, :, 1]]

    rel_emb = jnp.einsum('bi,oij,bj->bo', ent_l, raw['rel_w'], ent_r)
    rel_fwd, rel_bwd = rel_emb[:, :D], rel_emb[:, D:]

    def gate(r3, e3):
        x = jnp.concatenate([r3, e3], axis=-1)
        return jax.nn.relu(jnp.einsum('bmk,dk->bmd', x, raw['gw']) + raw['gb'])

    vh, vt = gate(rel_l, em_l), gate(rel_r, em_r)

    def enhance(a, ent):
        h = jax.nn.relu(a @ raw['lt'].T + ent @ raw['lh'].T)
        return _ref_ln(h + ent, raw['ln_g'], raw['ln_b'])

    eh_ = enhance(_ref_attention(raw['a1'], rel_fwd, rel_l, vh), ent_l)
    et_ = enhance(_ref_attention(raw['a1'], rel_bwd, rel_r, vt), ent_r)
    eh = enhance(_ref_attention(raw['a2'], et_, em_l, vh), ent_l)
    et = enhance(_ref_attention(raw['a2'], eh_, em_r, vt), ent_r)

    pair = jnp.concatenate([eh, et], axis=-1)
    h = jax.nn.relu(pair @ raw['w1'].T + raw['b1'])
    h = h @ raw['w2'].T
    return _ref_ln(h + pair, raw['ln1_g'], raw['ln1_b'])


# --------------------------------------------------------------------------
if __name__ == "__main__":
    B, M, D = 32, 8, 32          # batch, max neighbours, embedding_size
    num_symbols = 50
    BLOCK_B = 16                 # batch tile per grid step (exercises grid=(2,))

    key = jax.random.PRNGKey(0)
    pkey, dkey = jax.random.split(key)
    raw = init_raw_params(pkey, num_symbols, D)
    kweights = kernel_params(raw, D)

    k1, k2, k3 = jax.random.split(dkey, 3)
    entity_pairs = jax.random.randint(k1, (B, 2), 0, num_symbols)
    entity_left_connections = jax.random.randint(k2, (B, M, 2), 0, num_symbols)
    entity_right_connections = jax.random.randint(k3, (B, M, 2), 0, num_symbols)
    entity_left_degrees = jnp.full((B,), M, dtype=jnp.int32)
    entity_right_degrees = jnp.full((B,), M, dtype=jnp.int32)
    entity_meta = (entity_left_connections, entity_left_degrees,
                   entity_right_connections, entity_right_degrees)

    out = attention_module_forward(raw, kweights, entity_pairs, entity_meta,
                                   block_b=BLOCK_B)
    out = jax.block_until_ready(out)
    assert out.shape == (B, 2 * D)

    ref = ref_forward(raw, entity_pairs, entity_meta)
    err = float(np.max(np.abs(np.asarray(out) - np.asarray(ref))))
    # tolerance accounts for the approximate (EUP) softmax reciprocal
    if not np.allclose(np.asarray(out), np.asarray(ref), rtol=2e-2, atol=2e-2):
        raise AssertionError(f"kernel/reference mismatch, max abs err = {err}")

    print("KERNEL_OK")
</pallas_src>

<mosaic_0001>
module attributes {stable_mosaic.version = 11 : i64} {
  func.func @spd_attention_kernel(%arg0: i32, %arg1: memref<16x32xf32, #tpu.memory_space<vmem>>, %arg2: memref<16x32xf32, #tpu.memory_space<vmem>>, %arg3: memref<16x8x32xf32, #tpu.memory_space<vmem>>, %arg4: memref<16x8x32xf32, #tpu.memory_space<vmem>>, %arg5: memref<16x8x32xf32, #tpu.memory_space<vmem>>, %arg6: memref<16x8x32xf32, #tpu.memory_space<vmem>>, %arg7: memref<32x1024xf32, #tpu.memory_space<vmem>>, %arg8: memref<32x1024xf32, #tpu.memory_space<vmem>>, %arg9: memref<1024x64xf32, #tpu.memory_space<vmem>>, %arg10: memref<64x32xf32, #tpu.memory_space<vmem>>, %arg11: memref<32x32xf32, #tpu.memory_space<vmem>>, %arg12: memref<32x32xf32, #tpu.memory_space<vmem>>, %arg13: memref<32x32xf32, #tpu.memory_space<vmem>>, %arg14: memref<32x32xf32, #tpu.memory_space<vmem>>, %arg15: memref<32x32xf32, #tpu.memory_space<vmem>>, %arg16: memref<32x32xf32, #tpu.memory_space<vmem>>, %arg17: memref<64x64xf32, #tpu.memory_space<vmem>>, %arg18: memref<64x64xf32, #tpu.memory_space<vmem>>, %arg19: memref<8x64xf32, #tpu.memory_space<vmem>>, %arg20: memref<16x64xf32, #tpu.memory_space<vmem>>) attributes {dimension_semantics = [#tpu.dimension_semantics<parallel>], iteration_bounds = array<i64: 2>, scalar_prefetch = 0 : i64, scratch_operands = 0 : i64, tpu.core_type = #tpu.core_type<tc>, window_params = [{transform_indices = @transform_0, window_bounds = array<i64: 16, 32>}, {transform_indices = @transform_1, window_bounds = array<i64: 16, 32>}, {transform_indices = @transform_2, window_bounds = array<i64: 16, 8, 32>}, {transform_indices = @transform_3, window_bounds = array<i64: 16, 8, 32>}, {transform_indices = @transform_4, window_bounds = array<i64: 16, 8, 32>}, {transform_indices = @transform_5, window_bounds = array<i64: 16, 8, 32>}, {pipeline_mode = #tpu.pipeline_mode<synchronous>, transform_indices = @transform_6, window_bounds = array<i64: 32, 1024>}, {pipeline_mode = #tpu.pipeline_mode<synchronous>, transform_indices = @transform_7, window_bounds = array<i64: 32, 1024>}, {pipeline_mode = #tpu.pipeline_mode<synchronous>, transform_indices = @transform_8, window_bounds = array<i64: 1024, 64>}, {pipeline_mode = #tpu.pipeline_mode<synchronous>, transform_indices = @transform_9, window_bounds = array<i64: 64, 32>}, {pipeline_mode = #tpu.pipeline_mode<synchronous>, transform_indices = @transform_10, window_bounds = array<i64: 32, 32>}, {pipeline_mode = #tpu.pipeline_mode<synchronous>, transform_indices = @transform_11, window_bounds = array<i64: 32, 32>}, {pipeline_mode = #tpu.pipeline_mode<synchronous>, transform_indices = @transform_12, window_bounds = array<i64: 32, 32>}, {pipeline_mode = #tpu.pipeline_mode<synchronous>, transform_indices = @transform_13, window_bounds = array<i64: 32, 32>}, {pipeline_mode = #tpu.pipeline_mode<synchronous>, transform_indices = @transform_14, window_bounds = array<i64: 32, 32>}, {pipeline_mode = #tpu.pipeline_mode<synchronous>, transform_indices = @transform_15, window_bounds = array<i64: 32, 32>}, {pipeline_mode = #tpu.pipeline_mode<synchronous>, transform_indices = @transform_16, window_bounds = array<i64: 64, 64>}, {pipeline_mode = #tpu.pipeline_mode<synchronous>, transform_indices = @transform_17, window_bounds = array<i64: 64, 64>}, {pipeline_mode = #tpu.pipeline_mode<synchronous>, transform_indices = @transform_18, window_bounds = array<i64: 8, 64>}, {transform_indices = @transform_19, window_bounds = array<i64: 16, 64>}]} {
    %c0 = arith.constant 0 : index
    %c0_0 = arith.constant 0 : index
    %0 = vector.load %arg1[%c0, %c0_0] : memref<16x32xf32, #tpu.memory_space<vmem>>, vector<16x32xf32>
    %c0_1 = arith.constant 0 : index
    %c0_2 = arith.constant 0 : index
    %1 = vector.load %arg2[%c0_1, %c0_2] : memref<16x32xf32, #tpu.memory_space<vmem>>, vector<16x32xf32>
    %c0_3 = arith.constant 0 : index
    %c0_4 = arith.constant 0 : index
    %c0_5 = arith.constant 0 : index
    %2 = vector.load %arg3[%c0_3, %c0_4, %c0_5] : memref<16x8x32xf32, #tpu.memory_space<vmem>>, vector<16x8x32xf32>
    %c0_6 = arith.constant 0 : index
    %c0_7 = arith.constant 0 : index
    %c0_8 = arith.constant 0 : index
    %3 = vector.load %arg4[%c0_6, %c0_7, %c0_8] : memref<16x8x32xf32, #tpu.memory_space<vmem>>, vector<16x8x32xf32>
    %c0_9 = arith.constant 0 : index
    %c0_10 = arith.constant 0 : index
    %c0_11 = arith.constant 0 : index
    %4 = vector.load %arg5[%c0_9, %c0_10, %c0_11] : memref<16x8x32xf32, #tpu.memory_space<vmem>>, vector<16x8x32xf32>
    %c0_12 = arith.constant 0 : index
    %c0_13 = arith.constant 0 : index
    %c0_14 = arith.constant 0 : index
    %5 = vector.load %arg6[%c0_12, %c0_13, %c0_14] : memref<16x8x32xf32, #tpu.memory_space<vmem>>, vector<16x8x32xf32>
    %c0_15 = arith.constant 0 : index
    %c0_16 = arith.constant 0 : index
    %6 = vector.load %arg19[%c0_15, %c0_16] : memref<8x64xf32, #tpu.memory_space<vmem>>, vector<8x64xf32>
    %7 = vector.extract_strided_slice %6 {offsets = [0, 0], sizes = [1, 32], strides = [1, 1]} : vector<8x64xf32> to vector<1x32xf32>
    %8 = vector.extract_strided_slice %6 {offsets = [1, 0], sizes = [1, 32], strides = [1, 1]} : vector<8x64xf32> to vector<1x32xf32>
    %9 = vector.extract_strided_slice %6 {offsets = [2, 0], sizes = [1, 32], strides = [1, 1]} : vector<8x64xf32> to vector<1x32xf32>
    %10 = vector.extract_strided_slice %6 {offsets = [3, 0], sizes = [1, 32], strides = [1, 1]} : vector<8x64xf32> to vector<1x32xf32>
    %11 = vector.extract_strided_slice %6 {offsets = [4, 0], sizes = [1, 32], strides = [1, 1]} : vector<8x64xf32> to vector<1x32xf32>
    %12 = vector.extract_strided_slice %6 {offsets = [5, 0], sizes = [1, 64], strides = [1, 1]} : vector<8x64xf32> to vector<1x64xf32>
    %13 = vector.extract_strided_slice %6 {offsets = [6, 0], sizes = [1, 64], strides = [1, 1]} : vector<8x64xf32> to vector<1x64xf32>
    %14 = vector.extract_strided_slice %6 {offsets = [7, 0], sizes = [1, 64], strides = [1, 1]} : vector<8x64xf32> to vector<1x64xf32>
    %c0_17 = arith.constant 0 : index
    %c0_18 = arith.constant 0 : index
    %15 = vector.load %arg7[%c0_17, %c0_18] : memref<32x1024xf32, #tpu.memory_space<vmem>>, vector<32x1024xf32>
    %cst = arith.constant dense<0.000000e+00> : vector<16x1024xf32>
    %16 = tpu.matmul %0, %15, %cst {dimension_numbers = #tpu.dot_dimension_numbers<[1], [0], [0], [1], [0, 0, 1, 1], [], []>} : vector<16x32xf32>, vector<32x1024xf32>, vector<16x1024xf32> -> vector<16x1024xf32>
    %c0_19 = arith.constant 0 : index
    %c0_20 = arith.constant 0 : index
    %17 = vector.load %arg8[%c0_19, %c0_20] : memref<32x1024xf32, #tpu.memory_space<vmem>>, vector<32x1024xf32>
    %cst_21 = arith.constant dense<0.000000e+00> : vector<16x1024xf32>
    %18 = tpu.matmul %1, %17, %cst_21 {dimension_numbers = #tpu.dot_dimension_numbers<[1], [0], [0], [1], [0, 0, 1, 1], [], []>} : vector<16x32xf32>, vector<32x1024xf32>, vector<16x1024xf32> -> vector<16x1024xf32>
    %19 = arith.mulf %16, %18 : vector<16x1024xf32>
    %c0_22 = arith.constant 0 : index
    %c0_23 = arith.constant 0 : index
    %20 = vector.load %arg9[%c0_22, %c0_23] : memref<1024x64xf32, #tpu.memory_space<vmem>>, vector<1024x64xf32>
    %cst_24 = arith.constant dense<0.000000e+00> : vector<16x64xf32>
    %21 = tpu.matmul %19, %20, %cst_24 {dimension_numbers = #tpu.dot_dimension_numbers<[1], [0], [0], [1], [0, 0, 1, 1], [], []>} : vector<16x1024xf32>, vector<1024x64xf32>, vector<16x64xf32> -> vector<16x64xf32>
    %22 = tpu.concatenate %0, %1 in 0 : vector<16x32xf32>, vector<16x32xf32> -> vector<32x32xf32>
    %23 = tpu.concatenate %2, %4 in 0 : vector<16x8x32xf32>, vector<16x8x32xf32> -> vector<32x8x32xf32>
    %24 = tpu.concatenate %3, %5 in 0 : vector<16x8x32xf32>, vector<16x8x32xf32> -> vector<32x8x32xf32>
    %25 = vector.extract_strided_slice %21 {offsets = [0, 0], sizes = [16, 32], strides = [1, 1]} : vector<16x64xf32> to vector<16x32xf32>
    %26 = vector.extract_strided_slice %21 {offsets = [0, 32], sizes = [16, 32], strides = [1, 1]} : vector<16x64xf32> to vector<16x32xf32>
    %27 = tpu.concatenate %25, %26 in 0 : vector<16x32xf32>, vector<16x32xf32> -> vector<32x32xf32>
    %28 = vector.shape_cast %23 : vector<32x8x32xf32> to vector<256x32xf32>
    %29 = vector.shape_cast %24 : vector<32x8x32xf32> to vector<256x32xf32>
    %30 = tpu.concatenate %28, %29 in 1 : vector<256x32xf32>, vector<256x32xf32> -> vector<256x64xf32>
    %c0_25 = arith.constant 0 : index
    %c0_26 = arith.constant 0 : index
    %31 = vector.load %arg10[%c0_25, %c0_26] : memref<64x32xf32, #tpu.memory_space<vmem>>, vector<64x32xf32>
    %cst_27 = arith.constant dense<0.000000e+00> : vector<256x32xf32>
    %32 = tpu.matmul %30, %31, %cst_27 {dimension_numbers = #tpu.dot_dimension_numbers<[1], [0], [0], [1], [0, 0, 1, 1], [], []>} : vector<256x64xf32>, vector<64x32xf32>, vector<256x32xf32> -> vector<256x32xf32>
    %33 = vector.broadcast %7 : vector<1x32xf32> to vector<256x32xf32>
    %34 = arith.addf %32, %33 : vector<256x32xf32>
    %cst_28 = arith.constant 0.000000e+00 : f32
    %35 = vector.broadcast %cst_28 : f32 to vector<256x32xf32>
    %36 = arith.maximumf %34, %35 : vector<256x32xf32>
    %37 = vector.shape_cast %36 : vector<256x32xf32> to vector<32x8x32xf32>
    %c0_29 = arith.constant 0 : index
    %c0_30 = arith.constant 0 : index
    %38 = vector.load %arg11[%c0_29, %c0_30] : memref<32x32xf32, #tpu.memory_space<vmem>>, vector<32x32xf32>
    %c0_31 = arith.constant 0 : index
    %c0_32 = arith.constant 0 : index
    %39 = vector.load %arg12[%c0_31, %c0_32] : memref<32x32xf32, #tpu.memory_space<vmem>>, vector<32x32xf32>
    %c0_33 = arith.constant 0 : index
    %c0_34 = arith.constant 0 : index
    %40 = vector.load %arg13[%c0_33, %c0_34] : memref<32x32xf32, #tpu.memory_space<vmem>>, vector<32x32xf32>
    %c0_35 = arith.constant 0 : index
    %c0_36 = arith.constant 0 : index
    %41 = vector.load %arg14[%c0_35, %c0_36] : memref<32x32xf32, #tpu.memory_space<vmem>>, vector<32x32xf32>
    %cst_37 = arith.constant dense<0.000000e+00> : vector<32x32xf32>
    %42 = tpu.matmul %27, %40, %cst_37 {dimension_numbers = #tpu.dot_dimension_numbers<[1], [0], [0], [1], [0, 0, 1, 1], [], []>} : vector<32x32xf32>, vector<32x32xf32>, vector<32x32xf32> -> vector<32x32xf32>
    %43 = vector.shape_cast %42 : vector<32x32xf32> to vector<32x1x32xf32>
    %44 = vector.broadcast %43 : vector<32x1x32xf32> to vector<32x8x32xf32>
    %45 = arith.mulf %23, %44 : vector<32x8x32xf32>
    %cst_38 = arith.constant dense<0.000000e+00> : vector<32x8xf32>
    %46 = vector.multi_reduction <add>, %45, %cst_38 [2] : vector<32x8x32xf32> to vector<32x8xf32>
    %cst_39 = arith.constant dense<0xFF800000> : vector<32xf32>
    %47 = vector.multi_reduction <maximumf>, %46, %cst_39 [1] : vector<32x8xf32> to vector<32xf32>
    %48 = vector.shape_cast %47 : vector<32xf32> to vector<32x1xf32>
    %49 = vector.broadcast %48 : vector<32x1xf32> to vector<32x8xf32>
    %50 = arith.subf %46, %49 : vector<32x8xf32>
    %51 = math.exp %50 : vector<32x8xf32>
    %cst_40 = arith.constant dense<0.000000e+00> : vector<32xf32>
    %52 = vector.multi_reduction <add>, %51, %cst_40 [1] : vector<32x8xf32> to vector<32xf32>
    %53 = vector.shape_cast %52 : vector<32xf32> to vector<32x1xf32>
    %54 = tpu.reciprocal %53 {approx = true} : vector<32x1xf32> -> vector<32x1xf32>
    %55 = vector.broadcast %54 : vector<32x1xf32> to vector<32x8xf32>
    %56 = arith.mulf %51, %55 : vector<32x8xf32>
    %57 = vector.shape_cast %56 : vector<32x8xf32> to vector<32x8x1xf32>
    %58 = vector.broadcast %57 : vector<32x8x1xf32> to vector<32x8x32xf32>
    %59 = arith.mulf %58, %37 : vector<32x8x32xf32>
    %cst_41 = arith.constant dense<0.000000e+00> : vector<32x32xf32>
    %60 = vector.multi_reduction <add>, %59, %cst_41 [1] : vector<32x8x32xf32> to vector<32x32xf32>
    %cst_42 = arith.constant dense<0.000000e+00> : vector<32x32xf32>
    %61 = tpu.matmul %60, %41, %cst_42 {dimension_numbers = #tpu.dot_dimension_numbers<[1], [0], [0], [1], [0, 0, 1, 1], [], []>} : vector<32x32xf32>, vector<32x32xf32>, vector<32x32xf32> -> vector<32x32xf32>
    %62 = vector.broadcast %10 : vector<1x32xf32> to vector<32x32xf32>
    %63 = arith.addf %61, %62 : vector<32x32xf32>
    %cst_43 = arith.constant dense<0.000000e+00> : vector<32x32xf32>
    %64 = tpu.matmul %63, %38, %cst_43 {dimension_numbers = #tpu.dot_dimension_numbers<[1], [0], [0], [1], [0, 0, 1, 1], [], []>} : vector<32x32xf32>, vector<32x32xf32>, vector<32x32xf32> -> vector<32x32xf32>
    %cst_44 = arith.constant dense<0.000000e+00> : vector<32x32xf32>
    %65 = tpu.matmul %22, %39, %cst_44 {dimension_numbers = #tpu.dot_dimension_numbers<[1], [0], [0], [1], [0, 0, 1, 1], [], []>} : vector<32x32xf32>, vector<32x32xf32>, vector<32x32xf32> -> vector<32x32xf32>
    %66 = arith.addf %64, %65 : vector<32x32xf32>
    %cst_45 = arith.constant 0.000000e+00 : f32
    %67 = vector.broadcast %cst_45 : f32 to vector<32x32xf32>
    %68 = arith.maximumf %66, %67 : vector<32x32xf32>
    %69 = arith.addf %68, %22 : vector<32x32xf32>
    %cst_46 = arith.constant dense<0.000000e+00> : vector<32xf32>
    %70 = vector.multi_reduction <add>, %69, %cst_46 [1] : vector<32x32xf32> to vector<32xf32>
    %71 = vector.shape_cast %70 : vector<32xf32> to vector<32x1xf32>
    %cst_47 = arith.constant 3.200000e+01 : f32
    %72 = vector.broadcast %cst_47 : f32 to vector<32x1xf32>
    %73 = arith.divf %71, %72 : vector<32x1xf32>
    %74 = vector.broadcast %73 : vector<32x1xf32> to vector<32x32xf32>
    %75 = arith.subf %69, %74 : vector<32x32xf32>
    %76 = arith.mulf %75, %75 : vector<32x32xf32>
    %cst_48 = arith.constant dense<0.000000e+00> : vector<32xf32>
    %77 = vector.multi_reduction <add>, %76, %cst_48 [1] : vector<32x32xf32> to vector<32xf32>
    %78 = vector.shape_cast %77 : vector<32xf32> to vector<32x1xf32>
    %cst_49 = arith.constant 3.200000e+01 : f32
    %79 = vector.broadcast %cst_49 : f32 to vector<32x1xf32>
    %80 = arith.divf %78, %79 : vector<32x1xf32>
    %81 = vector.broadcast %73 : vector<32x1xf32> to vector<32x32xf32>
    %82 = arith.subf %69, %81 : vector<32x32xf32>
    %cst_50 = arith.constant 9.99999974E-6 : f32
    %83 = vector.broadcast %cst_50 : f32 to vector<32x1xf32>
    %84 = arith.addf %80, %83 : vector<32x1xf32>
    %85 = math.rsqrt %84 : vector<32x1xf32>
    %86 = vector.broadcast %85 : vector<32x1xf32> to vector<32x32xf32>
    %87 = arith.mulf %82, %86 : vector<32x32xf32>
    %88 = vector.broadcast %8 : vector<1x32xf32> to vector<32x32xf32>
    %89 = arith.mulf %87, %88 : vector<32x32xf32>
    %90 = vector.broadcast %9 : vector<1x32xf32> to vector<32x32xf32>
    %91 = arith.addf %89, %90 : vector<32x32xf32>
    %92 = vector.extract_strided_slice %91 {offsets = [16, 0], sizes = [16, 32], strides = [1, 1]} : vector<32x32xf32> to vector<16x32xf32>
    %93 = vector.extract_strided_slice %91 {offsets = [0, 0], sizes = [16, 32], strides = [1, 1]} : vector<32x32xf32> to vector<16x32xf32>
    %94 = tpu.concatenate %92, %93 in 0 : vector<16x32xf32>, vector<16x32xf32> -> vector<32x32xf32>
    %c0_51 = arith.constant 0 : index
    %c0_52 = arith.constant 0 : index
    %95 = vector.load %arg15[%c0_51, %c0_52] : memref<32x32xf32, #tpu.memory_space<vmem>>, vector<32x32xf32>
    %c0_53 = arith.constant 0 : index
    %c0_54 = arith.constant 0 : index
    %96 = vector.load %arg16[%c0_53, %c0_54] : memref<32x32xf32, #tpu.memory_space<vmem>>, vector<32x32xf32>
    %cst_55 = arith.constant dense<0.000000e+00> : vector<32x32xf32>
    %97 = tpu.matmul %94, %95, %cst_55 {dimension_numbers = #tpu.dot_dimension_numbers<[1], [0], [0], [1], [0, 0, 1, 1], [], []>} : vector<32x32xf32>, vector<32x32xf32>, vector<32x32xf32> -> vector<32x32xf32>
    %98 = vector.shape_cast %97 : vector<32x32xf32> to vector<32x1x32xf32>
    %99 = vector.broadcast %98 : vector<32x1x32xf32> to vector<32x8x32xf32>
    %100 = arith.mulf %24, %99 : vector<32x8x32xf32>
    %cst_56 = arith.constant dense<0.000000e+00> : vector<32x8xf32>
    %101 = vector.multi_reduction <add>, %100, %cst_56 [2] : vector<32x8x32xf32> to vector<32x8xf32>
    %cst_57 = arith.constant dense<0xFF800000> : vector<32xf32>
    %102 = vector.multi_reduction <maximumf>, %101, %cst_57 [1] : vector<32x8xf32> to vector<32xf32>
    %103 = vector.shape_cast %102 : vector<32xf32> to vector<32x1xf32>
    %104 = vector.broadcast %103 : vector<32x1xf32> to vector<32x8xf32>
    %105 = arith.subf %101, %104 : vector<32x8xf32>
    %106 = math.exp %105 : vector<32x8xf32>
    %cst_58 = arith.constant dense<0.000000e+00> : vector<32xf32>
    %107 = vector.multi_reduction <add>, %106, %cst_58 [1] : vector<32x8xf32> to vector<32xf32>
    %108 = vector.shape_cast %107 : vector<32xf32> to vector<32x1xf32>
    %109 = tpu.reciprocal %108 {approx = true} : vector<32x1xf32> -> vector<32x1xf32>
    %110 = vector.broadcast %109 : vector<32x1xf32> to vector<32x8xf32>
    %111 = arith.mulf %106, %110 : vector<32x8xf32>
    %112 = vector.shape_cast %111 : vector<32x8xf32> to vector<32x8x1xf32>
    %113 = vector.broadcast %112 : vector<32x8x1xf32> to vector<32x8x32xf32>
    %114 = arith.mulf %113, %37 : vector<32x8x32xf32>
    %cst_59 = arith.constant dense<0.000000e+00> : vector<32x32xf32>
    %115 = vector.multi_reduction <add>, %114, %cst_59 [1] : vector<32x8x32xf32> to vector<32x32xf32>
    %cst_60 = arith.constant dense<0.000000e+00> : vector<32x32xf32>
    %116 = tpu.matmul %115, %96, %cst_60 {dimension_numbers = #tpu.dot_dimension_numbers<[1], [0], [0], [1], [0, 0, 1, 1], [], []>} : vector<32x32xf32>, vector<32x32xf32>, vector<32x32xf32> -> vector<32x32xf32>
    %117 = vector.broadcast %11 : vector<1x32xf32> to vector<32x32xf32>
    %118 = arith.addf %116, %117 : vector<32x32xf32>
    %cst_61 = arith.constant dense<0.000000e+00> : vector<32x32xf32>
    %119 = tpu.matmul %118, %38, %cst_61 {dimension_numbers = #tpu.dot_dimension_numbers<[1], [0], [0], [1], [0, 0, 1, 1], [], []>} : vector<32x32xf32>, vector<32x32xf32>, vector<32x32xf32> -> vector<32x32xf32>
    %cst_62 = arith.constant dense<0.000000e+00> : vector<32x32xf32>
    %120 = tpu.matmul %22, %39, %cst_62 {dimension_numbers = #tpu.dot_dimension_numbers<[1], [0], [0], [1], [0, 0, 1, 1], [], []>} : vector<32x32xf32>, vector<32x32xf32>, vector<32x32xf32> -> vector<32x32xf32>
    %121 = arith.addf %119, %120 : vector<32x32xf32>
    %cst_63 = arith.constant 0.000000e+00 : f32
    %122 = vector.broadcast %cst_63 : f32 to vector<32x32xf32>
    %123 = arith.maximumf %121, %122 : vector<32x32xf32>
    %124 = arith.addf %123, %22 : vector<32x32xf32>
    %cst_64 = arith.constant dense<0.000000e+00> : vector<32xf32>
    %125 = vector.multi_reduction <add>, %124, %cst_64 [1] : vector<32x32xf32> to vector<32xf32>
    %126 = vector.shape_cast %125 : vector<32xf32> to vector<32x1xf32>
    %cst_65 = arith.constant 3.200000e+01 : f32
    %127 = vector.broadcast %cst_65 : f32 to vector<32x1xf32>
    %128 = arith.divf %126, %127 : vector<32x1xf32>
    %129 = vector.broadcast %128 : vector<32x1xf32> to vector<32x32xf32>
    %130 = arith.subf %124, %129 : vector<32x32xf32>
    %131 = arith.mulf %130, %130 : vector<32x32xf32>
    %cst_66 = arith.constant dense<0.000000e+00> : vector<32xf32>
    %132 = vector.multi_reduction <add>, %131, %cst_66 [1] : vector<32x32xf32> to vector<32xf32>
    %133 = vector.shape_cast %132 : vector<32xf32> to vector<32x1xf32>
    %cst_67 = arith.constant 3.200000e+01 : f32
    %134 = vector.broadcast %cst_67 : f32 to vector<32x1xf32>
    %135 = arith.divf %133, %134 : vector<32x1xf32>
    %136 = vector.broadcast %128 : vector<32x1xf32> to vector<32x32xf32>
    %137 = arith.subf %124, %136 : vector<32x32xf32>
    %cst_68 = arith.constant 9.99999974E-6 : f32
    %138 = vector.broadcast %cst_68 : f32 to vector<32x1xf32>
    %139 = arith.addf %135, %138 : vector<32x1xf32>
    %140 = math.rsqrt %139 : vector<32x1xf32>
    %141 = vector.broadcast %140 : vector<32x1xf32> to vector<32x32xf32>
    %142 = arith.mulf %137, %141 : vector<32x32xf32>
    %143 = vector.broadcast %8 : vector<1x32xf32> to vector<32x32xf32>
    %144 = arith.mulf %142, %143 : vector<32x32xf32>
    %145 = vector.broadcast %9 : vector<1x32xf32> to vector<32x32xf32>
    %146 = arith.addf %144, %145 : vector<32x32xf32>
    %147 = vector.extract_strided_slice %146 {offsets = [0, 0], sizes = [16, 32], strides = [1, 1]} : vector<32x32xf32> to vector<16x32xf32>
    %148 = vector.extract_strided_slice %146 {offsets = [16, 0], sizes = [16, 32], strides = [1, 1]} : vector<32x32xf32> to vector<16x32xf32>
    %149 = tpu.concatenate %147, %148 in 1 : vector<16x32xf32>, vector<16x32xf32> -> vector<16x64xf32>
    %c0_69 = arith.constant 0 : index
    %c0_70 = arith.constant 0 : index
    %150 = vector.load %arg17[%c0_69, %c0_70] : memref<64x64xf32, #tpu.memory_space<vmem>>, vector<64x64xf32>
    %cst_71 = arith.constant dense<0.000000e+00> : vector<16x64xf32>
    %151 = tpu.matmul %149, %150, %cst_71 {dimension_numbers = #tpu.dot_dimension_numbers<[1], [0], [0], [1], [0, 0, 1, 1], [], []>} : vector<16x64xf32>, vector<64x64xf32>, vector<16x64xf32> -> vector<16x64xf32>
    %152 = vector.broadcast %12 : vector<1x64xf32> to vector<16x64xf32>
    %153 = arith.addf %151, %152 : vector<16x64xf32>
    %cst_72 = arith.constant 0.000000e+00 : f32
    %154 = vector.broadcast %cst_72 : f32 to vector<16x64xf32>
    %155 = arith.maximumf %153, %154 : vector<16x64xf32>
    %c0_73 = arith.constant 0 : index
    %c0_74 = arith.constant 0 : index
    %156 = vector.load %arg18[%c0_73, %c0_74] : memref<64x64xf32, #tpu.memory_space<vmem>>, vector<64x64xf32>
    %cst_75 = arith.constant dense<0.000000e+00> : vector<16x64xf32>
    %157 = tpu.matmul %155, %156, %cst_75 {dimension_numbers = #tpu.dot_dimension_numbers<[1], [0], [0], [1], [0, 0, 1, 1], [], []>} : vector<16x64xf32>, vector<64x64xf32>, vector<16x64xf32> -> vector<16x64xf32>
    %158 = arith.addf %157, %149 : vector<16x64xf32>
    %cst_76 = arith.constant dense<0.000000e+00> : vector<16xf32>
    %159 = vector.multi_reduction <add>, %158, %cst_76 [1] : vector<16x64xf32> to vector<16xf32>
    %160 = vector.shape_cast %159 : vector<16xf32> to vector<16x1xf32>
    %cst_77 = arith.constant 6.400000e+01 : f32
    %161 = vector.broadcast %cst_77 : f32 to vector<16x1xf32>
    %162 = arith.divf %160, %161 : vector<16x1xf32>
    %163 = vector.broadcast %162 : vector<16x1xf32> to vector<16x64xf32>
    %164 = arith.subf %158, %163 : vector<16x64xf32>
    %165 = arith.mulf %164, %164 : vector<16x64xf32>
    %cst_78 = arith.constant dense<0.000000e+00> : vector<16xf32>
    %166 = vector.multi_reduction <add>, %165, %cst_78 [1] : vector<16x64xf32> to vector<16xf32>
    %167 = vector.shape_cast %166 : vector<16xf32> to vector<16x1xf32>
    %cst_79 = arith.constant 6.400000e+01 : f32
    %168 = vector.broadcast %cst_79 : f32 to vector<16x1xf32>
    %169 = arith.divf %167, %168 : vector<16x1xf32>
    %170 = vector.broadcast %162 : vector<16x1xf32> to vector<16x64xf32>
    %171 = arith.subf %158, %170 : vector<16x64xf32>
    %cst_80 = arith.constant 9.99999974E-6 : f32
    %172 = vector.broadcast %cst_80 : f32 to vector<16x1xf32>
    %173 = arith.addf %169, %172 : vector<16x1xf32>
    %174 = math.rsqrt %173 : vector<16x1xf32>
    %175 = vector.broadcast %174 : vector<16x1xf32> to vector<16x64xf32>
    %176 = arith.mulf %171, %175 : vector<16x64xf32>
    %177 = vector.broadcast %13 : vector<1x64xf32> to vector<16x64xf32>
    %178 = arith.mulf %176, %177 : vector<16x64xf32>
    %179 = vector.broadcast %14 : vector<1x64xf32> to vector<16x64xf32>
    %180 = arith.addf %178, %179 : vector<16x64xf32>
    %c0_81 = arith.constant 0 : index
    %c0_82 = arith.constant 0 : index
    %181 = vector.load %arg20[%c0_81, %c0_82] : memref<16x64xf32, #tpu.memory_space<vmem>>, vector<16x64xf32>
    tpu.vector_store %arg20[%c0_81, %c0_82], %180 {strides = array<i32>} : memref<16x64xf32, #tpu.memory_space<vmem>>, vector<16x64xf32>,
    return
  }
  func.func @transform_0(%arg0: i32) -> (i32, i32) {
    %c0_i32 = arith.constant 0 : i32
    %c0_i32_0 = arith.constant 0 : i32
    return %arg0, %c0_i32 : i32, i32
  }
  func.func @transform_1(%arg0: i32) -> (i32, i32) {
    %c0_i32 = arith.constant 0 : i32
    %c0_i32_0 = arith.constant 0 : i32
    return %arg0, %c0_i32 : i32, i32
  }
  func.func @transform_2(%arg0: i32) -> (i32, i32, i32) {
    %c0_i32 = arith.constant 0 : i32
    %c0_i32_0 = arith.constant 0 : i32
    %c0_i32_1 = arith.constant 0 : i32
    return %arg0, %c0_i32, %c0_i32_0 : i32, i32, i32
  }
  func.func @transform_3(%arg0: i32) -> (i32, i32, i32) {
    %c0_i32 = arith.constant 0 : i32
    %c0_i32_0 = arith.constant 0 : i32
    %c0_i32_1 = arith.constant 0 : i32
    return %arg0, %c0_i32, %c0_i32_0 : i32, i32, i32
  }
  func.func @transform_4(%arg0: i32) -> (i32, i32, i32) {
    %c0_i32 = arith.constant 0 : i32
    %c0_i32_0 = arith.constant 0 : i32
    %c0_i32_1 = arith.constant 0 : i32
    return %arg0, %c0_i32, %c0_i32_0 : i32, i32, i32
  }
  func.func @transform_5(%arg0: i32) -> (i32, i32, i32) {
    %c0_i32 = arith.constant 0 : i32
    %c0_i32_0 = arith.constant 0 : i32
    %c0_i32_1 = arith.constant 0 : i32
    return %arg0, %c0_i32, %c0_i32_0 : i32, i32, i32
  }
  func.func @transform_6(%arg0: i32) -> (i32, i32) {
    %c0_i32 = arith.constant 0 : i32
    %c0_i32_0 = arith.constant 0 : i32
    %c0_i32_1 = arith.constant 0 : i32
    return %c0_i32, %c0_i32_0 : i32, i32
  }
  func.func @transform_7(%arg0: i32) -> (i32, i32) {
    %c0_i32 = arith.constant 0 : i32
    %c0_i32_0 = arith.constant 0 : i32
    %c0_i32_1 = arith.constant 0 : i32
    return %c0_i32, %c0_i32_0 : i32, i32
  }
  func.func @transform_8(%arg0: i32) -> (i32, i32) {
    %c0_i32 = arith.constant 0 : i32
    %c0_i32_0 = arith.constant 0 : i32
    %c0_i32_1 = arith.constant 0 : i32
    return %c0_i32, %c0_i32_0 : i32, i32
  }
  func.func @transform_9(%arg0: i32) -> (i32, i32) {
    %c0_i32 = arith.constant 0 : i32
    %c0_i32_0 = arith.constant 0 : i32
    %c0_i32_1 = arith.constant 0 : i32
    return %c0_i32, %c0_i32_0 : i32, i32
  }
  func.func @transform_10(%arg0: i32) -> (i32, i32) {
    %c0_i32 = arith.constant 0 : i32
    %c0_i32_0 = arith.constant 0 : i32
    %c0_i32_1 = arith.constant 0 : i32
    return %c0_i32, %c0_i32_0 : i32, i32
  }
  func.func @transform_11(%arg0: i32) -> (i32, i32) {
    %c0_i32 = arith.constant 0 : i32
    %c0_i32_0 = arith.constant 0 : i32
    %c0_i32_1 = arith.constant 0 : i32
    return %c0_i32, %c0_i32_0 : i32, i32
  }
  func.func @transform_12(%arg0: i32) -> (i32, i32) {
    %c0_i32 = arith.constant 0 : i32
    %c0_i32_0 = arith.constant 0 : i32
    %c0_i32_1 = arith.constant 0 : i32
    return %c0_i32, %c0_i32_0 : i32, i32
  }
  func.func @transform_13(%arg0: i32) -> (i32, i32) {
    %c0_i32 = arith.constant 0 : i32
    %c0_i32_0 = arith.constant 0 : i32
    %c0_i32_1 = arith.constant 0 : i32
    return %c0_i32, %c0_i32_0 : i32, i32
  }
  func.func @transform_14(%arg0: i32) -> (i32, i32) {
    %c0_i32 = arith.constant 0 : i32
    %c0_i32_0 = arith.constant 0 : i32
    %c0_i32_1 = arith.constant 0 : i32
    return %c0_i32, %c0_i32_0 : i32, i32
  }
  func.func @transform_15(%arg0: i32) -> (i32, i32) {
    %c0_i32 = arith.constant 0 : i32
    %c0_i32_0 = arith.constant 0 : i32
    %c0_i32_1 = arith.constant 0 : i32
    return %c0_i32, %c0_i32_0 : i32, i32
  }
  func.func @transform_16(%arg0: i32) -> (i32, i32) {
    %c0_i32 = arith.constant 0 : i32
    %c0_i32_0 = arith.constant 0 : i32
    %c0_i32_1 = arith.constant 0 : i32
    return %c0_i32, %c0_i32_0 : i32, i32
  }
  func.func @transform_17(%arg0: i32) -> (i32, i32) {
    %c0_i32 = arith.constant 0 : i32
    %c0_i32_0 = arith.constant 0 : i32
    %c0_i32_1 = arith.constant 0 : i32
    return %c0_i32, %c0_i32_0 : i32, i32
  }
  func.func @transform_18(%arg0: i32) -> (i32, i32) {
    %c0_i32 = arith.constant 0 : i32
    %c0_i32_0 = arith.constant 0 : i32
    %c0_i32_1 = arith.constant 0 : i32
    return %c0_i32, %c0_i32_0 : i32, i32
  }
  func.func @transform_19(%arg0: i32) -> (i32, i32) {
    %c0_i32 = arith.constant 0 : i32
    %c0_i32_0 = arith.constant 0 : i32
    return %arg0, %c0_i32 : i32, i32
  }
}

</mosaic_0001>

<bundles_post_ra>
// kernel: tpu_custom_call.1
= control target key start
LH: loop header
LB: loop body
LE: loop exit
PB: predicated region body
PF: predicated region fallthrough
CT: control target
= control target key end

     0   :  { %s12742_s0 = inlined_call_operand.hbm [shape: f32[32,32], index: 0, kind: input, shape index: {}]   ;;  %s12743_s1 = inlined_call_operand.hbm [shape: f32[32,32], index: 1, kind: input, shape index: {}]   ;;  %s12744_s2 = inlined_call_operand.vmem [shape: f32[32,8,32], index: 2, kind: input, shape index: {}]   ;;  %s12745_s3 = inlined_call_operand.vmem [shape: f32[32,8,32], index: 3, kind: input, shape index: {}]   ;;  %s12746_s4 = inlined_call_operand.vmem [shape: f32[32,8,32], index: 4, kind: input, shape index: {}]   ;;  %s12747_s5 = inlined_call_operand.vmem [shape: f32[32,8,32], index: 5, kind: input, shape index: {}]   ;;  %s12748_s6 = inlined_call_operand.vmem [shape: f32[32,1024], index: 6, kind: input, shape index: {}]   ;;  %s12749_s7 = inlined_call_operand.vmem [shape: f32[32,1024], index: 7, kind: input, shape index: {}]   ;;  %s12750_s8 = inlined_call_operand.vmem [shape: f32[1024,64], index: 8, kind: input, shape index: {}]   ;;  %s12751_s9 = inlined_call_operand.vmem [shape: f32[64,32], index: 9, kind: input, shape index: {}]   ;;  %s12752_s10 = inlined_call_operand.hbm [shape: f32[32,32], index: 10, kind: input, shape index: {}]   ;;  %s12753_s11 = inlined_call_operand.hbm [shape: f32[32,32], index: 11, kind: input, shape index: {}]   ;;  %s12754_s12 = inlined_call_operand.hbm [shape: f32[32,32], index: 12, kind: input, shape index: {}]   ;;  %s12755_s13 = inlined_call_operand.hbm [shape: f32[32,32], index: 13, kind: input, shape index: {}]   ;;  %s12756_s14 = inlined_call_operand.hbm [shape: f32[32,32], index: 14, kind: input, shape index: {}]   ;;  %s12757_s15 = inlined_call_operand.hbm [shape: f32[32,32], index: 15, kind: input, shape index: {}]   ;;  %s12758_s16 = inlined_call_operand.vmem [shape: f32[64,64], index: 16, kind: input, shape index: {}]   ;;  %s12759_s17 = inlined_call_operand.vmem [shape: f32[64,64], index: 17, kind: input, shape index: {}]   ;;  %s12760_s18 = inlined_call_operand.vmem [shape: f32[8,64], index: 18, kind: input, shape index: {}]   ;;  %s12761_s19 = inlined_call_operand.hbm [shape: f32[32,64], index: 19, kind: output, shape index: {}]  }
   0x1   :  { %12848 = sst [smem:[#allocation64_spill]] %s12742_s0 }
   0x2   :  { %12849 = sst [smem:[#allocation65_spill]] %s12743_s1 }
   0x3   :  { %12850 = sst [smem:[#allocation66_spill]] %s12744_s2 }
   0x4   :  { %12851 = sst [smem:[#allocation67_spill]] %s12745_s3 }
   0x5   :  { %12852 = sst [smem:[#allocation68_spill]] %s12746_s4 }
   0x6   :  { %12853 = sst [smem:[#allocation69_spill]] %s12747_s5 }
   0x7   :  { %12854 = sst [smem:[#allocation70_spill]] %s12748_s6 }
   0x8   :  { %12855 = sst [smem:[#allocation71_spill]] %s12751_s9 }
   0x9   :  { %12856 = sst [smem:[#allocation72_spill]] %s12752_s10 }
   0xa   :  { %12857 = sst [smem:[#allocation73_spill]] %s12753_s11 }
   0xb   :  { %12858 = sst [smem:[#allocation74_spill]] %s12754_s12 }
   0xc   :  { %12859 = sst [smem:[#allocation75_spill]] %s12755_s13 }
   0xd   :  { %12860 = sst [smem:[#allocation76_spill]] %s12756_s14 }
   0xe   :  { %12861 = sst [smem:[#allocation77_spill]] %s12757_s15 }
   0xf   :  { %12862 = sst [smem:[#allocation78_spill]] %s12758_s16 }
  0x10   :  { %12863 = sst [smem:[#allocation79_spill]] %s12759_s17 }
  0x11   :  { %12864 = sst [smem:[#allocation80_spill]] %s12760_s18 }
  0x12   :  { %12865 = sst [smem:[#allocation81_spill]] %s12761_s19 }
  0x13   :  { %24 = vsyncpa [#allocation3], 0 }
  0x14   :  { %26 = vsyncpa [#allocation3 + $0x1], 0 }
  0x15   :  { %27 = vsyncpa [#allocation6], 0 }
  0x16   :  { %29 = vsyncpa [#allocation6 + $0x1], 0 }
  0x17   :  { %30 = vsyncpa [#allocation9], 0 }
  0x18   :  { %31 = vsyncpa [#allocation12], 0 }
  0x19   :  { %32 = vsyncpa [#allocation15], 0 }
  0x1a   :  { %33 = vsyncpa [#allocation4], 0 }
  0x1b   :  { %35 = vsyncpa [#allocation4 + $0x1], 0  ;;  %s9373_s0 = smov 0   ;;  %s9375_s30 = smov 0  }
  0x1c   :  { %s9377_s20 = smov 0   ;;  %s9379_s21 = smov 0  }
  0x1d LB: > { %s9255_s1 = smov [#allocation7]   ;;  %s9394_s2 = sadd.s32 4294967295, %s9253_s21   ;;  %s9253_s21 = sphi %s9379_s21, %s13089_s21   ;;  %s9249_s20 = sphi %s9377_s20, %s13088_s20   ;;  %s9245_s30 = sphi %s9375_s30, %s13087_s30   ;;  %s9241_s0 = sphi %s9373_s0, %s13086_s0  }
  0x1e   : > { %s525_s22 = sshll.u32 %s9255_s1, 4  ;;  %p7726_p0 = scmp.ge.s32.totalorder %s9253_s21, 1  ;;  %s9399_s22 = int_to_ptr.vmem [resolvable:$true] %s525_s22 }
  0x1f   : > { %p12769_p1 = scmp.eq.s32.totalorder %s9394_s2, 0  ;;  %p501_p2 = scmp.lt.s32.totalorder %s9253_s21, 3 }
  0x20   : > { %s9256_s24 = smov [#allocation8]   ;;  %s9257_s26 = smov [#allocation11]  }
  0x21   : > { %p9401_p3 = pnand %p7726_p0, %p501_p2  ;;  %s538_s25 = sshll.u32 %s9256_s24, 4  ;;  %s9414_s25 = int_to_ptr.vmem [resolvable:$true] %s538_s25 }
  0x22   : > { %s564_s27 = sshll.u32 %s9257_s26, 4  ;;  %s12868_s10 = sld [smem:[#allocation72_spill]]  ;;  %s9416_s27 = int_to_ptr.vmem [resolvable:$true] %s564_s27 }
  0x23   : > { %s12866_s23 = scalar_select %p9401_p3, 1, 0 }
  0x24   : > { %p8640_p5 = pneg %p9401_p3 }
  0x26   : > { %p9410_p6 = pnand %p8640_p5, %p12769_p1 }
  0x28   : > { %s8939_s1 = scalar_lea.hbm %s12868_s10, 512  ;;  %p9426_p8 = pneg %p9410_p6 }
  0x29   : > { %p8940_p7 = scmp.ne.s32.totalorder %s12868_s10, %s8939_s1  ;;  %p8946_p11 = scmp.lt.u32.totalorder %s8939_s1, %s12868_s10 }
  0x2b   : > { %p8942_p9 = pnand %p9426_p8, %p8940_p7 }
  0x2d   : > { %p8943_p10 = pneg %p8942_p9 }
  0x2f   : > { %p8948_p12 = pnand %p8946_p11, %p8943_p10 }
  0x31   : > { %8951 = shalt.err (!%p8948_p12)
}
  0x32   : > { %s8952_s17 = scalar_lea.vmem %s9399_s22, 512  ;;  %p8960_p5 = scmp.lt.s32.totalorder %s9399_s22, %s9399_s22 }
  0x33   : > { %p8953_p13 = scmp.ne.s32.totalorder %s9399_s22, %s8952_s17  ;;  %p8961_p4 = scmp.lt.s32.totalorder %s8952_s17, %s8952_s17 }
  0x35   : > { %p8955_p0 = pnand %p8953_p13, %p9426_p8  ;;  %p8962_p7 = por %p8961_p4, %p8960_p5 }
  0x37   : > { %p8956_p2 = pneg %p8955_p0 }
  0x39   : > { %p8963_p9 = pnand %p8962_p7, %p8956_p2 }
  0x3b   : > { %8966 = shalt.err (!%p8963_p9)
}
  0x3c   : > { %s12771_s19 = smov 128   ;;  %s12773_s16 = smov 8  }
  0x3d   : > { %8643 = dma.hbm_to_vmem [thread:$0]  (!%p9410_p6), %s12868_s10, 512, %s9399_s22, [#allocation6], %s12771_s19, %s12771_s19, %s12773_s16  }
  0x3e   : > { %s12870_s11 = sld [smem:[#allocation73_spill]] }
  0x44   : > { %s8967_s17 = scalar_lea.hbm %s12870_s11, 512 }
  0x45   : > { %p8968_p4 = scmp.ne.s32.totalorder %s12870_s11, %s8967_s17  ;;  %p8974_p12 = scmp.lt.u32.totalorder %s8967_s17, %s12870_s11 }
  0x47   : > { %p8970_p10 = pnand %p8968_p4, %p9426_p8 }
  0x49   : > { %p8971_p11 = pneg %p8970_p10 }
  0x4b   : > { %p8976_p13 = pnand %p8974_p12, %p8971_p11 }
  0x4d   : > { %8979 = shalt.err (!%p8976_p13)
}
  0x4e   : > { %s8980_s22 = scalar_lea.vmem %s9414_s25, 512  ;;  %p8988_p7 = scmp.lt.s32.totalorder %s9414_s25, %s9414_s25 }
  0x4f   : > { %p8981_p0 = scmp.ne.s32.totalorder %s9414_s25, %s8980_s22  ;;  %p8989_p9 = scmp.lt.s32.totalorder %s8980_s22, %s8980_s22 }
  0x51   : > { %p8983_p2 = pnand %p8981_p0, %p9426_p8  ;;  %p8990_p4 = por %p8989_p9, %p8988_p7 }
  0x53   : > { %p8984_p5 = pneg %p8983_p2 }
  0x55   : > { %p8991_p10 = pnand %p8990_p4, %p8984_p5 }
  0x57   : > { %8994 = shalt.err (!%p8991_p10)
}
  0x58   : > { %8646 = dma.hbm_to_vmem [thread:$0]  (!%p9410_p6), %s12870_s11, 512, %s9414_s25, [#allocation9], %s12771_s19, %s12771_s19, %s12773_s16  }
  0x59   : > { %s12871_s13 = sld [smem:[#allocation75_spill]] }
  0x5f   : > { %s8995_s28 = scalar_lea.hbm %s12871_s13, 512 }
  0x60   : > { %p8996_p11 = scmp.ne.s32.totalorder %s12871_s13, %s8995_s28  ;;  %p9002_p0 = scmp.lt.u32.totalorder %s8995_s28, %s12871_s13 }
  0x62   : > { %p8998_p12 = pnand %p8996_p11, %p9426_p8 }
  0x64   : > { %p8999_p13 = pneg %p8998_p12 }
  0x66   : > { %p9004_p2 = pnand %p9002_p0, %p8999_p13 }
  0x68   : > { %9007 = shalt.err (!%p9004_p2)
}
  0x69   : > { %s9008_s25 = scalar_lea.vmem %s9416_s27, 512  ;;  %p9016_p4 = scmp.lt.s32.totalorder %s9416_s27, %s9416_s27 }
  0x6a   : > { %p9009_p5 = scmp.ne.s32.totalorder %s9416_s27, %s9008_s25  ;;  %p9017_p10 = scmp.lt.s32.totalorder %s9008_s25, %s9008_s25 }
  0x6c   : > { %p9011_p7 = pnand %p9009_p5, %p9426_p8  ;;  %p9018_p11 = por %p9017_p10, %p9016_p4 }
  0x6e   : > { %p9012_p9 = pneg %p9011_p7 }
  0x70   : > { %p9019_p12 = pnand %p9018_p11, %p9012_p9 }
  0x72   : > { %9022 = shalt.err (!%p9019_p12)
}
  0x73   : > { %8652 = dma.hbm_to_vmem [thread:$0]  (!%p9410_p6), %s12871_s13, 512, %s9416_s27, [#allocation12], %s12771_s19, %s12771_s19, %s12773_s16  }
  0x74   : > { %s9260_s5 = smov [#allocation10]   ;;  %s9261_s18 = smov [#allocation13]  }
  0x75   : > { %s551_s9 = sshll.u32 %s9260_s5, 4  ;;  %s577_s28 = sshll.u32 %s9261_s18, 4  ;;  %s552_s9 = int_to_ptr.vmem [resolvable:$true] %s551_s9  ;;  %s578_s28 = int_to_ptr.vmem [resolvable:$true] %s577_s28 }
  0x76   : > { %s12872_s12 = sld [smem:[#allocation74_spill]] }
  0x7c   : > { %s9023_s26 = scalar_lea.hbm %s12872_s12, 512 }
  0x7d   : > { %p9024_p13 = scmp.ne.s32.totalorder %s12872_s12, %s9023_s26  ;;  %p9030_p5 = scmp.lt.u32.totalorder %s9023_s26, %s12872_s12 }
  0x7f   : > { %p9026_p0 = pnand %p9024_p13, %p9426_p8 }
  0x81   : > { %p9027_p2 = pneg %p9026_p0 }
  0x83   : > { %p9032_p7 = pnand %p9030_p5, %p9027_p2 }
  0x85   : > { %9035 = shalt.err (!%p9032_p7)
}
  0x86   : > { %s9036_s27 = scalar_lea.vmem %s552_s9, 512  ;;  %p9044_p11 = scmp.lt.s32.totalorder %s552_s9, %s552_s9 }
  0x87   : > { %p9037_p9 = scmp.ne.s32.totalorder %s552_s9, %s9036_s27  ;;  %p9045_p12 = scmp.lt.s32.totalorder %s9036_s27, %s9036_s27 }
  0x89   : > { %p9039_p4 = pnand %p9037_p9, %p9426_p8  ;;  %p9046_p1 = por %p9045_p12, %p9044_p11 }
  0x8b   : > { %p9040_p10 = pneg %p9039_p4 }
  0x8d   : > { %p9047_p3 = pnand %p9046_p1, %p9040_p10 }
  0x8f   : > { %9050 = shalt.err (!%p9047_p3)
}
  0x90   : > { %8649 = dma.hbm_to_vmem [thread:$0]  (!%p9410_p6), %s12872_s12, 512, %s552_s9, [#allocation9], %s12771_s19, %s12771_s19, %s12773_s16  }
  0x91   : > { %s12873_s14 = sld [smem:[#allocation76_spill]] }
  0x97   : > { %s9051_s29 = scalar_lea.hbm %s12873_s14, 512 }
  0x98   : > { %p9052_p1 = scmp.ne.s32.totalorder %s12873_s14, %s9051_s29  ;;  %p9058_p0 = scmp.lt.u32.totalorder %s9051_s29, %s12873_s14 }
  0x9a   : > { %p9054_p3 = pnand %p9052_p1, %p9426_p8 }
  0x9c   : > { %p9055_p13 = pneg %p9054_p3 }
  0x9e   : > { %p9060_p2 = pnand %p9058_p0, %p9055_p13 }
  0xa0   : > { %9063 = shalt.err (!%p9060_p2)
}
  0xa1   : > { %s9064_s22 = scalar_lea.vmem %s578_s28, 512  ;;  %p9072_p4 = scmp.lt.s32.totalorder %s578_s28, %s578_s28 }
  0xa2   : > { %p9065_p5 = scmp.ne.s32.totalorder %s578_s28, %s9064_s22  ;;  %p9073_p10 = scmp.lt.s32.totalorder %s9064_s22, %s9064_s22 }
  0xa4   : > { %p9067_p7 = pnand %p9065_p5, %p9426_p8  ;;  %p9074_p11 = por %p9073_p10, %p9072_p4 }
  0xa6   : > { %p9068_p9 = pneg %p9067_p7 }
  0xa8   : > { %p9075_p12 = pnand %p9074_p11, %p9068_p9 }
  0xaa   : > { %9078 = shalt.err (!%p9075_p12)
}
  0xab   : > { %8655 = dma.hbm_to_vmem [thread:$0]  (!%p9410_p6), %s12873_s14, 512, %s578_s28, [#allocation12], %s12771_s19, %s12771_s19, %s12773_s16  }
  0xac   : > { %s9262_s10 = smov [#allocation14]   ;;  %s12874_s15 = sld [smem:[#allocation77_spill]] }
  0xad   : > { %s590_s4 = sshll.u32 %s9262_s10, 4  ;;  %s591_s4 = int_to_ptr.vmem [resolvable:$true] %s590_s4 }
  0xb2   : > { %s9079_s29 = scalar_lea.hbm %s12874_s15, 512 }
  0xb3   : > { %p9080_p1 = scmp.ne.s32.totalorder %s12874_s15, %s9079_s29  ;;  %p9086_p0 = scmp.lt.u32.totalorder %s9079_s29, %s12874_s15 }
  0xb5   : > { %p9082_p3 = pnand %p9080_p1, %p9426_p8 }
  0xb7   : > { %p9083_p13 = pneg %p9082_p3 }
  0xb9   : > { %p9088_p2 = pnand %p9086_p0, %p9083_p13 }
  0xbb   : > { %9091 = shalt.err (!%p9088_p2)
}
  0xbc   : > { %s9092_s28 = scalar_lea.vmem %s591_s4, 512  ;;  %p9100_p4 = scmp.lt.s32.totalorder %s591_s4, %s591_s4 }
  0xbd   : > { %p9093_p5 = scmp.ne.s32.totalorder %s591_s4, %s9092_s28  ;;  %p9101_p10 = scmp.lt.s32.totalorder %s9092_s28, %s9092_s28 }
  0xbf   : > { %p9095_p7 = pnand %p9093_p5, %p9426_p8  ;;  %p9102_p11 = por %p9101_p10, %p9100_p4 }
  0xc1   : > { %p9096_p9 = pneg %p9095_p7 }
  0xc3   : > { %p9103_p12 = pnand %p9102_p11, %p9096_p9 }
  0xc5   : > { %9106 = shalt.err (!%p9103_p12)
}
  0xc6   : > { %8658 = dma.hbm_to_vmem [thread:$0]  (!%p9410_p6), %s12874_s15, 512, %s591_s4, [#allocation15], %s12771_s19, %s12771_s19, %s12773_s16  }
  0xc7   : > { %s7725_s3 = sadd.s32 4294967294, %s9253_s21   ;;  %s9567_s24 = sadd.s32 1, %s9253_s21  }
  0xc8   : > { %s45_s27 = ssub.s32 %s9253_s21, %s9567_s24  ;;  %s48_s10 = sadd.s32 1, %s9249_s20 }
  0xc9   : > { %p46_p8 = scmp.eq.s32.totalorder %s45_s27, 0  ;;  %p55_p1 = scmp.ne.s32.totalorder %s9249_s20, %s9245_s30 }
  0xca   : > { %p56_p3 = scmp.eq.s32.totalorder %s9253_s21, 0  ;;  %p61_p13 = scmp.ne.s32.totalorder %s9245_s30, %s9241_s0 }
  0xcb   : > { %s9578_s5 = scalar_select %p46_p8, %s9249_s20, %s48_s10  }
  0xcc   : > { %p9580_p0 = por %p56_p3, %p55_p1  ;;  %p12876_p2 = scmp.eq.s32.totalorder %s9394_s2, 0 }
  0xcd   : > { %p488_p5 = scmp.eq.s32.totalorder %s9394_s2, 1  ;;  %p494_p7 = scmp.eq.s32.totalorder %s7725_s3, 1 }
  0xce   : > { %p9586_p6 = por %p12876_p2, %p61_p13  ;;  %p8676_p9 = scmp.lt.s32.totalorder %s9253_s21, 2 }
  0xcf   : > { %s613_s29 = sand.u32 1, %s9249_s20   ;;  %p9593_p4 = por %p488_p5, %p55_p1 }
  0xd0   : > { %p9597_p10 = por %p494_p7, %p61_p13  ;;  %s7734_s17 = sshll.u32 %s613_s29, 4 }
  0xd1   : > { %s12878_s1 = scalar_select %p9593_p4, 1, 0 }
  0xd2   : > { %s12879_s26 = scalar_select %p9597_p10, 1, 0 }
  0xd3   : > { %s7843_s25 = sshll.u32 %s9253_s21, 8  ;;  %s12880_s9 = sld [smem:[#allocation64_spill]] }
  0xd4   : > { %s617_s3 = scalar_lea.vmem [#allocation2], %s7734_s17  ;;  %p9611_p11 = pnand %p8676_p9, %p9580_p0 }
  0xd5   : > { %s624_s10 = sshll.u32 %s617_s3, 4  ;;  %s12882_s12 = sld [smem:[#allocation65_spill]]  ;;  %s9607_s10 = int_to_ptr.vmem [resolvable:$true] %s624_s10 }
  0xd6   : > { %s638_s22 = scalar_lea.vmem [#allocation5], %s7734_s17  ;;  %s9622_s14 = scalar_lea.sflag [#allocation3], %s613_s29 }
  0xd7   : > { %s9620_s13 = sshll.u32 %s638_s22, 4  ;;  %p9109_p8 = pneg %p9611_p11  ;;  %s9654_s13 = int_to_ptr.vmem [resolvable:$true] %s9620_s13 }
  0xd9   : > { %s9605_s27 = scalar_lea.hbm %s12880_s9, %s7843_s25  ;;  %s9112_s11 = scalar_lea.hbm %s12880_s9, 512 }
  0xda   : > { %s9107_s3 = scalar_lea.hbm %s9605_s27, 256  ;;  %p9113_p13 = scmp.lt.u32.totalorder %s9605_s27, %s12880_s9 }
  0xdb   : > { %s9618_s28 = scalar_lea.hbm %s12882_s12, %s7843_s25  ;;  %p9108_p12 = scmp.ne.s32.totalorder %s9605_s27, %s9107_s3 }
  0xdc   : > { %p9114_p0 = scmp.lt.u32.totalorder %s9112_s11, %s9107_s3  ;;  %p9116_p5 = scmp.lt.u32.totalorder %s9107_s3, %s9605_s27 }
  0xdd   : > { %p9110_p1 = pnand %p9109_p8, %p9108_p12 }
  0xde   : > { %p9115_p2 = por %p9114_p0, %p9113_p13 }
  0xdf   : > { %p9111_p3 = pneg %p9110_p1 }
  0xe0   : > { %p9117_p7 = por %p9116_p5, %p9115_p2 }
  0xe2   : > { %p9118_p9 = pnand %p9117_p7, %p9111_p3 }
  0xe4   : > { %9121 = shalt.err (!%p9118_p9)
}
  0xe5   : > { %s9122_s29 = scalar_lea.vmem %s9607_s10, 256  ;;  %s9263_s15 = smov [#allocation2]  }
  0xe6   : > { %p9123_p12 = scmp.ne.s32.totalorder %s9607_s10, %s9122_s29  ;;  %s9127_s17 = sshll.u32 %s9263_s15, 4  ;;  %s9128_s17 = int_to_ptr.vmem [resolvable:$false] %s9127_s17 }
  0xe7   : > { %s9129_s22 = scalar_lea.vmem %s9128_s17, 512  ;;  %p9130_p4 = scmp.lt.s32.totalorder %s9607_s10, %s9128_s17 }
  0xe8   : > { %p9125_p1 = pnand %p9123_p12, %p9109_p8  ;;  %p9131_p13 = scmp.lt.s32.totalorder %s9129_s22, %s9122_s29 }
  0xea   : > { %p9126_p10 = pneg %p9125_p1  ;;  %p9132_p0 = por %p9131_p13, %p9130_p4 }
  0xec   : > { %p9133_p2 = pnand %p9132_p0, %p9126_p10 }
  0xee   : > { %9136 = shalt.err (!%p9133_p2)
}
  0xef   : > { %s12883_s3 = smov 8   ;;  %s12884_s18 = smov 128  }
  0xf0   : > { %8662 = dma.hbm_to_vmem [thread:$0]  (!%p9611_p11), %s9605_s27, 256, %s9607_s10, %s9622_s14, %s12884_s18, %s12884_s18, %s12883_s3  }
  0xf1   : > { %s634_s11 = sand.u32 1, %s9253_s21   ;;  %s9137_s25 = scalar_lea.hbm %s9618_s28, 256 }
  0xf2   : > { %s9657_s16 = scalar_lea.sflag [#allocation6], %s634_s11  ;;  %p9138_p4 = scmp.ne.s32.totalorder %s9618_s28, %s9137_s25 }
  0xf3   : > { %s9142_s17 = scalar_lea.hbm %s12882_s12, 512  ;;  %p9143_p5 = scmp.lt.u32.totalorder %s9618_s28, %s12882_s12 }
  0xf4   : > { %p9140_p10 = pnand %p9138_p4, %p9109_p8  ;;  %p9144_p7 = scmp.lt.u32.totalorder %s9142_s17, %s9137_s25 }
  0xf5   : > { %p9146_p12 = scmp.lt.u32.totalorder %s9137_s25, %s9618_s28 }
  0xf6   : > { %p9141_p3 = pneg %p9140_p10  ;;  %p9145_p9 = por %p9144_p7, %p9143_p5 }
  0xf8   : > { %p9147_p1 = por %p9146_p12, %p9145_p9 }
  0xfa   : > { %p9148_p13 = pnand %p9147_p1, %p9141_p3 }
  0xfc   : > { %9151 = shalt.err (!%p9148_p13)
}
  0xfd   : > { %s9152_s14 = scalar_lea.vmem %s9654_s13, 256  ;;  %s9264_s27 = smov [#allocation5]  }
  0xfe   : > { %p9153_p0 = scmp.ne.s32.totalorder %s9654_s13, %s9152_s14  ;;  %s9157_s10 = sshll.u32 %s9264_s27, 4  ;;  %s9158_s10 = int_to_ptr.vmem [resolvable:$false] %s9157_s10 }
  0xff   : > { %s9159_s9 = scalar_lea.vmem %s9158_s10, 512  ;;  %p9160_p10 = scmp.lt.s32.totalorder %s9654_s13, %s9158_s10 }
 0x100   : > { %p9155_p2 = pnand %p9153_p0, %p9109_p8  ;;  %p9161_p5 = scmp.lt.s32.totalorder %s9159_s9, %s9152_s14 }
 0x102   : > { %p9156_p4 = pneg %p9155_p2  ;;  %p9162_p7 = por %p9161_p5, %p9160_p10 }
 0x104   : > { %p9163_p9 = pnand %p9162_p7, %p9156_p4 }
 0x106   : > { %9166 = shalt.err (!%p9163_p9)
}
 0x107   : > { %8665 = dma.hbm_to_vmem [thread:$0]  (!%p9611_p11), %s9618_s28, 256, %s9654_s13, %s9657_s16, %s12884_s18, %s12884_s18, %s12883_s3  }
 0x108   : > { %p12885_p8 = scmp.ne.s32.totalorder %s12866_s23, 0 }
 0x10a   : > { %693 = sbr.rel (%p12885_p8) target bundleno = 5436 (0x153c), region = 96 }
 0x111   : > { %s9689_s11 = sand.u32 1, %s9245_s30  }
 0x112   : > { %s9692_s25 = sshll.u32 %s9689_s11, 4  ;;  %s696_s19 = scalar_lea.sflag [#allocation3], %s9689_s11 }
 0x113   : > { %s9696_s29 = scalar_lea.vmem [#allocation2], %s9692_s25 }
 0x114   : > { %9212 = dma.done.wait (%p9586_p6), %s696_s19, 256  }
 0x115   : > { %9214 = vsyncadd (%p9586_p6), %s696_s19, 4294967040  ;;  %s704_s13 = sand.u32 1, %s9394_s2   ;;  %s9704_s28 = scalar_lea.vmem [#allocation5], %s9692_s25 }
 0x116   : > { %s705_s23 = scalar_lea.sflag [#allocation6], %s704_s13 }
 0x117   : > { %9216 = dma.done.wait (%p9586_p6), %s705_s23, 256  }
 0x118   : > { %9218 = vsyncadd (%p9586_p6), %s705_s23, 4294967040  ;;  %p12886_p11 = scmp.eq.s32.totalorder %s9394_s2, 0 }
 0x11a   : > { %9220 = dma.done.wait (%p12886_p11), [#allocation6], 512   ;;  %p12887_p3 = pmov %p12886_p11 }
 0x11c   : > { %9222 = vsyncadd (%p12887_p3), [#allocation6], 4294966784  ;;  %p12888_p12 = pmov %p12887_p3 }
 0x11d   : > { %p12889_p1 = pmov %p12887_p3 }
 0x11e   : > { %9224 = dma.done.wait (%p12888_p12), [#allocation9], 1024  }
 0x11f   : > { %9226 = vsyncadd (%p12889_p1), [#allocation9], 4294966272  ;;  %p12890_p13 = pmov %p12889_p1 }
 0x120   : > { %p12891_p0 = pmov %p12889_p1 }
 0x121   : > { %9228 = dma.done.wait (%p12890_p13), [#allocation12], 1024  }
 0x122   : > { %9230 = vsyncadd (%p12891_p0), [#allocation12], 4294966272  ;;  %p12892_p6 = pmov %p12891_p0 }
 0x123   : > { %p12893_p2 = pmov %p12891_p0 }
 0x124   : > { %9232 = dma.done.wait (%p12892_p6), [#allocation15], 512  }
 0x125   : > { %9234 = vsyncadd (%p12893_p2), [#allocation15], 4294966784  ;;  %v9265_v0 = vmov 0.0   ;;  %s12894_s6 = sld [smem:[#allocation70_spill]]  ;;  %v839_v34 = vld [vmem:[%s9696_s29] sm:$0xff]  ;;  %vm940_vm0 = vcmask 261120  }
 0x126   : > { %1011 = vmatprep.mubr.f32.mxu0 %v9265_v0  ;;  %1088 = vmatprep.mubr.f32.mxu1 %v9265_v0  ;;  %v1256_v48 = vld [vmem:[%s12749_s7 + $0x8] sm:$0xff]  ;;  %v1258_v52 = vld [vmem:[%s12749_s7 + $0x18] sm:$0xff]  ;;  %v1255_v55 = vld [vmem:[%s12749_s7] sm:$0xff]  ;;  %s7750_s22 = sshll.u32 %s9394_s2, 4  ;;  %s12895_s9 = sld [smem:[#allocation67_spill]]  ;;  %vm2223_vm1 = vcmask 523264  }
 0x127   : > { %v1264_v49 = vld [vmem:[%s12749_s7 + $0x48] sm:$0xff]  ;;  %v1266_v53 = vld [vmem:[%s12749_s7 + $0x58] sm:$0xff]  ;;  %v1263_v56 = vld [vmem:[%s12749_s7 + $0x40] sm:$0xff]  ;;  %p815_p4 = scmp.lt.s32.totalorder %s7750_s22, 31  ;;  %s12777_s13 = smov 32   ;;  %vm3336_vm2 = vcmask 1041409  }
 0x128   : > { %v840_v50 = vld [vmem:[%s9696_s29 + $0x8] sm:$0xff]  ;;  %v8346_v57 = vpack.c.bf16 %v1264_v49, %v1256_v48  ;;  %v1257_v58 = vld [vmem:[%s12749_s7 + $0x10] sm:$0xff]  ;;  %v8354_v60 = vpack.c.bf16 %v1266_v53, %v1258_v52  ;;  %v8348_v63 = vpack.c.bf16 %v1263_v56, %v1255_v55  ;;  %s9267_s23 = smov 96   ;;  %s12896_s18 = sld [smem:[#allocation69_spill]]  ;;  %vm3338_vm3 = vcmask 1042434  }
 0x129   : > { %v1265_v59 = vld [vmem:[%s12749_s7 + $0x50] sm:$0xff]  ;;  %v1272_v61 = vld [vmem:[%s12749_s7 + $0x88] sm:$0xff]  ;;  %v1636_v49 = vld [vmem:[%s12750_s8 + $0x98] sm:$0xff]  ;;  %s13091_s22 = smov (!%p815_p4, %s7750_s22), 31  ;;  %s12899_s15 = sld [smem:[#allocation68_spill]]  ;;  %vm3340_vm4 = vcmask 1043459  }
 0x12a   : > { %v1280_v62 = vld [vmem:[%s12749_s7 + $0xc8] sm:$0xff]  ;;  %v1635_v48 = vld [vmem:[%s12750_s8 + $0x90] sm:$0xff]  ;;  %v1620_v56 = vld [vmem:[%s12750_s8 + $0x18] sm:$0xff]  ;;  %s10381_s14 = sshll.u32 %s13091_s22, 3  ;;  %s12897_s22 = sld [smem:[#allocation71_spill]]  ;;  %vm3342_vm5 = vcmask 1044484  }
 0x12b   : > { %v909_v1 = vld [vmem:[%s12894_s6 + $0x8] sm:$0xff]  ;;  %v911_v3 = vld [vmem:[%s12894_s6 + $0x18] sm:$0xff]  ;;  %v908_v6 = vld [vmem:[%s12894_s6] sm:$0xff]  ;;  %vm3344_vm6 = vcmask 1045509   ;;  %vm3346_vm7 = vcmask 1046534   ;;  %vm3348_vm8 = vcmask 1047559  }
 0x12c   : > { %v917_v2 = vld [vmem:[%s12894_s6 + $0x48] sm:$0xff]  ;;  %v919_v5 = vld [vmem:[%s12894_s6 + $0x58] sm:$0xff]  ;;  %v916_v7 = vld [vmem:[%s12894_s6 + $0x40] sm:$0xff]  ;;  %s10387_s19 = scalar_lea.vmem %s12895_s9, %s10381_s14  ;;  %vm3375_vm9 = vcmask 64512   ;;  %s13078_s3 = sld [smem:[#allocation78_spill]] }
 0x12d   : > { %v8314_v4 = vpack.c.bf16 %v917_v2, %v909_v1  ;;  %v8322_v8 = vpack.c.bf16 %v919_v5, %v911_v3  ;;  %v8316_v9 = vpack.c.bf16 %v916_v7, %v908_v6  ;;  %v910_v10 = vld [vmem:[%s12894_s6 + $0x10] sm:$0xff]  ;;  %v925_v12 = vld [vmem:[%s12894_s6 + $0x88] sm:$0xff]  ;;  %v927_v15 = vld [vmem:[%s12894_s6 + $0x98] sm:$0xff]  ;;  %v8356_v3 = vpack.c.bf16 %v1265_v59, %v1257_v58  ;;  %s811_s10 = scalar_lea.vmem [#allocation16], %s9692_s25  ;;  %p13083_p5 = scmp.ne.s32.totalorder %s12878_s1, 0 }
 0x12e   : > { %v918_v11 = vld [vmem:[%s12894_s6 + $0x50] sm:$0xff]  ;;  %v933_v14 = vld [vmem:[%s12894_s6 + $0xc8] sm:$0xff]  ;;  %v935_v16 = vld [vmem:[%s12894_s6 + $0xd8] sm:$0xff]  ;;  %v8350_v6 = vpack.c.bf16 %v1280_v62, %v1272_v61  ;;  %s10421_s16 = scalar_lea.vmem %s12896_s18, %s10381_s14 }
 0x12f   : > { %8315 = vmatprep.subr.bf16.mxu0 %v8314_v4  ;;  %v8324_v13 = vpack.c.bf16 %v918_v11, %v910_v10  ;;  %8323 = vmatprep.subr.bf16.mxu1 %v8322_v8  ;;  %v8318_v17 = vpack.c.bf16 %v933_v14, %v925_v12  ;;  %v8326_v18 = vpack.c.bf16 %v935_v16, %v927_v15  ;;  %v924_v19 = vld [vmem:[%s12894_s6 + $0x80] sm:$0xff]  ;;  %v926_v21 = vld [vmem:[%s12894_s6 + $0x90] sm:$0xff]  ;;  %v913_v24 = vld [vmem:[%s12894_s6 + $0x28] sm:$0xff]  ;;  %s10572_s17 = scalar_lea.vmem %s12899_s15, %s10381_s14  ;;  %s13079_s15 = sld [smem:[#allocation79_spill]] }
 0x130   : > { %8317 = vmatpush1.bf16.msra.mxu0 %v8316_v9  ;;  %v932_v20 = vld [vmem:[%s12894_s6 + $0xc0] sm:$0xff]  ;;  %v934_v23 = vld [vmem:[%s12894_s6 + $0xd0] sm:$0xff]  ;;  %v921_v26 = vld [vmem:[%s12894_s6 + $0x68] sm:$0xff] }
 0x131   : > { %8325 = vmatpush1.bf16.msra.mxu1 %v8324_v13  ;;  %v8320_v22 = vpack.c.bf16 %v932_v20, %v924_v19  ;;  %8319 = vmatprep.subr.bf16.mxu0 %v8318_v17  ;;  %v8328_v25 = vpack.c.bf16 %v934_v23, %v926_v21  ;;  %v915_v27 = vld [vmem:[%s12894_s6 + $0x38] sm:$0xff]  ;;  %v8330_v29 = vpack.c.bf16 %v921_v26, %v913_v24  ;;  %v912_v31 = vld [vmem:[%s12894_s6 + $0x20] sm:$0xff]  ;;  %v914_v33 = vld [vmem:[%s12894_s6 + $0x30] sm:$0xff] }
 0x132   : > { %8327 = vmatprep.subr.bf16.mxu1 %v8326_v18  ;;  %v923_v28 = vld [vmem:[%s12894_s6 + $0x78] sm:$0xff]  ;;  %v920_v32 = vld [vmem:[%s12894_s6 + $0x60] sm:$0xff]  ;;  %v922_v36 = vld [vmem:[%s12894_s6 + $0x70] sm:$0xff] }
 0x133   : > { %v8338_v30 = vpack.c.bf16 %v923_v28, %v915_v27  ;;  %v8332_v35 = vpack.c.bf16 %v920_v32, %v912_v31  ;;  %v929_v37 = vld [vmem:[%s12894_s6 + $0xa8] sm:$0xff]  ;;  %v8340_v38 = vpack.c.bf16 %v922_v36, %v914_v33  ;;  %v931_v40 = vld [vmem:[%s12894_s6 + $0xb8] sm:$0xff]  ;;  %v928_v43 = vld [vmem:[%s12894_s6 + $0xa0] sm:$0xff] }
 0x134   : > { %8321 = vmatpush1.bf16.msra.mxu0 %v8320_v22  ;;  %v937_v39 = vld [vmem:[%s12894_s6 + $0xe8] sm:$0xff]  ;;  %v939_v41 = vld [vmem:[%s12894_s6 + $0xf8] sm:$0xff]  ;;  %v936_v44 = vld [vmem:[%s12894_s6 + $0xe0] sm:$0xff] }
 0x135   : > { %8329 = vmatpush1.bf16.msra.mxu1 %v8328_v25  ;;  %8331 = vmatprep.subr.bf16.mxu0 %v8330_v29  ;;  %v8334_v42 = vpack.c.bf16 %v937_v39, %v929_v37  ;;  %v930_v45 = vld [vmem:[%s12894_s6 + $0xb0] sm:$0xff]  ;;  %v8342_v46 = vpack.c.bf16 %v939_v41, %v931_v40  ;;  %v8336_v51 = vpack.c.bf16 %v936_v44, %v928_v43  ;;  %v1274_v1 = vld [vmem:[%s12749_s7 + $0x98] sm:$0xff]  ;;  %v1271_v4 = vld [vmem:[%s12749_s7 + $0x80] sm:$0xff] }
 0x136   : > { %8339 = vmatprep.subr.bf16.mxu1 %v8338_v30  ;;  %v938_v47 = vld [vmem:[%s12894_s6 + $0xf0] sm:$0xff]  ;;  %v1282_v2 = vld [vmem:[%s12749_s7 + $0xd8] sm:$0xff]  ;;  %v1279_v5 = vld [vmem:[%s12749_s7 + $0xc0] sm:$0xff]  ;;  %s12898_s6 = sld [smem:[#allocation66_spill]] }
 0x137   : > { %7758 = vmatmul.mubr.msk.f32.vlgmr.msra.gmra.mrb[0].mxu0 %vm940_vm0, %v839_v34  ;;  %v8344_v54 = vpack.c.bf16 %v938_v47, %v930_v45  ;;  %v1273_v7 = vld [vmem:[%s12749_s7 + $0x90] sm:$0xff]  ;;  %v8358_v9 = vpack.c.bf16 %v1282_v2, %v1274_v1  ;;  %v1260_v10 = vld [vmem:[%s12749_s7 + $0x28] sm:$0xff]  ;;  %v8352_v12 = vpack.c.bf16 %v1279_v5, %v1271_v4  ;;  %v1262_v13 = vld [vmem:[%s12749_s7 + $0x38] sm:$0xff] }
 0x138   : > { %7760 = vmatmul.mubr.msk.f32.vlgmr.msra.gmra.mrb[0].mxu1 %vm940_vm0, %v839_v34  ;;  %8333 = vmatpush1.bf16.msra.mxu0 %v8332_v35  ;;  %v1281_v8 = vld [vmem:[%s12749_s7 + $0xd0] sm:$0xff]  ;;  %v1268_v11 = vld [vmem:[%s12749_s7 + $0x68] sm:$0xff]  ;;  %v1270_v14 = vld [vmem:[%s12749_s7 + $0x78] sm:$0xff] }
 0x139   : > { %8341 = vmatpush1.bf16.msra.mxu1 %v8340_v38  ;;  %1017 = vmatprep.mubr.f32.mxu0 %v9265_v0  ;;  %v8360_v15 = vpack.c.bf16 %v1281_v8, %v1273_v7  ;;  %v1259_v16 = vld [vmem:[%s12749_s7 + $0x20] sm:$0xff]  ;;  %v8362_v18 = vpack.c.bf16 %v1268_v11, %v1260_v10  ;;  %v1261_v19 = vld [vmem:[%s12749_s7 + $0x30] sm:$0xff]  ;;  %v8370_v21 = vpack.c.bf16 %v1270_v14, %v1262_v13  ;;  %v1276_v22 = vld [vmem:[%s12749_s7 + $0xa8] sm:$0xff] }
 0x13a   : > { %1094 = vmatprep.mubr.f32.mxu1 %v9265_v0  ;;  %8335 = vmatprep.subr.bf16.mxu0 %v8334_v42  ;;  %v1267_v17 = vld [vmem:[%s12749_s7 + $0x60] sm:$0xff]  ;;  %v1269_v20 = vld [vmem:[%s12749_s7 + $0x70] sm:$0xff]  ;;  %v1284_v23 = vld [vmem:[%s12749_s7 + $0xe8] sm:$0xff] }
 0x13b   : > { %7759 = vmatmul.mubr.msk.f32.gmra.mrb[2].mxu0 %vm940_vm0, %v840_v50  ;;  %8343 = vmatprep.subr.bf16.mxu1 %v8342_v46  ;;  %v841_v24 = vld [vmem:[%s9704_s28] sm:$0xff]  ;;  %v8364_v25 = vpack.c.bf16 %v1267_v17, %v1259_v16  ;;  %v1278_v26 = vld [vmem:[%s12749_s7 + $0xb8] sm:$0xff]  ;;  %v8372_v28 = vpack.c.bf16 %v1269_v20, %v1261_v19  ;;  %v8366_v31 = vpack.c.bf16 %v1284_v23, %v1276_v22  ;;  %v1634_v36 = vld [vmem:[%s12750_s8 + $0x88] sm:$0xff] }
 0x13c   : > { %7761 = vmatmul.mubr.msk.f32.gmra.mrb[2].mxu1 %vm940_vm0, %v840_v50  ;;  %8337 = vmatpush1.bf16.msra.mxu0 %v8336_v51  ;;  %v1286_v27 = vld [vmem:[%s12749_s7 + $0xf8] sm:$0xff]  ;;  %v1275_v29 = vld [vmem:[%s12749_s7 + $0xa0] sm:$0xff]  ;;  %v1277_v32 = vld [vmem:[%s12749_s7 + $0xb0] sm:$0xff]  ;;  %s10473_s9 = scalar_lea.vmem %s12898_s6, %s10381_s14  ;;  %s12909_s14 = smov 32  }
 0x13d   : > { %8345 = vmatpush1.bf16.msra.mxu1 %v8344_v54  ;;  %1165 = vmatprep.mubr.f32.mxu0 %v9265_v0  ;;  %v1283_v30 = vld [vmem:[%s12749_s7 + $0xe0] sm:$0xff]  ;;  %v1285_v33 = vld [vmem:[%s12749_s7 + $0xf0] sm:$0xff]  ;;  %v842_v37 = vld [vmem:[%s9704_s28 + $0x8] sm:$0xff]  ;;  %v8382_v54 = vpack.c.bf16 %v1636_v49, %v1635_v48 }
 0x13e   : > { %1242 = vmatprep.mubr.f32.mxu1 %v9265_v0  ;;  %8347 = vmatprep.subr.bf16.mxu0 %v8346_v57  ;;  %v1633_v35 = vld [vmem:[%s12750_s8 + $0x80] sm:$0xff]  ;;  %v8368_v38 = vpack.c.bf16 %v1283_v30, %v1275_v29  ;;  %v1666_v40 = vld [vmem:[%s12750_s8 + $0x188] sm:$0xff]  ;;  %v8376_v41 = vpack.c.bf16 %v1285_v33, %v1277_v32  ;;  %v1668_v51 = vld [vmem:[%s12750_s8 + $0x198] sm:$0xff] }
 0x13f   : > { %7762 = vmatmul.mubr.msk.f32.vlgmr.msra.gmra.mrb[4].mxu0 %vm940_vm0, %v839_v34  ;;  %8355 = vmatprep.subr.bf16.mxu1 %v8354_v60  ;;  %v1665_v39 = vld [vmem:[%s12750_s8 + $0x180] sm:$0xff]  ;;  %v8378_v42 = vpack.c.bf16 %v1634_v36, %v1633_v35  ;;  %v1618_v44 = vld [vmem:[%s12750_s8 + $0x8] sm:$0xff]  ;;  %v1619_v55 = vld [vmem:[%s12750_s8 + $0x10] sm:$0xff] }
 0x140   : > { %7764 = vmatmul.mubr.msk.f32.vlgmr.msra.gmra.mrb[4].mxu1 %vm940_vm0, %v839_v34  ;;  %8349 = vmatpush1.bf16.msra.mxu0 %v8348_v63  ;;  %v8374_v34 = vpack.c.bf16 %v1286_v27, %v1278_v26  ;;  %v1617_v43 = vld [vmem:[%s12750_s8] sm:$0xff]  ;;  %v8410_v46 = vpack.c.bf16 %v1666_v40, %v1665_v39  ;;  %v1650_v47 = vld [vmem:[%s12750_s8 + $0x108] sm:$0xff]  ;;  %v1651_v57 = vld [vmem:[%s12750_s8 + $0x110] sm:$0xff]  ;;  %v8384_v1 = vpack.c.bf16 %v1620_v56, %v1619_v55 }
 0x141   : > { %8357 = vmatpush1.bf16.msra.mxu1 %v8356_v3  ;;  %1171 = vmatprep.mubr.f32.mxu0 %v9265_v0  ;;  %v1649_v45 = vld [vmem:[%s12750_s8 + $0x100] sm:$0xff]  ;;  %v8380_v52 = vpack.c.bf16 %v1618_v44, %v1617_v43  ;;  %v1652_v59 = vld [vmem:[%s12750_s8 + $0x118] sm:$0xff]  ;;  %v1638_v61 = vld [vmem:[%s12750_s8 + $0xa8] sm:$0xff] }
 0x142   : > { %1248 = vmatprep.mubr.f32.mxu1 %v9265_v0  ;;  %8351 = vmatprep.subr.bf16.mxu0 %v8350_v6  ;;  %v8412_v53 = vpack.c.bf16 %v1650_v47, %v1649_v45  ;;  %v1637_v60 = vld [vmem:[%s12750_s8 + $0xa0] sm:$0xff]  ;;  %v1670_v63 = vld [vmem:[%s12750_s8 + $0x1a8] sm:$0xff]  ;;  %v8416_v2 = vpack.c.bf16 %v1652_v59, %v1651_v57  ;;  %v1639_v10 = vld [vmem:[%s12750_s8 + $0xb0] sm:$0xff] }
 0x143   : > { %7763 = vmatmul.mubr.msk.f32.gmra.mrb[6].mxu0 %vm940_vm0, %v840_v50  ;;  %8359 = vmatprep.subr.bf16.mxu1 %v8358_v9  ;;  %v1669_v62 = vld [vmem:[%s12750_s8 + $0x1a0] sm:$0xff]  ;;  %v8386_v3 = vpack.c.bf16 %v1638_v61, %v1637_v60  ;;  %v1622_v5 = vld [vmem:[%s12750_s8 + $0x28] sm:$0xff]  ;;  %v1640_v11 = vld [vmem:[%s12750_s8 + $0xb8] sm:$0xff] }
 0x144   : > { %7765 = vmatmul.mubr.msk.f32.gmra.mrb[6].mxu1 %vm940_vm0, %v840_v50  ;;  %8353 = vmatpush1.bf16.msra.mxu0 %v8352_v12  ;;  %v1667_v50 = vld [vmem:[%s12750_s8 + $0x190] sm:$0xff]  ;;  %v1621_v4 = vld [vmem:[%s12750_s8 + $0x20] sm:$0xff]  ;;  %v8418_v6 = vpack.c.bf16 %v1670_v63, %v1669_v62  ;;  %v1654_v7 = vld [vmem:[%s12750_s8 + $0x128] sm:$0xff]  ;;  %v8390_v13 = vpack.c.bf16 %v1640_v11, %v1639_v10 }
 0x145   : > { %8361 = vmatpush1.bf16.msra.mxu1 %v8360_v15  ;;  %1357 = vmatprep.mubr.f32.mxu0 %v9265_v0  ;;  %v8414_v58 = vpack.c.bf16 %v1668_v51, %v1667_v50  ;;  %v8388_v8 = vpack.c.bf16 %v1622_v5, %v1621_v4  ;;  %v1671_v12 = vld [vmem:[%s12750_s8 + $0x1b0] sm:$0xff]  ;;  %v1672_v14 = vld [vmem:[%s12750_s8 + $0x1b8] sm:$0xff]  ;;  %v1641_v22 = vld [vmem:[%s12750_s8 + $0xc0] sm:$0xff] }
 0x146   : > { %1434 = vmatprep.mubr.f32.mxu1 %v9265_v0  ;;  %8363 = vmatprep.subr.bf16.mxu0 %v8362_v18  ;;  %v1623_v15 = vld [vmem:[%s12750_s8 + $0x30] sm:$0xff]  ;;  %v1624_v16 = vld [vmem:[%s12750_s8 + $0x38] sm:$0xff]  ;;  %v8422_v17 = vpack.c.bf16 %v1672_v14, %v1671_v12  ;;  %v1642_v23 = vld [vmem:[%s12750_s8 + $0xc8] sm:$0xff] }
 0x147   : > { %7766 = vmatmul.mubr.msk.f32.vlgmr.msra.gmra.mrb[8].mxu0 %vm940_vm0, %v841_v24  ;;  %8371 = vmatprep.subr.bf16.mxu1 %v8370_v21  ;;  %v8392_v18 = vpack.c.bf16 %v1624_v16, %v1623_v15  ;;  %v1655_v19 = vld [vmem:[%s12750_s8 + $0x130] sm:$0xff]  ;;  %v1656_v20 = vld [vmem:[%s12750_s8 + $0x138] sm:$0xff]  ;;  %v1674_v26 = vld [vmem:[%s12750_s8 + $0x1c8] sm:$0xff] }
 0x148   : > { %7768 = vmatmul.mubr.msk.f32.vlgmr.msra.gmra.mrb[8].mxu1 %vm940_vm0, %v841_v24  ;;  %8365 = vmatpush1.bf16.msra.mxu0 %v8364_v25  ;;  %v8424_v21 = vpack.c.bf16 %v1656_v20, %v1655_v19  ;;  %v8394_v25 = vpack.c.bf16 %v1642_v23, %v1641_v22  ;;  %v1625_v27 = vld [vmem:[%s12750_s8 + $0x40] sm:$0xff]  ;;  %v1658_v32 = vld [vmem:[%s12750_s8 + $0x148] sm:$0xff]  ;;  %v1644_v35 = vld [vmem:[%s12750_s8 + $0xd8] sm:$0xff] }
 0x149   : > { %8373 = vmatpush1.bf16.msra.mxu1 %v8372_v28  ;;  %1363 = vmatprep.mubr.f32.mxu0 %v9265_v0  ;;  %v1626_v28 = vld [vmem:[%s12750_s8 + $0x48] sm:$0xff]  ;;  %v1675_v36 = vld [vmem:[%s12750_s8 + $0x1d0] sm:$0xff]  ;;  %v1628_v40 = vld [vmem:[%s12750_s8 + $0x58] sm:$0xff] }
 0x14a   : > { %1440 = vmatprep.mubr.f32.mxu1 %v9265_v0  ;;  %8367 = vmatprep.subr.bf16.mxu0 %v8366_v31  ;;  %v8396_v30 = vpack.c.bf16 %v1626_v28, %v1625_v27  ;;  %v1657_v31 = vld [vmem:[%s12750_s8 + $0x140] sm:$0xff]  ;;  %v1627_v39 = vld [vmem:[%s12750_s8 + $0x50] sm:$0xff]  ;;  %v1660_v44 = vld [vmem:[%s12750_s8 + $0x158] sm:$0xff] }
 0x14b   : > { %7767 = vmatmul.mubr.msk.f32.gmra.mrb[10].mxu0 %vm940_vm0, %v842_v37  ;;  %8375 = vmatprep.subr.bf16.mxu1 %v8374_v34  ;;  %v8428_v33 = vpack.c.bf16 %v1658_v32, %v1657_v31  ;;  %v1643_v34 = vld [vmem:[%s12750_s8 + $0xd0] sm:$0xff]  ;;  %v1646_v47 = vld [vmem:[%s12750_s8 + $0xe8] sm:$0xff]  ;;  %v1677_v48 = vld [vmem:[%s12750_s8 + $0x1e0] sm:$0xff] }
 0x14c   : > { %7769 = vmatmul.mubr.msk.f32.gmra.mrb[10].mxu1 %vm940_vm0, %v842_v37  ;;  %8369 = vmatpush1.bf16.msra.mxu0 %v8368_v38  ;;  %v1676_v38 = vld [vmem:[%s12750_s8 + $0x1d8] sm:$0xff]  ;;  %v1659_v43 = vld [vmem:[%s12750_s8 + $0x150] sm:$0xff]  ;;  %v1678_v50 = vld [vmem:[%s12750_s8 + $0x1e8] sm:$0xff] }
 0x14d   : > { %8377 = vmatpush1.bf16.msra.mxu1 %v8376_v41  ;;  %1511 = vmatprep.mubr.f32.mxu0 %v9265_v0  ;;  %v8430_v41 = vpack.c.bf16 %v1676_v38, %v1675_v36  ;;  %v8432_v45 = vpack.c.bf16 %v1660_v44, %v1659_v43  ;;  %v1629_v51 = vld [vmem:[%s12750_s8 + $0x60] sm:$0xff]  ;;  %v1662_v56 = vld [vmem:[%s12750_s8 + $0x168] sm:$0xff]  ;;  %v1648_v59 = vld [vmem:[%s12750_s8 + $0xf8] sm:$0xff] }
 0x14e   : > { %1588 = vmatprep.mubr.f32.mxu1 %v9265_v0  ;;  %8379 = vmatprep.subr.bf16.mxu0 %v8378_v42  ;;  %v8400_v42 = vpack.c.bf16 %v1628_v40, %v1627_v39  ;;  %v1661_v55 = vld [vmem:[%s12750_s8 + $0x160] sm:$0xff]  ;;  %v1679_v60 = vld [vmem:[%s12750_s8 + $0x1f0] sm:$0xff]  ;;  %v1680_v62 = vld [vmem:[%s12750_s8 + $0x1f8] sm:$0xff] }
 0x14f   : > { %7770 = vmatmul.mubr.msk.f32.vlgmr.msra.gmra.mrb[12].mxu0 %vm940_vm0, %v841_v24  ;;  %8411 = vmatprep.subr.bf16.mxu1 %v8410_v46  ;;  %v1645_v46 = vld [vmem:[%s12750_s8 + $0xe0] sm:$0xff]  ;;  %v8436_v57 = vpack.c.bf16 %v1662_v56, %v1661_v55  ;;  %v1631_v63 = vld [vmem:[%s12750_s8 + $0x70] sm:$0xff]  ;;  %v1664_v5 = vld [vmem:[%s12750_s8 + $0x178] sm:$0xff] }
 0x150   : > { %7772 = vmatmul.mubr.msk.f32.vlgmr.msra.gmra.mrb[12].mxu1 %vm940_vm0, %v841_v24  ;;  %1517 = vmatprep.mubr.f32.mxu0 %v9265_v0  ;;  %v1673_v24 = vld [vmem:[%s12750_s8 + $0x1c0] sm:$0xff]  ;;  %v8402_v49 = vpack.c.bf16 %v1646_v47, %v1645_v46  ;;  %v1663_v4 = vld [vmem:[%s12750_s8 + $0x170] sm:$0xff]  ;;  %v1730_v10 = vld [vmem:[%s12750_s8 + $0x388] sm:$0xff] }
 0x151   : > { %1594 = vmatprep.mubr.f32.mxu1 %v9265_v0  ;;  %8381 = vmatpush3.bf16.msra.mxu0 %v8380_v52  ;;  %v1653_v0 = vld [vmem:[%s12750_s8 + $0x120] sm:$0xff]  ;;  %v8426_v29 = vpack.c.bf16 %v1674_v26, %v1673_v24  ;;  %v1630_v52 = vld [vmem:[%s12750_s8 + $0x68] sm:$0xff]  ;;  %v1731_v38 = vld [vmem:[%s12750_s8 + $0x390] sm:$0xff] }
 0x152   : > { %8413 = vmatpush3.bf16.msra.mxu1 %v8412_v53  ;;  %8383 = vmatprep.subr.bf16.mxu0 %v8382_v54  ;;  %v8420_v9 = vpack.c.bf16 %v1654_v7, %v1653_v0  ;;  %v8434_v53 = vpack.c.bf16 %v1678_v50, %v1677_v48  ;;  %v8404_v54 = vpack.c.bf16 %v1630_v52, %v1629_v51  ;;  %v1697_v0 = vld [vmem:[%s12750_s8 + $0x280] sm:$0xff]  ;;  %v1698_v7 = vld [vmem:[%s12750_s8 + $0x288] sm:$0xff]  ;;  %v1732_v39 = vld [vmem:[%s12750_s8 + $0x398] sm:$0xff] }
 0x153   : > { %7771 = vmatmul.mubr.msk.f32.gmra.mrb[14].mxu0 %vm940_vm0, %v842_v37  ;;  %8415 = vmatprep.subr.bf16.mxu1 %v8414_v58  ;;  %v1647_v58 = vld [vmem:[%s12750_s8 + $0xf0] sm:$0xff]  ;;  %v1681_v28 = vld [vmem:[%s12750_s8 + $0x200] sm:$0xff]  ;;  %v1714_v32 = vld [vmem:[%s12750_s8 + $0x308] sm:$0xff]  ;;  %v8478_v51 = vpack.c.bf16 %v1732_v39, %v1731_v38 }
 0x154   : > { %7773 = vmatmul.mubr.msk.f32.gmra.mrb[14].mxu1 %vm940_vm0, %v842_v37  ;;  %v8398_v37 = vpack.c.bf16 %v1644_v35, %v1643_v34  ;;  %v8406_v61 = vpack.c.bf16 %v1648_v59, %v1647_v58  ;;  %v1700_v34 = vld [vmem:[%s12750_s8 + $0x298] sm:$0xff]  ;;  %v1683_v47 = vld [vmem:[%s12750_s8 + $0x210] sm:$0xff]  ;;  %v1733_v58 = vld [vmem:[%s12750_s8 + $0x3a0] sm:$0xff] }
 0x155   : > { %8385 = vmatpush3.bf16.msra.mxu0 %v8384_v1  ;;  %v1632_v1 = vld [vmem:[%s12750_s8 + $0x78] sm:$0xff]  ;;  %v1734_v59 = vld [vmem:[%s12750_s8 + $0x3a8] sm:$0xff]  ;;  %v1737_v38 = vld [vmem:[%s12750_s8 + $0x3c0] sm:$0xff] }
 0x156   : > { %8417 = vmatpush3.bf16.msra.mxu1 %v8416_v2  ;;  %8387 = vmatprep.subr.bf16.mxu0 %v8386_v3  ;;  %v8438_v2 = vpack.c.bf16 %v1680_v62, %v1679_v60  ;;  %v8408_v3 = vpack.c.bf16 %v1632_v1, %v1631_v63  ;;  %v1684_v48 = vld [vmem:[%s12750_s8 + $0x218] sm:$0xff]  ;;  %v1738_v39 = vld [vmem:[%s12750_s8 + $0x3c8] sm:$0xff] }
 0x157   : > { %8419 = vmatprep.subr.bf16.mxu1 %v8418_v6  ;;  %v8440_v6 = vpack.c.bf16 %v1664_v5, %v1663_v4  ;;  %v1716_v52 = vld [vmem:[%s12750_s8 + $0x318] sm:$0xff]  ;;  %v8448_v63 = vpack.c.bf16 %v1684_v48, %v1683_v47  ;;  %v1685_v4 = vld [vmem:[%s12750_s8 + $0x220] sm:$0xff]  ;;  %v1686_v5 = vld [vmem:[%s12750_s8 + $0x228] sm:$0xff]  ;;  %v8490_v47 = vpack.c.bf16 %v1738_v39, %v1737_v38 }
 0x158   : > { %v1707_v48 = vld [vmem:[%s12750_s8 + $0x2d0] sm:$0xff] }
 0x159   : > { %8389 = vmatpush3.bf16.msra.mxu0 %v8388_v8  ;;  %v1729_v8 = vld [vmem:[%s12750_s8 + $0x380] sm:$0xff] }
 0x15a   : > { %8421 = vmatpush3.bf16.msra.mxu1 %v8420_v9  ;;  %8391 = vmatprep.subr.bf16.mxu0 %v8390_v13  ;;  %v8442_v9 = vpack.c.bf16 %v1698_v7, %v1697_v0  ;;  %v8474_v11 = vpack.c.bf16 %v1730_v10, %v1729_v8  ;;  %v8482_v7 = vpack.c.bf16 %v1734_v59, %v1733_v58  ;;  %v1718_v8 = vld [vmem:[%s12750_s8 + $0x328] sm:$0xff]  ;;  %v1704_v10 = vld [vmem:[%s12750_s8 + $0x2b8] sm:$0xff] }
 0x15b   : > { %8423 = vmatprep.subr.bf16.mxu1 %v8422_v17  ;;  %v1724_v59 = vld [vmem:[%s12750_s8 + $0x358] sm:$0xff] }
 0x15d   : > { %8393 = vmatpush3.bf16.msra.mxu0 %v8392_v18 }
 0x15e   : > { %8425 = vmatpush3.bf16.msra.mxu1 %v8424_v21  ;;  %8395 = vmatprep.subr.bf16.mxu0 %v8394_v25 }
 0x15f   : > { %8427 = vmatprep.subr.bf16.mxu1 %v8426_v29  ;;  %v1682_v29 = vld [vmem:[%s12750_s8 + $0x208] sm:$0xff] }
 0x160   : > { %v8444_v43 = vpack.c.bf16 %v1682_v29, %v1681_v28 }
 0x161   : > { %8397 = vmatpush3.bf16.msra.mxu0 %v8396_v30  ;;  %v1713_v30 = vld [vmem:[%s12750_s8 + $0x300] sm:$0xff] }
 0x162   : > { %8429 = vmatpush3.bf16.msra.mxu1 %v8428_v33  ;;  %8399 = vmatprep.subr.bf16.mxu0 %v8398_v37  ;;  %v1699_v33 = vld [vmem:[%s12750_s8 + $0x290] sm:$0xff] }
 0x163   : > { %8431 = vmatprep.subr.bf16.mxu1 %v8430_v41  ;;  %v8446_v46 = vpack.c.bf16 %v1700_v34, %v1699_v33  ;;  %v1705_v33 = vld [vmem:[%s12750_s8 + $0x2c0] sm:$0xff]  ;;  %v1706_v34 = vld [vmem:[%s12750_s8 + $0x2c8] sm:$0xff] }
 0x165   : > { %8401 = vmatpush3.bf16.msra.mxu0 %v8400_v42 }
 0x166   : > { %8433 = vmatpush3.bf16.msra.mxu1 %v8432_v45  ;;  %8403 = vmatprep.subr.bf16.mxu0 %v8402_v49  ;;  %v8476_v45 = vpack.c.bf16 %v1714_v32, %v1713_v30  ;;  %v1715_v49 = vld [vmem:[%s12750_s8 + $0x310] sm:$0xff]  ;;  %v1720_v32 = vld [vmem:[%s12750_s8 + $0x338] sm:$0xff] }
 0x167   : > { %8435 = vmatprep.subr.bf16.mxu1 %v8434_v53  ;;  %v1701_v53 = vld [vmem:[%s12750_s8 + $0x2a0] sm:$0xff]  ;;  %v1687_v30 = vld [vmem:[%s12750_s8 + $0x230] sm:$0xff] }
 0x169   : > { %8405 = vmatpush3.bf16.msra.mxu0 %v8404_v54  ;;  %v1702_v54 = vld [vmem:[%s12750_s8 + $0x2a8] sm:$0xff] }
 0x16a   : > { %8437 = vmatpush3.bf16.msra.mxu1 %v8436_v57  ;;  %8407 = vmatprep.subr.bf16.mxu0 %v8406_v61 }
 0x16b   : > { %8439 = vmatprep.subr.bf16.mxu1 %v8438_v2  ;;  %v8480_v2 = vpack.c.bf16 %v1716_v52, %v1715_v49  ;;  %v1708_v49 = vld [vmem:[%s12750_s8 + $0x2d8] sm:$0xff] }
 0x16d   : > { %8409 = vmatpush3.bf16.msra.mxu0 %v8408_v3  ;;  %v8450_v3 = vpack.c.bf16 %v1702_v54, %v1701_v53  ;;  %v8462_v54 = vpack.c.bf16 %v1708_v49, %v1707_v48  ;;  %v864_v48 = vld [vmem:[%s10387_s19 + $0x28] sm:$0xff] }
 0x16e   : > { %8441 = vmatpush3.bf16.msra.mxu1 %v8440_v6  ;;  %8443 = vmatprep.subr.bf16.mxu0 %v8442_v9  ;;  %v1717_v6 = vld [vmem:[%s12750_s8 + $0x320] sm:$0xff]  ;;  %v1703_v9 = vld [vmem:[%s12750_s8 + $0x2b0] sm:$0xff] }
 0x16f   : > { %8475 = vmatprep.subr.bf16.mxu1 %v8474_v11  ;;  %v8484_v28 = vpack.c.bf16 %v1718_v8, %v1717_v6  ;;  %v8454_v29 = vpack.c.bf16 %v1704_v10, %v1703_v9  ;;  %v1725_v6 = vld [vmem:[%s12750_s8 + $0x360] sm:$0xff]  ;;  %v1711_v8 = vld [vmem:[%s12750_s8 + $0x2f0] sm:$0xff]  ;;  %v1712_v9 = vld [vmem:[%s12750_s8 + $0x2f8] sm:$0xff] }
 0x170   : > { %v1743_v10 = vld [vmem:[%s12750_s8 + $0x3f0] sm:$0xff] }
 0x20a   : > { %v1013_v12 = vpop.f32.mrb[0].mxu0 }
 0x20b   : > { %v1015_v13 = vpop.f32.mrb[1].mxu0  ;;  %v1090_v14 = vpop.f32.mrb[0].mxu1 }
 0x20c   : > { %v1092_v15 = vpop.f32.mrb[1].mxu1 }
 0x20e   : > { %v1019_v16 = vpop.f32.mrb[2].mxu0 }
 0x20f   : > { %v1021_v17 = vpop.f32.mrb[3].mxu0  ;;  %v1096_v18 = vpop.f32.mrb[2].mxu1 }
 0x210   : > { %v1098_v19 = vpop.f32.mrb[3].mxu1 }
 0x212   : > { %v10158_v20 = vpop.f32.mrb[4].mxu0 }
 0x213   : > { %v10160_v21 = vpop.f32.mrb[5].mxu0  ;;  %v10162_v22 = vpop.f32.mrb[4].mxu1 }
 0x214   : > { %v10164_v23 = vpop.f32.mrb[5].mxu1 }
 0x216   : > { %v10166_v24 = vpop.f32.mrb[6].mxu0 }
 0x217   : > { %v10168_v25 = vpop.f32.mrb[7].mxu0  ;;  %v10170_v26 = vpop.f32.mrb[6].mxu1 }
 0x218   : > { %v10172_v27 = vpop.f32.mrb[7].mxu1 }
 0x21a   : > { %v1359_v31 = vpop.f32.mrb[8].mxu0 }
 0x21b   : > { %v1601_v35 = vmul.f32 %v1359_v31, %v1013_v12  ;;  %v1436_v36 = vpop.f32.mrb[8].mxu1  ;;  %v1361_v37 = vpop.f32.mrb[9].mxu0 }
 0x21c   : > { %v1603_v40 = vmul.f32 %v1436_v36, %v1090_v14  ;;  %v1602_v41 = vmul.f32 %v1361_v37, %v1015_v13  ;;  %v1438_v42 = vpop.f32.mrb[9].mxu1  ;;  %v1735_v14 = vld [vmem:[%s12750_s8 + $0x3b0] sm:$0xff] }
 0x21d   : > { %v1604_v44 = vmul.f32 %v1438_v42, %v1092_v15  ;;  %v1736_v15 = vld [vmem:[%s12750_s8 + $0x3b8] sm:$0xff] }
 0x21e   : > { %v1365_v50 = vpop.f32.mrb[10].mxu0  ;;  %1809 = vmatprep.mubr.f32.mxu0 %v1602_v41 }
 0x21f   : > { %v1609_v55 = vmul.f32 %v1365_v50, %v1019_v16  ;;  %v1442_v56 = vpop.f32.mrb[10].mxu1  ;;  %1884 = vmatprep.mubr.f32.mxu1 %v1604_v44  ;;  %v1367_v57 = vpop.f32.mrb[11].mxu0  ;;  %1810 = vmatmul.mubr.f32.vlgmr.msra.gmra.mrb[16].mxu0 %v1601_v35  ;;  %v1739_v50 = vld [vmem:[%s12750_s8 + $0x3d0] sm:$0xff] }
 0x220   : > { %v1611_v60 = vmul.f32 %v1442_v56, %v1096_v18  ;;  %v1610_v61 = vmul.f32 %v1367_v57, %v1021_v17  ;;  %v1444_v62 = vpop.f32.mrb[11].mxu1  ;;  %1885 = vmatmul.mubr.f32.vlgmr.msra.gmra.mrb[16].mxu1 %v1603_v40  ;;  %8445 = vmatpush3.bf16.msra.mxu0 %v8444_v43  ;;  %v1692_v56 = vld [vmem:[%s12750_s8 + $0x258] sm:$0xff]  ;;  %v1723_v57 = vld [vmem:[%s12750_s8 + $0x350] sm:$0xff] }
 0x221   : > { %v1612_v1 = vmul.f32 %v1444_v62, %v1098_v19  ;;  %8477 = vmatpush3.bf16.msra.mxu1 %v8476_v45  ;;  %8447 = vmatprep.subr.bf16.mxu0 %v8446_v46  ;;  %v8452_v19 = vpack.c.bf16 %v1686_v5, %v1685_v4  ;;  %v8458_v45 = vpack.c.bf16 %v1706_v34, %v1705_v33  ;;  %v1689_v46 = vld [vmem:[%s12750_s8 + $0x240] sm:$0xff]  ;;  %v1694_v5 = vld [vmem:[%s12750_s8 + $0x268] sm:$0xff] }
 0x222   : > { %v1513_v0 = vpop.f32.mrb[12].mxu0  ;;  %1814 = vmatprep.mubr.f32.mxu0 %v1610_v61  ;;  %8479 = vmatprep.subr.bf16.mxu1 %v8478_v51  ;;  %v1740_v51 = vld [vmem:[%s12750_s8 + $0x3d8] sm:$0xff]  ;;  %v1710_v61 = vld [vmem:[%s12750_s8 + $0x2e8] sm:$0xff]  ;;  %v1741_v62 = vld [vmem:[%s12750_s8 + $0x3e0] sm:$0xff] }
 0x223   : > { %v10241_v11 = vmul.f32 %v1513_v0, %v10158_v20  ;;  %v1590_v12 = vpop.f32.mrb[12].mxu1  ;;  %1889 = vmatprep.mubr.f32.mxu1 %v1612_v1  ;;  %v1515_v13 = vpop.f32.mrb[13].mxu0  ;;  %1815 = vmatmul.mubr.f32.gmra.mrb[18].mxu0 %v1609_v55  ;;  %v1691_v55 = vld [vmem:[%s12750_s8 + $0x250] sm:$0xff]  ;;  %v8494_v58 = vpack.c.bf16 %v1740_v51, %v1739_v50  ;;  %v1693_v4 = vld [vmem:[%s12750_s8 + $0x260] sm:$0xff] }
 0x224   : > { %v10250_v16 = vmul.f32 %v1590_v12, %v10162_v22  ;;  %v1606_v17 = vmul.f32 %v1515_v13, %v10160_v21  ;;  %v1592_v18 = vpop.f32.mrb[13].mxu1  ;;  %1890 = vmatmul.mubr.f32.gmra.mrb[18].mxu1 %v1611_v60  ;;  %8449 = vmatpush3.bf16.msra.mxu0 %v8448_v63  ;;  %v1688_v22 = vld [vmem:[%s12750_s8 + $0x238] sm:$0xff]  ;;  %v1719_v21 = vld [vmem:[%s12750_s8 + $0x330] sm:$0xff]  ;;  %v1709_v60 = vld [vmem:[%s12750_s8 + $0x2e0] sm:$0xff]  ;;  %v8464_v1 = vpack.c.bf16 %v1692_v56, %v1691_v55 }
 0x225   : > { %v1608_v20 = vmul.f32 %v1592_v18, %v10164_v23  ;;  %8481 = vmatpush3.bf16.msra.mxu1 %v8480_v2  ;;  %8451 = vmatprep.subr.bf16.mxu0 %v8450_v3  ;;  %v8486_v23 = vpack.c.bf16 %v1736_v15, %v1735_v14  ;;  %v8488_v44 = vpack.c.bf16 %v1720_v32, %v1719_v21  ;;  %v1742_v63 = vld [vmem:[%s12750_s8 + $0x3e8] sm:$0xff]  ;;  %v1744_v12 = vld [vmem:[%s12750_s8 + $0x3f8] sm:$0xff] }
 0x226   : > { %v1519_v31 = vpop.f32.mrb[14].mxu0  ;;  %1959 = vmatprep.mubr.f32.mxu0 %v1606_v17  ;;  %8483 = vmatprep.subr.bf16.mxu1 %v8482_v7  ;;  %v8496_v2 = vpack.c.bf16 %v1724_v59, %v1723_v57  ;;  %v8466_v3 = vpack.c.bf16 %v1710_v61, %v1709_v60  ;;  %v8498_v0 = vpack.c.bf16 %v1742_v63, %v1741_v62  ;;  %v1726_v7 = vld [vmem:[%s12750_s8 + $0x368] sm:$0xff]  ;;  %v1695_v17 = vld [vmem:[%s12750_s8 + $0x270] sm:$0xff]  ;;  %v1696_v18 = vld [vmem:[%s12750_s8 + $0x278] sm:$0xff] }
 0x227   : > { %v10273_v35 = vmul.f32 %v1519_v31, %v10166_v24  ;;  %v1596_v36 = vpop.f32.mrb[14].mxu1  ;;  %2034 = vmatprep.mubr.f32.mxu1 %v1608_v20  ;;  %v1521_v37 = vpop.f32.mrb[15].mxu0  ;;  %v8456_v24 = vpack.c.bf16 %v1688_v22, %v1687_v30  ;;  %v8468_v13 = vpack.c.bf16 %v1694_v5, %v1693_v4  ;;  %v8500_v14 = vpack.c.bf16 %v1726_v7, %v1725_v6  ;;  %v1727_v20 = vld [vmem:[%s12750_s8 + $0x370] sm:$0xff]  ;;  %v2585_v22 = vld [vmem:[#allocation10] sm:$0xff]  ;;  %v2586_v21 = vld [vmem:[#allocation10 + $0x8] sm:$0xff] }
 0x228   : > { %v10282_v40 = vmul.f32 %v1596_v36, %v10170_v26  ;;  %v10285_v41 = vmul.f32 %v1521_v37, %v10168_v25  ;;  %v1598_v42 = vpop.f32.mrb[15].mxu1  ;;  %8453 = vmatpush3.bf16.msra.mxu0 %v8452_v19  ;;  %v1690_v26 = vld [vmem:[%s12750_s8 + $0x248] sm:$0xff]  ;;  %v1721_v25 = vld [vmem:[%s12750_s8 + $0x340] sm:$0xff]  ;;  %v8470_v15 = vpack.c.bf16 %v1712_v9, %v1711_v8  ;;  %v8502_v19 = vpack.c.bf16 %v1744_v12, %v1743_v10  ;;  %v2588_v32 = vld [vmem:[#allocation10 + $0x18] sm:$0xff] }
 0x229   : > { %v10288_v43 = vmul.f32 %v1598_v42, %v10172_v27  ;;  %8485 = vmatpush3.bf16.msra.mxu1 %v8484_v28  ;;  %8455 = vmatprep.subr.bf16.mxu0 %v8454_v29  ;;  %v1722_v27 = vld [vmem:[%s12750_s8 + $0x348] sm:$0xff]  ;;  %v8460_v52 = vpack.c.bf16 %v1690_v26, %v1689_v46  ;;  %v1728_v28 = vld [vmem:[%s12750_s8 + $0x378] sm:$0xff]  ;;  %v8472_v29 = vpack.c.bf16 %v1696_v18, %v1695_v17  ;;  %v861_v46 = vld [vmem:[%s10387_s19 + $0x10] sm:$0xff] }
 0x22a   : > { %8487 = vmatprep.subr.bf16.mxu1 %v8486_v23  ;;  %v8492_v53 = vpack.c.bf16 %v1722_v27, %v1721_v25  ;;  %v8504_v30 = vpack.c.bf16 %v1728_v28, %v1727_v20  ;;  %v8522_v31 = vpack.c.bf16 %v2586_v21, %v2585_v22  ;;  %v2587_v23 = vld [vmem:[#allocation10 + $0x10] sm:$0xff]  ;;  %v862_v26 = vld [vmem:[%s10387_s19 + $0x18] sm:$0xff]  ;;  %v867_v63 = vld [vmem:[%s10387_s19 + $0x40] sm:$0xff] }
 0x22b   : > { %v8526_v33 = vpack.c.bf16 %v2588_v32, %v2587_v23  ;;  %v865_v59 = vld [vmem:[%s10387_s19 + $0x30] sm:$0xff]  ;;  %v866_v5 = vld [vmem:[%s10387_s19 + $0x38] sm:$0xff]  ;;  %v871_v7 = vld [vmem:[%s10387_s19 + $0x60] sm:$0xff] }
 0x22c   : > { %8457 = vmatpush3.bf16.msra.mxu0 %v8456_v24  ;;  %v869_v4 = vld [vmem:[%s10387_s19 + $0x50] sm:$0xff]  ;;  %v870_v6 = vld [vmem:[%s10387_s19 + $0x58] sm:$0xff]  ;;  %v872_v9 = vld [vmem:[%s10387_s19 + $0x68] sm:$0xff] }
 0x22d   : > { %8489 = vmatpush3.bf16.msra.mxu1 %v8488_v44  ;;  %8459 = vmatprep.subr.bf16.mxu0 %v8458_v45  ;;  %v897_v8 = vld [vmem:[%s10421_s16 + $0x30] sm:$0xff]  ;;  %v899_v10 = vld [vmem:[%s10421_s16 + $0x40] sm:$0xff]  ;;  %v894_v17 = vld [vmem:[%s10421_s16 + $0x18] sm:$0xff] }
 0x22e   : > { %8491 = vmatprep.subr.bf16.mxu1 %v8490_v47  ;;  %v873_v12 = vld [vmem:[%s10387_s19 + $0x70] sm:$0xff]  ;;  %v895_v18 = vld [vmem:[%s10421_s16 + $0x20] sm:$0xff]  ;;  %v898_v20 = vld [vmem:[%s10421_s16 + $0x38] sm:$0xff] }
 0x22f   : > { %v900_v28 = vld [vmem:[%s10421_s16 + $0x48] sm:$0xff]  ;;  %v2211_v22 = vld [vmem:[%s12897_s22] sm:$0xff]  ;;  %v2213_v23 = vld [vmem:[%s12897_s22 + $0x10] sm:$0xff] }
 0x230   : > { %8461 = vmatpush3.bf16.msra.mxu0 %v8460_v52  ;;  %v2212_v21 = vld [vmem:[%s12897_s22 + $0x8] sm:$0xff]  ;;  %v2214_v32 = vld [vmem:[%s12897_s22 + $0x18] sm:$0xff] }
 0x231   : > { %8493 = vmatpush3.bf16.msra.mxu1 %v8492_v53  ;;  %8463 = vmatprep.subr.bf16.mxu0 %v8462_v54 }
 0x232   : > { %8495 = vmatprep.subr.bf16.mxu1 %v8494_v58 }
 0x234   : > { %8465 = vmatpush3.bf16.msra.mxu0 %v8464_v1  ;;  %v860_v1 = vld [vmem:[%s10387_s19 + $0x8] sm:$0xff] }
 0x235   : > { %8497 = vmatpush3.bf16.msra.mxu1 %v8496_v2  ;;  %8467 = vmatprep.subr.bf16.mxu0 %v8466_v3  ;;  %v868_v2 = vld [vmem:[%s10387_s19 + $0x48] sm:$0xff]  ;;  %v863_v3 = vld [vmem:[%s10387_s19 + $0x20] sm:$0xff] }
 0x236   : > { %8499 = vmatprep.subr.bf16.mxu1 %v8498_v0  ;;  %v874_v0 = vld [vmem:[%s10387_s19 + $0x78] sm:$0xff] }
 0x238   : > { %8469 = vmatpush3.bf16.msra.mxu0 %v8468_v13  ;;  %v891_v13 = vld [vmem:[%s10421_s16] sm:$0xff] }
 0x239   : > { %8501 = vmatpush3.bf16.msra.mxu1 %v8500_v14  ;;  %8471 = vmatprep.subr.bf16.mxu0 %v8470_v15  ;;  %v892_v14 = vld [vmem:[%s10421_s16 + $0x8] sm:$0xff]  ;;  %v893_v15 = vld [vmem:[%s10421_s16 + $0x10] sm:$0xff] }
 0x23a   : > { %8503 = vmatprep.subr.bf16.mxu1 %v8502_v19  ;;  %v896_v19 = vld [vmem:[%s10421_s16 + $0x28] sm:$0xff] }
 0x23c   : > { %8473 = vmatpush3.bf16.msra.mxu0 %v8472_v29 }
 0x23d   : > { %8505 = vmatpush3.bf16.msra.mxu1 %v8504_v30 }
 0x23e   : > { %8523 = vmatprep.subr.bf16.mxu1 %v8522_v31 }
 0x23f   : > { %1960 = vmatmul.mubr.f32.vlgmr.msra.gmra.mrb[20].mxu0 %v10241_v11  ;;  %v859_v11 = vld [vmem:[%s10387_s19] sm:$0xff] }
 0x240   : > { %2035 = vmatmul.mubr.f32.vlgmr.msra.gmra.mrb[20].mxu1 %v10250_v16  ;;  %1964 = vmatprep.mubr.f32.mxu0 %v10285_v41 }
 0x241   : > { %2039 = vmatprep.mubr.f32.mxu1 %v10288_v43  ;;  %8525 = vmatpush3.bf16.msra.mxu1 %v8522_v31  ;;  %v8506_v31 = vpack.c.bf16 %v2212_v21, %v2211_v22 }
 0x242   : > { %8527 = vmatprep.subr.bf16.mxu1 %v8526_v33  ;;  %2083 = vrot.lane.b32.xlu1 %v859_v11, %s12777_s13  ;;  %v2215_v11 = vld [vmem:[%s12897_s22 + $0x20] sm:$0xff] }
 0x243   : > { %1965 = vmatmul.mubr.f32.gmra.mrb[22].mxu0 %v10273_v35  ;;  %8507 = vmatprep.subr.bf16.mxu0 %v8506_v31 }
 0x244   : > { %2040 = vmatmul.mubr.f32.gmra.mrb[22].mxu1 %v10282_v40  ;;  %8509 = vmatpush3.bf16.msra.mxu0 %v8506_v31  ;;  %v10596_v31 = vld [vmem:[%s10572_s17 + $0x10] sm:$0xff] }
 0x245   : > { %8529 = vmatpush3.bf16.msra.mxu1 %v8526_v33  ;;  %v8510_v33 = vpack.c.bf16 %v2214_v32, %v2213_v23 }
 0x246   : > { %2087 = vrot.lane.b32.xlu1 %v861_v46, %s12777_s13  ;;  %v10499_v46 = vld [vmem:[%s10473_s9 + $0x20] sm:$0xff] }
 0x247   : > { %8511 = vmatprep.subr.bf16.mxu0 %v8510_v33 }
 0x248   : > { %8513 = vmatpush3.bf16.msra.mxu0 %v8510_v33  ;;  %v10602_v33 = vld [vmem:[%s10572_s17 + $0x18] sm:$0xff] }
 0x24a   : > { %2089 = vrot.lane.b32.xlu1 %v862_v26, %s12777_s13  ;;  %v10502_v26 = vld [vmem:[%s10473_s9 + $0x18] sm:$0xff] }
 0x24e   : > { %2093 = vrot.lane.b32.xlu1 %v864_v48, %s12777_s13 }
 0x252   : > { %2095 = vrot.lane.b32.xlu1 %v865_v59, %s12777_s13 }
 0x256   : > { %2099 = vrot.lane.b32.xlu1 %v867_v63, %s12777_s13 }
 0x25a   : > { %2101 = vrot.lane.b32.xlu1 %v868_v2, %s12777_s13 }
 0x25e   : > { %2103 = vrot.lane.b32.xlu1 %v869_v4, %s12777_s13  ;;  %v10548_v4 = vld [vmem:[%s10473_s9 + $0x58] sm:$0xff] }
 0x262   : > { %2105 = vrot.lane.b32.xlu1 %v870_v6, %s12777_s13 }
 0x266   : > { %2107 = vrot.lane.b32.xlu1 %v871_v7, %s12777_s13 }
 0x26a   : > { %2109 = vrot.lane.b32.xlu1 %v872_v9, %s12777_s13  ;;  %v10560_v9 = vld [vmem:[%s10473_s9 + $0x68] sm:$0xff] }
 0x26e   : > { %2111 = vrot.lane.b32.xlu1 %v873_v12, %s12777_s13 }
 0x272   : > { %2115 = vrot.lane.b32.xlu1 %v891_v13, %s12777_s13 }
 0x276   : > { %2117 = vrot.lane.b32.xlu1 %v892_v14, %s12777_s13  ;;  %v10566_v14 = vld [vmem:[%s10473_s9 + $0x78] sm:$0xff] }
 0x27a   : > { %2119 = vrot.lane.b32.xlu1 %v893_v15, %s12777_s13  ;;  %v10575_v15 = vld [vmem:[%s10473_s9 + $0x70] sm:$0xff] }
 0x27e   : > { %2121 = vrot.lane.b32.xlu1 %v894_v17, %s12777_s13 }
 0x282   : > { %2123 = vrot.lane.b32.xlu1 %v895_v18, %s12777_s13 }
 0x286   : > { %2125 = vrot.lane.b32.xlu1 %v896_v19, %s12777_s13 }
 0x28a   : > { %2129 = vrot.lane.b32.xlu1 %v898_v20, %s12777_s13  ;;  %v10583_v20 = vld [vmem:[%s10572_s17] sm:$0xff] }
 0x28e   : > { %2133 = vrot.lane.b32.xlu1 %v900_v28, %s12777_s13 }
 0x2f2   : > { %v7878_v16 = vpop.f32.mrb[16].mxu0 }
 0x2f3   : > { %v7916_v34 = vpop.f32.mrb[16].mxu1  ;;  %v7879_v35 = vpop.f32.mrb[17].mxu0 }
 0x2f4   : > { %v7880_v36 = vadd.f32 %v7879_v35, %v7878_v16  ;;  %v7917_v37 = vpop.f32.mrb[17].mxu1  ;;  %v2216_v16 = vld [vmem:[%s12897_s22 + $0x28] sm:$0xff]  ;;  %v10476_v35 = vld [vmem:[%s10473_s9] sm:$0xff] }
 0x2f5   : > { %v7918_v38 = vadd.f32 %v7917_v37, %v7916_v34  ;;  %v8514_v34 = vpack.c.bf16 %v2216_v16, %v2215_v11  ;;  %v2217_v37 = vld [vmem:[%s12897_s22 + $0x30] sm:$0xff]  ;;  %v2219_v16 = vlaneseq }
 0x2f6   : > { %v7881_v39 = vpop.f32.mrb[18].mxu0 }
 0x2f7   : > { %v1887_v40 = vadd.f32 %v7918_v38, %v7880_v36  ;;  %v7919_v41 = vpop.f32.mrb[18].mxu1  ;;  %v7882_v42 = vpop.f32.mrb[19].mxu0  ;;  %8515 = vmatprep.subr.bf16.mxu0 %v8514_v34  ;;  %v2218_v38 = vld [vmem:[%s12897_s22 + $0x38] sm:$0xff] }
 0x2f8   : > { %v7883_v24 = vadd.f32 %v7882_v42, %v7881_v39  ;;  %v7920_v43 = vpop.f32.mrb[19].mxu1  ;;  %8517 = vmatpush3.bf16.msra.mxu0 %v8514_v34  ;;  %v2084_v36 = vpop.permute.xlu1 %2083  ;;  %v10491_v42 = vld [vmem:[%s10473_s9 + $0x8] sm:$0xff]  ;;  %v9268_v34 = vmov 1966171168  }
 0x2f9   : > { %v7921_v44 = vadd.f32 %v7920_v43, %v7919_v41  ;;  %v2179_v39 = vsel %vm940_vm0, %v10476_v35, %v2084_v36  ;;  %v10488_v41 = vld [vmem:[%s10473_s9 + $0x10] sm:$0xff]  ;;  %v2692_v36 = vunpack.c.l.s4 %v9268_v34 }
 0x2fa   : > { %8130 = vmatprep.mubr.msk.f32.mxu0 %vm2223_vm1, %v2179_v39 }
 0x2fb   : > { %v1892_v45 = vadd.f32 %v7921_v44, %v7883_v24  ;;  %v2693_v39 = vunpack.c.0.s8 %v2692_v36 }
 0x2fc   : > { %v2088_v24 = vpop.permute.xlu1 %2087 }
 0x2fd   : > { %v2181_v44 = vsel %vm940_vm0, %v10488_v41, %v2088_v24 }
 0x312   : > { %v7954_v25 = vpop.f32.mrb[20].mxu0 }
 0x313   : > { %v7992_v47 = vpop.f32.mrb[20].mxu1  ;;  %v7955_v27 = vpop.f32.mrb[21].mxu0 }
 0x314   : > { %v7956_v49 = vadd.f32 %v7955_v27, %v7954_v25  ;;  %v7993_v50 = vpop.f32.mrb[21].mxu1  ;;  %v2090_v25 = vpop.permute.xlu1 %2089 }
 0x315   : > { %v7994_v51 = vadd.f32 %v7993_v50, %v7992_v47  ;;  %v2182_v27 = vsel %vm940_vm0, %v10502_v26, %v2090_v25 }
 0x316   : > { %v1962_v52 = vadd.f32 %v7956_v49, %v1887_v40  ;;  %v7957_v53 = vpop.f32.mrb[22].mxu0  ;;  %v8518_v40 = vpack.c.bf16 %v2218_v38, %v2217_v37  ;;  %v10511_v49 = vld [vmem:[%s10473_s9 + $0x28] sm:$0xff]  ;;  %v10608_v38 = vshrl.u32 %v2219_v16, 7 }
 0x317   : > { %v7995_v54 = vpop.f32.mrb[22].mxu1  ;;  %v7958_v55 = vpop.f32.mrb[23].mxu0 }
 0x318   : > { %v7959_v56 = vadd.f32 %v7958_v55, %v7957_v53  ;;  %v7996_v57 = vpop.f32.mrb[23].mxu1  ;;  %v2037_v58 = vadd.f32 %v7994_v51, %v1962_v52  ;;  %8519 = vmatprep.subr.bf16.mxu0 %v8518_v40  ;;  %v2094_v50 = vpop.permute.xlu1 %2093  ;;  %v10517_v53 = vld [vmem:[%s10473_s9 + $0x38] sm:$0xff] }
 0x319   : > { %v7997_v60 = vadd.f32 %v7996_v57, %v7995_v54  ;;  %8521 = vmatpush3.bf16.msra.mxu0 %v8518_v40  ;;  %v2184_v51 = vsel %vm940_vm0, %v10511_v49, %v2094_v50  ;;  %v10521_v54 = vld [vmem:[%s10473_s9 + $0x30] sm:$0xff]  ;;  %v10611_v40 = vld [vmem:[%s10572_s17 + $0x20] sm:$0xff]  ;;  %v10629_v50 = vld [vmem:[%s10572_s17 + $0x38] sm:$0xff] }
 0x31a   : > { %v1967_v61 = vadd.f32 %v7959_v56, %v1892_v45  ;;  %2047 = vrot.lane.b32.xlu0 %v2037_v58, %s9267_s23  ;;  %8186 = vmatprep.mubr.msk.f32.mxu1 %vm940_vm0, %v2037_v58  ;;  %v10530_v58 = vld [vmem:[%s10473_s9 + $0x40] sm:$0xff] }
 0x31c   : > { %v2042_v62 = vadd.f32 %v7997_v60, %v1967_v61  ;;  %v2096_v55 = vpop.permute.xlu1 %2095  ;;  %v10536_v61 = vld [vmem:[%s10473_s9 + $0x48] sm:$0xff] }
 0x31d   : > { %v2185_v57 = vsel %vm940_vm0, %v10521_v54, %v2096_v55 }
 0x31e   : > { %2049 = vrot.lane.b32.xlu0 %v2042_v62, %s9267_s23  ;;  %8187 = vmatmul.mubr.msk.f32.vlgmr.msra.gmra.mrb[24].mxu1 %vm940_vm0, %v2042_v62  ;;  %s7524_s23 = sshll.u32 %s811_s10, 4  ;;  %s12696_s23 = int_to_ptr.vmem [resolvable:$true] %s7524_s23 }
 0x31f   : > { %s9167_s25 = scalar_lea.vmem %s12696_s23, 256 }
 0x320   : > { %v2100_v59 = vpop.permute.xlu1 %2099  ;;  %p9168_p10 = scmp.ne.s32.totalorder %s12696_s23, %s9167_s25 }
 0x321   : > { %v2187_v60 = vsel %vm940_vm0, %v10530_v58, %v2100_v59 }
 0x322   : > { %2085 = vrot.lane.b32.xlu0 %v860_v1, %s12777_s13  ;;  %v10542_v1 = vld [vmem:[%s10473_s9 + $0x50] sm:$0xff]  ;;  %p9169_p7 = pnand %p9168_p10, %p13083_p5 }
 0x324   : > { %v2102_v62 = vpop.permute.xlu1 %2101  ;;  %p9170_p9 = pneg %p9169_p7 }
 0x325   : > { %v2188_v63 = vsel %vm940_vm0, %v10536_v61, %v2102_v62 }
 0x326   : > { %2091 = vrot.lane.b32.xlu0 %v863_v3, %s12777_s13 }
 0x328   : > { %v2104_v2 = vpop.permute.xlu1 %2103 }
 0x329   : > { %v2189_v3 = vsel %vm940_vm0, %v10542_v1, %v2104_v2 }
 0x32a   : > { %2097 = vrot.lane.b32.xlu0 %v866_v5, %s12777_s13 }
 0x32c   : > { %v2106_v5 = vpop.permute.xlu1 %2105 }
 0x32d   : > { %v2190_v6 = vsel %vm940_vm0, %v10548_v4, %v2106_v5 }
 0x32e   : > { %2113 = vrot.lane.b32.xlu0 %v874_v0, %s12777_s13  ;;  %v10554_v0 = vld [vmem:[%s10473_s9 + $0x60] sm:$0xff]  ;;  %s12931_s9 = sld [smem:[#allocation80_spill]] }
 0x330   : > { %v2108_v7 = vpop.permute.xlu1 %2107 }
 0x332   : > { %2127 = vrot.lane.b32.xlu0 %v897_v8, %s12777_s13  ;;  %v2191_v8 = vsel %vm940_vm0, %v10554_v0, %v2108_v7  ;;  %v10644_v7 = vld [vmem:[%s10572_s17 + $0x40] sm:$0xff] }
 0x336   : > { %2131 = vrot.lane.b32.xlu0 %v899_v10, %s12777_s13  ;;  %v2110_v10 = vpop.permute.xlu1 %2109 }
 0x337   : > { %v2192_v12 = vsel %vm940_vm0, %v10560_v9, %v2110_v10 }
 0x33a   : > { %v2112_v17 = vpop.permute.xlu1 %2111 }
 0x33b   : > { %v2193_v19 = vsel %vm940_vm0, %v10575_v15, %v2112_v17 }
 0x33e   : > { %v2116_v28 = vpop.permute.xlu1 %2115 }
 0x342   : > { %v2118_v22 = vpop.permute.xlu1 %2117 }
 0x346   : > { %v2120_v23 = vpop.permute.xlu1 %2119 }
 0x347   : > { %v2197_v32 = vsel %vm940_vm0, %v10596_v31, %v2120_v23 }
 0x34a   : > { %v2122_v11 = vpop.permute.xlu1 %2121 }
 0x34b   : > { %v2198_v37 = vsel %vm940_vm0, %v10602_v33, %v2122_v11 }
 0x34e   : > { %v2124_v24 = vpop.permute.xlu1 %2123 }
 0x352   : > { %v2126_v25 = vpop.permute.xlu1 %2125 }
 0x356   : > { %v2130_v59 = vpop.permute.xlu1 %2129 }
 0x38c   : > { %v2048_v29 = vpop.permute.xlu0 %2047 }
 0x38d   : > { %8189 = vmatprep.mubr.msk.f32.mxu1 %vm940_vm0, %v2048_v29  ;;  %v2195_v29 = vsel %vm940_vm0, %v10583_v20, %v2116_v28 }
 0x390   : > { %v2050_v30 = vpop.permute.xlu0 %2049 }
 0x391   : > { %8190 = vmatmul.mubr.msk.f32.gmra.mrb[26].mxu1 %vm940_vm0, %v2050_v30  ;;  %v10590_v30 = vld [vmem:[%s10572_s17 + $0x8] sm:$0xff] }
 0x392   : > { %v2196_v21 = vsel %vm940_vm0, %v10590_v30, %v2118_v22 }
 0x394   : > { %v2086_v43 = vpop.permute.xlu0 %2085 }
 0x395   : > { %v2180_v45 = vsel %vm940_vm0, %v10491_v42, %v2086_v43  ;;  %v2199_v43 = vsel %vm940_vm0, %v10611_v40, %v2124_v24 }
 0x396   : > { %8131 = vmatmul.mubr.msk.f32.vlgmr.msra.gmra.mrb[24].mxu0 %vm2223_vm1, %v2180_v45  ;;  %v10620_v45 = vsub.s32 %v2693_v39, %v10608_v38 }
 0x397   : > { %8133 = vmatprep.mubr.msk.f32.mxu0 %vm2223_vm1, %v2181_v44  ;;  %v10617_v44 = vld [vmem:[%s10572_s17 + $0x28] sm:$0xff] }
 0x398   : > { %v2092_v47 = vpop.permute.xlu0 %2091  ;;  %12900 = vst [vmem:[#allocation24_spill] sm:$0xff] %v10620_v45 }
 0x399   : > { %v2183_v48 = vsel %vm940_vm0, %v10499_v46, %v2092_v47  ;;  %v2200_v47 = vsel %vm940_vm0, %v10617_v44, %v2126_v25 }
 0x39a   : > { %8134 = vmatmul.mubr.msk.f32.gmra.mrb[26].mxu0 %vm2223_vm1, %v2182_v27  ;;  %v10626_v27 = vld [vmem:[%s10572_s17 + $0x30] sm:$0xff] }
 0x39b   : > { %8136 = vmatprep.mubr.msk.f32.mxu0 %vm2223_vm1, %v2183_v48 }
 0x39c   : > { %v2098_v52 = vpop.permute.xlu0 %2097 }
 0x39d   : > { %v2186_v56 = vsel %vm940_vm0, %v10517_v53, %v2098_v52 }
 0x39e   : > { %8137 = vmatmul.mubr.msk.f32.gmra.mrb[28].mxu0 %vm2223_vm1, %v2184_v51 }
 0x39f   : > { %8139 = vmatprep.mubr.msk.f32.mxu0 %vm2223_vm1, %v2185_v57 }
 0x3a0   : > { %v2114_v13 = vpop.permute.xlu0 %2113 }
 0x3a1   : > { %v2194_v18 = vsel %vm940_vm0, %v10566_v14, %v2114_v13 }
 0x3a2   : > { %8140 = vmatmul.mubr.msk.f32.gmra.mrb[30].mxu0 %vm2223_vm1, %v2186_v56 }
 0x3a3   : > { %8142 = vmatprep.mubr.msk.f32.mxu0 %vm2223_vm1, %v2187_v60 }
 0x3a4   : > { %v2128_v48 = vpop.permute.xlu0 %2127 }
 0x3a5   : > { %v2201_v52 = vsel %vm940_vm0, %v10626_v27, %v2128_v48 }
 0x3a6   : > { %8143 = vmatmul.mubr.msk.f32.gmra.mrb[32].mxu0 %vm2223_vm1, %v2188_v63  ;;  %v2202_v63 = vsel %vm940_vm0, %v10629_v50, %v2130_v59  ;;  %v10675_v59 = vld [vmem:[%s10572_s17 + $0x48] sm:$0xff] }
 0x3a7   : > { %8145 = vmatprep.mubr.msk.f32.mxu0 %vm2223_vm1, %v2189_v3 }
 0x3aa   : > { %8146 = vmatmul.mubr.msk.f32.gmra.mrb[34].mxu0 %vm2223_vm1, %v2190_v6  ;;  %v10641_v6 = vsub.s32 0, %v10608_v38 }
 0x3ab   : > { %8148 = vmatprep.mubr.msk.f32.mxu0 %vm2223_vm1, %v2191_v8  ;;  %v2132_v8 = vpop.permute.xlu0 %2131 }
 0x3ac   : > { %v2203_v13 = vsel %vm940_vm0, %v10644_v7, %v2132_v8 }
 0x3ae   : > { %8149 = vmatmul.mubr.msk.f32.gmra.mrb[36].mxu0 %vm2223_vm1, %v2192_v12 }
 0x3af   : > { %8151 = vmatprep.mubr.msk.f32.mxu0 %vm2223_vm1, %v2193_v19 }
 0x3b2   : > { %8152 = vmatmul.mubr.msk.f32.gmra.mrb[38].mxu0 %vm2223_vm1, %v2194_v18 }
 0x3b3   : > { %8154 = vmatprep.mubr.msk.f32.mxu0 %vm2223_vm1, %v2195_v29 }
 0x3b6   : > { %8155 = vmatmul.mubr.msk.f32.gmra.mrb[40].mxu0 %vm2223_vm1, %v2196_v21 }
 0x3b7   : > { %8157 = vmatprep.mubr.msk.f32.mxu0 %vm2223_vm1, %v2197_v32 }
 0x3ba   : > { %8158 = vmatmul.mubr.msk.f32.gmra.mrb[42].mxu0 %vm2223_vm1, %v2198_v37 }
 0x3bb   : > { %8160 = vmatprep.mubr.msk.f32.mxu0 %vm2223_vm1, %v2199_v43 }
 0x3be   : > { %8161 = vmatmul.mubr.msk.f32.gmra.mrb[44].mxu0 %vm2223_vm1, %v2200_v47 }
 0x3bf   : > { %8163 = vmatprep.mubr.msk.f32.mxu0 %vm2223_vm1, %v2201_v52 }
 0x3c2   : > { %8164 = vmatmul.mubr.msk.f32.gmra.mrb[46].mxu0 %vm2223_vm1, %v2202_v63 }
 0x3c3   : > { %8166 = vmatprep.mubr.msk.f32.mxu0 %vm2223_vm1, %v2203_v13 }
 0x3f1   : > { %v8188_v51 = vpop.f32.mrb[24].mxu1 }
 0x3f2   : > { %v2739_v55 = vcombine.high %v8188_v51, %v8188_v51  ;;  %v2746_v56 = vrot.slane %v8188_v51, %v10620_v45  ;;  %v2667_v57 = vpop.f32.mrb[25].mxu1 }
 0x3f3   : > { %v2690_v60 = vcombine.high %v2667_v57, %v2667_v57  ;;  %v2697_v62 = vrot.slane %v2667_v57, %v10620_v45 }
 0x3f4   : > { %v2753_v2 = vrot.slane %v2739_v55, %v10620_v45  ;;  %v2754_v3 = vcombine.high %v2746_v56, %v2746_v56  ;;  %v2762_v5 = vrot.slane %v2746_v56, %v10620_v45  ;;  %v2134_v56 = vpop.permute.xlu1 %2133 }
 0x3f5   : > { %v10648_v10 = vrot.slane %v2690_v60, %v10620_v45  ;;  %v2713_v12 = vrot.slane %v2697_v62, %v10620_v45 }
 0x3f6   : > { %v2769_v17 = vrot.slane %v2753_v2, %v10620_v45  ;;  %v2776_v18 = vrot.slane %v2754_v3, %v10620_v45  ;;  %v2784_v19 = vcombine.high %v2762_v5, %v2762_v5  ;;  %v2921_v22 = vrot.slane %v2762_v5, %v10641_v6 }
 0x3f7   : > { %v2720_v28 = vrot.slane %v10648_v10, %v10620_v45  ;;  %v2735_v29 = vcombine.high %v2713_v12, %v2713_v12  ;;  %v2889_v21 = vrot.slane %v2713_v12, %v10641_v6  ;;  %v2755_v43 = vcombine.high %v2753_v2, %v2753_v2 }
 0x3f8   : > { %v2785_v23 = vcombine.high %v2769_v17, %v2769_v17  ;;  %v2925_v32 = vrot.slane %v2776_v18, %v10641_v6  ;;  %v2929_v36 = vrot.slane %v2784_v19, %v10641_v6  ;;  %v3054_v37 = vmul.f32 %v2921_v22, %v10530_v58 }
 0x3f9   : > { %v2897_v11 = vrot.slane %v2735_v29, %v10641_v6  ;;  %v2736_v34 = vcombine.high %v2720_v28, %v2720_v28  ;;  %v3046_v51 = vmul.f32 %v2889_v21, %v10476_v35  ;;  %v2786_v57 = vcombine.high %v2776_v18, %v2776_v18 }
 0x3fa   : > { %v2945_v39 = vrot.slane %v2785_v23, %v10641_v6  ;;  %v3055_v24 = vmul.f32 %v2925_v32, %v10536_v61  ;;  %v3056_v47 = vmul.f32 %v2929_v36, %v10542_v1  ;;  %v3102_v48 = vsel %vm940_vm0, %v3054_v37, 0.0 }
 0x3fb   : > { %v3048_v25 = vmul.f32 %v2897_v11, %v10488_v41  ;;  %3103 = vadd.xlane.f32.xlu1 %v3102_v48  ;;  %v2913_v58 = vrot.slane %v2736_v34, %v10641_v6  ;;  %v2783_v61 = vrot.slane %v2755_v43, %v10620_v45  ;;  %v2705_v41 = vcombine.high %v2697_v62, %v2697_v62 }
 0x3fc   : > { %v3060_v55 = vmul.f32 %v2945_v39, %v10575_v15  ;;  %v3078_v1 = vsel %vm940_vm0, %v3046_v51, 0.0  ;;  %v2933_v60 = vrot.slane %v2786_v57, %v10641_v6  ;;  %v2204_v35 = vsel %vm940_vm0, %v10675_v59, %v2134_v56 }
 0x3fd   : > { %v3084_v52 = vsel %vm940_vm0, %v3048_v25, 0.0  ;;  %v3052_v63 = vmul.f32 %v2913_v58, %v10521_v54  ;;  %v2941_v2 = vrot.slane %v2783_v61, %v10641_v6  ;;  %8167 = vmatmul.mubr.msk.f32.gmra.mrb[48].mxu0 %vm2223_vm1, %v2204_v35  ;;  %v2727_v5 = vrot.slane %v2705_v41, %v10620_v45 }
 0x3fe   : > { %3085 = vadd.xlane.f32.xlu0 %v3084_v52  ;;  %v3120_v15 = vsel %vm940_vm0, %v3060_v55, 0.0  ;;  %v3057_v3 = vmul.f32 %v2933_v60, %v10548_v4  ;;  %v3105_v8 = vsel %vm940_vm0, %v3055_v24, 0.0  ;;  %v2937_v12 = vrot.slane %v2769_v17, %v10641_v6 }
 0x3ff   : > { %3079 = vadd.xlane.f32.xlu1 %v3078_v1  ;;  %v3059_v62 = vmul.f32 %v2941_v2, %v10560_v9  ;;  %v3096_v13 = vsel %vm940_vm0, %v3052_v63, 0.0  ;;  %v3108_v54 = vsel %vm940_vm0, %v3056_v47, 0.0  ;;  %v2893_v4 = vrot.slane %v2727_v5, %v10641_v6 }
 0x400   : > { %v3058_v18 = vmul.f32 %v2937_v12, %v10554_v0  ;;  %v2905_v29 = vrot.slane %v2720_v28, %v10641_v6  ;;  %v2706_v21 = vcombine.high %v10648_v10, %v10648_v10  ;;  %v2737_v23 = vcombine.high %v2727_v5, %v2727_v5 }
 0x401   : > { %v3047_v9 = vmul.f32 %v2893_v4, %v10491_v42  ;;  %v3111_v32 = vsel %vm940_vm0, %v3057_v3, 0.0  ;;  %v3117_v28 = vsel %vm940_vm0, %v3059_v62, 0.0  ;;  %v2787_v36 = vcombine.high %v2783_v61, %v2783_v61 }
 0x402   : > { %3121 = vadd.xlane.f32.xlu0 %v3120_v15  ;;  %v3114_v19 = vsel %vm940_vm0, %v3058_v18, 0.0  ;;  %v3050_v22 = vmul.f32 %v2905_v29, %v10499_v46  ;;  %v2901_v11 = vrot.slane %v2737_v23, %v10641_v6  ;;  %v2734_v42 = vrot.slane %v2706_v21, %v10620_v45  ;;  %v10742_v23 = vld [vmem:[%s10572_s17 + $0x50] sm:$0xff] }
 0x403   : > { %3106 = vadd.xlane.f32.xlu1 %v3105_v8  ;;  %v3081_v17 = vsel %vm940_vm0, %v3047_v9, 0.0  ;;  %v2949_v39 = vrot.slane %v2787_v36, %v10641_v6  ;;  %v10730_v8 = vld [vmem:[%s10572_s17 + $0x60] sm:$0xff] }
 0x404   : > { %v3090_v0 = vsel %vm940_vm0, %v3050_v22, 0.0  ;;  %v3049_v34 = vmul.f32 %v2901_v11, %v10502_v26  ;;  %v2909_v46 = vrot.slane %v2734_v42, %v10641_v6  ;;  %v2738_v24 = vcombine.high %v2734_v42, %v2734_v42 }
 0x405   : > { %v3061_v25 = vmul.f32 %v2949_v39, %v10566_v14 }
 0x406   : > { %3097 = vadd.xlane.f32.xlu0 %v3096_v13  ;;  %v3087_v10 = vsel %vm940_vm0, %v3049_v34, 0.0  ;;  %v3051_v37 = vmul.f32 %v2909_v46, %v10511_v49  ;;  %v2917_v47 = vrot.slane %v2738_v24, %v10641_v6  ;;  %v10752_v46 = vld [vmem:[%s10572_s17 + $0x58] sm:$0xff] }
 0x407   : > { %3109 = vadd.xlane.f32.xlu1 %v3108_v54  ;;  %v3123_v26 = vsel %vm940_vm0, %v3061_v25, 0.0 }
 0x408   : > { %v3093_v43 = vsel %vm940_vm0, %v3051_v37, 0.0  ;;  %v3053_v48 = vmul.f32 %v2917_v47, %v10517_v53 }
 0x40a   : > { %v3099_v51 = vsel %vm940_vm0, %v3053_v48, 0.0 }
 0x40b   : > { %3115 = vadd.xlane.f32.xlu1 %v3114_v19 }
 0x40f   : > { %3082 = vadd.xlane.f32.xlu1 %v3081_v17 }
 0x413   : > { %3091 = vadd.xlane.f32.xlu1 %v3090_v0 }
 0x417   : > { %3112 = vadd.xlane.f32.xlu1 %v3111_v32 }
 0x41b   : > { %3118 = vadd.xlane.f32.xlu1 %v3117_v28 }
 0x41f   : > { %3088 = vadd.xlane.f32.xlu1 %v3087_v10 }
 0x423   : > { %3094 = vadd.xlane.f32.xlu1 %v3093_v43 }
 0x427   : > { %3124 = vadd.xlane.f32.xlu1 %v3123_v26  ;;  %v10763_v26 = vld [vmem:[%s10572_s17 + $0x68] sm:$0xff] }
 0x42b   : > { %3100 = vadd.xlane.f32.xlu1 %v3099_v51 }
 0x464   : > { %v8191_v49 = vpop.f32.mrb[26].mxu1 }
 0x465   : > { %v2837_v52 = vcombine.high %v8191_v49, %v8191_v49  ;;  %v2844_v55 = vrot.slane %v8191_v49, %v10620_v45  ;;  %v2677_v58 = vpop.f32.mrb[27].mxu1 }
 0x466   : > { %v2795_v56 = vrot.slane %v2677_v58, %v10620_v45  ;;  %v2788_v35 = vcombine.high %v2677_v58, %v2677_v58 }
 0x467   : > { %v2851_v14 = vrot.slane %v2837_v52, %v10620_v45  ;;  %v2852_v57 = vcombine.high %v2844_v55, %v2844_v55  ;;  %v2860_v61 = vrot.slane %v2844_v55, %v10620_v45 }
 0x468   : > { %v2803_v41 = vcombine.high %v2795_v56, %v2795_v56  ;;  %v2811_v53 = vrot.slane %v2795_v56, %v10620_v45  ;;  %v2802_v13 = vrot.slane %v2788_v35, %v10620_v45 }
 0x469   : > { %v2867_v1 = vrot.slane %v2851_v14, %v10620_v45  ;;  %v2874_v60 = vrot.slane %v2852_v57, %v10620_v45  ;;  %v2882_v15 = vcombine.high %v2860_v61, %v2860_v61  ;;  %v2985_v2 = vrot.slane %v2860_v61, %v10641_v6 }
 0x46a   : > { %v2825_v63 = vrot.slane %v2803_v41, %v10620_v45  ;;  %v2953_v3 = vrot.slane %v2811_v53, %v10641_v6  ;;  %v2853_v12 = vcombine.high %v2851_v14, %v2851_v14  ;;  %v2833_v4 = vcombine.high %v2811_v53, %v2811_v53  ;;  %v10772_v14 = vld [vmem:[%s10572_s17 + $0x70] sm:$0xff] }
 0x46b   : > { %v3001_v62 = vrot.slane %v2867_v1, %v10641_v6  ;;  %v2989_v5 = vrot.slane %v2874_v60, %v10641_v6  ;;  %v3070_v54 = vmul.f32 %v2985_v2, %v10644_v7  ;;  %v2993_v9 = vrot.slane %v2882_v15, %v10641_v6 }
 0x46c   : > { %v3062_v18 = vmul.f32 %v2953_v3, %v10583_v20  ;;  %v2957_v19 = vrot.slane %v2825_v63, %v10641_v6  ;;  %v2884_v29 = vcombine.high %v2874_v60, %v2874_v60  ;;  %v2804_v20 = vcombine.high %v2802_v13, %v2802_v13 }
 0x46d   : > { %v3150_v17 = vsel %vm940_vm0, %v3070_v54, 0.0  ;;  %v3074_v21 = vmul.f32 %v3001_v62, %v10730_v8  ;;  %v3071_v0 = vmul.f32 %v2989_v5, %v10675_v59  ;;  %v3072_v32 = vmul.f32 %v2993_v9, %v10742_v23  ;;  %v10786_v5 = vld [vmem:[%s10572_s17 + $0x78] sm:$0xff] }
 0x46e   : > { %v3126_v22 = vsel %vm940_vm0, %v3062_v18, 0.0  ;;  %3151 = vadd.xlane.f32.xlu1 %v3150_v17  ;;  %v3063_v7 = vmul.f32 %v2957_v19, %v10590_v30  ;;  %v2997_v11 = vrot.slane %v2884_v29, %v10641_v6  ;;  %v2961_v42 = vrot.slane %v2833_v4, %v10641_v6 }
 0x46f   : > { %3127 = vadd.xlane.f32.xlu0 %v3126_v22  ;;  %v2818_v28 = vrot.slane %v2802_v13, %v10620_v45  ;;  %v3162_v34 = vsel %vm940_vm0, %v3074_v21, 0.0  ;;  %v3153_v59 = vsel %vm940_vm0, %v3071_v0, 0.0  ;;  %v2881_v36 = vrot.slane %v2853_v12, %v10620_v45  ;;  %v10788_v12 = vpop.f32.mrb[24].mxu0 }
 0x470   : > { %v3129_v30 = vsel %vm940_vm0, %v3063_v7, 0.0  ;;  %v3156_v10 = vsel %vm940_vm0, %v3072_v32, 0.0  ;;  %v3073_v37 = vmul.f32 %v2997_v11, %v10752_v46  ;;  %v3064_v39 = vmul.f32 %v2961_v42, %v10596_v31  ;;  %12901 = vst [vmem:[#allocation25_spill] sm:$0xff] %v10788_v12  ;;  %v10794_v54 = vpop.f32.mrb[25].mxu0  ;;  %v902_v11 = vld [vmem:[%s10421_s16 + $0x58] sm:$0xff] }
 0x471   : > { %v3005_v24 = vrot.slane %v2881_v36, %v10641_v6  ;;  %v2969_v43 = vrot.slane %v2818_v28, %v10641_v6  ;;  %v2883_v25 = vcombine.high %v2867_v1, %v2867_v1  ;;  %v2832_v47 = vrot.slane %v2804_v20, %v10620_v45  ;;  %12902 = vst [vmem:[#allocation26_spill] sm:$0xff] %v10794_v54  ;;  %v10796_v18 = vpop.f32.mrb[26].mxu0 }
 0x472   : > { %3163 = vadd.xlane.f32.xlu1 %v3162_v34  ;;  %v3159_v48 = vsel %vm940_vm0, %v3073_v37, 0.0  ;;  %v3132_v51 = vsel %vm940_vm0, %v3064_v39, 0.0  ;;  %v2835_v49 = vcombine.high %v2825_v63, %v2825_v63  ;;  %v2834_v52 = vcombine.high %v2818_v28, %v2818_v28  ;;  %12903 = vst [vmem:[#allocation27_spill] sm:$0xff] %v10796_v18  ;;  %v10800_v19 = vpop.f32.mrb[27].mxu0  ;;  %v901_v37 = vld [vmem:[%s10421_s16 + $0x50] sm:$0xff] }
 0x473   : > { %3154 = vadd.xlane.f32.xlu0 %v3153_v59  ;;  %v3075_v31 = vmul.f32 %v3005_v24, %v10763_v26  ;;  %v3066_v55 = vmul.f32 %v2969_v43, %v10611_v40  ;;  %v3009_v58 = vrot.slane %v2883_v25, %v10641_v6  ;;  %v2973_v56 = vrot.slane %v2832_v47, %v10641_v6  ;;  %v10804_v17 = vpop.f32.mrb[28].mxu0 }
 0x474   : > { %v2965_v57 = vrot.slane %v2835_v49, %v10641_v6  ;;  %v2977_v61 = vrot.slane %v2834_v52, %v10641_v6  ;;  %v2885_v41 = vcombine.high %v2881_v36, %v2881_v36  ;;  %v2836_v62 = vcombine.high %v2832_v47, %v2832_v47  ;;  %12904 = vst [vmem:[#allocation28_spill] sm:$0xff] %v10800_v19  ;;  %v10806_v22 = vpop.f32.mrb[29].mxu0 }
 0x475   : > { %v3165_v53 = vsel %vm940_vm0, %v3075_v31, 0.0  ;;  %v3138_v1 = vsel %vm940_vm0, %v3066_v55, 0.0  ;;  %v3076_v40 = vmul.f32 %v3009_v58, %v10772_v14  ;;  %v3067_v60 = vmul.f32 %v2973_v56, %v10617_v44  ;;  %12905 = vst [vmem:[#allocation29_spill] sm:$0xff] %v10804_v17  ;;  %12906 = vst [vmem:[#allocation30_spill] sm:$0xff] %v10806_v22  ;;  %v10813_v7 = vpop.f32.mrb[30].mxu0 }
 0x476   : > { %3130 = vadd.xlane.f32.xlu1 %v3129_v30  ;;  %v3065_v35 = vmul.f32 %v2965_v57, %v10602_v33  ;;  %v3068_v15 = vmul.f32 %v2977_v61, %v10626_v27  ;;  %v3013_v3 = vrot.slane %v2885_v41, %v10641_v6  ;;  %v2981_v27 = vrot.slane %v2836_v62, %v10641_v6  ;;  %v10818_v42 = vpop.f32.mrb[31].mxu0 }
 0x477   : > { %3157 = vadd.xlane.f32.xlu0 %v3156_v10  ;;  %v3168_v63 = vsel %vm940_vm0, %v3076_v40, 0.0  ;;  %v3141_v2 = vsel %vm940_vm0, %v3067_v60, 0.0  ;;  %12907 = vst [vmem:[#allocation31_spill] sm:$0xff] %v10813_v7  ;;  %12908 = vst [vmem:[#allocation32_spill] sm:$0xff] %v10818_v42  ;;  %v3207_v39 = vand.u32 127, %v2219_v16  ;;  %v11056_v18 = vsub.s32 5, %v10608_v38 }
 0x478   : > { %v3135_v44 = vsel %vm940_vm0, %v3065_v35, 0.0  ;;  %v3144_v13 = vsel %vm940_vm0, %v3068_v15, 0.0  ;;  %v3077_v33 = vmul.f32 %v3013_v3, %v10786_v5  ;;  %v3069_v29 = vmul.f32 %v2981_v27, %v10629_v50 }
 0x479   : > { %v10821_v50 = vpop.f32.mrb[32].mxu0  ;;  %v10845_v47 = vsub.s32 %v3207_v39, %v10608_v38 }
 0x47a   : > { %3160 = vadd.xlane.f32.xlu1 %v3159_v48  ;;  %v3171_v9 = vsel %vm940_vm0, %v3077_v33, 0.0  ;;  %v3147_v0 = vsel %vm940_vm0, %v3069_v29, 0.0  ;;  %12910 = vst [vmem:[#allocation33_spill] sm:$0xff] %v10821_v50  ;;  %v10825_v34 = vpop.f32.mrb[33].mxu0 }
 0x47b   : > { %3133 = vadd.xlane.f32.xlu0 %v3132_v51 }
 0x47d   : > { %v10829_v36 = vpop.f32.mrb[34].mxu0 }
 0x47e   : > { %3166 = vadd.xlane.f32.xlu1 %v3165_v53  ;;  %12911 = vst [vmem:[#allocation34_spill] sm:$0xff] %v10829_v36  ;;  %v10831_v30 = vpop.f32.mrb[35].mxu0 }
 0x47f   : > { %3139 = vadd.xlane.f32.xlu0 %v3138_v1  ;;  %12912 = vst [vmem:[#allocation35_spill] sm:$0xff] %v10831_v30 }
 0x481   : > { %v10840_v43 = vpop.f32.mrb[36].mxu0 }
 0x482   : > { %3169 = vadd.xlane.f32.xlu1 %v3168_v63  ;;  %12913 = vst [vmem:[#allocation36_spill] sm:$0xff] %v10840_v43  ;;  %v10842_v25 = vpop.f32.mrb[37].mxu0 }
 0x483   : > { %3142 = vadd.xlane.f32.xlu0 %v3141_v2  ;;  %12914 = vst [vmem:[#allocation37_spill] sm:$0xff] %v10842_v25 }
 0x485   : > { %v10851_v49 = vpop.f32.mrb[38].mxu0 }
 0x486   : > { %3136 = vadd.xlane.f32.xlu1 %v3135_v44  ;;  %12915 = vst [vmem:[#allocation38_spill] sm:$0xff] %v10851_v49  ;;  %v10855_v52 = vpop.f32.mrb[39].mxu0 }
 0x487   : > { %3145 = vadd.xlane.f32.xlu0 %v3144_v13  ;;  %12916 = vst [vmem:[#allocation39_spill] sm:$0xff] %v10855_v52 }
 0x488   : > { %v10798_v4 = vpop.xlane.xlu1 %3103 }
 0x489   : > { %v3243_v31 = vrot.slane %v10798_v4, %v10845_v47  ;;  %v10876_v35 = vpop.f32.mrb[40].mxu0 }
 0x48a   : > { %12917 = vst [vmem:[#allocation40_spill] sm:$0xff] %v10876_v35  ;;  %v10882_v2 = vpop.f32.mrb[41].mxu0 }
 0x48b   : > { %3172 = vadd.xlane.f32.xlu0 %v3171_v9  ;;  %v10859_v55 = vpop.xlane.xlu0 %3085  ;;  %12918 = vst [vmem:[#allocation41_spill] sm:$0xff] %v10882_v2 }
 0x48c   : > { %v10808_v21 = vpop.xlane.xlu1 %3079  ;;  %v3219_v33 = vrot.slane %v10859_v55, %v10845_v47 }
 0x48d   : > { %v3211_v15 = vrot.slane %v10808_v21, %v10845_v47 }
 0x48f   : > { %3148 = vadd.xlane.f32.xlu0 %v3147_v0  ;;  %v10880_v63 = vpop.xlane.xlu0 %3121 }
 0x490   : > { %v10811_v20 = vpop.xlane.xlu1 %3106  ;;  %v3267_v27 = vrot.slane %v10880_v63, %v10845_v47 }
 0x491   : > { %v3247_v51 = vrot.slane %v10811_v20, %v10845_v47 }
 0x493   : > { %v3350_v57 = vsel %vm3336_vm2, %v3247_v51, %v3243_v31 }
 0x494   : > { %v10815_v32 = vpop.xlane.xlu1 %3109 }
 0x495   : > { %v3251_v16 = vrot.slane %v10815_v32, %v10845_v47 }
 0x497   : > { %2137 = vrot.lane.b32.xlu1 %v902_v11, %s12909_s14  ;;  %v3351_v61 = vsel %vm3338_vm3, %v3251_v16, %v3350_v57  ;;  %v10909_v57 = vpop.xlane.xlu0 %3097 }
 0x498   : > { %v10823_v28 = vpop.xlane.xlu1 %3115 }
 0x499   : > { %v3259_v40 = vrot.slane %v10823_v28, %v10845_v47 }
 0x49c   : > { %v10827_v59 = vpop.xlane.xlu1 %3082 }
 0x49d   : > { %v3215_v41 = vrot.slane %v10827_v59, %v10845_v47 }
 0x49f   : > { %v3337_v62 = vsel %vm3336_vm2, %v3215_v41, %v3211_v15  ;;  %v3235_v15 = vrot.slane %v10909_v57, %v10845_v47 }
 0x4a0   : > { %v10833_v10 = vpop.xlane.xlu1 %3091  ;;  %v3339_v0 = vsel %vm3338_vm3, %v3219_v33, %v3337_v62 }
 0x4a1   : > { %v3227_v16 = vrot.slane %v10833_v10, %v10845_v47 }
 0x4a4   : > { %v10837_v24 = vpop.xlane.xlu1 %3112 }
 0x4a5   : > { %2135 = vrot.lane.b32.xlu0 %v901_v37, %s12909_s14  ;;  %v3255_v58 = vrot.slane %v10837_v24, %v10845_v47 }
 0x4a7   : > { %v3352_v53 = vsel %vm3340_vm4, %v3255_v58, %v3351_v61  ;;  %v10907_v58 = vpop.f32.mrb[42].mxu0 }
 0x4a8   : > { %v10847_v48 = vpop.xlane.xlu1 %3118  ;;  %v3353_v3 = vsel %vm3342_vm5, %v3259_v40, %v3352_v53  ;;  %12919 = vst [vmem:[#allocation42_spill] sm:$0xff] %v10907_v58  ;;  %v10911_v61 = vpop.f32.mrb[43].mxu0 }
 0x4a9   : > { %v3263_v1 = vrot.slane %v10847_v48, %v10845_v47  ;;  %12920 = vst [vmem:[#allocation43_spill] sm:$0xff] %v10911_v61 }
 0x4ab   : > { %v3354_v13 = vsel %vm3344_vm6, %v3263_v1, %v3353_v3 }
 0x4ac   : > { %v10863_v56 = vpop.xlane.xlu1 %3088  ;;  %v3355_v11 = vsel %vm3346_vm7, %v3267_v27, %v3354_v13 }
 0x4ad   : > { %v3223_v44 = vrot.slane %v10863_v56, %v10845_v47 }
 0x4af   : > { %v3341_v37 = vsel %vm3340_vm4, %v3223_v44, %v3339_v0  ;;  %v10922_v44 = vpop.f32.mrb[44].mxu0  ;;  %v904_v0 = vld [vmem:[%s10421_s16 + $0x68] sm:$0xff] }
 0x4b0   : > { %v10874_v60 = vpop.xlane.xlu1 %3094  ;;  %v3343_v53 = vsel %vm3342_vm5, %v3227_v16, %v3341_v37  ;;  %12921 = vst [vmem:[#allocation44_spill] sm:$0xff] %v10922_v44  ;;  %v10925_v33 = vpop.f32.mrb[45].mxu0  ;;  %v9269_v16 = vmov 0  }
 0x4b1   : > { %v3231_v39 = vrot.slane %v10874_v60, %v10845_v47  ;;  %12922 = vst [vmem:[#allocation45_spill] sm:$0xff] %v10925_v33  ;;  %v10927_v27 = vpop.f32.mrb[46].mxu0  ;;  %8732 = vset.pattern.permute.xlu1 %v9269_v16  ;;  %8731 = vset.pattern.permute.xlu0 %v9269_v16 }
 0x4b2   : > { %12923 = vst [vmem:[#allocation46_spill] sm:$0xff] %v10927_v27 }
 0x4b3   : > { %v3345_v40 = vsel %vm3344_vm6, %v3231_v39, %v3343_v53 }
 0x4b4   : > { %v10893_v9 = vpop.xlane.xlu1 %3124  ;;  %v3347_v3 = vsel %vm3346_vm7, %v3235_v15, %v3345_v40 }
 0x4b5   : > { %v3271_v29 = vrot.slane %v10893_v9, %v10845_v47 }
 0x4b7   : > { %v3356_v51 = vsel %vm3348_vm8, %v3271_v29, %v3355_v11  ;;  %v10929_v29 = vpop.f32.mrb[47].mxu0  ;;  %v906_v11 = vld [vmem:[%s10421_s16 + $0x78] sm:$0xff] }
 0x4b8   : > { %v10905_v31 = vpop.xlane.xlu1 %3100  ;;  %v3379_v41 = vsel %vm3375_vm9, %v3356_v51, -inf  ;;  %12924 = vst [vmem:[#allocation47_spill] sm:$0xff] %v10929_v29  ;;  %v903_v51 = vld [vmem:[%s10421_s16 + $0x60] sm:$0xff] }
 0x4b9   : > { %v3239_v1 = vrot.slane %v10905_v31, %v10845_v47 }
 0x4bb   : > { %3380 = vmax.xlane.f32.xlu1 %v3379_v41  ;;  %v3349_v62 = vsel %vm3348_vm8, %v3239_v1, %v3347_v3 }
 0x4bc   : > { %v3376_v13 = vsel %vm3375_vm9, %v3349_v62, -inf }
 0x4c4   : > { %3377 = vmax.xlane.f32.xlu0 %v3376_v13 }
 0x4cc   : > { %2141 = vrot.lane.b32.xlu1 %v904_v0, %s12909_s14 }
 0x4d0   : > { %2145 = vrot.lane.b32.xlu1 %v906_v11, %s12909_s14  ;;  %v10935_v37 = vpop.f32.mrb[48].mxu0 }
 0x4d1   : > { %12925 = vst [vmem:[#allocation48_spill] sm:$0xff] %v10935_v37  ;;  %v10937_v39 = vpop.f32.mrb[49].mxu0 }
 0x4d2   : > { %12926 = vst [vmem:[#allocation49_spill] sm:$0xff] %v10937_v39 }
 0x4da   : > { %2139 = vrot.lane.b32.xlu0 %v903_v51, %s12909_s14 }
 0x4fb   : > { %v10941_v41 = vpop.xlane.xlu1 %3151 }
 0x4fc   : > { %v10943_v53 = vpop.xlane.xlu0 %3127  ;;  %v3307_v27 = vrot.slane %v10941_v41, %v10845_v47 }
 0x4fd   : > { %v3275_v61 = vrot.slane %v10943_v53, %v10845_v47 }
 0x4ff   : > { %v10945_v1 = vpop.xlane.xlu1 %3163 }
 0x500   : > { %v10947_v40 = vpop.xlane.xlu0 %3154  ;;  %v3323_v17 = vrot.slane %v10945_v1, %v10845_v47 }
 0x501   : > { %v3311_v51 = vrot.slane %v10947_v40, %v10845_v47 }
 0x503   : > { %v10949_v15 = vpop.xlane.xlu1 %3130  ;;  %v3364_v35 = vsel %vm3336_vm2, %v3311_v51, %v3307_v27 }
 0x504   : > { %v10951_v3 = vpop.xlane.xlu0 %3157  ;;  %v3279_v33 = vrot.slane %v10949_v15, %v10845_v47 }
 0x505   : > { %v3315_v16 = vrot.slane %v10951_v3, %v10845_v47 }
 0x506   : > { %v3357_v7 = vsel %vm3336_vm2, %v3279_v33, %v3275_v61 }
 0x507   : > { %v10953_v62 = vpop.xlane.xlu1 %3160  ;;  %v3365_v2 = vsel %vm3338_vm3, %v3315_v16, %v3364_v35 }
 0x508   : > { %v10955_v13 = vpop.xlane.xlu0 %3133  ;;  %v3319_v44 = vrot.slane %v10953_v62, %v10845_v47 }
 0x509   : > { %v3283_v58 = vrot.slane %v10955_v13, %v10845_v47 }
 0x50a   : > { %v3366_v49 = vsel %vm3340_vm4, %v3319_v44, %v3365_v2 }
 0x50b   : > { %v10957_v0 = vpop.xlane.xlu1 %3166  ;;  %v3358_v27 = vsel %vm3338_vm3, %v3283_v58, %v3357_v7  ;;  %v3367_v44 = vsel %vm3342_vm5, %v3323_v17, %v3366_v49 }
 0x50c   : > { %v10959_v11 = vpop.xlane.xlu0 %3139  ;;  %v3327_v42 = vrot.slane %v10957_v0, %v10845_v47 }
 0x50d   : > { %v3291_v35 = vrot.slane %v10959_v11, %v10845_v47 }
 0x50e   : > { %v3368_v58 = vsel %vm3344_vm6, %v3327_v42, %v3367_v44 }
 0x50f   : > { %v10965_v45 = vpop.xlane.xlu1 %3169 }
 0x510   : > { %v10967_v29 = vpop.xlane.xlu0 %3142  ;;  %v3331_v51 = vrot.slane %v10965_v45, %v10845_v47 }
 0x511   : > { %v3295_v16 = vrot.slane %v10967_v29, %v10845_v47 }
 0x512   : > { %v3369_v22 = vsel %vm3346_vm7, %v3331_v51, %v3368_v58  ;;  %v11033_v58 = vsub.s32 6, %v10608_v38 }
 0x513   : > { %v10981_v39 = vpop.xlane.xlu1 %3136 }
 0x514   : > { %v10983_v37 = vpop.xlane.xlu0 %3145  ;;  %v3287_v43 = vrot.slane %v10981_v39, %v10845_v47 }
 0x515   : > { %v3299_v17 = vrot.slane %v10983_v37, %v10845_v47 }
 0x516   : > { %v3359_v61 = vsel %vm3340_vm4, %v3287_v43, %v3358_v27 }
 0x517   : > { %v3360_v33 = vsel %vm3342_vm5, %v3291_v35, %v3359_v61  ;;  %v2138_v61 = vpop.permute.xlu1 %2137 }
 0x518   : > { %v10999_v2 = vpop.xlane.xlu0 %3172  ;;  %v3361_v43 = vsel %vm3344_vm6, %v3295_v16, %v3360_v33  ;;  %v2206_v33 = vsel %vm940_vm0, %v10752_v46, %v2138_v61 }
 0x519   : > { %v3335_v7 = vrot.slane %v10999_v2, %v10845_v47  ;;  %v3362_v42 = vsel %vm3346_vm7, %v3299_v17, %v3361_v43  ;;  %v11036_v43 = vsub.s32 2, %v10608_v38 }
 0x51b   : > { %v3370_v19 = vsel %vm3348_vm8, %v3335_v7, %v3369_v22  ;;  %v11030_v7 = vsub.s32 1, %v10608_v38 }
 0x51c   : > { %v11013_v49 = vpop.xlane.xlu0 %3148  ;;  %v3385_v27 = vsel %vm3375_vm9, %v3370_v19, -inf  ;;  %v905_v19 = vld [vmem:[%s10421_s16 + $0x70] sm:$0xff] }
 0x51d   : > { %v3303_v35 = vrot.slane %v11013_v49, %v10845_v47  ;;  %3386 = vmax.xlane.f32.xlu0 %v3385_v27 }
 0x51f   : > { %v3363_v51 = vsel %vm3348_vm8, %v3303_v35, %v3362_v42  ;;  %v11042_v35 = vsub.s32 3, %v10608_v38 }
 0x520   : > { %v3382_v22 = vsel %vm3375_vm9, %v3363_v51, -inf  ;;  %v2136_v44 = vpop.permute.xlu0 %2135 }
 0x521   : > { %3383 = vmax.xlane.f32.xlu1 %v3382_v22  ;;  %v2205_v16 = vsel %vm940_vm0, %v10742_v23, %v2136_v44 }
 0x522   : > { %8169 = vmatprep.mubr.msk.f32.mxu0 %vm2223_vm1, %v2205_v16 }
 0x523   : > { %8170 = vmatmul.mubr.msk.f32.gmra.mrb[50].mxu0 %vm2223_vm1, %v2206_v33  ;;  %v11049_v33 = vsub.s32 4, %v10608_v38 }
 0x533   : > { %2143 = vrot.lane.b32.xlu0 %v905_v19, %s12909_s14 }
 0x548   : > { %v3381_v46 = vpop.xlane.xlu1 %3380 }
 0x549   : > { %v3427_v17 = vrot.slane %v3381_v46, %v10641_v6  ;;  %v3431_v23 = vrot.slane %v3381_v46, %v11030_v7  ;;  %v3451_v27 = vrot.slane %v3381_v46, %v11033_v58  ;;  %v3435_v61 = vrot.slane %v3381_v46, %v11036_v43 }
 0x54a   : > { %v3439_v16 = vrot.slane %v3381_v46, %v11042_v35 }
 0x54b   : > { %v3560_v42 = vsub.f32 %v10798_v4, %v3427_v17  ;;  %v3561_v51 = vsub.f32 %v10811_v20, %v3431_v23  ;;  %v3566_v22 = vsub.f32 %v10880_v63, %v3451_v27  ;;  %v3562_v54 = vsub.f32 %v10815_v32, %v3435_v61 }
 0x54c   : > { %v3443_v63 = vrot.slane %v3381_v46, %v11049_v33  ;;  %v3563_v23 = vsub.f32 %v10837_v24, %v3439_v16  ;;  %v2142_v27 = vpop.permute.xlu1 %2141 }
 0x54d   : > { %v3600_v44 = vmul.f32 1.442695, %v3560_v42  ;;  %v3602_v19 = vmul.f32 1.442695, %v3561_v51  ;;  %v3612_v36 = vmul.f32 1.442695, %v3566_v22  ;;  %v3447_v51 = vrot.slane %v3381_v46, %v11056_v18 }
 0x54e   : > { %v3604_v17 = vmul.f32 1.442695, %v3562_v54  ;;  %v11066_v42 = vsub.s32 7, %v10608_v38  ;;  %v2208_v54 = vsel %vm940_vm0, %v10763_v26, %v2142_v27  ;;  %v3606_v24 = vmul.f32 1.442695, %v3563_v23 }
 0x54f   : > { %8733 = vpow2.f32 %v3600_v44 }
 0x550   : > { %8735 = vpow2.f32 %v3602_v19  ;;  %v3565_v19 = vsub.f32 %v10847_v48, %v3447_v51 }
 0x551   : > { %v11053_v25 = vpop.xlane.xlu0 %3377  ;;  %8737 = vpow2.f32 %v3612_v36  ;;  %v3564_v36 = vsub.f32 %v10823_v28, %v3443_v63  ;;  %v3455_v28 = vrot.slane %v3381_v46, %v11066_v42 }
 0x552   : > { %v3395_v4 = vrot.slane %v11053_v25, %v10641_v6  ;;  %v3407_v20 = vrot.slane %v11053_v25, %v11042_v35  ;;  %v3411_v22 = vrot.slane %v11053_v25, %v11049_v33  ;;  %8739 = vpow2.f32 %v3604_v17 }
 0x553   : > { %v3415_v16 = vrot.slane %v11053_v25, %v11056_v18  ;;  %v3419_v63 = vrot.slane %v11053_v25, %v11033_v58  ;;  %v3610_v46 = vmul.f32 1.442695, %v3565_v19  ;;  %v3399_v48 = vrot.slane %v11053_v25, %v11030_v7 }
 0x554   : > { %v3552_v32 = vsub.f32 %v10808_v21, %v3395_v4  ;;  %v3555_v30 = vsub.f32 %v10863_v56, %v3407_v20  ;;  %v3556_v56 = vsub.f32 %v10833_v10, %v3411_v22  ;;  %v3567_v10 = vsub.f32 %v10893_v9, %v3455_v28 }
 0x555   : > { %v2140_v61 = vpop.permute.xlu0 %2139  ;;  %v3553_v9 = vsub.f32 %v10827_v59, %v3399_v48  ;;  %v2146_v48 = vpop.permute.xlu1 %2145 }
 0x556   : > { %v3584_v44 = vmul.f32 1.442695, %v3552_v32  ;;  %v2207_v21 = vsel %vm940_vm0, %v10730_v8, %v2140_v61  ;;  %v3590_v26 = vmul.f32 1.442695, %v3555_v30  ;;  %v3608_v8 = vmul.f32 1.442695, %v3564_v36 }
 0x557   : > { %8172 = vmatprep.mubr.msk.f32.mxu0 %vm2223_vm1, %v2207_v21  ;;  %v3592_v17 = vmul.f32 1.442695, %v3556_v56  ;;  %v3557_v30 = vsub.f32 %v10874_v60, %v3415_v16  ;;  %v3558_v32 = vsub.f32 %v10909_v57, %v3419_v63  ;;  %v3614_v61 = vmul.f32 1.442695, %v3567_v10 }
 0x558   : > { %8173 = vmatmul.mubr.msk.f32.gmra.mrb[52].mxu0 %vm2223_vm1, %v2208_v54  ;;  %8741 = vpow2.f32 %v3584_v44  ;;  %v3403_v60 = vrot.slane %v11053_v25, %v11036_v43  ;;  %v3423_v57 = vrot.slane %v11053_v25, %v11066_v42 }
 0x559   : > { %v11078_v38 = vpop.eup %8733  ;;  %8743 = vpow2.f32 %v3606_v24  ;;  %v3594_v27 = vmul.f32 1.442695, %v3557_v30  ;;  %v3596_v44 = vmul.f32 1.442695, %v3558_v32  ;;  %v3586_v24 = vmul.f32 1.442695, %v3553_v9 }
 0x55a   : > { %3705 = vperm.xlu0 %8731, %v11078_v38   ;;  %v11087_v4 = vpop.eup %8735  ;;  %8745 = vpow2.f32 %v3590_v26  ;;  %v3554_v54 = vsub.f32 %v10859_v55, %v3403_v60  ;;  %v3559_v21 = vsub.f32 %v10905_v31, %v3423_v57 }
 0x55b   : > { %v11089_v20 = vpop.eup %8737  ;;  %3708 = vperm.xlu1 %8732, %v11087_v4   ;;  %8747 = vpow2.f32 %v3608_v8 }
 0x55c   : > { %v11099_v23 = vpop.eup %8739  ;;  %8749 = vpow2.f32 %v3592_v17  ;;  %v3588_v16 = vmul.f32 1.442695, %v3554_v54  ;;  %v3598_v25 = vmul.f32 1.442695, %v3559_v21 }
 0x55d   : > { %8751 = vpow2.f32 %v3610_v46 }
 0x55e   : > { %3723 = vperm.xlu0 %8731, %v11089_v20   ;;  %8753 = vpow2.f32 %v3594_v27 }
 0x55f   : > { %3711 = vperm.xlu1 %8732, %v11099_v23   ;;  %8755 = vpow2.f32 %v3614_v61 }
 0x560   : > { %8757 = vpow2.f32 %v3596_v44 }
 0x561   : > { %8759 = vpow2.f32 %v3586_v24 }
 0x562   : > { %v11106_v51 = vpop.eup %8741  ;;  %8761 = vpow2.f32 %v3588_v16 }
 0x563   : > { %v11108_v22 = vpop.eup %8743  ;;  %3681 = vperm.xlu0 %8731, %v11106_v51   ;;  %8763 = vpow2.f32 %v3598_v25 }
 0x564   : > { %3714 = vperm.xlu1 %8732, %v11108_v22   ;;  %v11115_v36 = vpop.eup %8745 }
 0x565   : > { %v11117_v59 = vpop.eup %8747 }
 0x566   : > { %v11122_v26 = vpop.eup %8749 }
 0x567   : > { %3690 = vperm.xlu0 %8731, %v11115_v36   ;;  %v11124_v56 = vpop.eup %8751 }
 0x568   : > { %3717 = vperm.xlu1 %8732, %v11117_v59   ;;  %v11128_v55 = vpop.eup %8753 }
 0x569   : > { %v11130_v28 = vpop.eup %8755 }
 0x56a   : > { %v11134_v31 = vpop.eup %8757 }
 0x56b   : > { %3693 = vperm.xlu0 %8731, %v11122_v26   ;;  %v11136_v19 = vpop.eup %8759 }
 0x56c   : > { %3720 = vperm.xlu1 %8732, %v11124_v56   ;;  %v11140_v8 = vpop.eup %8761 }
 0x56d   : > { %v11143_v63 = vpop.eup %8763 }
 0x56f   : > { %3696 = vperm.xlu0 %8731, %v11128_v55  }
 0x570   : > { %3726 = vperm.xlu1 %8732, %v11130_v28  }
 0x573   : > { %3699 = vperm.xlu0 %8731, %v11134_v31  }
 0x574   : > { %3684 = vperm.xlu1 %8732, %v11136_v19  }
 0x578   : > { %3687 = vperm.xlu1 %8732, %v11140_v8  }
 0x57c   : > { %3702 = vperm.xlu1 %8732, %v11143_v63  }
 0x5aa   : > { %v11146_v17 = vpop.xlane.xlu0 %3386 }
 0x5ab   : > { %v3491_v30 = vrot.slane %v11146_v17, %v10641_v6  ;;  %v3503_v10 = vrot.slane %v11146_v17, %v11042_v35  ;;  %v3495_v46 = vrot.slane %v11146_v17, %v11030_v7  ;;  %v3507_v27 = vrot.slane %v11146_v17, %v11049_v33 }
 0x5ac   : > { %v3499_v9 = vrot.slane %v11146_v17, %v11036_v43  ;;  %v3511_v54 = vrot.slane %v11146_v17, %v11056_v18 }
 0x5ad   : > { %v3576_v32 = vsub.f32 %v10941_v41, %v3491_v30  ;;  %v3579_v61 = vsub.f32 %v10953_v62, %v3503_v10  ;;  %v3577_v57 = vsub.f32 %v10947_v40, %v3495_v46  ;;  %v3580_v24 = vsub.f32 %v10945_v1, %v3507_v27 }
 0x5ae   : > { %v2144_v44 = vpop.permute.xlu0 %2143  ;;  %v11164_v16 = vpop.xlane.xlu1 %3383  ;;  %v2210_v62 = vsel %vm940_vm0, %v10786_v5, %v2146_v48  ;;  %v3578_v30 = vsub.f32 %v10951_v3, %v3499_v9  ;;  %v3581_v1 = vsub.f32 %v10957_v0, %v3511_v54 }
 0x5af   : > { %v3632_v60 = vmul.f32 1.442695, %v3576_v32  ;;  %v3638_v21 = vmul.f32 1.442695, %v3579_v61  ;;  %v2209_v41 = vsel %vm940_vm0, %v10772_v14, %v2144_v44  ;;  %v3459_v25 = vrot.slane %v11164_v16, %v10641_v6 }
 0x5b0   : > { %8175 = vmatprep.mubr.msk.f32.mxu0 %vm2223_vm1, %v2209_v41  ;;  %v3634_v40 = vmul.f32 1.442695, %v3577_v57  ;;  %v3640_v10 = vmul.f32 1.442695, %v3580_v24  ;;  %v3463_v46 = vrot.slane %v11164_v16, %v11030_v7  ;;  %v3467_v14 = vrot.slane %v11164_v16, %v11036_v43 }
 0x5b1   : > { %8765 = vpow2.f32 %v3632_v60  ;;  %8176 = vmatmul.mubr.msk.f32.gmra.mrb[54].mxu0 %vm2223_vm1, %v2210_v62  ;;  %v3636_v5 = vmul.f32 1.442695, %v3578_v30  ;;  %v3568_v48 = vsub.f32 %v10943_v53, %v3459_v25  ;;  %v3642_v27 = vmul.f32 1.442695, %v3581_v1 }
 0x5b2   : > { %8767 = vpow2.f32 %v3638_v21  ;;  %v3471_v3 = vrot.slane %v11164_v16, %v11042_v35  ;;  %v3569_v0 = vsub.f32 %v10949_v15, %v3463_v46  ;;  %v3475_v61 = vrot.slane %v11164_v16, %v11049_v33 }
 0x5b3   : > { %8769 = vpow2.f32 %v3634_v40  ;;  %v3616_v60 = vmul.f32 1.442695, %v3568_v48  ;;  %v3570_v9 = vsub.f32 %v10955_v13, %v3467_v14  ;;  %v3515_v53 = vrot.slane %v11146_v17, %v11033_v58 }
 0x5b4   : > { %8771 = vpow2.f32 %v3640_v10  ;;  %v3571_v44 = vsub.f32 %v10981_v39, %v3471_v3  ;;  %v3618_v57 = vmul.f32 1.442695, %v3569_v0  ;;  %v3479_v15 = vrot.slane %v11164_v16, %v11056_v18 }
 0x5b5   : > { %8773 = vpow2.f32 %v3636_v5  ;;  %v3620_v24 = vmul.f32 1.442695, %v3570_v9  ;;  %v3572_v21 = vsub.f32 %v10959_v11, %v3475_v61  ;;  %v3582_v13 = vsub.f32 %v10965_v45, %v3515_v53 }
 0x5b6   : > { %8775 = vpow2.f32 %v3642_v27  ;;  %v3622_v41 = vmul.f32 1.442695, %v3571_v44  ;;  %v3483_v39 = vrot.slane %v11164_v16, %v11033_v58  ;;  %v3573_v30 = vsub.f32 %v10967_v29, %v3479_v15 }
 0x5b7   : > { %8777 = vpow2.f32 %v3616_v60  ;;  %v3624_v40 = vmul.f32 1.442695, %v3572_v21  ;;  %v3644_v11 = vmul.f32 1.442695, %v3582_v13  ;;  %v3487_v10 = vrot.slane %v11164_v16, %v11066_v42 }
 0x5b8   : > { %8779 = vpow2.f32 %v3618_v57  ;;  %v3626_v46 = vmul.f32 1.442695, %v3573_v30  ;;  %v3574_v14 = vsub.f32 %v10983_v37, %v3483_v39  ;;  %v3519_v48 = vrot.slane %v11146_v17, %v11066_v42 }
 0x5b9   : > { %8781 = vpow2.f32 %v3620_v24  ;;  %v3575_v27 = vsub.f32 %v11013_v49, %v3487_v10 }
 0x5ba   : > { %8783 = vpow2.f32 %v3622_v41  ;;  %v3628_v16 = vmul.f32 1.442695, %v3574_v14  ;;  %v3583_v61 = vsub.f32 %v10999_v2, %v3519_v48 }
 0x5bb   : > { %v11184_v32 = vpop.eup %8765  ;;  %8785 = vpow2.f32 %v3624_v40  ;;  %v3630_v37 = vmul.f32 1.442695, %v3575_v27 }
 0x5bc   : > { %3753 = vperm.xlu1 %8732, %v11184_v32   ;;  %v11193_v54 = vpop.eup %8767  ;;  %8787 = vpow2.f32 %v3644_v11  ;;  %v3646_v49 = vmul.f32 1.442695, %v3583_v61 }
 0x5bd   : > { %v11200_v62 = vpop.eup %8769  ;;  %8789 = vpow2.f32 %v3626_v46 }
 0x5be   : > { %v11202_v25 = vpop.eup %8771  ;;  %3756 = vperm.xlu0 %8731, %v11200_v62   ;;  %8791 = vpow2.f32 %v3628_v16 }
 0x5bf   : > { %v11209_v45 = vpop.eup %8773  ;;  %8793 = vpow2.f32 %v3630_v37 }
 0x5c0   : > { %3762 = vperm.xlu1 %8732, %v11193_v54   ;;  %v11211_v1 = vpop.eup %8775  ;;  %8795 = vpow2.f32 %v3646_v49 }
 0x5c1   : > { %v11218_v5 = vpop.eup %8777 }
 0x5c2   : > { %3759 = vperm.xlu0 %8731, %v11209_v45   ;;  %v11220_v29 = vpop.eup %8779 }
 0x5c3   : > { %v11227_v3 = vpop.eup %8781 }
 0x5c4   : > { %3765 = vperm.xlu1 %8732, %v11202_v25   ;;  %v11229_v0 = vpop.eup %8783 }
 0x5c5   : > { %v11234_v60 = vpop.eup %8785 }
 0x5c6   : > { %3729 = vperm.xlu0 %8731, %v11218_v5   ;;  %v11236_v17 = vpop.eup %8787 }
 0x5c7   : > { %v11240_v9 = vpop.eup %8789 }
 0x5c8   : > { %3768 = vperm.xlu1 %8732, %v11211_v1   ;;  %v11243_v53 = vpop.eup %8791 }
 0x5c9   : > { %v11246_v2 = vpop.eup %8793 }
 0x5ca   : > { %3735 = vperm.xlu0 %8731, %v11227_v3   ;;  %v11249_v24 = vpop.eup %8795 }
 0x5cb   : > { %12927 = vst [vmem:[#allocation50_spill] sm:$0xff] %v11249_v24 }
 0x5cc   : > { %3732 = vperm.xlu1 %8732, %v11220_v29  }
 0x5ce   : > { %3741 = vperm.xlu0 %8731, %v11234_v60  }
 0x5d0   : > { %3738 = vperm.xlu1 %8732, %v11229_v0  }
 0x5d2   : > { %3744 = vperm.xlu0 %8731, %v11240_v9  }
 0x5d4   : > { %3771 = vperm.xlu1 %8732, %v11236_v17  }
 0x5d6   : > { %3747 = vperm.xlu0 %8731, %v11243_v53  }
 0x5d9   : > { %v3706_v44 = vpop.permute.xlu0 %3705 }
 0x5da   : > { %v3709_v57 = vpop.permute.xlu1 %3708  ;;  %3750 = vperm.xlu0 %8731, %v11246_v2   ;;  %v3811_v46 = vrot.slane %v3706_v44, %v10845_v47 }
 0x5db   : > { %v3815_v10 = vrot.slane %v3709_v57, %v10845_v47 }
 0x5dd   : > { %v3724_v15 = vpop.permute.xlu0 %3723  ;;  %v3911_v61 = vsel %vm3336_vm2, %v3815_v10, %v3811_v46 }
 0x5de   : > { %v3712_v21 = vpop.permute.xlu1 %3711  ;;  %3774 = vperm.xlu0 %8731, %v11249_v24   ;;  %v3835_v46 = vrot.slane %v3724_v15, %v10845_v47 }
 0x5df   : > { %v3819_v48 = vrot.slane %v3712_v21, %v10845_v47 }
 0x5e1   : > { %v3912_v52 = vsel %vm3338_vm3, %v3819_v48, %v3911_v61 }
 0x5e2   : > { %v3682_v13 = vpop.permute.xlu0 %3681 }
 0x5e3   : > { %v3715_v41 = vpop.permute.xlu1 %3714 }
 0x5e4   : > { %v3823_v16 = vrot.slane %v3715_v41, %v10845_v47 }
 0x5e6   : > { %v3691_v39 = vpop.permute.xlu0 %3690  ;;  %v3913_v44 = vsel %vm3340_vm4, %v3823_v16, %v3912_v52 }
 0x5e7   : > { %v3718_v40 = vpop.permute.xlu1 %3717  ;;  %v3791_v48 = vrot.slane %v3691_v39, %v10845_v47 }
 0x5e8   : > { %v3827_v27 = vrot.slane %v3718_v40, %v10845_v47  ;;  %v3779_v40 = vrot.slane %v3682_v13, %v10845_v47 }
 0x5ea   : > { %v3694_v11 = vpop.permute.xlu0 %3693  ;;  %v3914_v41 = vsel %vm3342_vm5, %v3827_v27, %v3913_v44 }
 0x5eb   : > { %v3721_v30 = vpop.permute.xlu1 %3720 }
 0x5ec   : > { %v3831_v49 = vrot.slane %v3721_v30, %v10845_v47 }
 0x5ee   : > { %v3697_v37 = vpop.permute.xlu0 %3696  ;;  %v3915_v30 = vsel %vm3344_vm6, %v3831_v49, %v3914_v41 }
 0x5ef   : > { %v3727_v14 = vpop.permute.xlu1 %3726  ;;  %v3916_v13 = vsel %vm3346_vm7, %v3835_v46, %v3915_v30 }
 0x5f0   : > { %v3839_v50 = vrot.slane %v3727_v14, %v10845_v47  ;;  %v3799_v14 = vrot.slane %v3697_v37, %v10845_v47 }
 0x5f2   : > { %v3700_v52 = vpop.permute.xlu0 %3699  ;;  %v3917_v15 = vsel %vm3348_vm8, %v3839_v50, %v3916_v13 }
 0x5f3   : > { %v3685_v12 = vpop.permute.xlu1 %3684  ;;  %v3803_v44 = vrot.slane %v3700_v52, %v10845_v47 }
 0x5f4   : > { %v3783_v21 = vrot.slane %v3685_v12, %v10845_v47  ;;  %v3795_v12 = vrot.slane %v3694_v11, %v10845_v47  ;;  %v3939_v11 = vsel %vm3375_vm9, %v3917_v15, 0.0 }
 0x5f6   : > { %v11259_v24 = vpop.f32.mrb[50].mxu0  ;;  %v3904_v61 = vsel %vm3336_vm2, %v3783_v21, %v3779_v40 }
 0x5f7   : > { %12928 = vst [vmem:[#allocation51_spill] sm:$0xff] %v11259_v24  ;;  %v11262_v57 = vpop.f32.mrb[51].mxu0  ;;  %v3688_v10 = vpop.permute.xlu1 %3687 }
 0x5f8   : > { %v3787_v24 = vrot.slane %v3688_v10, %v10845_v47 }
 0x5fa   : > { %v3905_v16 = vsel %vm3338_vm3, %v3787_v24, %v3904_v61 }
 0x5fb   : > { %v3906_v27 = vsel %vm3340_vm4, %v3791_v48, %v3905_v16  ;;  %v3703_v49 = vpop.permute.xlu1 %3702 }
 0x5fc   : > { %v3807_v39 = vrot.slane %v3703_v49, %v10845_v47  ;;  %v3907_v21 = vsel %vm3342_vm5, %v3795_v12, %v3906_v27 }
 0x5fd   : > { %v3908_v41 = vsel %vm3344_vm6, %v3799_v14, %v3907_v21  ;;  %3940 = vadd.xlane.f32.xlu0 %v3939_v11 }
 0x5fe   : > { %v3909_v24 = vsel %vm3346_vm7, %v3803_v44, %v3908_v41 }
 0x5ff   : > { %v3910_v37 = vsel %vm3348_vm8, %v3807_v39, %v3909_v24 }
 0x600   : > { %v3936_v40 = vsel %vm3375_vm9, %v3910_v37, 0.0 }
 0x601   : > { %3937 = vadd.xlane.f32.xlu1 %v3936_v40 }
 0x62b   : > { %v11288_v10 = vpop.f32.mrb[52].mxu0 }
 0x62c   : > { %12929 = vst [vmem:[#allocation52_spill] sm:$0xff] %v11288_v10  ;;  %v11290_v50 = vpop.f32.mrb[53].mxu0 }
 0x62d   : > { %12930 = vst [vmem:[#allocation53_spill] sm:$0xff] %v11290_v50 }
 0x63b   : > { %v3754_v30 = vpop.permute.xlu1 %3753 }
 0x63c   : > { %v3875_v10 = vrot.slane %v3754_v30, %v10845_v47 }
 0x63d   : > { %v3757_v48 = vpop.permute.xlu0 %3756 }
 0x63f   : > { %v3763_v46 = vpop.permute.xlu1 %3762 }
 0x641   : > { %v3760_v52 = vpop.permute.xlu0 %3759 }
 0x643   : > { %v3766_v61 = vpop.permute.xlu1 %3765 }
 0x645   : > { %v3730_v16 = vpop.permute.xlu0 %3729 }
 0x646   : > { %v3843_v15 = vrot.slane %v3730_v16, %v10845_v47  ;;  %v3883_v16 = vrot.slane %v3760_v52, %v10845_v47 }
 0x647   : > { %v3769_v12 = vpop.permute.xlu1 %3768 }
 0x648   : > { %v3895_v52 = vrot.slane %v3769_v12, %v10845_v47 }
 0x649   : > { %v3736_v14 = vpop.permute.xlu0 %3735 }
 0x64a   : > { %v3851_v41 = vrot.slane %v3736_v14, %v10845_v47 }
 0x64b   : > { %v3733_v13 = vpop.permute.xlu1 %3732 }
 0x64c   : > { %v3847_v27 = vrot.slane %v3733_v13, %v10845_v47  ;;  %v3879_v13 = vrot.slane %v3757_v48, %v10845_v47  ;;  %v3891_v48 = vrot.slane %v3766_v61, %v10845_v47 }
 0x64d   : > { %v3742_v44 = vpop.permute.xlu0 %3741 }
 0x64e   : > { %v3918_v39 = vsel %vm3336_vm2, %v3847_v27, %v3843_v15  ;;  %v3859_v40 = vrot.slane %v3742_v44, %v10845_v47  ;;  %v3925_v15 = vsel %vm3336_vm2, %v3879_v13, %v3875_v10 }
 0x64f   : > { %v3739_v49 = vpop.permute.xlu1 %3738  ;;  %v3919_v11 = vsel %vm3338_vm3, %v3851_v41, %v3918_v39  ;;  %v3887_v39 = vrot.slane %v3763_v46, %v10845_v47  ;;  %v3926_v30 = vsel %vm3338_vm3, %v3883_v16, %v3925_v15 }
 0x650   : > { %v3855_v21 = vrot.slane %v3739_v49, %v10845_v47 }
 0x651   : > { %v3745_v24 = vpop.permute.xlu0 %3744  ;;  %v3927_v10 = vsel %vm3340_vm4, %v3887_v39, %v3926_v30 }
 0x652   : > { %v3920_v37 = vsel %vm3340_vm4, %v3855_v21, %v3919_v11  ;;  %v3863_v49 = vrot.slane %v3745_v24, %v10845_v47 }
 0x653   : > { %v3921_v27 = vsel %vm3342_vm5, %v3859_v40, %v3920_v37  ;;  %v3772_v21 = vpop.permute.xlu1 %3771  ;;  %v3928_v37 = vsel %vm3342_vm5, %v3891_v48, %v3927_v10 }
 0x654   : > { %v3922_v44 = vsel %vm3344_vm6, %v3863_v49, %v3921_v27  ;;  %v3899_v24 = vrot.slane %v3772_v21, %v10845_v47  ;;  %v3929_v12 = vsel %vm3344_vm6, %v3895_v52, %v3928_v37 }
 0x655   : > { %v3748_v50 = vpop.permute.xlu0 %3747 }
 0x656   : > { %v3867_v14 = vrot.slane %v3748_v50, %v10845_v47  ;;  %v3930_v16 = vsel %vm3346_vm7, %v3899_v24, %v3929_v12 }
 0x658   : > { %v3923_v50 = vsel %vm3346_vm7, %v3867_v14, %v3922_v44 }
 0x659   : > { %v3751_v41 = vpop.permute.xlu0 %3750 }
 0x65a   : > { %v3871_v11 = vrot.slane %v3751_v41, %v10845_v47 }
 0x65c   : > { %v3924_v46 = vsel %vm3348_vm8, %v3871_v11, %v3923_v50 }
 0x65d   : > { %v3775_v40 = vpop.permute.xlu0 %3774  ;;  %v3942_v13 = vsel %vm3375_vm9, %v3924_v46, 0.0 }
 0x65e   : > { %v3903_v61 = vrot.slane %v3775_v40, %v10845_v47  ;;  %3943 = vadd.xlane.f32.xlu0 %v3942_v13 }
 0x660   : > { %v3931_v27 = vsel %vm3348_vm8, %v3903_v61, %v3930_v16 }
 0x661   : > { %v3945_v49 = vsel %vm3375_vm9, %v3931_v27, 0.0 }
 0x662   : > { %3946 = vadd.xlane.f32.xlu0 %v3945_v49 }
 0x684   : > { %v11324_v14 = vpop.f32.mrb[54].mxu0 }
 0x685   : > { %v11326_v15 = vpop.f32.mrb[55].mxu0 }
 0x68a   : > { %v3941_v39 = vpop.xlane.xlu0 %3940 }
 0x68b   : > { %8797 = vrcp.f32 %v3941_v39 }
 0x68e   : > { %v3938_v21 = vpop.xlane.xlu1 %3937 }
 0x68f   : > { %8799 = vrcp.f32 %v3938_v21 }
 0x695   : > { %v8798_v44 = vpop.eup %8797 }
 0x696   : > { %v4015_v30 = vrot.slane %v8798_v44, %v11033_v58  ;;  %v3991_v48 = vrot.slane %v8798_v44, %v10641_v6  ;;  %v3995_v50 = vrot.slane %v8798_v44, %v11030_v7  ;;  %v3999_v40 = vrot.slane %v8798_v44, %v11036_v43 }
 0x697   : > { %v4003_v61 = vrot.slane %v8798_v44, %v11042_v35  ;;  %v4007_v16 = vrot.slane %v8798_v44, %v11049_v33  ;;  %v4011_v49 = vrot.slane %v8798_v44, %v11056_v18  ;;  %v4019_v39 = vrot.slane %v8798_v44, %v11066_v42  ;;  %v2589_v44 = vld [vmem:[#allocation11] sm:$0xff] }
 0x698   : > { %v4130_v52 = vmul.f32 %v11089_v20, %v4015_v30  ;;  %v4124_v11 = vmul.f32 %v11078_v38, %v3991_v48  ;;  %v4125_v46 = vmul.f32 %v11087_v4, %v3995_v50  ;;  %v4126_v38 = vmul.f32 %v11099_v23, %v3999_v40 }
 0x699   : > { %v8800_v41 = vpop.eup %8799  ;;  %v4127_v4 = vmul.f32 %v11108_v22, %v4003_v61  ;;  %v4128_v23 = vmul.f32 %v11117_v59, %v4007_v16  ;;  %v4129_v22 = vmul.f32 %v11124_v56, %v4011_v49  ;;  %v4131_v21 = vmul.f32 %v11130_v28, %v4019_v39 }
 0x69a   : > { %v3963_v24 = vrot.slane %v8800_v41, %v11030_v7  ;;  %4220 = vperm.xlu0 %8731, %v4130_v52   ;;  %4190 = vperm.xlu1 %8732, %v4124_v11   ;;  %v3971_v37 = vrot.slane %v8800_v41, %v11042_v35  ;;  %v3975_v13 = vrot.slane %v8800_v41, %v11049_v33  ;;  %v2590_v52 = vld [vmem:[#allocation11 + $0x8] sm:$0xff]  ;;  %v2591_v11 = vld [vmem:[#allocation11 + $0x10] sm:$0xff] }
 0x69b   : > { %v3979_v12 = vrot.slane %v8800_v41, %v11056_v18  ;;  %v3983_v27 = vrot.slane %v8800_v41, %v11033_v58  ;;  %v3967_v30 = vrot.slane %v8800_v41, %v11036_v43  ;;  %v8530_v28 = vpack.c.bf16 %v2590_v52, %v2589_v44 }
 0x69c   : > { %v4117_v10 = vmul.f32 %v11136_v19, %v3963_v24  ;;  %v4119_v20 = vmul.f32 %v11115_v36, %v3971_v37  ;;  %v4120_v19 = vmul.f32 %v11122_v26, %v3975_v13  ;;  %v2592_v24 = vld [vmem:[#allocation11 + $0x18] sm:$0xff] }
 0x69d   : > { %v4121_v36 = vmul.f32 %v11128_v55, %v3979_v12  ;;  %v4122_v26 = vmul.f32 %v11134_v31, %v3983_v27  ;;  %v3959_v55 = vrot.slane %v8800_v41, %v10641_v6  ;;  %v4118_v48 = vmul.f32 %v11140_v8, %v3967_v30  ;;  %8531 = vmatprep.subr.bf16.mxu1 %v8530_v28 }
 0x69e   : > { %4155 = vperm.xlu0 %8731, %v4117_v10   ;;  %4195 = vperm.xlu1 %8732, %v4125_v46   ;;  %v3987_v31 = vrot.slane %v8800_v41, %v11066_v42  ;;  %v8534_v50 = vpack.c.bf16 %v2592_v24, %v2591_v11  ;;  %v12937_v11 = vld [vmem:[#allocation50_spill] sm:$0xff] }
 0x69f   : > { %v4116_v59 = vmul.f32 %v11106_v51, %v3959_v55  ;;  %8533 = vmatpush3.bf16.msra.mxu1 %v8530_v28 }
 0x6a0   : > { %v4123_v56 = vmul.f32 %v11143_v63, %v3987_v31  ;;  %8535 = vmatprep.subr.bf16.mxu1 %v8534_v50 }
 0x6a2   : > { %4165 = vperm.xlu0 %8731, %v4119_v20   ;;  %4200 = vperm.xlu1 %8732, %v4126_v38  }
 0x6a3   : > { %8537 = vmatpush3.bf16.msra.mxu1 %v8534_v50  ;;  %v12938_v50 = vld [vmem:[#allocation25_spill] sm:$0xff] }
 0x6a6   : > { %4170 = vperm.xlu0 %8731, %v4120_v19   ;;  %4205 = vperm.xlu1 %8732, %v4127_v4  }
 0x6aa   : > { %4175 = vperm.xlu0 %8731, %v4121_v36   ;;  %4210 = vperm.xlu1 %8732, %v4128_v23  }
 0x6ae   : > { %4180 = vperm.xlu0 %8731, %v4122_v26   ;;  %4215 = vperm.xlu1 %8732, %v4129_v22  }
 0x6b2   : > { %4225 = vperm.xlu1 %8732, %v4131_v21  }
 0x6b6   : > { %4150 = vperm.xlu1 %8732, %v4116_v59  }
 0x6ba   : > { %4160 = vperm.xlu1 %8732, %v4118_v48  }
 0x6be   : > { %4185 = vperm.xlu1 %8732, %v4123_v56   ;;  %v12935_v56 = vld [vmem:[#allocation39_spill] sm:$0xff] }
 0x6eb   : > { %v3944_v51 = vpop.xlane.xlu0 %3943 }
 0x6ef   : > { %v3947_v10 = vpop.xlane.xlu0 %3946 }
 0x6f0   : > { %8801 = vrcp.f32 %v3947_v10  ;;  %v12940_v10 = vld [vmem:[#allocation35_spill] sm:$0xff] }
 0x6f1   : > { %8803 = vrcp.f32 %v3944_v51 }
 0x6fa   : > { %v8802_v8 = vpop.eup %8801 }
 0x6fb   : > { %v4059_v41 = vrot.slane %v8802_v8, %v11030_v7  ;;  %v4055_v63 = vrot.slane %v8802_v8, %v10641_v6  ;;  %v4063_v40 = vrot.slane %v8802_v8, %v11036_v43  ;;  %v4067_v20 = vrot.slane %v8802_v8, %v11042_v35  ;;  %v8804_v38 = vpop.eup %8803 }
 0x6fc   : > { %v4023_v19 = vrot.slane %v8804_v38, %v10641_v6  ;;  %v4071_v4 = vrot.slane %v8802_v8, %v11049_v33  ;;  %v4031_v12 = vrot.slane %v8804_v38, %v11036_v43  ;;  %v4075_v16 = vrot.slane %v8802_v8, %v11056_v18 }
 0x6fd   : > { %v4141_v46 = vmul.f32 %v11200_v62, %v4059_v41  ;;  %v4140_v37 = vmul.f32 %v11184_v32, %v4055_v63  ;;  %v4142_v13 = vmul.f32 %v11209_v45, %v4063_v40  ;;  %v4143_v61 = vmul.f32 %v11193_v54, %v4067_v20  ;;  %v12942_v20 = vld [vmem:[#allocation27_spill] sm:$0xff] }
 0x6fe   : > { %v4132_v62 = vmul.f32 %v11218_v5, %v4023_v19  ;;  %v4144_v32 = vmul.f32 %v11202_v25, %v4071_v4  ;;  %v4134_v45 = vmul.f32 %v11227_v3, %v4031_v12  ;;  %v4145_v54 = vmul.f32 %v11211_v1, %v4075_v16  ;;  %v12946_v4 = vld [vmem:[#allocation37_spill] sm:$0xff] }
 0x6ff   : > { %4275 = vperm.xlu0 %8731, %v4141_v46   ;;  %4270 = vperm.xlu1 %8732, %v4140_v37   ;;  %v4039_v36 = vrot.slane %v8804_v38, %v11049_v33  ;;  %v4027_v23 = vrot.slane %v8804_v38, %v11030_v7  ;;  %v4043_v27 = vrot.slane %v8804_v38, %v11056_v18 }
 0x700   : > { %v4035_v49 = vrot.slane %v8804_v38, %v11042_v35  ;;  %v4047_v26 = vrot.slane %v8804_v38, %v11033_v58  ;;  %v4079_v22 = vrot.slane %v8802_v8, %v11033_v58  ;;  %v4051_v21 = vrot.slane %v8804_v38, %v11066_v42 }
 0x701   : > { %v4136_v5 = vmul.f32 %v11234_v60, %v4039_v36  ;;  %v4133_v25 = vmul.f32 %v11220_v29, %v4027_v23  ;;  %v4137_v3 = vmul.f32 %v11240_v9, %v4043_v27  ;;  %v11389_v60 = vld [vmem:[%s12931_s9] sm:$0xff]  ;;  %v12948_v36 = vld [vmem:[#allocation26_spill] sm:$0xff] }
 0x702   : > { %v4135_v1 = vmul.f32 %v11229_v0, %v4035_v49  ;;  %v4138_v29 = vmul.f32 %v11243_v53, %v4047_v26  ;;  %v4146_v39 = vmul.f32 %v11236_v17, %v4079_v22  ;;  %v11396_v0 = vrot.slane %v11389_v60, %v10641_v6  ;;  %v12933_v17 = vld [vmem:[#allocation33_spill] sm:$0xff]  ;;  %v12952_v27 = vld [vmem:[#allocation30_spill] sm:$0xff] }
 0x703   : > { %4280 = vperm.xlu0 %8731, %v4142_v13   ;;  %4285 = vperm.xlu1 %8732, %v4143_v61   ;;  %v4139_v30 = vmul.f32 %v11246_v2, %v4051_v21  ;;  %v4083_v53 = vrot.slane %v8802_v8, %v11066_v42  ;;  %v12944_v13 = vld [vmem:[#allocation34_spill] sm:$0xff] }
 0x704   : > { %v11400_v9 = vadd.f32 %v10825_v34, %v11396_v0  ;;  %v11406_v48 = vadd.f32 %v12933_v17, %v11396_v0  ;;  %v11411_v44 = vadd.f32 %v12935_v56, %v11396_v0  ;;  %v11419_v51 = vadd.f32 %v12938_v50, %v11396_v0  ;;  %v12958_v17 = vld [vmem:[#allocation32_spill] sm:$0xff] }
 0x705   : > { %v4147_v28 = vmul.f32 %v12937_v11, %v4083_v53  ;;  %v11423_v8 = vadd.f32 %v12940_v10, %v11396_v0  ;;  %v11431_v38 = vadd.f32 %v12942_v20, %v11396_v0  ;;  %v11435_v61 = vadd.f32 %v12944_v13, %v11396_v0  ;;  %v12960_v13 = vld [vmem:[#allocation38_spill] sm:$0xff] }
 0x706   : > { %12932 = vst [vmem:[#allocation54_spill] sm:$0xff] %v11400_v9  ;;  %12934 = vst [vmem:[#allocation33_spill] sm:$0xff] %v11406_v48  ;;  %v12792_v31 = vmax.f32 %v11400_v9, 0.0  ;;  %v12790_v24 = vmax.f32 %v11406_v48, 0.0  ;;  %v12788_v41 = vmax.f32 %v11411_v44, 0.0  ;;  %v11447_v23 = vadd.f32 %v12948_v36, %v11396_v0 }
 0x707   : > { %4230 = vperm.xlu0 %8731, %v4132_v62   ;;  %4290 = vperm.xlu1 %8732, %v4144_v32   ;;  %12936 = vst [vmem:[#allocation39_spill] sm:$0xff] %v11411_v44  ;;  %12939 = vst [vmem:[#allocation50_spill] sm:$0xff] %v11419_v51  ;;  %v11441_v62 = vadd.f32 %v12946_v4, %v11396_v0  ;;  %v12784_v32 = vmax.f32 %v11419_v51, 0.0  ;;  %v12789_v12 = vmax.f32 %v11423_v8, 0.0  ;;  %v12787_v26 = vmax.f32 %v11435_v61, 0.0 }
 0x708   : > { %12941 = vst [vmem:[#allocation25_spill] sm:$0xff] %v11423_v8  ;;  %12943 = vst [vmem:[#allocation35_spill] sm:$0xff] %v11431_v38  ;;  %v11455_v49 = vadd.f32 %v12952_v27, %v11396_v0  ;;  %v11476_v56 = vadd.f32 %v12958_v17, %v11396_v0 }
 0x709   : > { %12945 = vst [vmem:[#allocation27_spill] sm:$0xff] %v11435_v61  ;;  %12947 = vst [vmem:[#allocation34_spill] sm:$0xff] %v11441_v62 }
 0x70a   : > { %12949 = vst [vmem:[#allocation37_spill] sm:$0xff] %v11447_v23  ;;  %v12793_v27 = vmax.f32 %v11476_v56, 0.0 }
 0x70b   : > { %4240 = vperm.xlu0 %8731, %v4134_v45   ;;  %4295 = vperm.xlu1 %8732, %v4145_v54  }
 0x70f   : > { %4250 = vperm.xlu0 %8731, %v4136_v5   ;;  %4235 = vperm.xlu1 %8732, %v4133_v25   ;;  %v12950_v5 = vld [vmem:[#allocation28_spill] sm:$0xff] }
 0x710   : > { %v11451_v25 = vadd.f32 %v12950_v5, %v11396_v0  ;;  %12953 = vst [vmem:[#allocation28_spill] sm:$0xff] %v11455_v49 }
 0x712   : > { %12951 = vst [vmem:[#allocation26_spill] sm:$0xff] %v11451_v25 }
 0x713   : > { %4255 = vperm.xlu0 %8731, %v4137_v3   ;;  %4245 = vperm.xlu1 %8732, %v4135_v1   ;;  %v12783_v1 = vmax.f32 %v11431_v38, 0.0 }
 0x717   : > { %4260 = vperm.xlu0 %8731, %v4138_v29   ;;  %4300 = vperm.xlu1 %8732, %v4146_v39   ;;  %v12954_v39 = vld [vmem:[#allocation29_spill] sm:$0xff] }
 0x718   : > { %v11465_v21 = vadd.f32 %v12954_v39, %v11396_v0 }
 0x719   : > { %v4191_v55 = vpop.permute.xlu1 %4190  ;;  %v4221_v59 = vpop.permute.xlu0 %4220 }
 0x71a   : > { %v4316_v2 = vmul.f32 %v4191_v55, %v12792_v31  ;;  %v4322_v19 = vmul.f32 %v4221_v59, %v12788_v41  ;;  %12955 = vst [vmem:[#allocation30_spill] sm:$0xff] %v11465_v21  ;;  %v12956_v55 = vld [vmem:[#allocation36_spill] sm:$0xff] }
 0x71b   : > { %4265 = vperm.xlu0 %8731, %v4139_v30   ;;  %v11469_v59 = vadd.f32 %v12956_v55, %v11396_v0  ;;  %v12782_v30 = vmax.f32 %v11441_v62, 0.0  ;;  %12959 = vst [vmem:[#allocation36_spill] sm:$0xff] %v11476_v56 }
 0x71c   : > { %v4396_v37 = vsel %vm940_vm0, %v4316_v2, 0.0  ;;  %v4438_v22 = vsel %vm940_vm0, %v4322_v19, 0.0  ;;  %v11487_v19 = vadd.f32 %v12960_v13, %v11396_v0 }
 0x71d   : > { %v4196_v52 = vpop.permute.xlu1 %4195  ;;  %v4156_v34 = vpop.permute.xlu0 %4155  ;;  %v4397_v16 = vrot.slane %v4396_v37, 4  ;;  %12957 = vst [vmem:[#allocation29_spill] sm:$0xff] %v11469_v59 }
 0x71e   : > { %v4317_v40 = vmul.f32 %v4196_v52, %v12790_v24  ;;  %v4309_v53 = vmul.f32 %v4156_v34, %v12784_v32  ;;  %12961 = vst [vmem:[#allocation32_spill] sm:$0xff] %v11487_v19 }
 0x71f   : > { %4305 = vperm.xlu0 %8731, %v4147_v28   ;;  %v4398_v52 = vadd.f32 %v4397_v16, %v4396_v37  ;;  %v12791_v16 = vmax.f32 %v11465_v21, 0.0 }
 0x720   : > { %v4403_v3 = vsel %vm940_vm0, %v4317_v40, 0.0  ;;  %v4439_v40 = vrot.slane %v4438_v22, 4  ;;  %v4347_v36 = vsel %vm940_vm0, %v4309_v53, 0.0  ;;  %v12797_v53 = vmax.f32 %v11487_v19, 0.0 }
 0x721   : > { %v4201_v63 = vpop.permute.xlu1 %4200  ;;  %v4166_v46 = vpop.permute.xlu0 %4165  ;;  %v4404_v11 = vrot.slane %v4403_v3, 4  ;;  %v4399_v39 = vrot.slane %v4398_v52, 2  ;;  %v4348_v32 = vrot.slane %v4347_v36, 4 }
 0x722   : > { %v4318_v29 = vmul.f32 %v4201_v63, %v12789_v12  ;;  %v12785_v63 = vmax.f32 %v11455_v49, 0.0  ;;  %v4311_v4 = vmul.f32 %v4166_v46, %v12783_v1  ;;  %v4440_v13 = vadd.f32 %v4439_v40, %v4438_v22  ;;  %v12962_v40 = vld [vmem:[#allocation31_spill] sm:$0xff]  ;;  %v2582_v12 = vld [vmem:[#allocation8 + $0x8] sm:$0xff] }
 0x723   : > { %v4405_v55 = vadd.f32 %v4404_v11, %v4403_v3 }
 0x724   : > { %v4410_v37 = vsel %vm940_vm0, %v4318_v29, 0.0  ;;  %v4441_v24 = vrot.slane %v4440_v13, 2 }
 0x725   : > { %v4206_v45 = vpop.permute.xlu1 %4205  ;;  %v4171_v54 = vpop.permute.xlu0 %4170 }
 0x726   : > { %v4319_v28 = vmul.f32 %v4206_v45, %v12787_v26  ;;  %v12786_v45 = vmax.f32 %v11469_v59, 0.0  ;;  %v4312_v5 = vmul.f32 %v4171_v54, %v12785_v63  ;;  %v4361_v54 = vsel %vm940_vm0, %v4311_v4, 0.0  ;;  %v2581_v4 = vld [vmem:[#allocation8] sm:$0xff] }
 0x727   : > { %v4362_v31 = vrot.slane %v4361_v54, 4 }
 0x728   : > { %v4417_v17 = vsel %vm940_vm0, %v4319_v28, 0.0  ;;  %v4368_v11 = vsel %vm940_vm0, %v4312_v5, 0.0 }
 0x729   : > { %v4211_v2 = vpop.permute.xlu1 %4210  ;;  %v4176_v50 = vpop.permute.xlu0 %4175  ;;  %v4418_v3 = vrot.slane %v4417_v17, 4  ;;  %v4369_v34 = vrot.slane %v4368_v11, 4 }
 0x72a   : > { %v4320_v20 = vmul.f32 %v4211_v2, %v12782_v30  ;;  %v4411_v30 = vrot.slane %v4410_v37, 4  ;;  %v4313_v63 = vmul.f32 %v4176_v50, %v12791_v16 }
 0x72c   : > { %v4424_v46 = vsel %vm940_vm0, %v4320_v20, 0.0  ;;  %v11512_v20 = vadd.f32 %v12962_v40, %v11396_v0  ;;  %v4412_v50 = vadd.f32 %v4411_v30, %v4410_v37 }
 0x72d   : > { %v4216_v2 = vpop.permute.xlu1 %4215  ;;  %v4181_v29 = vpop.permute.xlu0 %4180  ;;  %v4425_v26 = vrot.slane %v4424_v46, 4 }
 0x72e   : > { %v4321_v1 = vmul.f32 %v4216_v2, %v12786_v45  ;;  %v4314_v22 = vmul.f32 %v4181_v29, %v12793_v27  ;;  %12963 = vst [vmem:[#allocation38_spill] sm:$0xff] %v11512_v20  ;;  %v4400_v2 = vadd.f32 %v4399_v39, %v4398_v52  ;;  %v4406_v45 = vrot.slane %v4405_v55, 2 }
 0x72f   : > { %v4375_v29 = vsel %vm940_vm0, %v4313_v63, 0.0  ;;  %v4419_v27 = vadd.f32 %v4418_v3, %v4417_v17  ;;  %v11519_v39 = vpack.c.bf16 %v2582_v12, %v2581_v4  ;;  %v4426_v37 = vadd.f32 %v4425_v26, %v4424_v46 }
 0x730   : > { %v4431_v28 = vsel %vm940_vm0, %v4321_v1, 0.0  ;;  %v4349_v1 = vadd.f32 %v4348_v32, %v4347_v36  ;;  %v4382_v40 = vsel %vm940_vm0, %v4314_v22, 0.0  ;;  %v4401_v56 = vrot.slane %v4400_v2, 1 }
 0x731   : > { %v4226_v41 = vpop.permute.xlu1 %4225  ;;  %v4432_v16 = vrot.slane %v4431_v28, 4  ;;  %v4407_v30 = vadd.f32 %v4406_v45, %v4405_v55  ;;  %v4413_v19 = vrot.slane %v4412_v50, 2  ;;  %v12964_v36 = vmax.f32 %v11447_v23, 0.0  ;;  %8539 = vmatprep.subr.bf16.mxu1 %v11519_v39 }
 0x732   : > { %v4323_v5 = vmul.f32 %v4226_v41, %v12797_v53  ;;  %v4376_v41 = vrot.slane %v4375_v29, 4  ;;  %v11525_v63 = vadd.f32 %v4441_v24, %v4440_v13  ;;  %v4350_v17 = vrot.slane %v4349_v1, 2 }
 0x733   : > { %v4433_v32 = vadd.f32 %v4432_v16, %v4431_v28  ;;  %v4383_v3 = vrot.slane %v4382_v40, 4  ;;  %v4363_v22 = vadd.f32 %v4362_v31, %v4361_v54  ;;  %v4420_v4 = vrot.slane %v4419_v27, 2 }
 0x734   : > { %v4445_v52 = vsel %vm940_vm0, %v4323_v5, 0.0  ;;  %v4370_v5 = vadd.f32 %v4369_v34, %v4368_v11  ;;  %v4402_v26 = vadd.f32 %v4401_v56, %v4400_v2  ;;  %v4408_v55 = vrot.slane %v4407_v30, 1 }
 0x735   : > { %v4151_v21 = vpop.permute.xlu1 %4150  ;;  %v4446_v12 = vrot.slane %v4445_v52, 4  ;;  %v4427_v46 = vrot.slane %v4426_v37, 2  ;;  %v4414_v28 = vadd.f32 %v4413_v19, %v4412_v50  ;;  %v4377_v23 = vadd.f32 %v4376_v41, %v4375_v29 }
 0x736   : > { %v4308_v53 = vmul.f32 %v4151_v21, %v12964_v36  ;;  %v4434_v21 = vrot.slane %v4433_v32, 2  ;;  %v12965_v36 = vmax.f32 %v11451_v25, 0.0  ;;  %v4351_v13 = vadd.f32 %v4350_v17, %v4349_v1 }
 0x737   : > { %v4384_v49 = vadd.f32 %v4383_v3, %v4382_v40  ;;  %v4447_v59 = vadd.f32 %v4446_v12, %v4445_v52  ;;  %v4364_v31 = vrot.slane %v4363_v22, 2  ;;  %v4421_v54 = vadd.f32 %v4420_v4, %v4419_v27 }
 0x738   : > { %v4340_v45 = vsel %vm940_vm0, %v4308_v53, 0.0  ;;  %v4371_v34 = vrot.slane %v4370_v5, 2  ;;  %v4409_v56 = vadd.f32 %v4408_v55, %v4407_v30  ;;  %v4428_v11 = vadd.f32 %v4427_v46, %v4426_v37 }
 0x739   : > { %v4341_v10 = vrot.slane %v4340_v45, 4  ;;  %v4161_v16 = vpop.permute.xlu1 %4160  ;;  %v4415_v19 = vrot.slane %v4414_v28, 1  ;;  %v4378_v50 = vrot.slane %v4377_v23, 2  ;;  %v4435_v29 = vadd.f32 %v4434_v21, %v4433_v32 }
 0x73a   : > { %v4310_v24 = vmul.f32 %v4161_v16, %v12965_v36  ;;  %v12966_v41 = vmax.f32 %v11512_v20, 0.0  ;;  %v4385_v1 = vrot.slane %v4384_v49, 2  ;;  %v4448_v40 = vrot.slane %v4447_v59, 2 }
 0x73b   : > { %v4342_v38 = vadd.f32 %v4341_v10, %v4340_v45  ;;  %v4365_v17 = vadd.f32 %v4364_v31, %v4363_v22  ;;  %v4422_v27 = vrot.slane %v4421_v54, 1  ;;  %v4372_v3 = vadd.f32 %v4371_v34, %v4370_v5 }
 0x73c   : > { %v4354_v53 = vsel %vm940_vm0, %v4310_v24, 0.0  ;;  %v4429_v30 = vrot.slane %v4428_v11, 1  ;;  %v4352_v55 = vrot.slane %v4351_v13, 1  ;;  %v4416_v46 = vadd.f32 %v4415_v19, %v4414_v28 }
 0x73d   : > { %v4343_v2 = vrot.slane %v4342_v38, 2  ;;  %v4355_v62 = vrot.slane %v4354_v53, 4  ;;  %v4186_v51 = vpop.permute.xlu1 %4185  ;;  %v4379_v36 = vadd.f32 %v4378_v50, %v4377_v23  ;;  %v4436_v32 = vrot.slane %v4435_v29, 1 }
 0x73e   : > { %v4315_v16 = vmul.f32 %v4186_v51, %v12966_v41  ;;  %v4386_v21 = vadd.f32 %v4385_v1, %v4384_v49  ;;  %v4449_v24 = vadd.f32 %v4448_v40, %v4447_v59  ;;  %v4423_v22 = vadd.f32 %v4422_v27, %v4421_v54 }
 0x73f   : > { %v4344_v52 = vadd.f32 %v4343_v2, %v4342_v38  ;;  %v4356_v10 = vadd.f32 %v4355_v62, %v4354_v53  ;;  %v4607_v38 = vsel %vm3336_vm2, %v4409_v56, %v4402_v26  ;;  %v4366_v62 = vrot.slane %v4365_v17, 1 }
 0x740   : > { %v4389_v12 = vsel %vm940_vm0, %v4315_v16, 0.0  ;;  %v4373_v5 = vrot.slane %v4372_v3, 1  ;;  %v4430_v34 = vadd.f32 %v4429_v30, %v4428_v11  ;;  %v4353_v16 = vadd.f32 %v4352_v55, %v4351_v13 }
 0x741   : > { %v4345_v37 = vrot.slane %v4344_v52, 1  ;;  %v4357_v4 = vrot.slane %v4356_v10, 2  ;;  %v4390_v45 = vrot.slane %v4389_v12, 4  ;;  %v4608_v20 = vsel %vm3338_vm3, %v4416_v46, %v4607_v38 }
 0x742   : > { %v4380_v25 = vrot.slane %v4379_v36, 1  ;;  %v4437_v28 = vadd.f32 %v4436_v32, %v4435_v29  ;;  %v4387_v23 = vrot.slane %v4386_v21, 1  ;;  %v4450_v19 = vrot.slane %v4449_v24, 1  ;;  %v2577_v32 = vld [vmem:[#allocation7] sm:$0xff] }
 0x743   : > { %v4358_v51 = vadd.f32 %v4357_v4, %v4356_v10  ;;  %v4391_v41 = vadd.f32 %v4390_v45, %v4389_v12  ;;  %v4346_v31 = vadd.f32 %v4345_v37, %v4344_v52  ;;  %v4443_v50 = vrot.slane %v11525_v63, 1  ;;  %v2583_v37 = vld [vmem:[#allocation8 + $0x10] sm:$0xff] }
 0x744   : > { %v4367_v1 = vadd.f32 %v4366_v62, %v4365_v17  ;;  %v4609_v26 = vsel %vm3340_vm4, %v4423_v22, %v4608_v20  ;;  %v4374_v56 = vadd.f32 %v4373_v5, %v4372_v3  ;;  %v4381_v52 = vadd.f32 %v4380_v25, %v4379_v36  ;;  %v2584_v20 = vld [vmem:[#allocation8 + $0x18] sm:$0xff] }
 0x745   : > { %v4359_v53 = vrot.slane %v4358_v51, 1  ;;  %v4392_v2 = vrot.slane %v4391_v41, 2  ;;  %v4600_v54 = vsel %vm3336_vm2, %v4353_v16, %v4346_v31  ;;  %v4610_v11 = vsel %vm3342_vm5, %v4430_v34, %v4609_v26 }
 0x746   : > { %v4611_v10 = vsel %vm3344_vm6, %v4437_v28, %v4610_v11  ;;  %v4388_v27 = vadd.f32 %v4387_v23, %v4386_v21  ;;  %v4451_v12 = vadd.f32 %v4450_v19, %v4449_v24  ;;  %v4444_v4 = vadd.f32 %v4443_v50, %v11525_v63  ;;  %v2578_v21 = vld [vmem:[#allocation7 + $0x8] sm:$0xff]  ;;  %v12967_v24 = vld [vmem:[#allocation48_spill] sm:$0xff] }
 0x747   : > { %v4360_v49 = vadd.f32 %v4359_v53, %v4358_v51  ;;  %v4393_v59 = vadd.f32 %v4392_v2, %v4391_v41  ;;  %v8542_v46 = vpack.c.bf16 %v2584_v20, %v2583_v37  ;;  %v11553_v63 = vpack.c.bf16 %v2578_v21, %v2577_v32  ;;  %v12969_v41 = vld [vmem:[#allocation49_spill] sm:$0xff]  ;;  %v12982_v37 = vld [vmem:[#allocation52_spill] sm:$0xff] }
 0x748   : > { %v4612_v25 = vsel %vm3346_vm7, %v4444_v4, %v4611_v10  ;;  %v11558_v51 = vadd.f32 %v12967_v24, %v11396_v0  ;;  %v11562_v38 = vadd.f32 %v12969_v41, %v11396_v0  ;;  %v11572_v5 = vadd.f32 %v11262_v57, %v11396_v0  ;;  %v12974_v28 = vld [vmem:[#allocation41_spill] sm:$0xff]  ;;  %v12986_v24 = vld [vmem:[#allocation44_spill] sm:$0xff] }
 0x749   : > { %v4601_v13 = vsel %vm3338_vm3, %v4360_v49, %v4600_v54  ;;  %v4394_v40 = vrot.slane %v4393_v59, 1  ;;  %v4613_v36 = vsel %vm3348_vm8, %v4451_v12, %v4612_v25  ;;  %v11580_v23 = vadd.f32 %v12974_v28, %v11396_v0  ;;  %v12980_v10 = vld [vmem:[#allocation53_spill] sm:$0xff] }
 0x74a   : > { %v4602_v29 = vsel %vm3340_vm4, %v4367_v1, %v4601_v13  ;;  %12968 = vst [vmem:[#allocation31_spill] sm:$0xff] %v11558_v51  ;;  %12970 = vst [vmem:[#allocation48_spill] sm:$0xff] %v11562_v38  ;;  %v12813_v62 = vmax.f32 %v11558_v51, 0.0  ;;  %v12812_v22 = vmax.f32 %v11562_v38, 0.0  ;;  %v12811_v49 = vmax.f32 %v11572_v5, 0.0 }
 0x74b   : > { %v4395_v30 = vadd.f32 %v4394_v40, %v4393_v59  ;;  %v4603_v17 = vsel %vm3342_vm5, %v4374_v56, %v4602_v29  ;;  %12975 = vst [vmem:[#allocation41_spill] sm:$0xff] %v11580_v23  ;;  %v12976_v56 = vld [vmem:[#allocation40_spill] sm:$0xff]  ;;  %v11605_v20 = vadd.f32 %v12982_v37, %v11396_v0  ;;  %v11616_v41 = vadd.f32 %v12986_v24, %v11396_v0 }
 0x74c   : > { %v4604_v3 = vsel %vm3344_vm6, %v4381_v52, %v4603_v17  ;;  %v11588_v11 = vadd.f32 %v12976_v56, %v11396_v0  ;;  %v12978_v52 = vld [vmem:[#allocation43_spill] sm:$0xff]  ;;  %v12809_v17 = vmax.f32 %v11580_v23, 0.0 }
 0x74d   : > { %v4605_v45 = vsel %vm3346_vm7, %v4388_v27, %v4604_v3  ;;  %v11596_v29 = vadd.f32 %v12978_v52, %v11396_v0  ;;  %v11600_v27 = vadd.f32 %v12980_v10, %v11396_v0  ;;  %12983 = vst [vmem:[#allocation52_spill] sm:$0xff] %v11605_v20  ;;  %v12984_v3 = vld [vmem:[#allocation42_spill] sm:$0xff]  ;;  %12987 = vst [vmem:[#allocation44_spill] sm:$0xff] %v11616_v41 }
 0x74e   : > { %v4606_v55 = vsel %vm3348_vm8, %v4395_v30, %v4605_v45  ;;  %12977 = vst [vmem:[#allocation40_spill] sm:$0xff] %v11588_v11  ;;  %v11610_v45 = vadd.f32 %v12984_v3, %v11396_v0  ;;  %v12814_v21 = vmax.f32 %v11588_v11, 0.0 }
 0x74f   : > { %8200 = vmatprep.mubr.msk.f32.mxu1 %vm940_vm0, %v4606_v55  ;;  %12979 = vst [vmem:[#allocation43_spill] sm:$0xff] %v11596_v29  ;;  %12981 = vst [vmem:[#allocation53_spill] sm:$0xff] %v11600_v27 }
 0x750   : > { %8201 = vmatmul.mubr.msk.f32.vlgmr.msra.gmra.mrb[28].mxu1 %vm940_vm0, %v4613_v36  ;;  %12985 = vst [vmem:[#allocation42_spill] sm:$0xff] %v11610_v45 }
 0x751   : > { %8541 = vmatpush3.bf16.msra.mxu1 %v11519_v39  ;;  %v12971_v39 = vld [vmem:[#allocation51_spill] sm:$0xff] }
 0x752   : > { %8543 = vmatprep.subr.bf16.mxu1 %v8542_v46  ;;  %v11568_v31 = vadd.f32 %v12971_v39, %v11396_v0  ;;  %12973 = vst [vmem:[#allocation51_spill] sm:$0xff] %v11572_v5 }
 0x754   : > { %12972 = vst [vmem:[#allocation49_spill] sm:$0xff] %v11568_v31  ;;  %v12810_v19 = vmax.f32 %v11568_v31, 0.0 }
 0x755   : > { %8545 = vmatpush3.bf16.msra.mxu1 %v8542_v46 }
 0x756   : > { %8547 = vmatprep.subr.bf16.mxu1 %v11553_v63 }
 0x77e   : > { %v4271_v34 = vpop.permute.xlu1 %4270  ;;  %v4276_v53 = vpop.permute.xlu0 %4275 }
 0x77f   : > { %v4332_v2 = vmul.f32 %v4271_v34, %v12812_v22  ;;  %v4333_v16 = vmul.f32 %v4276_v53, %v12813_v62  ;;  %v12807_v34 = vmax.f32 %v11596_v29, 0.0  ;;  %v12988_v53 = vld [vmem:[#allocation45_spill] sm:$0xff] }
 0x781   : > { %v4508_v59 = vsel %vm940_vm0, %v4332_v2, 0.0  ;;  %v4515_v57 = vsel %vm940_vm0, %v4333_v16, 0.0  ;;  %v11623_v2 = vadd.f32 %v12988_v53, %v11396_v0  ;;  %v12808_v16 = vmax.f32 %v11600_v27, 0.0  ;;  %v12992_v53 = vld [vmem:[#allocation47_spill] sm:$0xff] }
 0x782   : > { %v4509_v50 = vrot.slane %v4508_v59, 4  ;;  %v4516_v1 = vrot.slane %v4515_v57, 4  ;;  %v4286_v26 = vpop.permute.xlu1 %4285  ;;  %v4281_v54 = vpop.permute.xlu0 %4280 }
 0x783   : > { %v4335_v13 = vmul.f32 %v4286_v26, %v12810_v19  ;;  %v4334_v40 = vmul.f32 %v4281_v54, %v12811_v49  ;;  %12989 = vst [vmem:[#allocation45_spill] sm:$0xff] %v11623_v2  ;;  %v12818_v54 = vmax.f32 %v11610_v45, 0.0 }
 0x784   : > { %v4510_v12 = vadd.f32 %v4509_v50, %v4508_v59  ;;  %v4517_v30 = vadd.f32 %v4516_v1, %v4515_v57  ;;  %v12990_v59 = vld [vmem:[#allocation46_spill] sm:$0xff]  ;;  %v12806_v50 = vmax.f32 %v11605_v20, 0.0 }
 0x785   : > { %v4529_v4 = vsel %vm940_vm0, %v4335_v13, 0.0  ;;  %v4522_v46 = vsel %vm940_vm0, %v4334_v40, 0.0  ;;  %v11628_v57 = vadd.f32 %v12990_v59, %v11396_v0 }
 0x786   : > { %v4511_v55 = vrot.slane %v4510_v12, 2  ;;  %v4518_v25 = vrot.slane %v4517_v30, 2  ;;  %v4291_v36 = vpop.permute.xlu1 %4290  ;;  %v4231_v32 = vpop.permute.xlu0 %4230  ;;  %v4530_v28 = vrot.slane %v4529_v4, 4  ;;  %v4523_v1 = vrot.slane %v4522_v46, 4 }
 0x787   : > { %v4324_v39 = vmul.f32 %v4231_v32, %v12809_v17  ;;  %12991 = vst [vmem:[#allocation46_spill] sm:$0xff] %v11628_v57  ;;  %v4336_v40 = vmul.f32 %v4291_v36, %v12808_v16 }
 0x788   : > { %v4512_v56 = vadd.f32 %v4511_v55, %v4510_v12  ;;  %v4519_v13 = vadd.f32 %v4518_v25, %v4517_v30  ;;  %v11643_v12 = vadd.f32 %v12992_v53, %v11396_v0  ;;  %v11647_v30 = vadd.f32 %v11324_v14, %v11396_v0 }
 0x789   : > { %v4452_v26 = vsel %vm940_vm0, %v4324_v39, 0.0  ;;  %v12815_v39 = vmax.f32 %v11623_v2, 0.0  ;;  %v4531_v55 = vadd.f32 %v4530_v28, %v4529_v4  ;;  %v4524_v36 = vadd.f32 %v4523_v1, %v4522_v46 }
 0x78a   : > { %v4296_v52 = vpop.permute.xlu1 %4295  ;;  %v4241_v10 = vpop.permute.xlu0 %4240  ;;  %v4453_v3 = vrot.slane %v4452_v26, 4  ;;  %12993 = vst [vmem:[#allocation47_spill] sm:$0xff] %v11643_v12  ;;  %12994 = vst [vmem:[#allocation55_spill] sm:$0xff] %v11647_v30  ;;  %v4536_v53 = vsel %vm940_vm0, %v4336_v40, 0.0 }
 0x78b   : > { %v4337_v32 = vmul.f32 %v4296_v52, %v12806_v50  ;;  %v4326_v24 = vmul.f32 %v4241_v10, %v12807_v34  ;;  %v11653_v10 = vadd.f32 %v11326_v15, %v11396_v0  ;;  %v4513_v50 = vrot.slane %v4512_v56, 1 }
 0x78c   : > { %v4454_v59 = vadd.f32 %v4453_v3, %v4452_v26  ;;  %v4520_v34 = vrot.slane %v4519_v13, 1  ;;  %v4532_v26 = vrot.slane %v4531_v55, 2  ;;  %v4525_v0 = vrot.slane %v4524_v36, 2 }
 0x78d   : > { %v4466_v52 = vsel %vm940_vm0, %v4326_v24, 0.0  ;;  %12995 = vst [vmem:[#allocation56_spill] sm:$0xff] %v11653_v10  ;;  %v4543_v14 = vsel %vm940_vm0, %v4337_v32, 0.0  ;;  %v4537_v3 = vrot.slane %v4536_v53, 4  ;;  %v11666_v25 = vadd.f32 %v4513_v50, %v4512_v56 }
 0x78e   : > { %v4236_v16 = vpop.permute.xlu1 %4235  ;;  %v4251_v17 = vpop.permute.xlu0 %4250  ;;  %v4455_v19 = vrot.slane %v4454_v59, 2  ;;  %v4467_v4 = vrot.slane %v4466_v52, 4  ;;  %v4544_v32 = vrot.slane %v4543_v14, 4  ;;  %v11668_v1 = vadd.f32 %v4520_v34, %v4519_v13 }
 0x78f   : > { %v4325_v46 = vmul.f32 %v4236_v16, %v12814_v21  ;;  %v4328_v15 = vmul.f32 %v4251_v17, %v12815_v39  ;;  %v11674_v49 = vadd.f32 %v4532_v26, %v4531_v55  ;;  %v11676_v11 = vadd.f32 %v4525_v0, %v4524_v36 }
 0x790   : > { %v4468_v40 = vadd.f32 %v4467_v4, %v4466_v52  ;;  %v4456_v28 = vadd.f32 %v4455_v19, %v4454_v59  ;;  %v12996_v4 = vmax.f32 %v11616_v41, 0.0  ;;  %v4545_v50 = vadd.f32 %v4544_v32, %v4543_v14 }
 0x791   : > { %v4459_v24 = vsel %vm940_vm0, %v4325_v46, 0.0  ;;  %v4480_v62 = vsel %vm940_vm0, %v4328_v15, 0.0  ;;  %v4538_v15 = vadd.f32 %v4537_v3, %v4536_v53  ;;  %v12997_v55 = vmax.f32 %v11653_v10, 0.0 }
 0x792   : > { %v4460_v22 = vrot.slane %v4459_v24, 4  ;;  %v4246_v16 = vpop.permute.xlu1 %4245  ;;  %v4256_v21 = vpop.permute.xlu0 %4255  ;;  %v4481_v37 = vrot.slane %v4480_v62, 4  ;;  %v4469_v17 = vrot.slane %v4468_v40, 2  ;;  %v4457_v59 = vrot.slane %v4456_v28, 1 }
 0x793   : > { %v4327_v52 = vmul.f32 %v4246_v16, %v12818_v54  ;;  %v4329_v46 = vmul.f32 %v4256_v21, %v12996_v4  ;;  %v12998_v53 = vmax.f32 %v11643_v12, 0.0  ;;  %v4546_v3 = vrot.slane %v4545_v50, 2 }
 0x794   : > { %v4461_v39 = vadd.f32 %v4460_v22, %v4459_v24  ;;  %v4482_v2 = vadd.f32 %v4481_v37, %v4480_v62  ;;  %v4470_v45 = vadd.f32 %v4469_v17, %v4468_v40  ;;  %v4539_v37 = vrot.slane %v4538_v15, 2 }
 0x795   : > { %v4473_v34 = vsel %vm940_vm0, %v4327_v52, 0.0  ;;  %v4487_v19 = vsel %vm940_vm0, %v4329_v46, 0.0  ;;  %v4458_v41 = vadd.f32 %v4457_v59, %v4456_v28 }
 0x796   : > { %v4462_v56 = vrot.slane %v4461_v39, 2  ;;  %v4301_v13 = vpop.permute.xlu1 %4300  ;;  %v4261_v22 = vpop.permute.xlu0 %4260  ;;  %v4483_v24 = vrot.slane %v4482_v2, 2  ;;  %v4474_v16 = vrot.slane %v4473_v34, 4  ;;  %v4488_v54 = vrot.slane %v4487_v19, 4 }
 0x797   : > { %v4338_v36 = vmul.f32 %v4301_v13, %v12997_v55  ;;  %v4330_v62 = vmul.f32 %v4261_v22, %v12998_v53  ;;  %v12999_v22 = vmax.f32 %v11628_v57, 0.0 }
 0x798   : > { %v4463_v21 = vadd.f32 %v4462_v56, %v4461_v39  ;;  %v4484_v14 = vadd.f32 %v4483_v24, %v4482_v2  ;;  %v4475_v26 = vadd.f32 %v4474_v16, %v4473_v34  ;;  %v4489_v0 = vadd.f32 %v4488_v54, %v4487_v19 }
 0x799   : > { %v4550_v52 = vsel %vm940_vm0, %v4338_v36, 0.0  ;;  %v4494_v4 = vsel %vm940_vm0, %v4330_v62, 0.0  ;;  %v4471_v56 = vrot.slane %v4470_v45, 1  ;;  %v4527_v24 = vrot.slane %v11676_v11, 1 }
 0x79a   : > { %v4464_v32 = vrot.slane %v4463_v21, 1  ;;  %v4266_v46 = vpop.permute.xlu0 %4265  ;;  %v4476_v40 = vrot.slane %v4475_v26, 2  ;;  %v4490_v39 = vrot.slane %v4489_v0, 2  ;;  %v4551_v17 = vrot.slane %v4550_v52, 4 }
 0x79b   : > { %v4495_v55 = vrot.slane %v4494_v4, 4  ;;  %v4331_v53 = vmul.f32 %v4266_v46, %v12999_v22  ;;  %v4485_v2 = vrot.slane %v4484_v14, 1  ;;  %v4540_v16 = vadd.f32 %v4539_v37, %v4538_v15 }
 0x79c   : > { %v4465_v13 = vadd.f32 %v4464_v32, %v4463_v21  ;;  %v4477_v34 = vadd.f32 %v4476_v40, %v4475_v26  ;;  %v4491_v54 = vadd.f32 %v4490_v39, %v4489_v0  ;;  %v4552_v19 = vadd.f32 %v4551_v17, %v4550_v52 }
 0x79d   : > { %v4496_v36 = vadd.f32 %v4495_v55, %v4494_v4  ;;  %v4501_v62 = vsel %vm940_vm0, %v4331_v53, 0.0  ;;  %v4547_v32 = vadd.f32 %v4546_v3, %v4545_v50  ;;  %v4472_v20 = vadd.f32 %v4471_v56, %v4470_v45 }
 0x79e   : > { %v4306_v28 = vpop.permute.xlu0 %4305  ;;  %v4614_v59 = vsel %vm3336_vm2, %v4465_v13, %v4458_v41  ;;  %v4478_v10 = vrot.slane %v4477_v34, 1  ;;  %v4553_v12 = vrot.slane %v4552_v19, 2  ;;  %v4502_v21 = vrot.slane %v4501_v62, 4 }
 0x79f   : > { %v4497_v57 = vrot.slane %v4496_v36, 2  ;;  %v13000_v46 = vmax.f32 %v11647_v30, 0.0  ;;  %v4486_v0 = vadd.f32 %v4485_v2, %v4484_v14  ;;  %v4492_v40 = vrot.slane %v4491_v54, 1 }
 0x7a0   : > { %v4479_v52 = vadd.f32 %v4478_v10, %v4477_v34  ;;  %v4503_v39 = vadd.f32 %v4502_v21, %v4501_v62  ;;  %v4554_v15 = vadd.f32 %v4553_v12, %v4552_v19  ;;  %v4615_v17 = vsel %vm3338_vm3, %v4472_v20, %v4614_v59 }
 0x7a1   : > { %v4339_v26 = vmul.f32 %v4306_v28, %v13000_v46  ;;  %v4498_v37 = vadd.f32 %v4497_v57, %v4496_v36  ;;  %v4534_v41 = vrot.slane %v11674_v49, 1  ;;  %v4528_v50 = vadd.f32 %v4527_v24, %v11676_v11 }
 0x7a2   : > { %v4504_v13 = vrot.slane %v4503_v39, 2  ;;  %v4616_v45 = vsel %vm3340_vm4, %v4479_v52, %v4615_v17  ;;  %v4541_v3 = vrot.slane %v4540_v16, 1  ;;  %v4548_v14 = vrot.slane %v4547_v32, 1  ;;  %v8899_v17 = vld [vmem:[%s9704_s28] sm:$0xff] }
 0x7a3   : > { %v4557_v4 = vsel %vm940_vm0, %v4339_v26, 0.0  ;;  %v4499_v56 = vrot.slane %v4498_v37, 1  ;;  %v4617_v10 = vsel %vm3342_vm5, %v4486_v0, %v4616_v45  ;;  %v4493_v22 = vadd.f32 %v4492_v40, %v4491_v54  ;;  %v2579_v40 = vld [vmem:[#allocation7 + $0x10] sm:$0xff] }
 0x7a4   : > { %v4558_v55 = vrot.slane %v4557_v4, 4  ;;  %v4505_v12 = vadd.f32 %v4504_v13, %v4503_v39  ;;  %v4621_v20 = vsel %vm3336_vm2, %v11668_v1, %v11666_v25  ;;  %v4555_v53 = vrot.slane %v4554_v15, 1  ;;  %v2580_v39 = vld [vmem:[#allocation7 + $0x18] sm:$0xff] }
 0x7a5   : > { %v4500_v2 = vadd.f32 %v4499_v56, %v4498_v37  ;;  %v4535_v34 = vadd.f32 %v4534_v41, %v11674_v49  ;;  %v4618_v11 = vsel %vm3344_vm6, %v4493_v22, %v4617_v10  ;;  %v4622_v24 = vsel %vm3338_vm3, %v4528_v50, %v4621_v20  ;;  %v8900_v41 = vld [vmem:[%s9704_s28 + $0x8] sm:$0xff] }
 0x7a6   : > { %v4559_v57 = vadd.f32 %v4558_v55, %v4557_v4  ;;  %v4506_v19 = vrot.slane %v4505_v12, 1  ;;  %v4542_v62 = vadd.f32 %v4541_v3, %v4540_v16  ;;  %v4549_v28 = vadd.f32 %v4548_v14, %v4547_v32  ;;  %v8898_v4 = vld [vmem:[%s9696_s29 + $0x8] sm:$0xff] }
 0x7a7   : > { %v4556_v21 = vadd.f32 %v4555_v53, %v4554_v15  ;;  %v4619_v46 = vsel %vm3346_vm7, %v4500_v2, %v4618_v11  ;;  %v4623_v49 = vsel %vm3340_vm4, %v4535_v34, %v4622_v24  ;;  %v8897_v15 = vld [vmem:[%s9696_s29] sm:$0xff]  ;;  %v11716_v37 = vpack.c.bf16 %v2580_v39, %v2579_v40 }
 0x7a8   : > { %v4560_v36 = vrot.slane %v4559_v57, 2  ;;  %v4507_v54 = vadd.f32 %v4506_v19, %v4505_v12  ;;  %v4624_v26 = vsel %vm3342_vm5, %v4542_v62, %v4623_v49  ;;  %v4567_v13 = vrot.slane %v11389_v60, %v11042_v35 }
 0x7a9   : > { %v4625_v16 = vsel %vm3344_vm6, %v4549_v28, %v4624_v26  ;;  %13001 = vst [vmem:[#allocation57_spill] sm:$0xff] %v11716_v37 }
 0x7aa   : > { %v4561_v59 = vadd.f32 %v4560_v36, %v4559_v57  ;;  %v4620_v1 = vsel %vm3348_vm8, %v4507_v54, %v4619_v46  ;;  %v4626_v32 = vsel %vm3346_vm7, %v4556_v21, %v4625_v16 }
 0x7ab   : > { %8203 = vmatprep.mubr.msk.f32.mxu1 %vm940_vm0, %v4620_v1 }
 0x7ac   : > { %v4562_v25 = vrot.slane %v4561_v59, 1 }
 0x7ae   : > { %v4563_v0 = vadd.f32 %v4562_v25, %v4561_v59 }
 0x7b0   : > { %v4627_v52 = vsel %vm3348_vm8, %v4563_v0, %v4626_v32 }
 0x7b1   : > { %8204 = vmatmul.mubr.msk.f32.gmra.mrb[30].mxu1 %vm940_vm0, %v4627_v52 }
 0x7b2   : > { %8214 = vmatprep.mubr.msk.f32.mxu1 %vm940_vm0, %v8897_v15 }
 0x7b5   : > { %8215 = vmatmul.mubr.msk.f32.vlgmr.msra.gmra.mrb[32].mxu1 %vm940_vm0, %v8898_v4 }
 0x7b6   : > { %8549 = vmatpush3.bf16.msra.mxu1 %v11553_v63  ;;  %8217 = vmatprep.mubr.msk.f32.mxu1 %vm940_vm0, %v8899_v17 }
 0x7b7   : > { %8551 = vmatprep.subr.bf16.mxu1 %v11716_v37 }
 0x7b9   : > { %8218 = vmatmul.mubr.msk.f32.gmra.mrb[34].mxu1 %vm940_vm0, %v8900_v41 }
 0x7ba   : > { %8553 = vmatpush3.bf16.msra.mxu1 %v11716_v37 }
 0x823   : > { %v8202_v55 = vpop.f32.mrb[28].mxu1 }
 0x824   : > { %v4702_v45 = vpop.f32.mrb[29].mxu1  ;;  %v4708_v3 = vadd.f32 %v8202_v55, %v4567_v13 }
 0x825   : > { %v4703_v50 = vadd.f32 %v4702_v45, %v4567_v13 }
 0x827   : > { %8228 = vmatprep.mubr.msk.f32.mxu1 %vm940_vm0, %v4703_v50 }
 0x828   : > { %8229 = vmatmul.mubr.msk.f32.vlgmr.msra.gmra.mrb[36].mxu1 %vm940_vm0, %v4708_v3 }
 0x884   : > { %v8205_v56 = vpop.f32.mrb[30].mxu1 }
 0x885   : > { %v4712_v10 = vpop.f32.mrb[31].mxu1  ;;  %v4718_v22 = vadd.f32 %v8205_v56, %v4567_v13 }
 0x886   : > { %v4713_v14 = vadd.f32 %v4712_v10, %v4567_v13 }
 0x888   : > { %8231 = vmatprep.mubr.msk.f32.mxu1 %vm940_vm0, %v4713_v14  ;;  %v11732_v12 = vpop.f32.mrb[32].mxu1 }
 0x889   : > { %13002 = vst [vmem:[#allocation58_spill] sm:$0xff] %v11732_v12  ;;  %8232 = vmatmul.mubr.msk.f32.gmra.mrb[38].mxu1 %vm940_vm0, %v4718_v22  ;;  %v11735_v57 = vpop.f32.mrb[33].mxu1 }
 0x88a   : > { %13003 = vst [vmem:[#allocation59_spill] sm:$0xff] %v11735_v57 }
 0x88c   : > { %v11737_v60 = vpop.f32.mrb[34].mxu1 }
 0x88d   : > { %13004 = vst [vmem:[#allocation60_spill] sm:$0xff] %v11737_v60  ;;  %v11739_v20 = vpop.f32.mrb[35].mxu1 }
 0x88e   : > { %13005 = vst [vmem:[#allocation61_spill] sm:$0xff] %v11739_v20 }
 0x8fb   : > { %v8230_v53 = vpop.f32.mrb[36].mxu1 }
 0x8fc   : > { %v4890_v2 = vadd.f32 %v8230_v53, %v11732_v12  ;;  %v4884_v34 = vpop.f32.mrb[37].mxu1 }
 0x8fd   : > { %v4885_v19 = vadd.f32 %v4884_v34, %v11735_v57 }
 0x8fe   : > { %v4904_v25 = vmax.f32 %v4890_v2, 0.0 }
 0x8ff   : > { %v4903_v28 = vmax.f32 %v4885_v19, 0.0 }
 0x900   : > { %v4908_v0 = vadd.f32 %v8898_v4, %v4904_v25 }
 0x901   : > { %v4907_v1 = vadd.f32 %v8897_v15, %v4903_v28  ;;  %v4983_v28 = vld [vmem:[#allocation13 + $0x18] sm:$0xff] }
 0x902   : > { %v4914_v32 = vsel %vm940_vm0, %v4908_v0, 0.0 }
 0x903   : > { %v4911_v16 = vsel %vm940_vm0, %v4907_v1, 0.0 }
 0x95c   : > { %v8233_v36 = vpop.f32.mrb[38].mxu1 }
 0x95d   : > { %v4900_v11 = vadd.f32 %v8233_v36, %v11737_v60  ;;  %v4894_v24 = vpop.f32.mrb[39].mxu1  ;;  %v4980_v36 = vld [vmem:[#allocation13] sm:$0xff] }
 0x95e   : > { %v4895_v62 = vadd.f32 %v4894_v24, %v11739_v20  ;;  %v4982_v24 = vld [vmem:[#allocation13 + $0x10] sm:$0xff] }
 0x95f   : > { %v4906_v59 = vmax.f32 %v4900_v11, 0.0  ;;  %v4981_v11 = vld [vmem:[#allocation13 + $0x8] sm:$0xff] }
 0x960   : > { %v4905_v54 = vmax.f32 %v4895_v62, 0.0  ;;  %v8554_v62 = vpack.c.bf16 %v4981_v11, %v4980_v36 }
 0x961   : > { %v4910_v21 = vadd.f32 %v8900_v41, %v4906_v59  ;;  %v8558_v59 = vpack.c.bf16 %v4983_v28, %v4982_v24 }
 0x962   : > { %v4909_v46 = vadd.f32 %v8899_v17, %v4905_v54  ;;  %8555 = vmatprep.subr.bf16.mxu1 %v8554_v62 }
 0x963   : > { %v4920_v49 = vsel %vm940_vm0, %v4910_v21, 0.0  ;;  %8557 = vmatpush3.bf16.msra.mxu1 %v8554_v62  ;;  %v13008_v62 = vld [vmem:[#allocation24_spill] sm:$0xff] }
 0x964   : > { %4921 = vadd.xlane.f32.xlu0 %v4920_v49  ;;  %v4917_v26 = vsel %vm940_vm0, %v4909_v46, 0.0  ;;  %8559 = vmatprep.subr.bf16.mxu1 %v8558_v59 }
 0x965   : > { %4918 = vadd.xlane.f32.xlu1 %v4917_v26 }
 0x967   : > { %8561 = vmatpush3.bf16.msra.mxu1 %v8558_v59 }
 0x968   : > { %4912 = vadd.xlane.f32.xlu0 %v4911_v16 }
 0x96c   : > { %4915 = vadd.xlane.f32.xlu0 %v4914_v32 }
 0x9f1   : > { %v4922_v52 = vpop.xlane.xlu0 %4921 }
 0x9f2   : > { %v4927_v40 = vmul.f32 0.03125, %v4922_v52  ;;  %v4919_v39 = vpop.xlane.xlu1 %4918 }
 0x9f3   : > { %v4926_v41 = vmul.f32 0.03125, %v4919_v39  ;;  %v8901_v39 = vld [vmem:[%s12931_s9] sm:$0xff] }
 0x9f4   : > { %v4931_v17 = vsub.f32 %v4910_v21, %v4927_v40 }
 0x9f5   : > { %v4930_v13 = vsub.f32 %v4909_v46, %v4926_v41  ;;  %v4913_v15 = vpop.xlane.xlu0 %4912  ;;  %v11757_v41 = vrot.slane %v8901_v39, %v11030_v7 }
 0x9f6   : > { %v4924_v55 = vmul.f32 0.03125, %v4913_v15  ;;  %v4935_v45 = vmul.f32 %v4931_v17, %v4931_v17 }
 0x9f7   : > { %v4934_v50 = vmul.f32 %v4930_v13, %v4930_v13  ;;  %13006 = vst [vmem:[#allocation62_spill] sm:$0xff] %v11757_v41 }
 0x9f8   : > { %v4928_v3 = vsub.f32 %v4907_v1, %v4924_v55  ;;  %v4945_v56 = vsel %vm940_vm0, %v4935_v45, 0.0 }
 0x9f9   : > { %4946 = vadd.xlane.f32.xlu0 %v4945_v56  ;;  %v4916_v4 = vpop.xlane.xlu0 %4915  ;;  %v4942_v10 = vsel %vm940_vm0, %v4934_v50, 0.0  ;;  %v11760_v56 = vrot.slane %v8901_v39, %v11036_v43 }
 0x9fa   : > { %v4925_v14 = vmul.f32 0.03125, %v4916_v4  ;;  %4943 = vadd.xlane.f32.xlu1 %v4942_v10  ;;  %v4932_v22 = vmul.f32 %v4928_v3, %v4928_v3 }
 0x9fb   : > { %13007 = vst [vmem:[#allocation63_spill] sm:$0xff] %v11760_v56 }
 0x9fc   : > { %v4929_v53 = vsub.f32 %v4908_v0, %v4925_v14  ;;  %v4936_v2 = vsel %vm940_vm0, %v4932_v22, 0.0 }
 0x9fe   : > { %4937 = vadd.xlane.f32.xlu1 %v4936_v2  ;;  %v4933_v34 = vmul.f32 %v4929_v53, %v4929_v53 }
 0xa00   : > { %v4939_v19 = vsel %vm940_vm0, %v4933_v34, 0.0 }
 0xa01   : > { %4940 = vadd.xlane.f32.xlu0 %v4939_v19 }
 0xa86   : > { %v4947_v54 = vpop.xlane.xlu0 %4946 }
 0xa87   : > { %v4951_v21 = vmul.f32 0.03125, %v4947_v54  ;;  %v4944_v46 = vpop.xlane.xlu1 %4943 }
 0xa88   : > { %v4950_v25 = vmul.f32 0.03125, %v4944_v46 }
 0xa89   : > { %v4955_v1 = vadd.f32 1e-05, %v4951_v21 }
 0xa8a   : > { %v4954_v49 = vadd.f32 1e-05, %v4950_v25 }
 0xa8b   : > { %8805 = vrsqrt.f32 %v4955_v1  ;;  %v4938_v26 = vpop.xlane.xlu1 %4937 }
 0xa8c   : > { %8807 = vrsqrt.f32 %v4954_v49  ;;  %v4948_v0 = vmul.f32 0.03125, %v4938_v26 }
 0xa8e   : > { %v4952_v16 = vadd.f32 1e-05, %v4948_v0  ;;  %v4941_v32 = vpop.xlane.xlu0 %4940 }
 0xa8f   : > { %v4949_v52 = vmul.f32 0.03125, %v4941_v32 }
 0xa90   : > { %8809 = vrsqrt.f32 %v4952_v16 }
 0xa91   : > { %v4953_v40 = vadd.f32 1e-05, %v4949_v52 }
 0xa93   : > { %8811 = vrsqrt.f32 %v4953_v40 }
 0xa95   : > { %v8806_v15 = vpop.eup %8805 }
 0xa96   : > { %v8808_v55 = vpop.eup %8807  ;;  %v4963_v45 = vmul.f32 %v8806_v15, %v4931_v17 }
 0xa97   : > { %v4962_v50 = vmul.f32 %v8808_v55, %v4930_v13  ;;  %v8902_v55 = vld [vmem:[%s10387_s19 + $0x40] sm:$0xff] }
 0xa98   : > { %v4971_v4 = vmul.f32 %v11757_v41, %v4963_v45 }
 0xa99   : > { %v4970_v10 = vmul.f32 %v11757_v41, %v4962_v50 }
 0xa9a   : > { %v8810_v14 = vpop.eup %8809  ;;  %v4979_v34 = vadd.f32 %v11760_v56, %v4971_v4 }
 0xa9b   : > { %v4978_v22 = vadd.f32 %v11760_v56, %v4970_v10  ;;  %v4960_v2 = vmul.f32 %v8810_v14, %v4928_v3 }
 0xa9d   : > { %v8812_v19 = vpop.eup %8811  ;;  %8242 = vmatprep.mubr.msk.f32.mxu1 %vm940_vm0, %v4978_v22  ;;  %v4968_v36 = vmul.f32 %v11757_v41, %v4960_v2  ;;  %v8903_v2 = vld [vmem:[%s10387_s19] sm:$0xff] }
 0xa9e   : > { %8243 = vmatmul.mubr.msk.f32.vlgmr.msra.gmra.mrb[40].mxu1 %vm940_vm0, %v4979_v34  ;;  %v4961_v17 = vmul.f32 %v8812_v19, %v4929_v53 }
 0xa9f   : > { %v4976_v13 = vadd.f32 %v11760_v56, %v4968_v36 }
 0xaa0   : > { %v4969_v11 = vmul.f32 %v11757_v41, %v4961_v17  ;;  %v8904_v17 = vld [vmem:[%s10387_s19 + $0x8] sm:$0xff] }
 0xaa1   : > { %8245 = vmatprep.mubr.msk.f32.mxu1 %vm940_vm0, %v4976_v13 }
 0xaa2   : > { %v4977_v24 = vadd.f32 %v11760_v56, %v4969_v11  ;;  %v8905_v11 = vld [vmem:[%s10387_s19 + $0x48] sm:$0xff] }
 0xaa4   : > { %8246 = vmatmul.mubr.msk.f32.gmra.mrb[42].mxu1 %vm940_vm0, %v4977_v24 }
 0xb71   : > { %v8244_v3 = vpop.f32.mrb[40].mxu1 }
 0xb72   : > { %v5145_v28 = vrot.slane %v8244_v3, %v13008_v62  ;;  %v5066_v59 = vpop.f32.mrb[41].mxu1  ;;  %v5138_v54 = vcombine.high %v8244_v3, %v8244_v3 }
 0xb73   : > { %v5089_v21 = vcombine.high %v5066_v59, %v5066_v59  ;;  %v5096_v46 = vrot.slane %v5066_v59, %v13008_v62 }
 0xb74   : > { %v5153_v53 = vcombine.high %v5145_v28, %v5145_v28  ;;  %v5161_v25 = vrot.slane %v5145_v28, %v13008_v62  ;;  %v11782_v0 = vrot.slane %v5138_v54, %v13008_v62 }
 0xb75   : > { %v5104_v1 = vcombine.high %v5096_v46, %v5096_v46  ;;  %v5112_v49 = vrot.slane %v5096_v46, %v13008_v62  ;;  %v5103_v16 = vrot.slane %v5089_v21, %v13008_v62 }
 0xb76   : > { %v11779_v26 = vrot.slane %v5153_v53, %v13008_v62  ;;  %v5320_v39 = vrot.slane %v5161_v25, %v10641_v6  ;;  %v5168_v10 = vrot.slane %v11782_v0, %v13008_v62  ;;  %v5183_v14 = vcombine.high %v5161_v25, %v5161_v25 }
 0xb77   : > { %v5126_v32 = vrot.slane %v5104_v1, %v13008_v62  ;;  %v11786_v52 = vpop.f32.mrb[42].mxu1  ;;  %v5288_v15 = vrot.slane %v5112_v49, %v10641_v6  ;;  %v11799_v22 = vrot.slane %v5103_v16, %v13008_v62  ;;  %v5105_v21 = vcombine.high %v5103_v16, %v5103_v16  ;;  %v8908_v16 = vld [vmem:[%s10387_s19 + $0x60] sm:$0xff] }
 0xb78   : > { %v11788_v40 = vpop.f32.mrb[43].mxu1  ;;  %v5453_v45 = vmul.f32 %v8902_v55, %v5320_v39  ;;  %v5324_v4 = vrot.slane %v11779_v26, %v10641_v6  ;;  %v5328_v28 = vrot.slane %v5183_v14, %v10641_v6  ;;  %v5184_v59 = vcombine.high %v5168_v10, %v5168_v10  ;;  %v8906_v39 = vld [vmem:[%s10387_s19 + $0x20] sm:$0xff]  ;;  %v8907_v55 = vld [vmem:[%s10387_s19 + $0x50] sm:$0xff] }
 0xb79   : > { %v5292_v50 = vrot.slane %v5126_v32, %v10641_v6  ;;  %v5445_v34 = vmul.f32 %v8903_v2, %v5288_v15  ;;  %v5304_v3 = vrot.slane %v11799_v22, %v10641_v6  ;;  %v5134_v46 = vcombine.high %v5112_v49, %v5112_v49 }
 0xb7a   : > { %v5501_v19 = vsel %vm940_vm0, %v5453_v45, 0.0  ;;  %v5454_v24 = vmul.f32 %v8905_v11, %v5324_v4  ;;  %v5336_v53 = vrot.slane %v5168_v10, %v10641_v6  ;;  %v5136_v25 = vcombine.high %v5126_v32, %v5126_v32 }
 0xb7b   : > { %v5477_v36 = vsel %vm940_vm0, %v5445_v34, 0.0  ;;  %v5446_v13 = vmul.f32 %v8904_v17, %v5292_v50  ;;  %5502 = vadd.xlane.f32.xlu0 %v5501_v19  ;;  %v5449_v15 = vmul.f32 %v8906_v39, %v5304_v3  ;;  %v5455_v45 = vmul.f32 %v8907_v55, %v5328_v28  ;;  %v8910_v3 = vld [vmem:[%s10387_s19 + $0x10] sm:$0xff]  ;;  %v8912_v55 = vld [vmem:[%s10387_s19 + $0x28] sm:$0xff] }
 0xb7c   : > { %5478 = vadd.xlane.f32.xlu1 %v5477_v36  ;;  %v5504_v1 = vsel %vm940_vm0, %v5454_v24, 0.0  ;;  %v5344_v50 = vrot.slane %v5184_v59, %v10641_v6  ;;  %v5154_v4 = vcombine.high %v11782_v0, %v11782_v0  ;;  %v11819_v49 = vrot.slane %v11788_v40, %v13008_v62  ;;  %v8909_v0 = vld [vmem:[%s10387_s19 + $0x70] sm:$0xff] }
 0xb7d   : > { %v5480_v54 = vsel %vm940_vm0, %v5446_v13, 0.0  ;;  %v5457_v32 = vmul.f32 %v8908_v16, %v5336_v53  ;;  %v5300_v10 = vrot.slane %v5136_v25, %v10641_v6  ;;  %v5296_v14 = vrot.slane %v5134_v46, %v10641_v6 }
 0xb7e   : > { %v11825_v2 = vrot.slane %v5105_v21, %v13008_v62  ;;  %v5489_v34 = vsel %vm940_vm0, %v5449_v15, 0.0  ;;  %v5507_v19 = vsel %vm940_vm0, %v5455_v45, 0.0  ;;  %v5459_v36 = vmul.f32 %v8909_v0, %v5344_v50  ;;  %v8914_v0 = vld [vmem:[%s10421_s16] sm:$0xff] }
 0xb7f   : > { %5481 = vadd.xlane.f32.xlu0 %v5480_v54  ;;  %v5185_v17 = vcombine.high %v11779_v26, %v11779_v26  ;;  %v5243_v13 = vrot.slane %v11786_v52, %v13008_v62  ;;  %v11836_v11 = vrot.slane %v11819_v49, %v13008_v62  ;;  %v5513_v24 = vsel %vm940_vm0, %v5457_v32, 0.0  ;;  %v8911_v54 = vld [vmem:[%s10387_s19 + $0x18] sm:$0xff] }
 0xb80   : > { %5505 = vadd.xlane.f32.xlu1 %v5504_v1  ;;  %v5447_v28 = vmul.f32 %v8910_v3, %v5296_v14  ;;  %v5308_v59 = vrot.slane %v11825_v2, %v10641_v6  ;;  %v5519_v26 = vsel %vm940_vm0, %v5459_v36, 0.0  ;;  %v5448_v21 = vmul.f32 %v8911_v54, %v5300_v10 }
 0xb81   : > { %v5332_v46 = vrot.slane %v5185_v17, %v10641_v6  ;;  %v5182_v53 = vrot.slane %v5154_v4, %v13008_v62  ;;  %v5236_v25 = vcombine.high %v11786_v52, %v11786_v52  ;;  %v5251_v1 = vcombine.high %v5243_v13, %v5243_v13  ;;  %v8913_v4 = vld [vmem:[%s10387_s19 + $0x58] sm:$0xff] }
 0xb82   : > { %v5259_v39 = vrot.slane %v5243_v13, %v13008_v62  ;;  %v5483_v15 = vsel %vm940_vm0, %v5447_v28, 0.0  ;;  %v5450_v45 = vmul.f32 %v8912_v55, %v5308_v59  ;;  %v5352_v50 = vrot.slane %v11836_v11, %v10641_v6 }
 0xb83   : > { %5490 = vadd.xlane.f32.xlu0 %v5489_v34  ;;  %v5486_v16 = vsel %vm940_vm0, %v5448_v21, 0.0  ;;  %v5456_v32 = vmul.f32 %v8913_v4, %v5332_v46  ;;  %v5340_v10 = vrot.slane %v5182_v53, %v10641_v6  ;;  %v5135_v52 = vcombine.high %v11799_v22, %v11799_v22 }
 0xb84   : > { %5508 = vadd.xlane.f32.xlu1 %v5507_v19  ;;  %v11859_v14 = vrot.slane %v5236_v25, %v13008_v62  ;;  %v11862_v34 = vrot.slane %v5251_v1, %v13008_v62  ;;  %v5492_v19 = vsel %vm940_vm0, %v5450_v45, 0.0  ;;  %v5461_v36 = vmul.f32 %v8914_v0, %v5352_v50  ;;  %v8916_v1 = vld [vmem:[%s10387_s19 + $0x30] sm:$0xff] }
 0xb85   : > { %v5384_v17 = vrot.slane %v5259_v39, %v10641_v6  ;;  %v5510_v13 = vsel %vm940_vm0, %v5456_v32, 0.0  ;;  %v5312_v3 = vrot.slane %v5135_v52, %v10641_v6  ;;  %v5186_v28 = vcombine.high %v5182_v53, %v5182_v53 }
 0xb86   : > { %v5187_v59 = vcombine.high %v11788_v40, %v11788_v40  ;;  %v11876_v54 = vrot.slane %v11859_v14, %v13008_v62  ;;  %v5281_v21 = vcombine.high %v5259_v39, %v5259_v39  ;;  %v5525_v46 = vsel %vm940_vm0, %v5461_v36, 0.0  ;;  %v8917_v40 = vld [vmem:[%s10421_s16 + $0x40] sm:$0xff] }
 0xb87   : > { %5520 = vadd.xlane.f32.xlu0 %v5519_v26  ;;  %v5202_v26 = vcombine.high %v11819_v49, %v11819_v49  ;;  %v5388_v25 = vrot.slane %v11862_v34, %v10641_v6  ;;  %v5469_v55 = vmul.f32 %v8917_v40, %v5384_v17  ;;  %v5348_v49 = vrot.slane %v5186_v28, %v10641_v6 }
 0xb88   : > { %5514 = vadd.xlane.f32.xlu1 %v5513_v24  ;;  %v8915_v24 = vld [vmem:[%s10387_s19 + $0x68] sm:$0xff]  ;;  %v5201_v45 = vrot.slane %v5187_v59, %v13008_v62  ;;  %v5232_v50 = vcombine.high %v11836_v11, %v11836_v11  ;;  %v5392_v32 = vrot.slane %v5281_v21, %v10641_v6  ;;  %v5400_v36 = vrot.slane %v11876_v54, %v10641_v6  ;;  %v8921_v59 = vld [vmem:[%s10421_s16 + $0x60] sm:$0xff] }
 0xb89   : > { %v5458_v22 = vmul.f32 %v8915_v24, %v5340_v10  ;;  %v11887_v39 = vrot.slane %v5202_v26, %v13008_v62  ;;  %v5549_v52 = vsel %vm940_vm0, %v5469_v55, 0.0  ;;  %v8920_v24 = vld [vmem:[%s10421_s16 + $0x50] sm:$0xff] }
 0xb8a   : > { %v5203_v17 = vcombine.high %v5201_v45, %v5201_v45  ;;  %v5217_v11 = vrot.slane %v5201_v45, %v13008_v62  ;;  %v5473_v26 = vmul.f32 %v8921_v59, %v5400_v36  ;;  %v8923_v45 = vld [vmem:[%s10421_s16 + $0x8] sm:$0xff]  ;;  %v8925_v36 = vld [vmem:[%s10387_s19 + $0x38] sm:$0xff] }
 0xb8b   : > { %5487 = vadd.xlane.f32.xlu0 %v5486_v16  ;;  %v5516_v53 = vsel %vm940_vm0, %v5458_v22, 0.0  ;;  %v8918_v16 = vld [vmem:[%s10421_s16 + $0x48] sm:$0xff]  ;;  %v5471_v22 = vmul.f32 %v8920_v24, %v5392_v32  ;;  %v5356_v21 = vrot.slane %v11887_v39, %v10641_v6  ;;  %v8927_v59 = vld [vmem:[%s10421_s16 + $0x58] sm:$0xff] }
 0xb8c   : > { %5484 = vadd.xlane.f32.xlu1 %v5483_v15  ;;  %v5451_v15 = vmul.f32 %v8916_v1, %v5312_v3  ;;  %v5470_v4 = vmul.f32 %v8918_v16, %v5388_v25  ;;  %v5360_v3 = vrot.slane %v5232_v50, %v10641_v6  ;;  %v5252_v25 = vcombine.high %v11859_v14, %v11859_v14  ;;  %v8922_v1 = vld [vmem:[%s10421_s16 + $0x10] sm:$0xff] }
 0xb8d   : > { %v5368_v40 = vrot.slane %v5217_v11, %v10641_v6  ;;  %v5231_v55 = vrot.slane %v5203_v17, %v13008_v62  ;;  %v5462_v50 = vmul.f32 %v8923_v45, %v5356_v21  ;;  %v5283_v14 = vcombine.high %v11862_v34, %v11862_v34  ;;  %v8926_v34 = vld [vmem:[%s10421_s16 + $0x28] sm:$0xff] }
 0xb8e   : > { %v5495_v10 = vsel %vm940_vm0, %v5451_v15, 0.0  ;;  %v5463_v15 = vmul.f32 %v8922_v1, %v5360_v3  ;;  %v5233_v32 = vcombine.high %v5217_v11, %v5217_v11  ;;  %v5234_v21 = vcombine.high %v11887_v39, %v11887_v39  ;;  %v8929_v1 = vld [vmem:[%s10421_s16 + $0x68] sm:$0xff] }
 0xb8f   : > { %5493 = vadd.xlane.f32.xlu0 %v5492_v19  ;;  %v8919_v19 = vld [vmem:[%s10387_s19 + $0x78] sm:$0xff]  ;;  %v5282_v39 = vcombine.high %v11876_v54, %v11876_v54 }
 0xb90   : > { %5511 = vadd.xlane.f32.xlu1 %v5510_v13  ;;  %v5460_v0 = vmul.f32 %v8919_v19, %v5348_v49  ;;  %v5552_v13 = vsel %vm940_vm0, %v5470_v4, 0.0  ;;  %v5561_v49 = vsel %vm940_vm0, %v5473_v26, 0.0  ;;  %v5531_v16 = vsel %vm940_vm0, %v5463_v15, 0.0  ;;  %v8924_v19 = vld [vmem:[%s10421_s16 + $0x20] sm:$0xff] }
 0xb91   : > { %v5372_v4 = vrot.slane %v5231_v55, %v10641_v6 }
 0xb92   : > { %v5522_v28 = vsel %vm940_vm0, %v5460_v0, 0.0  ;;  %v5465_v0 = vmul.f32 %v8924_v19, %v5368_v40  ;;  %v5408_v19 = vrot.slane %v5282_v39, %v10641_v6 }
 0xb93   : > { %5526 = vadd.xlane.f32.xlu0 %v5525_v46  ;;  %v5137_v46 = vcombine.high %v11825_v2, %v11825_v2  ;;  %v5466_v24 = vmul.f32 %v8926_v34, %v5372_v4  ;;  %v8931_v4 = vld [vmem:[%s10421_s16 + $0x18] sm:$0xff] }
 0xb94   : > { %5517 = vadd.xlane.f32.xlu1 %v5516_v53  ;;  %v5555_v53 = vsel %vm940_vm0, %v5471_v22, 0.0  ;;  %v5376_v22 = vrot.slane %v5233_v32, %v10641_v6  ;;  %v5537_v3 = vsel %vm940_vm0, %v5465_v0, 0.0  ;;  %v8932_v0 = vld [vmem:[%s10421_s16 + $0x78] sm:$0xff] }
 0xb95   : > { %v5316_v2 = vrot.slane %v5137_v46, %v10641_v6  ;;  %v5540_v46 = vsel %vm940_vm0, %v5466_v24, 0.0 }
 0xb97   : > { %5496 = vadd.xlane.f32.xlu0 %v5495_v10  ;;  %v5280_v10 = vrot.slane %v5252_v25, %v13008_v62  ;;  %v5452_v17 = vmul.f32 %v8925_v36, %v5316_v2  ;;  %v5235_v62 = vcombine.high %v5231_v55, %v5231_v55  ;;  %v8928_v25 = vld [vmem:[%s10421_s16 + $0x30] sm:$0xff]  ;;  %v8930_v2 = vld [vmem:[%s10421_s16 + $0x38] sm:$0xff] }
 0xb98   : > { %5550 = vadd.xlane.f32.xlu1 %v5549_v52  ;;  %v5528_v52 = vsel %vm940_vm0, %v5462_v50, 0.0 }
 0xb99   : > { %v5404_v11 = vrot.slane %v5280_v10, %v10641_v6  ;;  %v5380_v40 = vrot.slane %v5235_v62, %v10641_v6  ;;  %v5284_v45 = vcombine.high %v5280_v10, %v5280_v10 }
 0xb9b   : > { %5553 = vadd.xlane.f32.xlu0 %v5552_v13  ;;  %v5396_v13 = vrot.slane %v5283_v14, %v10641_v6  ;;  %v5474_v15 = vmul.f32 %v8929_v1, %v5404_v11  ;;  %v5468_v14 = vmul.f32 %v8930_v2, %v5380_v40 }
 0xb9c   : > { %5523 = vadd.xlane.f32.xlu1 %v5522_v28  ;;  %v5498_v28 = vsel %vm940_vm0, %v5452_v17, 0.0  ;;  %v8933_v17 = vld [vmem:[%s10421_s16 + $0x70] sm:$0xff]  ;;  %s13082_s16 = sld [smem:[#allocation81_spill]] }
 0xb9d   : > { %v5472_v26 = vmul.f32 %v8927_v59, %v5396_v13  ;;  %v5546_v10 = vsel %vm940_vm0, %v5468_v14, 0.0  ;;  %v5475_v13 = vmul.f32 %v8933_v17, %v5408_v19 }
 0xb9f   : > { %5556 = vadd.xlane.f32.xlu0 %v5555_v53  ;;  %v5467_v53 = vmul.f32 %v8928_v25, %v5376_v22  ;;  %v5558_v55 = vsel %vm940_vm0, %v5472_v26, 0.0  ;;  %v5567_v24 = vsel %vm940_vm0, %v5475_v13, 0.0 }
 0xba0   : > { %5562 = vadd.xlane.f32.xlu1 %v5561_v49  ;;  %v5364_v49 = vrot.slane %v5234_v21, %v10641_v6 }
 0xba1   : > { %v5543_v50 = vsel %vm940_vm0, %v5467_v53, 0.0 }
 0xba2   : > { %v5464_v32 = vmul.f32 %v8931_v4, %v5364_v49 }
 0xba3   : > { %5532 = vadd.xlane.f32.xlu0 %v5531_v16  ;;  %v5564_v16 = vsel %vm940_vm0, %v5474_v15, 0.0 }
 0xba4   : > { %5529 = vadd.xlane.f32.xlu1 %v5528_v52  ;;  %v5412_v52 = vrot.slane %v5284_v45, %v10641_v6  ;;  %v5534_v54 = vsel %vm940_vm0, %v5464_v32, 0.0 }
 0xba6   : > { %v5476_v36 = vmul.f32 %v8932_v0, %v5412_v52 }
 0xba7   : > { %5538 = vadd.xlane.f32.xlu0 %v5537_v3 }
 0xba8   : > { %5499 = vadd.xlane.f32.xlu1 %v5498_v28  ;;  %v5570_v34 = vsel %vm940_vm0, %v5476_v36, 0.0 }
 0xbab   : > { %5541 = vadd.xlane.f32.xlu0 %v5540_v46 }
 0xbac   : > { %5559 = vadd.xlane.f32.xlu1 %v5558_v55 }
 0xbaf   : > { %5544 = vadd.xlane.f32.xlu0 %v5543_v50 }
 0xbb0   : > { %5565 = vadd.xlane.f32.xlu1 %v5564_v16 }
 0xbb3   : > { %5547 = vadd.xlane.f32.xlu0 %v5546_v10 }
 0xbb4   : > { %5535 = vadd.xlane.f32.xlu1 %v5534_v54 }
 0xbb7   : > { %5571 = vadd.xlane.f32.xlu0 %v5570_v34 }
 0xbb8   : > { %5568 = vadd.xlane.f32.xlu1 %v5567_v24 }
 0xc08   : > { %v11954_v22 = vpop.xlane.xlu0 %5502 }
 0xc09   : > { %v11956_v11 = vpop.xlane.xlu1 %5478  ;;  %v5640_v55 = vrot.slane %v11954_v22, %v10845_v47 }
 0xc0a   : > { %v5608_v34 = vrot.slane %v11956_v11, %v10845_v47 }
 0xc0c   : > { %v11958_v62 = vpop.xlane.xlu0 %5481 }
 0xc0d   : > { %v11960_v3 = vpop.xlane.xlu1 %5505  ;;  %v5612_v10 = vrot.slane %v11958_v62, %v10845_v47 }
 0xc0e   : > { %v5644_v15 = vrot.slane %v11960_v3, %v10845_v47 }
 0xc10   : > { %v11962_v28 = vpop.xlane.xlu0 %5490  ;;  %v5740_v50 = vsel %vm3336_vm2, %v5644_v15, %v5640_v55 }
 0xc11   : > { %v11964_v59 = vpop.xlane.xlu1 %5508 }
 0xc12   : > { %v5648_v40 = vrot.slane %v11964_v59, %v10845_v47 }
 0xc14   : > { %v11966_v26 = vpop.xlane.xlu0 %5520  ;;  %v5741_v2 = vsel %vm3338_vm3, %v5648_v40, %v5740_v50  ;;  %v5733_v40 = vsel %vm3336_vm2, %v5612_v10, %v5608_v34 }
 0xc15   : > { %v11968_v21 = vpop.xlane.xlu1 %5514  ;;  %v5664_v0 = vrot.slane %v11966_v26, %v10845_v47 }
 0xc16   : > { %v5656_v4 = vrot.slane %v11968_v21, %v10845_v47 }
 0xc18   : > { %v11970_v46 = vpop.xlane.xlu0 %5487 }
 0xc19   : > { %v11972_v25 = vpop.xlane.xlu1 %5484 }
 0xc1a   : > { %v5616_v36 = vrot.slane %v11972_v25, %v10845_v47 }
 0xc1c   : > { %v11974_v53 = vpop.xlane.xlu0 %5493 }
 0xc1d   : > { %v11976_v1 = vpop.xlane.xlu1 %5511 }
 0xc1e   : > { %v5652_v49 = vrot.slane %v11976_v1, %v10845_v47 }
 0xc20   : > { %v11986_v45 = vpop.xlane.xlu0 %5526  ;;  %v5742_v14 = vsel %vm3340_vm4, %v5652_v49, %v5741_v2  ;;  %v5734_v49 = vsel %vm3338_vm3, %v5616_v36, %v5733_v40 }
 0xc21   : > { %v11988_v39 = vpop.xlane.xlu1 %5517  ;;  %v5743_v19 = vsel %vm3342_vm5, %v5656_v4, %v5742_v14 }
 0xc22   : > { %v5660_v16 = vrot.slane %v11988_v39, %v10845_v47 }
 0xc24   : > { %v11997_v32 = vpop.xlane.xlu0 %5496  ;;  %v5744_v54 = vsel %vm3344_vm6, %v5660_v16, %v5743_v19  ;;  %v5620_v16 = vrot.slane %v11970_v46, %v10845_v47  ;;  %v5624_v19 = vrot.slane %v11962_v28, %v10845_v47 }
 0xc25   : > { %v11999_v52 = vpop.xlane.xlu1 %5550  ;;  %v5745_v15 = vsel %vm3346_vm7, %v5664_v0, %v5744_v54  ;;  %v5628_v0 = vrot.slane %v11974_v53, %v10845_v47  ;;  %v5632_v36 = vrot.slane %v11997_v32, %v10845_v47 }
 0xc26   : > { %v5735_v4 = vsel %vm3340_vm4, %v5620_v16, %v5734_v49 }
 0xc27   : > { %v5736_v34 = vsel %vm3342_vm5, %v5624_v19, %v5735_v4 }
 0xc28   : > { %v12009_v17 = vpop.xlane.xlu0 %5553 }
 0xc29   : > { %v12011_v13 = vpop.xlane.xlu1 %5523  ;;  %v5708_v19 = vrot.slane %v12009_v17, %v10845_v47 }
 0xc2a   : > { %v5668_v24 = vrot.slane %v12011_v13, %v10845_v47 }
 0xc2c   : > { %v5746_v55 = vsel %vm3348_vm8, %v5668_v24, %v5745_v15  ;;  %v12021_v50 = vpop.xlane.xlu0 %5556 }
 0xc2d   : > { %v12023_v2 = vpop.xlane.xlu1 %5562  ;;  %v5768_v14 = vsel %vm3375_vm9, %v5746_v55, -inf  ;;  %v5737_v55 = vsel %vm3344_vm6, %v5628_v0, %v5736_v34  ;;  %v5712_v34 = vrot.slane %v12021_v50, %v10845_v47 }
 0xc2e   : > { %5769 = vmax.xlane.f32.xlu0 %v5768_v14  ;;  %v5738_v49 = vsel %vm3346_vm7, %v5632_v36, %v5737_v55  ;;  %v5672_v36 = vrot.slane %v11986_v45, %v10845_v47 }
 0xc30   : > { %v12031_v10 = vpop.xlane.xlu0 %5532 }
 0xc31   : > { %v12033_v54 = vpop.xlane.xlu1 %5529 }
 0xc32   : > { %v5676_v4 = vrot.slane %v12033_v54, %v10845_v47 }
 0xc34   : > { %v12040_v24 = vpop.xlane.xlu0 %5538  ;;  %v5747_v55 = vsel %vm3336_vm2, %v5676_v4, %v5672_v36  ;;  %v5720_v36 = vrot.slane %v12023_v2, %v10845_v47 }
 0xc35   : > { %v12042_v15 = vpop.xlane.xlu1 %5499  ;;  %v5688_v37 = vrot.slane %v12040_v24, %v10845_v47 }
 0xc36   : > { %v5636_v40 = vrot.slane %v12042_v15, %v10845_v47 }
 0xc38   : > { %v5739_v14 = vsel %vm3348_vm8, %v5636_v40, %v5738_v49  ;;  %v12049_v16 = vpop.xlane.xlu0 %5541  ;;  %v5704_v40 = vrot.slane %v11999_v52, %v10845_v47 }
 0xc39   : > { %v12051_v56 = vpop.xlane.xlu1 %5559  ;;  %v5765_v41 = vsel %vm3375_vm9, %v5739_v14, -inf  ;;  %v5680_v14 = vrot.slane %v12031_v10, %v10845_v47 }
 0xc3a   : > { %5766 = vmax.xlane.f32.xlu1 %v5765_v41  ;;  %v5716_v41 = vrot.slane %v12051_v56, %v10845_v47  ;;  %v5754_v49 = vsel %vm3336_vm2, %v5708_v19, %v5704_v40  ;;  %v5692_v40 = vrot.slane %v12049_v16, %v10845_v47 }
 0xc3b   : > { %v5755_v12 = vsel %vm3338_vm3, %v5712_v34, %v5754_v49  ;;  %v5748_v19 = vsel %vm3338_vm3, %v5680_v14, %v5747_v55 }
 0xc3c   : > { %v12058_v20 = vpop.xlane.xlu0 %5544  ;;  %v5756_v29 = vsel %vm3340_vm4, %v5716_v41, %v5755_v12 }
 0xc3d   : > { %v12060_v0 = vpop.xlane.xlu1 %5565  ;;  %v5696_v49 = vrot.slane %v12058_v20, %v10845_v47  ;;  %v5757_v41 = vsel %vm3342_vm5, %v5720_v36, %v5756_v29 }
 0xc3e   : > { %v5724_v4 = vrot.slane %v12060_v0, %v10845_v47 }
 0xc40   : > { %v12074_v60 = vpop.xlane.xlu0 %5547 }
 0xc41   : > { %v12076_v57 = vpop.xlane.xlu1 %5535  ;;  %v5700_v55 = vrot.slane %v12074_v60, %v10845_v47 }
 0xc42   : > { %v5684_v30 = vrot.slane %v12076_v57, %v10845_v47 }
 0xc44   : > { %v5749_v34 = vsel %vm3340_vm4, %v5684_v30, %v5748_v19  ;;  %v12095_v23 = vpop.xlane.xlu0 %5571  ;;  %v5758_v30 = vsel %vm3344_vm6, %v5724_v4, %v5757_v41 }
 0xc45   : > { %v5750_v27 = vsel %vm3342_vm5, %v5688_v37, %v5749_v34  ;;  %v12097_v12 = vpop.xlane.xlu1 %5568  ;;  %v5732_v19 = vrot.slane %v12095_v23, %v10845_v47 }
 0xc46   : > { %v5728_v14 = vrot.slane %v12097_v12, %v10845_v47  ;;  %v5751_v31 = vsel %vm3344_vm6, %v5692_v40, %v5750_v27 }
 0xc47   : > { %v5752_v37 = vsel %vm3346_vm7, %v5696_v49, %v5751_v31 }
 0xc48   : > { %v5753_v34 = vsel %vm3348_vm8, %v5700_v55, %v5752_v37  ;;  %v5759_v5 = vsel %vm3346_vm7, %v5728_v14, %v5758_v30 }
 0xc49   : > { %v5771_v29 = vsel %vm3375_vm9, %v5753_v34, -inf  ;;  %v5760_v36 = vsel %vm3348_vm8, %v5732_v19, %v5759_v5 }
 0xc4a   : > { %5772 = vmax.xlane.f32.xlu1 %v5771_v29  ;;  %v5774_v38 = vsel %vm3375_vm9, %v5760_v36, -inf }
 0xc4b   : > { %5775 = vmax.xlane.f32.xlu0 %v5774_v38 }
 0xcbb   : > { %v5770_v27 = vpop.xlane.xlu0 %5769 }
 0xcbc   : > { %v5816_v4 = vrot.slane %v5770_v27, %v10641_v6  ;;  %v5820_v40 = vrot.slane %v5770_v27, %v11030_v7  ;;  %v5840_v41 = vrot.slane %v5770_v27, %v11033_v58  ;;  %v5824_v31 = vrot.slane %v5770_v27, %v11036_v43 }
 0xcbd   : > { %v5828_v30 = vrot.slane %v5770_v27, %v11042_v35  ;;  %v5832_v34 = vrot.slane %v5770_v27, %v11049_v33 }
 0xcbe   : > { %v5949_v49 = vsub.f32 %v11954_v22, %v5816_v4  ;;  %v5950_v55 = vsub.f32 %v11960_v3, %v5820_v40  ;;  %v5955_v14 = vsub.f32 %v11966_v26, %v5840_v41  ;;  %v5951_v38 = vsub.f32 %v11964_v59, %v5824_v31 }
 0xcbf   : > { %v5952_v29 = vsub.f32 %v11976_v1, %v5828_v30  ;;  %v5836_v3 = vrot.slane %v5770_v27, %v11056_v18  ;;  %v5953_v4 = vsub.f32 %v11968_v21, %v5832_v34 }
 0xcc0   : > { %v5989_v5 = vmul.f32 1.442695, %v5949_v49  ;;  %v5991_v19 = vmul.f32 1.442695, %v5950_v55  ;;  %v6001_v37 = vmul.f32 1.442695, %v5955_v14  ;;  %v5844_v55 = vrot.slane %v5770_v27, %v11066_v42 }
 0xcc1   : > { %v5993_v36 = vmul.f32 1.442695, %v5951_v38  ;;  %v5995_v59 = vmul.f32 1.442695, %v5952_v29  ;;  %v5954_v14 = vsub.f32 %v11988_v39, %v5836_v3 }
 0xcc2   : > { %8813 = vpow2.f32 %v5989_v5  ;;  %v5997_v5 = vmul.f32 1.442695, %v5953_v4 }
 0xcc3   : > { %8815 = vpow2.f32 %v5991_v19  ;;  %v5956_v19 = vsub.f32 %v12011_v13, %v5844_v55  ;;  %v5999_v27 = vmul.f32 1.442695, %v5954_v14 }
 0xcc4   : > { %8817 = vpow2.f32 %v6001_v37 }
 0xcc5   : > { %8819 = vpow2.f32 %v5993_v36  ;;  %v6003_v36 = vmul.f32 1.442695, %v5956_v19 }
 0xcc6   : > { %8821 = vpow2.f32 %v5995_v59 }
 0xcc7   : > { %v5767_v51 = vpop.xlane.xlu1 %5766 }
 0xcc8   : > { %v5788_v22 = vrot.slane %v5767_v51, %v11030_v7  ;;  %v5796_v26 = vrot.slane %v5767_v51, %v11042_v35  ;;  %v5800_v41 = vrot.slane %v5767_v51, %v11049_v33  ;;  %v5804_v21 = vrot.slane %v5767_v51, %v11056_v18 }
 0xcc9   : > { %v5784_v39 = vrot.slane %v5767_v51, %v10641_v6  ;;  %v5808_v37 = vrot.slane %v5767_v51, %v11033_v58  ;;  %v5792_v13 = vrot.slane %v5767_v51, %v11036_v43  ;;  %v5812_v59 = vrot.slane %v5767_v51, %v11066_v42 }
 0xcca   : > { %v5942_v40 = vsub.f32 %v11958_v62, %v5788_v22  ;;  %v5944_v1 = vsub.f32 %v11970_v46, %v5796_v26  ;;  %v5945_v30 = vsub.f32 %v11962_v28, %v5800_v41  ;;  %v5946_v34 = vsub.f32 %v11974_v53, %v5804_v21 }
 0xccb   : > { %v5941_v22 = vsub.f32 %v11956_v11, %v5784_v39  ;;  %v5947_v3 = vsub.f32 %v11997_v32, %v5808_v37  ;;  %v5948_v51 = vsub.f32 %v12042_v15, %v5812_v59 }
 0xccc   : > { %v12132_v31 = vpop.eup %8813  ;;  %v5975_v49 = vmul.f32 1.442695, %v5942_v40  ;;  %v5979_v62 = vmul.f32 1.442695, %v5944_v1  ;;  %v5981_v28 = vmul.f32 1.442695, %v5945_v30  ;;  %v5943_v40 = vsub.f32 %v11972_v25, %v5792_v13 }
 0xccd   : > { %6094 = vperm.xlu1 %8732, %v12132_v31   ;;  %v12139_v38 = vpop.eup %8815  ;;  %v5983_v26 = vmul.f32 1.442695, %v5946_v34  ;;  %v5973_v41 = vmul.f32 1.442695, %v5941_v22  ;;  %v5985_v11 = vmul.f32 1.442695, %v5947_v3 }
 0xcce   : > { %8823 = vpow2.f32 %v5975_v49  ;;  %v12142_v46 = vpop.eup %8817  ;;  %v5977_v25 = vmul.f32 1.442695, %v5943_v40  ;;  %v5987_v15 = vmul.f32 1.442695, %v5948_v51 }
 0xccf   : > { %8825 = vpow2.f32 %v5997_v5  ;;  %6112 = vperm.xlu0 %8731, %v12142_v46   ;;  %v12149_v29 = vpop.eup %8819 }
 0xcd0   : > { %8827 = vpow2.f32 %v5979_v62  ;;  %v12155_v4 = vpop.eup %8821 }
 0xcd1   : > { %6097 = vperm.xlu1 %8732, %v12139_v38   ;;  %8829 = vpow2.f32 %v5999_v27 }
 0xcd2   : > { %8831 = vpow2.f32 %v5981_v28 }
 0xcd3   : > { %8833 = vpow2.f32 %v6003_v36 }
 0xcd4   : > { %8835 = vpow2.f32 %v5983_v26 }
 0xcd5   : > { %6100 = vperm.xlu1 %8732, %v12149_v29   ;;  %8837 = vpow2.f32 %v5973_v41 }
 0xcd6   : > { %8839 = vpow2.f32 %v5985_v11 }
 0xcd7   : > { %v12180_v30 = vpop.xlane.xlu1 %5772  ;;  %8841 = vpow2.f32 %v5977_v25 }
 0xcd8   : > { %v12157_v53 = vpop.eup %8823  ;;  %v12162_v1 = vpop.xlane.xlu0 %5775  ;;  %v5848_v37 = vrot.slane %v12180_v30, %v10641_v6  ;;  %8843 = vpow2.f32 %v5987_v15  ;;  %v5856_v3 = vrot.slane %v12180_v30, %v11036_v43 }
 0xcd9   : > { %6103 = vperm.xlu1 %8732, %v12155_v4   ;;  %6073 = vperm.xlu0 %8731, %v12157_v53   ;;  %v12165_v32 = vpop.eup %8825  ;;  %v5884_v55 = vrot.slane %v12162_v1, %v11030_v7  ;;  %v5880_v14 = vrot.slane %v12162_v1, %v10641_v6  ;;  %v5888_v5 = vrot.slane %v12162_v1, %v11036_v43 }
 0xcda   : > { %v12167_v49 = vpop.eup %8827  ;;  %v5892_v27 = vrot.slane %v12162_v1, %v11042_v35  ;;  %v5896_v13 = vrot.slane %v12162_v1, %v11049_v33  ;;  %v5900_v41 = vrot.slane %v12162_v1, %v11056_v18 }
 0xcdb   : > { %v12178_v21 = vpop.eup %8829  ;;  %v5966_v19 = vsub.f32 %v12009_v17, %v5884_v55  ;;  %v5965_v39 = vsub.f32 %v11999_v52, %v5880_v14  ;;  %v5967_v34 = vsub.f32 %v12021_v50, %v5888_v5  ;;  %v5957_v50 = vsub.f32 %v11986_v45, %v5848_v37 }
 0xcdc   : > { %v12182_v62 = vpop.eup %8831  ;;  %v5968_v52 = vsub.f32 %v12051_v56, %v5892_v27  ;;  %v5969_v56 = vsub.f32 %v12023_v2, %v5896_v13  ;;  %v5864_v45 = vrot.slane %v12180_v30, %v11049_v33  ;;  %v5959_v55 = vsub.f32 %v12031_v10, %v5856_v3 }
 0xcdd   : > { %6106 = vperm.xlu1 %8732, %v12165_v32   ;;  %6079 = vperm.xlu0 %8731, %v12167_v49   ;;  %v6023_v28 = vmul.f32 1.442695, %v5966_v19  ;;  %v12193_v36 = vpop.eup %8833  ;;  %v6021_v22 = vmul.f32 1.442695, %v5965_v39  ;;  %v6025_v26 = vmul.f32 1.442695, %v5967_v34  ;;  %v5852_v14 = vrot.slane %v12180_v30, %v11030_v7 }
 0xcde   : > { %v12195_v17 = vpop.eup %8835  ;;  %v6027_v11 = vmul.f32 1.442695, %v5968_v52  ;;  %v6005_v51 = vmul.f32 1.442695, %v5957_v50  ;;  %v5970_v2 = vsub.f32 %v12060_v0, %v5900_v41  ;;  %v6029_v5 = vmul.f32 1.442695, %v5969_v56 }
 0xcdf   : > { %8845 = vpow2.f32 %v6023_v28  ;;  %v12205_v59 = vpop.eup %8837  ;;  %v5868_v19 = vrot.slane %v12180_v30, %v11056_v18  ;;  %v5961_v15 = vsub.f32 %v12040_v24, %v5864_v45  ;;  %v6009_v10 = vmul.f32 1.442695, %v5959_v55 }
 0xce0   : > { %v12207_v40 = vpop.eup %8839  ;;  %8847 = vpow2.f32 %v6021_v22  ;;  %v5860_v37 = vrot.slane %v12180_v30, %v11042_v35  ;;  %v5958_v0 = vsub.f32 %v12033_v54, %v5852_v14  ;;  %v6031_v34 = vmul.f32 1.442695, %v5970_v2 }
 0xce1   : > { %6109 = vperm.xlu1 %8732, %v12178_v21   ;;  %6082 = vperm.xlu0 %8731, %v12182_v62   ;;  %8849 = vpow2.f32 %v6025_v26  ;;  %v12217_v25 = vpop.eup %8841  ;;  %v5872_v24 = vrot.slane %v12180_v30, %v11033_v58  ;;  %v5962_v28 = vsub.f32 %v12049_v16, %v5868_v19  ;;  %v6013_v13 = vmul.f32 1.442695, %v5961_v15 }
 0xce2   : > { %8851 = vpow2.f32 %v6027_v11  ;;  %v12226_v27 = vpop.eup %8843  ;;  %v5960_v3 = vsub.f32 %v12076_v57, %v5860_v37  ;;  %v6007_v54 = vmul.f32 1.442695, %v5958_v0  ;;  %v5904_v50 = vrot.slane %v12162_v1, %v11033_v58 }
 0xce3   : > { %8853 = vpow2.f32 %v6005_v51  ;;  %v5876_v16 = vrot.slane %v12180_v30, %v11066_v42  ;;  %v5963_v26 = vsub.f32 %v12058_v20, %v5872_v24  ;;  %v6015_v41 = vmul.f32 1.442695, %v5962_v28 }
 0xce4   : > { %8855 = vpow2.f32 %v6029_v5  ;;  %v6011_v57 = vmul.f32 1.442695, %v5960_v3  ;;  %v5971_v45 = vsub.f32 %v12097_v12, %v5904_v50  ;;  %v5908_v20 = vrot.slane %v12162_v1, %v11066_v42 }
 0xce5   : > { %6115 = vperm.xlu1 %8732, %v12193_v36   ;;  %6085 = vperm.xlu0 %8731, %v12195_v17   ;;  %8857 = vpow2.f32 %v6009_v10  ;;  %v5964_v55 = vsub.f32 %v12074_v60, %v5876_v16  ;;  %v6017_v30 = vmul.f32 1.442695, %v5963_v26 }
 0xce6   : > { %8859 = vpow2.f32 %v6031_v34  ;;  %v6033_v2 = vmul.f32 1.442695, %v5971_v45  ;;  %v5972_v5 = vsub.f32 %v12095_v23, %v5908_v20 }
 0xce7   : > { %8861 = vpow2.f32 %v6013_v13  ;;  %v6019_v12 = vmul.f32 1.442695, %v5964_v55 }
 0xce8   : > { %8863 = vpow2.f32 %v6007_v54  ;;  %v6035_v1 = vmul.f32 1.442695, %v5972_v5 }
 0xce9   : > { %6070 = vperm.xlu1 %8732, %v12205_v59   ;;  %6088 = vperm.xlu0 %8731, %v12207_v40   ;;  %v12228_v39 = vpop.eup %8845  ;;  %8865 = vpow2.f32 %v6015_v41 }
 0xcea   : > { %v12238_v52 = vpop.eup %8847  ;;  %8867 = vpow2.f32 %v6011_v57 }
 0xceb   : > { %v12240_v22 = vpop.eup %8849  ;;  %8869 = vpow2.f32 %v6017_v30 }
 0xcec   : > { %v12250_v56 = vpop.eup %8851  ;;  %8871 = vpow2.f32 %v6033_v2 }
 0xced   : > { %6076 = vperm.xlu1 %8732, %v12217_v25   ;;  %6145 = vperm.xlu0 %8731, %v12228_v39   ;;  %v12252_v11 = vpop.eup %8853  ;;  %8873 = vpow2.f32 %v6019_v12 }
 0xcee   : > { %v12260_v51 = vpop.eup %8855  ;;  %8875 = vpow2.f32 %v6035_v1 }
 0xcef   : > { %v12262_v14 = vpop.eup %8857 }
 0xcf0   : > { %v12267_v60 = vpop.eup %8859 }
 0xcf1   : > { %6091 = vperm.xlu1 %8732, %v12226_v27   ;;  %6148 = vperm.xlu0 %8731, %v12240_v22   ;;  %v12269_v19 = vpop.eup %8861 }
 0xcf2   : > { %v12273_v15 = vpop.eup %8863 }
 0xcf3   : > { %v12275_v10 = vpop.eup %8865 }
 0xcf4   : > { %v12279_v23 = vpop.eup %8867 }
 0xcf5   : > { %6142 = vperm.xlu1 %8732, %v12238_v52   ;;  %6118 = vperm.xlu0 %8731, %v12252_v11   ;;  %v12281_v37 = vpop.eup %8869 }
 0xcf6   : > { %v12285_v0 = vpop.eup %8871 }
 0xcf7   : > { %v12287_v34 = vpop.eup %8873 }
 0xcf8   : > { %v12291_v24 = vpop.eup %8875 }
 0xcf9   : > { %6151 = vperm.xlu1 %8732, %v12250_v56   ;;  %6124 = vperm.xlu0 %8731, %v12262_v14  }
 0xcfd   : > { %6154 = vperm.xlu1 %8732, %v12260_v51   ;;  %6130 = vperm.xlu0 %8731, %v12269_v19  }
 0xd01   : > { %6157 = vperm.xlu1 %8732, %v12267_v60   ;;  %6133 = vperm.xlu0 %8731, %v12275_v10  }
 0xd05   : > { %6121 = vperm.xlu1 %8732, %v12273_v15   ;;  %6136 = vperm.xlu0 %8731, %v12281_v37  }
 0xd09   : > { %6127 = vperm.xlu1 %8732, %v12279_v23   ;;  %6139 = vperm.xlu0 %8731, %v12287_v34  }
 0xd0d   : > { %6160 = vperm.xlu1 %8732, %v12285_v0   ;;  %6163 = vperm.xlu0 %8731, %v12291_v24  }
 0xd4c   : > { %v6095_v28 = vpop.permute.xlu1 %6094 }
 0xd4d   : > { %v6200_v45 = vrot.slane %v6095_v28, %v10845_v47 }
 0xd4e   : > { %v6113_v54 = vpop.permute.xlu0 %6112 }
 0xd4f   : > { %v6224_v28 = vrot.slane %v6113_v54, %v10845_v47 }
 0xd50   : > { %v6098_v13 = vpop.permute.xlu1 %6097 }
 0xd51   : > { %v6204_v26 = vrot.slane %v6098_v13, %v10845_v47 }
 0xd53   : > { %v6300_v2 = vsel %vm3336_vm2, %v6204_v26, %v6200_v45 }
 0xd54   : > { %v6101_v3 = vpop.permute.xlu1 %6100 }
 0xd55   : > { %v6208_v41 = vrot.slane %v6101_v3, %v10845_v47 }
 0xd57   : > { %v6301_v12 = vsel %vm3338_vm3, %v6208_v41, %v6300_v2 }
 0xd58   : > { %v6104_v50 = vpop.permute.xlu1 %6103  ;;  %v6074_v16 = vpop.permute.xlu0 %6073 }
 0xd59   : > { %v6212_v55 = vrot.slane %v6104_v50, %v10845_v47 }
 0xd5b   : > { %v6302_v1 = vsel %vm3340_vm4, %v6212_v55, %v6301_v12 }
 0xd5c   : > { %v6107_v57 = vpop.permute.xlu1 %6106  ;;  %v6080_v30 = vpop.permute.xlu0 %6079 }
 0xd5d   : > { %v6216_v20 = vrot.slane %v6107_v57, %v10845_v47 }
 0xd5f   : > { %v6303_v3 = vsel %vm3342_vm5, %v6216_v20, %v6302_v1  ;;  %v6172_v20 = vrot.slane %v6074_v16, %v10845_v47  ;;  %v6180_v1 = vrot.slane %v6080_v30, %v10845_v47 }
 0xd60   : > { %v6110_v5 = vpop.permute.xlu1 %6109  ;;  %v6083_v61 = vpop.permute.xlu0 %6082 }
 0xd61   : > { %v6220_v13 = vrot.slane %v6110_v5, %v10845_v47 }
 0xd63   : > { %v6304_v44 = vsel %vm3344_vm6, %v6220_v13, %v6303_v3 }
 0xd64   : > { %v6116_v50 = vpop.permute.xlu1 %6115  ;;  %v6086_v8 = vpop.permute.xlu0 %6085  ;;  %v6305_v26 = vsel %vm3346_vm7, %v6224_v28, %v6304_v44  ;;  %v6184_v44 = vrot.slane %v6083_v61, %v10845_v47 }
 0xd65   : > { %v6228_v57 = vrot.slane %v6116_v50, %v10845_v47  ;;  %v6188_v28 = vrot.slane %v6086_v8, %v10845_v47 }
 0xd67   : > { %v6306_v41 = vsel %vm3348_vm8, %v6228_v57, %v6305_v26 }
 0xd68   : > { %v6071_v45 = vpop.permute.xlu1 %6070  ;;  %v6328_v55 = vsel %vm3375_vm9, %v6306_v41, 0.0  ;;  %v6089_v12 = vpop.permute.xlu0 %6088 }
 0xd69   : > { %6329 = vadd.xlane.f32.xlu0 %v6328_v55  ;;  %v6168_v2 = vrot.slane %v6071_v45, %v10845_v47  ;;  %v6192_v26 = vrot.slane %v6089_v12, %v10845_v47 }
 0xd6b   : > { %v6293_v13 = vsel %vm3336_vm2, %v6172_v20, %v6168_v2 }
 0xd6c   : > { %v6077_v5 = vpop.permute.xlu1 %6076  ;;  %v6146_v41 = vpop.permute.xlu0 %6145 }
 0xd6d   : > { %v6176_v54 = vrot.slane %v6077_v5, %v10845_v47 }
 0xd6f   : > { %v6294_v3 = vsel %vm3338_vm3, %v6176_v54, %v6293_v13 }
 0xd70   : > { %v6295_v50 = vsel %vm3340_vm4, %v6180_v1, %v6294_v3  ;;  %v6092_v57 = vpop.permute.xlu1 %6091  ;;  %v6149_v20 = vpop.permute.xlu0 %6148 }
 0xd71   : > { %v6196_v16 = vrot.slane %v6092_v57, %v10845_v47  ;;  %v6296_v45 = vsel %vm3342_vm5, %v6184_v44, %v6295_v50 }
 0xd72   : > { %v6297_v30 = vsel %vm3344_vm6, %v6188_v28, %v6296_v45  ;;  %v6268_v45 = vrot.slane %v6146_v41, %v10845_v47 }
 0xd73   : > { %v6298_v55 = vsel %vm3346_vm7, %v6192_v26, %v6297_v30 }
 0xd74   : > { %v6143_v2 = vpop.permute.xlu1 %6142  ;;  %v6299_v61 = vsel %vm3348_vm8, %v6196_v16, %v6298_v55  ;;  %v6119_v54 = vpop.permute.xlu0 %6118 }
 0xd75   : > { %v6325_v8 = vsel %vm3375_vm9, %v6299_v61, 0.0  ;;  %v6232_v44 = vrot.slane %v6119_v54, %v10845_v47  ;;  %v6264_v26 = vrot.slane %v6143_v2, %v10845_v47  ;;  %v6272_v2 = vrot.slane %v6149_v20, %v10845_v47 }
 0xd76   : > { %6326 = vadd.xlane.f32.xlu1 %v6325_v8 }
 0xd77   : > { %v6314_v48 = vsel %vm3336_vm2, %v6268_v45, %v6264_v26 }
 0xd78   : > { %v6152_v5 = vpop.permute.xlu1 %6151  ;;  %v6125_v12 = vpop.permute.xlu0 %6124 }
 0xd79   : > { %v6240_v30 = vrot.slane %v6125_v12, %v10845_v47  ;;  %v6276_v9 = vrot.slane %v6152_v5, %v10845_v47  ;;  %v6315_v5 = vsel %vm3338_vm3, %v6272_v2, %v6314_v48 }
 0xd7c   : > { %v6155_v1 = vpop.permute.xlu1 %6154  ;;  %v6131_v3 = vpop.permute.xlu0 %6130 }
 0xd7d   : > { %v6248_v54 = vrot.slane %v6131_v3, %v10845_v47 }
 0xd80   : > { %v6158_v13 = vpop.permute.xlu1 %6157  ;;  %v6134_v50 = vpop.permute.xlu0 %6133 }
 0xd81   : > { %v6252_v41 = vrot.slane %v6134_v50, %v10845_v47 }
 0xd84   : > { %v6122_v57 = vpop.permute.xlu1 %6121  ;;  %v6137_v61 = vpop.permute.xlu0 %6136 }
 0xd85   : > { %v6236_v28 = vrot.slane %v6122_v57, %v10845_v47 }
 0xd87   : > { %v6307_v16 = vsel %vm3336_vm2, %v6236_v28, %v6232_v44  ;;  %v6280_v44 = vrot.slane %v6155_v1, %v10845_v47  ;;  %v6284_v28 = vrot.slane %v6158_v13, %v10845_v47  ;;  %v6316_v1 = vsel %vm3340_vm4, %v6276_v9, %v6315_v5 }
 0xd88   : > { %v6128_v55 = vpop.permute.xlu1 %6127  ;;  %v6308_v57 = vsel %vm3338_vm3, %v6240_v30, %v6307_v16  ;;  %v6140_v3 = vpop.permute.xlu0 %6139 }
 0xd89   : > { %v6244_v8 = vrot.slane %v6128_v55, %v10845_v47  ;;  %v6256_v55 = vrot.slane %v6137_v61, %v10845_v47  ;;  %v6260_v50 = vrot.slane %v6140_v3, %v10845_v47  ;;  %v6317_v13 = vsel %vm3342_vm5, %v6280_v44, %v6316_v1 }
 0xd8a   : > { %v6318_v61 = vsel %vm3344_vm6, %v6284_v28, %v6317_v13 }
 0xd8b   : > { %v6309_v12 = vsel %vm3340_vm4, %v6244_v8, %v6308_v57 }
 0xd8c   : > { %v6310_v26 = vsel %vm3342_vm5, %v6248_v54, %v6309_v12  ;;  %v6161_v45 = vpop.permute.xlu1 %6160  ;;  %v6164_v54 = vpop.permute.xlu0 %6163 }
 0xd8d   : > { %v6288_v16 = vrot.slane %v6161_v45, %v10845_v47  ;;  %v6311_v20 = vsel %vm3344_vm6, %v6252_v41, %v6310_v26  ;;  %v6292_v2 = vrot.slane %v6164_v54, %v10845_v47 }
 0xd8e   : > { %v6312_v30 = vsel %vm3346_vm7, %v6256_v55, %v6311_v20 }
 0xd8f   : > { %v6313_v8 = vsel %vm3348_vm8, %v6260_v50, %v6312_v30  ;;  %v6319_v57 = vsel %vm3346_vm7, %v6288_v16, %v6318_v61 }
 0xd90   : > { %v6331_v48 = vsel %vm3375_vm9, %v6313_v8, 0.0  ;;  %v6320_v9 = vsel %vm3348_vm8, %v6292_v2, %v6319_v57 }
 0xd91   : > { %6332 = vadd.xlane.f32.xlu0 %v6331_v48  ;;  %v6334_v41 = vsel %vm3375_vm9, %v6320_v9, 0.0 }
 0xd95   : > { %6335 = vadd.xlane.f32.xlu0 %v6334_v41 }
 0xdf6   : > { %v6330_v12 = vpop.xlane.xlu0 %6329 }
 0xdf7   : > { %8877 = vrcp.f32 %v6330_v12 }
 0xe01   : > { %v8878_v44 = vpop.eup %8877 }
 0xe02   : > { %v6380_v28 = vrot.slane %v8878_v44, %v10641_v6  ;;  %v6404_v55 = vrot.slane %v8878_v44, %v11033_v58  ;;  %v6384_v47 = vrot.slane %v8878_v44, %v11030_v7  ;;  %v6388_v16 = vrot.slane %v8878_v44, %v11036_v43 }
 0xe03   : > { %v6327_v26 = vpop.xlane.xlu1 %6326  ;;  %v6392_v1 = vrot.slane %v8878_v44, %v11042_v35  ;;  %v6408_v48 = vrot.slane %v8878_v44, %v11066_v42 }
 0xe04   : > { %8879 = vrcp.f32 %v6327_v26  ;;  %v6513_v45 = vmul.f32 %v12132_v31, %v6380_v28  ;;  %v6519_v5 = vmul.f32 %v12142_v46, %v6404_v55  ;;  %v6514_v3 = vmul.f32 %v12139_v38, %v6384_v47 }
 0xe05   : > { %v6515_v20 = vmul.f32 %v12149_v29, %v6388_v16  ;;  %v6516_v31 = vmul.f32 %v12155_v4, %v6392_v1  ;;  %v6396_v46 = vrot.slane %v8878_v44, %v11049_v33  ;;  %v6400_v29 = vrot.slane %v8878_v44, %v11056_v18 }
 0xe06   : > { %6579 = vperm.xlu1 %8732, %v6513_v45   ;;  %6609 = vperm.xlu0 %8731, %v6519_v5  }
 0xe07   : > { %v6517_v38 = vmul.f32 %v12165_v32, %v6396_v46  ;;  %v6518_v4 = vmul.f32 %v12178_v21, %v6400_v29  ;;  %v6520_v32 = vmul.f32 %v12193_v36, %v6408_v48  ;;  %v4984_v46 = vld [vmem:[#allocation14] sm:$0xff] }
 0xe0a   : > { %6584 = vperm.xlu1 %8732, %v6514_v3  }
 0xe0e   : > { %v8880_v50 = vpop.eup %8879  ;;  %6589 = vperm.xlu1 %8732, %v6515_v20  }
 0xe0f   : > { %v6352_v30 = vrot.slane %v8880_v50, %v11030_v7  ;;  %v6360_v61 = vrot.slane %v8880_v50, %v11042_v35  ;;  %v6364_v54 = vrot.slane %v8880_v50, %v11049_v33  ;;  %v6368_v57 = vrot.slane %v8880_v50, %v11056_v18 }
 0xe10   : > { %v6348_v2 = vrot.slane %v8880_v50, %v10641_v6  ;;  %v6372_v9 = vrot.slane %v8880_v50, %v11033_v58  ;;  %v6356_v12 = vrot.slane %v8880_v50, %v11036_v43  ;;  %v6376_v28 = vrot.slane %v8880_v50, %v11066_v42 }
 0xe11   : > { %v6506_v13 = vmul.f32 %v12157_v53, %v6352_v30  ;;  %v6508_v8 = vmul.f32 %v12167_v49, %v6360_v61  ;;  %v6509_v53 = vmul.f32 %v12182_v62, %v6364_v54  ;;  %v6510_v49 = vmul.f32 %v12195_v17, %v6368_v57 }
 0xe12   : > { %6594 = vperm.xlu1 %8732, %v6516_v31   ;;  %v6505_v21 = vmul.f32 %v12205_v59, %v6348_v2  ;;  %v6511_v62 = vmul.f32 %v12207_v40, %v6372_v9  ;;  %v6507_v36 = vmul.f32 %v12217_v25, %v6356_v12  ;;  %v6512_v17 = vmul.f32 %v12226_v27, %v6376_v28  ;;  %v13013_v12 = vld [vmem:[#allocation25_spill] sm:$0xff] }
 0xe13   : > { %6544 = vperm.xlu0 %8731, %v6506_v13   ;;  %v4985_v13 = vld [vmem:[#allocation14 + $0x8] sm:$0xff] }
 0xe16   : > { %6599 = vperm.xlu1 %8732, %v6517_v38  }
 0xe17   : > { %6554 = vperm.xlu0 %8731, %v6508_v8  }
 0xe1a   : > { %6604 = vperm.xlu1 %8732, %v6518_v4  }
 0xe1b   : > { %6559 = vperm.xlu0 %8731, %v6509_v53  }
 0xe1e   : > { %6614 = vperm.xlu1 %8732, %v6520_v32   ;;  %v6333_v41 = vpop.xlane.xlu0 %6332  ;;  %v13011_v32 = vld [vmem:[#allocation33_spill] sm:$0xff] }
 0xe1f   : > { %6564 = vperm.xlu0 %8731, %v6510_v49   ;;  %v13012_v2 = vmax.f32 %v13011_v32, 0.0 }
 0xe22   : > { %6539 = vperm.xlu1 %8732, %v6505_v21   ;;  %v6336_v44 = vpop.xlane.xlu0 %6335 }
 0xe23   : > { %6569 = vperm.xlu0 %8731, %v6511_v62   ;;  %8881 = vrcp.f32 %v6336_v44  ;;  %v13014_v62 = vmax.f32 %v13013_v12, 0.0 }
 0xe24   : > { %8883 = vrcp.f32 %v6333_v41 }
 0xe26   : > { %6549 = vperm.xlu1 %8732, %v6507_v36  }
 0xe2a   : > { %6574 = vperm.xlu1 %8732, %v6512_v17  }
 0xe2d   : > { %v8882_v55 = vpop.eup %8881 }
 0xe2e   : > { %v6448_v59 = vrot.slane %v8882_v55, %v11030_v7  ;;  %v6444_v26 = vrot.slane %v8882_v55, %v10641_v6  ;;  %v6452_v5 = vrot.slane %v8882_v55, %v11036_v43  ;;  %v6456_v25 = vrot.slane %v8882_v55, %v11042_v35  ;;  %v8884_v47 = vpop.eup %8883 }
 0xe2f   : > { %v6412_v16 = vrot.slane %v8884_v47, %v10641_v6  ;;  %v6460_v20 = vrot.slane %v8882_v55, %v11049_v33  ;;  %v6420_v1 = vrot.slane %v8884_v47, %v11036_v43  ;;  %v6464_v50 = vrot.slane %v8882_v55, %v11056_v18 }
 0xe30   : > { %v6530_v40 = vmul.f32 %v12228_v39, %v6448_v59  ;;  %v6529_v45 = vmul.f32 %v12238_v52, %v6444_v26  ;;  %v6531_v3 = vmul.f32 %v12240_v22, %v6452_v5  ;;  %v6532_v27 = vmul.f32 %v12250_v56, %v6456_v25 }
 0xe31   : > { %v6521_v39 = vmul.f32 %v12252_v11, %v6412_v16  ;;  %v6533_v52 = vmul.f32 %v12260_v51, %v6460_v20  ;;  %v6523_v22 = vmul.f32 %v12262_v14, %v6420_v1  ;;  %v6534_v56 = vmul.f32 %v12267_v60, %v6464_v50  ;;  %v13019_v1 = vld [vmem:[#allocation50_spill] sm:$0xff] }
 0xe32   : > { %6664 = vperm.xlu0 %8731, %v6530_v40   ;;  %6659 = vperm.xlu1 %8732, %v6529_v45   ;;  %v6428_v6 = vrot.slane %v8884_v47, %v11049_v33  ;;  %v6416_v30 = vrot.slane %v8884_v47, %v11030_v7  ;;  %v6432_v43 = vrot.slane %v8884_v47, %v11056_v18  ;;  %v13017_v40 = vld [vmem:[#allocation27_spill] sm:$0xff]  ;;  %v13020_v50 = vmax.f32 %v13019_v1, 0.0 }
 0xe33   : > { %v6424_v31 = vrot.slane %v8884_v47, %v11042_v35  ;;  %v8562_v14 = vpack.c.bf16 %v4985_v13, %v4984_v46  ;;  %v6436_v7 = vrot.slane %v8884_v47, %v11033_v58  ;;  %v6468_v38 = vrot.slane %v8882_v55, %v11033_v58  ;;  %v13023_v46 = vld [vmem:[#allocation35_spill] sm:$0xff] }
 0xe34   : > { %v6525_v11 = vmul.f32 %v12269_v19, %v6428_v6  ;;  %v6522_v51 = vmul.f32 %v12273_v15, %v6416_v30  ;;  %v6526_v60 = vmul.f32 %v12275_v10, %v6432_v43  ;;  %v4986_v19 = vld [vmem:[#allocation14 + $0x10] sm:$0xff]  ;;  %v4987_v15 = vld [vmem:[#allocation14 + $0x18] sm:$0xff]  ;;  %v6440_v54 = vrot.slane %v8884_v47, %v11066_v42 }
 0xe35   : > { %v6524_v61 = vmul.f32 %v12279_v23, %v6424_v31  ;;  %8563 = vmatprep.subr.bf16.mxu1 %v8562_v14  ;;  %v8566_v35 = vpack.c.bf16 %v4987_v15, %v4986_v19  ;;  %v6527_v29 = vmul.f32 %v12281_v37, %v6436_v7  ;;  %v6535_v8 = vmul.f32 %v12285_v0, %v6468_v38  ;;  %v13009_v37 = vld [vmem:[#allocation54_spill] sm:$0xff] }
 0xe36   : > { %6669 = vperm.xlu0 %8731, %v6531_v3   ;;  %6674 = vperm.xlu1 %8732, %v6532_v27   ;;  %v6528_v10 = vmul.f32 %v12287_v34, %v6440_v54  ;;  %v6472_v23 = vrot.slane %v8882_v55, %v11066_v42  ;;  %v13010_v53 = vmax.f32 %v13009_v37, 0.0  ;;  %v13018_v45 = vmax.f32 %v13017_v40, 0.0  ;;  %v13027_v37 = vld [vmem:[#allocation28_spill] sm:$0xff] }
 0xe37   : > { %8565 = vmatpush3.bf16.msra.mxu1 %v8562_v14  ;;  %v13024_v13 = vmax.f32 %v13023_v46, 0.0 }
 0xe38   : > { %8567 = vmatprep.subr.bf16.mxu1 %v8566_v35  ;;  %v6536_v4 = vmul.f32 %v12291_v24, %v6472_v23  ;;  %v13015_v24 = vld [vmem:[#allocation39_spill] sm:$0xff] }
 0xe39   : > { %v13016_v28 = vmax.f32 %v13015_v24, 0.0 }
 0xe3a   : > { %6619 = vperm.xlu0 %8731, %v6521_v39   ;;  %6679 = vperm.xlu1 %8732, %v6533_v52  }
 0xe3b   : > { %8569 = vmatpush3.bf16.msra.mxu1 %v8566_v35  ;;  %v13025_v35 = vld [vmem:[#allocation29_spill] sm:$0xff] }
 0xe3c   : > { %8571 = vmatprep.subr.bf16.mxu1 %v11553_v63 }
 0xe3e   : > { %6629 = vperm.xlu0 %8731, %v6523_v22   ;;  %6684 = vperm.xlu1 %8732, %v6534_v56   ;;  %v13021_v56 = vld [vmem:[#allocation34_spill] sm:$0xff] }
 0xe3f   : > { %v13022_v6 = vmax.f32 %v13021_v56, 0.0 }
 0xe42   : > { %6639 = vperm.xlu0 %8731, %v6525_v11   ;;  %6624 = vperm.xlu1 %8732, %v6522_v51  }
 0xe46   : > { %6644 = vperm.xlu0 %8731, %v6526_v60   ;;  %6634 = vperm.xlu1 %8732, %v6524_v61  }
 0xe4a   : > { %6649 = vperm.xlu0 %8731, %v6527_v29   ;;  %6689 = vperm.xlu1 %8732, %v6535_v8   ;;  %v13026_v29 = vmax.f32 %v13025_v35, 0.0 }
 0xe4e   : > { %6654 = vperm.xlu0 %8731, %v6528_v10  }
 0xe52   : > { %6694 = vperm.xlu0 %8731, %v6536_v4  }
 0xe85   : > { %v6580_v48 = vpop.permute.xlu1 %6579  ;;  %v6610_v41 = vpop.permute.xlu0 %6609 }
 0xe86   : > { %v6705_v0 = vmul.f32 %v6580_v48, %v13010_v53  ;;  %v6711_v17 = vmul.f32 %v6610_v41, %v13016_v28  ;;  %v13028_v53 = vmax.f32 %v13027_v37, 0.0  ;;  %v13029_v28 = vld [vmem:[#allocation32_spill] sm:$0xff] }
 0xe88   : > { %v6785_v9 = vsel %vm940_vm0, %v6705_v0, 0.0  ;;  %v6827_v3 = vsel %vm940_vm0, %v6711_v17, 0.0  ;;  %v13030_v17 = vmax.f32 %v13029_v28, 0.0 }
 0xe89   : > { %v6585_v57 = vpop.permute.xlu1 %6584  ;;  %v6786_v36 = vrot.slane %v6785_v9, 4  ;;  %v6828_v51 = vrot.slane %v6827_v3, 4 }
 0xe8a   : > { %v6706_v49 = vmul.f32 %v6585_v57, %v13012_v2 }
 0xe8b   : > { %v6787_v47 = vadd.f32 %v6786_v36, %v6785_v9  ;;  %v6829_v10 = vadd.f32 %v6828_v51, %v6827_v3 }
 0xe8c   : > { %v6792_v21 = vsel %vm940_vm0, %v6706_v49, 0.0 }
 0xe8d   : > { %v6590_v34 = vpop.permute.xlu1 %6589  ;;  %v6793_v55 = vrot.slane %v6792_v21, 4  ;;  %v6788_v43 = vrot.slane %v6787_v47, 2 }
 0xe8e   : > { %v6707_v44 = vmul.f32 %v6590_v34, %v13014_v62  ;;  %v6830_v62 = vrot.slane %v6829_v10, 2 }
 0xe8f   : > { %v6794_v16 = vadd.f32 %v6793_v55, %v6792_v21  ;;  %v6789_v23 = vadd.f32 %v6788_v43, %v6787_v47  ;;  %v13035_v43 = vld [vmem:[#allocation36_spill] sm:$0xff] }
 0xe90   : > { %v6799_v26 = vsel %vm940_vm0, %v6707_v44, 0.0 }
 0xe91   : > { %v6595_v59 = vpop.permute.xlu1 %6594  ;;  %v6800_v20 = vrot.slane %v6799_v26, 4  ;;  %v6795_v60 = vrot.slane %v6794_v16, 2  ;;  %v6790_v44 = vrot.slane %v6789_v23, 1 }
 0xe92   : > { %v6708_v5 = vmul.f32 %v6595_v59, %v13018_v45  ;;  %v6545_v25 = vpop.permute.xlu0 %6544  ;;  %v13031_v59 = vld [vmem:[#allocation30_spill] sm:$0xff] }
 0xe93   : > { %v6698_v22 = vmul.f32 %v6545_v25, %v13020_v50  ;;  %v6801_v61 = vadd.f32 %v6800_v20, %v6799_v26  ;;  %v6796_v57 = vadd.f32 %v6795_v60, %v6794_v16  ;;  %v13032_v26 = vmax.f32 %v13031_v59, 0.0 }
 0xe94   : > { %v6806_v27 = vsel %vm940_vm0, %v6708_v5, 0.0  ;;  %v6791_v1 = vadd.f32 %v6790_v44, %v6789_v23 }
 0xe95   : > { %v6600_v39 = vpop.permute.xlu1 %6599  ;;  %v6807_v52 = vrot.slane %v6806_v27, 4  ;;  %v6736_v19 = vsel %vm940_vm0, %v6698_v22, 0.0  ;;  %v6802_v32 = vrot.slane %v6801_v61, 2  ;;  %v6797_v45 = vrot.slane %v6796_v57, 1  ;;  %v13033_v22 = vld [vmem:[#allocation37_spill] sm:$0xff] }
 0xe96   : > { %v6709_v30 = vmul.f32 %v6600_v39, %v13022_v6  ;;  %v6555_v11 = vpop.permute.xlu0 %6554  ;;  %v6737_v2 = vrot.slane %v6736_v19, 4  ;;  %v13034_v56 = vmax.f32 %v13033_v22, 0.0 }
 0xe97   : > { %v6700_v14 = vmul.f32 %v6555_v11, %v13024_v13  ;;  %v6808_v38 = vadd.f32 %v6807_v52, %v6806_v27  ;;  %v6803_v5 = vadd.f32 %v6802_v32, %v6801_v61  ;;  %v12458_v52 = vadd.f32 %v6830_v62, %v6829_v10  ;;  %v13037_v10 = vld [vmem:[#allocation26_spill] sm:$0xff] }
 0xe98   : > { %v6813_v31 = vsel %vm940_vm0, %v6709_v30, 0.0  ;;  %v6738_v25 = vadd.f32 %v6737_v2, %v6736_v19  ;;  %v6798_v13 = vadd.f32 %v6797_v45, %v6796_v57  ;;  %v13038_v23 = vmax.f32 %v13037_v10, 0.0 }
 0xe99   : > { %v6605_v7 = vpop.permute.xlu1 %6604  ;;  %v6814_v15 = vrot.slane %v6813_v31, 4  ;;  %v6750_v4 = vsel %vm940_vm0, %v6700_v14, 0.0  ;;  %v6809_v9 = vrot.slane %v6808_v38, 2  ;;  %v6804_v14 = vrot.slane %v6803_v5, 1 }
 0xe9a   : > { %v6710_v8 = vmul.f32 %v6605_v7, %v13026_v29  ;;  %v6560_v54 = vpop.permute.xlu0 %6559  ;;  %v6751_v34 = vrot.slane %v6750_v4, 4  ;;  %v6739_v60 = vrot.slane %v6738_v25, 2  ;;  %v6996_v57 = vsel %vm3336_vm2, %v6798_v13, %v6791_v1 }
 0xe9b   : > { %v6701_v0 = vmul.f32 %v6560_v54, %v13028_v53  ;;  %v6815_v41 = vadd.f32 %v6814_v15, %v6813_v31  ;;  %v6810_v3 = vadd.f32 %v6809_v9, %v6808_v38  ;;  %v13036_v31 = vmax.f32 %v13035_v43, 0.0 }
 0xe9c   : > { %v6820_v48 = vsel %vm940_vm0, %v6710_v8, 0.0  ;;  %v6752_v16 = vadd.f32 %v6751_v34, %v6750_v4  ;;  %v6805_v32 = vadd.f32 %v6804_v14, %v6803_v5  ;;  %v6740_v2 = vadd.f32 %v6739_v60, %v6738_v25 }
 0xe9d   : > { %v6615_v49 = vpop.permute.xlu1 %6614  ;;  %v6757_v21 = vsel %vm940_vm0, %v6701_v0, 0.0  ;;  %v6821_v36 = vrot.slane %v6820_v48, 4  ;;  %v6816_v27 = vrot.slane %v6815_v41, 2  ;;  %v6811_v38 = vrot.slane %v6810_v3, 1 }
 0xe9e   : > { %v6565_v12 = vpop.permute.xlu0 %6564  ;;  %v6758_v24 = vrot.slane %v6757_v21, 4  ;;  %v6712_v55 = vmul.f32 %v6615_v49, %v13030_v17  ;;  %v6753_v15 = vrot.slane %v6752_v16, 2  ;;  %v6741_v45 = vrot.slane %v6740_v2, 1 }
 0xe9f   : > { %v6702_v40 = vmul.f32 %v6565_v12, %v13032_v26  ;;  %v6822_v50 = vadd.f32 %v6821_v36, %v6820_v48  ;;  %v6817_v19 = vadd.f32 %v6816_v27, %v6815_v41  ;;  %v6812_v62 = vadd.f32 %v6811_v38, %v6810_v3 }
 0xea0   : > { %v6759_v30 = vadd.f32 %v6758_v24, %v6757_v21  ;;  %v6834_v11 = vsel %vm940_vm0, %v6712_v55, 0.0  ;;  %v6754_v34 = vadd.f32 %v6753_v15, %v6752_v16  ;;  %v13039_v24 = vld [vmem:[#allocation38_spill] sm:$0xff]  ;;  %v6832_v3 = vrot.slane %v12458_v52, 1 }
 0xea1   : > { %v6540_v47 = vpop.permute.xlu1 %6539  ;;  %v6764_v20 = vsel %vm940_vm0, %v6702_v40, 0.0  ;;  %v6823_v29 = vrot.slane %v6822_v50, 2  ;;  %v6835_v8 = vrot.slane %v6834_v11, 4  ;;  %v6818_v41 = vrot.slane %v6817_v19, 1 }
 0xea2   : > { %v6570_v39 = vpop.permute.xlu0 %6569  ;;  %v6697_v6 = vmul.f32 %v6540_v47, %v13034_v56  ;;  %v6765_v51 = vrot.slane %v6764_v20, 4  ;;  %v6760_v48 = vrot.slane %v6759_v30, 2  ;;  %v13040_v28 = vmax.f32 %v13039_v24, 0.0 }
 0xea3   : > { %v6703_v46 = vmul.f32 %v6570_v39, %v13036_v31  ;;  %v6824_v44 = vadd.f32 %v6823_v29, %v6822_v50  ;;  %v6836_v59 = vadd.f32 %v6835_v8, %v6834_v11  ;;  %v6819_v27 = vadd.f32 %v6818_v41, %v6817_v19 }
 0xea4   : > { %v6729_v61 = vsel %vm940_vm0, %v6697_v6, 0.0  ;;  %v6766_v37 = vadd.f32 %v6765_v51, %v6764_v20  ;;  %v6761_v55 = vadd.f32 %v6760_v48, %v6759_v30  ;;  %v6755_v20 = vrot.slane %v6754_v34, 1 }
 0xea5   : > { %v6550_v7 = vpop.permute.xlu1 %6549  ;;  %v6730_v35 = vrot.slane %v6729_v61, 4  ;;  %v6771_v54 = vsel %vm940_vm0, %v6703_v46, 0.0  ;;  %v6997_v1 = vsel %vm3338_vm3, %v6805_v32, %v6996_v57  ;;  %v6825_v50 = vrot.slane %v6824_v44, 1 }
 0xea6   : > { %v6699_v4 = vmul.f32 %v6550_v7, %v13038_v23  ;;  %v6772_v0 = vrot.slane %v6771_v54, 4  ;;  %v6767_v26 = vrot.slane %v6766_v37, 2  ;;  %v6762_v56 = vrot.slane %v6761_v55, 1 }
 0xea7   : > { %v6731_v53 = vadd.f32 %v6730_v35, %v6729_v61  ;;  %v6837_v6 = vrot.slane %v6836_v59, 2  ;;  %v6998_v51 = vsel %vm3340_vm4, %v6812_v62, %v6997_v1  ;;  %v6742_v43 = vadd.f32 %v6741_v45, %v6740_v2  ;;  %v13041_v35 = vld [vmem:[#allocation31_spill] sm:$0xff] }
 0xea8   : > { %v6743_v49 = vsel %vm940_vm0, %v6699_v4, 0.0  ;;  %v6773_v12 = vadd.f32 %v6772_v0, %v6771_v54  ;;  %v6768_v30 = vadd.f32 %v6767_v26, %v6766_v37  ;;  %v6999_v13 = vsel %vm3342_vm5, %v6819_v27, %v6998_v51  ;;  %v13043_v54 = vld [vmem:[#allocation48_spill] sm:$0xff] }
 0xea9   : > { %v6575_v9 = vpop.permute.xlu1 %6574  ;;  %v6732_v21 = vrot.slane %v6731_v53, 2  ;;  %v6744_v36 = vrot.slane %v6743_v49, 4  ;;  %v6756_v14 = vadd.f32 %v6755_v20, %v6754_v34  ;;  %v6826_v19 = vadd.f32 %v6825_v50, %v6824_v44 }
 0xeaa   : > { %v6704_v17 = vmul.f32 %v6575_v9, %v13040_v28  ;;  %v6774_v5 = vrot.slane %v6773_v12, 2  ;;  %v13042_v29 = vmax.f32 %v13041_v35, 0.0  ;;  %v13044_v10 = vmax.f32 %v13043_v54, 0.0 }
 0xeab   : > { %v6733_v40 = vadd.f32 %v6732_v21, %v6731_v53  ;;  %v6745_v25 = vadd.f32 %v6744_v36, %v6743_v49  ;;  %v6763_v4 = vadd.f32 %v6762_v56, %v6761_v55  ;;  %v6838_v48 = vadd.f32 %v6837_v6, %v6836_v59  ;;  %v13045_v36 = vld [vmem:[#allocation51_spill] sm:$0xff] }
 0xeac   : > { %v6778_v47 = vsel %vm940_vm0, %v6704_v17, 0.0  ;;  %v6775_v31 = vadd.f32 %v6774_v5, %v6773_v12  ;;  %v6769_v37 = vrot.slane %v6768_v30, 1  ;;  %v7000_v62 = vsel %vm3344_vm6, %v6826_v19, %v6999_v13  ;;  %v13047_v17 = vld [vmem:[#allocation49_spill] sm:$0xff] }
 0xead   : > { %v6734_v16 = vrot.slane %v6733_v40, 1  ;;  %v6779_v39 = vrot.slane %v6778_v47, 4  ;;  %v6746_v22 = vrot.slane %v6745_v25, 2  ;;  %v13046_v24 = vmax.f32 %v13045_v36, 0.0 }
 0xeae   : > { %v6776_v0 = vrot.slane %v6775_v31, 1  ;;  %v13048_v55 = vmax.f32 %v13047_v17, 0.0  ;;  %v6839_v26 = vrot.slane %v6838_v48, 1 }
 0xeaf   : > { %v6780_v11 = vadd.f32 %v6779_v39, %v6778_v47  ;;  %v6747_v46 = vadd.f32 %v6746_v22, %v6745_v25  ;;  %v6735_v60 = vadd.f32 %v6734_v16, %v6733_v40  ;;  %v6770_v25 = vadd.f32 %v6769_v37, %v6768_v30  ;;  %v13053_v37 = vld [vmem:[#allocation43_spill] sm:$0xff] }
 0xeb0   : > { %v6777_v16 = vadd.f32 %v6776_v0, %v6775_v31 }
 0xeb1   : > { %v6781_v61 = vrot.slane %v6780_v11, 2  ;;  %v6665_v7 = vpop.permute.xlu0 %6664  ;;  %v6660_v38 = vpop.permute.xlu1 %6659  ;;  %v6748_v15 = vrot.slane %v6747_v46, 1  ;;  %v6989_v49 = vsel %vm3336_vm2, %v6742_v43, %v6735_v60  ;;  %v6833_v60 = vadd.f32 %v6832_v3, %v12458_v52 }
 0xeb2   : > { %v6722_v8 = vmul.f32 %v6665_v7, %v13042_v29  ;;  %v6721_v23 = vmul.f32 %v6660_v38, %v13044_v10  ;;  %v13054_v52 = vmax.f32 %v13053_v37, 0.0 }
 0xeb3   : > { %v6782_v53 = vadd.f32 %v6781_v61, %v6780_v11  ;;  %v6749_v57 = vadd.f32 %v6748_v15, %v6747_v46  ;;  %v13049_v11 = vld [vmem:[#allocation41_spill] sm:$0xff]  ;;  %v6840_v61 = vadd.f32 %v6839_v26, %v6838_v48  ;;  %v7001_v29 = vsel %vm3346_vm7, %v6833_v60, %v7000_v62 }
 0xeb4   : > { %v6904_v32 = vsel %vm940_vm0, %v6722_v8, 0.0  ;;  %v6897_v2 = vsel %vm940_vm0, %v6721_v23, 0.0  ;;  %v13050_v51 = vmax.f32 %v13049_v11, 0.0  ;;  %v13051_v46 = vld [vmem:[#allocation53_spill] sm:$0xff] }
 0xeb5   : > { %v6783_v9 = vrot.slane %v6782_v53, 1  ;;  %v6905_v41 = vrot.slane %v6904_v32, 4  ;;  %v6898_v34 = vrot.slane %v6897_v2, 4  ;;  %v6670_v21 = vpop.permute.xlu0 %6669  ;;  %v6675_v12 = vpop.permute.xlu1 %6674  ;;  %v6990_v44 = vsel %vm3338_vm3, %v6749_v57, %v6989_v49 }
 0xeb6   : > { %v6723_v28 = vmul.f32 %v6670_v21, %v13046_v24  ;;  %v6724_v59 = vmul.f32 %v6675_v12, %v13048_v55  ;;  %v6991_v5 = vsel %vm3340_vm4, %v6756_v14, %v6990_v44  ;;  %v13052_v13 = vmax.f32 %v13051_v46, 0.0  ;;  %v13057_v24 = vld [vmem:[#allocation45_spill] sm:$0xff] }
 0xeb7   : > { %v6906_v40 = vadd.f32 %v6905_v41, %v6904_v32  ;;  %v6899_v45 = vadd.f32 %v6898_v34, %v6897_v2  ;;  %v6992_v20 = vsel %vm3342_vm5, %v6763_v4, %v6991_v5  ;;  %v6784_v39 = vadd.f32 %v6783_v9, %v6782_v53  ;;  %v13055_v2 = vld [vmem:[#allocation52_spill] sm:$0xff]  ;;  %v13059_v55 = vld [vmem:[#allocation57_spill] sm:$0xff] }
 0xeb8   : > { %v6911_v47 = vsel %vm940_vm0, %v6723_v28, 0.0  ;;  %v6918_v27 = vsel %vm940_vm0, %v6724_v59, 0.0  ;;  %v6993_v30 = vsel %vm3344_vm6, %v6770_v25, %v6992_v20  ;;  %v7002_v53 = vsel %vm3348_vm8, %v6840_v61, %v7001_v29  ;;  %v13060_v25 = vld [vmem:[#allocation40_spill] sm:$0xff]  ;;  %v13064_v61 = vld [vmem:[#allocation42_spill] sm:$0xff] }
 0xeb9   : > { %v6912_v1 = vrot.slane %v6911_v47, 4  ;;  %v6919_v50 = vrot.slane %v6918_v27, 4  ;;  %v6620_v22 = vpop.permute.xlu0 %6619  ;;  %v6680_v56 = vpop.permute.xlu1 %6679  ;;  %v6907_v6 = vrot.slane %v6906_v40, 2  ;;  %v6900_v7 = vrot.slane %v6899_v45, 2 }
 0xeba   : > { %v6713_v43 = vmul.f32 %v6620_v22, %v13050_v51  ;;  %v6725_v14 = vmul.f32 %v6680_v56, %v13052_v13  ;;  %v6994_v15 = vsel %vm3346_vm7, %v6777_v16, %v6993_v30  ;;  %v13056_v49 = vmax.f32 %v13055_v2, 0.0 }
 0xebb   : > { %v6913_v38 = vadd.f32 %v6912_v1, %v6911_v47  ;;  %v6920_v35 = vadd.f32 %v6919_v50, %v6918_v27  ;;  %v6908_v10 = vadd.f32 %v6907_v6, %v6906_v40  ;;  %v6995_v4 = vsel %vm3348_vm8, %v6784_v39, %v6994_v15 }
 0xebc   : > { %v6841_v31 = vsel %vm940_vm0, %v6713_v43, 0.0  ;;  %v6925_v19 = vsel %vm940_vm0, %v6725_v14, 0.0  ;;  %8256 = vmatprep.mubr.msk.f32.mxu1 %vm940_vm0, %v6995_v4  ;;  %v6901_v0 = vadd.f32 %v6900_v7, %v6899_v45  ;;  %v13058_v28 = vmax.f32 %v13057_v24, 0.0  ;;  %v13062_v14 = vld [vmem:[#allocation44_spill] sm:$0xff] }
 0xebd   : > { %v6630_v8 = vpop.permute.xlu0 %6629  ;;  %v6685_v54 = vpop.permute.xlu1 %6684  ;;  %v6842_v23 = vrot.slane %v6841_v31, 4  ;;  %v6926_v48 = vrot.slane %v6925_v19, 4  ;;  %v6914_v57 = vrot.slane %v6913_v38, 2  ;;  %8257 = vmatmul.mubr.msk.f32.vlgmr.msra.gmra.mrb[44].mxu1 %vm940_vm0, %v7002_v53  ;;  %v6921_v41 = vrot.slane %v6920_v35, 2 }
 0xebe   : > { %v6715_v3 = vmul.f32 %v6630_v8, %v13054_v52  ;;  %v6726_v9 = vmul.f32 %v6685_v54, %v13056_v49  ;;  %8573 = vmatpush3.bf16.msra.mxu1 %v11553_v63  ;;  %v6909_v44 = vrot.slane %v6908_v10, 1  ;;  %v6902_v40 = vrot.slane %v6901_v0, 1  ;;  %v13068_v52 = vld [vmem:[#allocation56_spill] sm:$0xff] }
 0xebf   : > { %v6843_v34 = vadd.f32 %v6842_v23, %v6841_v31  ;;  %8575 = vmatprep.subr.bf16.mxu1 %v13059_v55  ;;  %v6927_v59 = vadd.f32 %v6926_v48, %v6925_v19  ;;  %v12519_v45 = vadd.f32 %v6914_v57, %v6913_v38  ;;  %v13061_v47 = vmax.f32 %v13060_v25, 0.0  ;;  %v13066_v23 = vld [vmem:[#allocation47_spill] sm:$0xff] }
 0xec0   : > { %v6855_v32 = vsel %vm940_vm0, %v6715_v3, 0.0  ;;  %v6932_v36 = vsel %vm940_vm0, %v6726_v9, 0.0  ;;  %v12524_v20 = vadd.f32 %v6921_v41, %v6920_v35  ;;  %v12527_v22 = vadd.f32 %v6909_v44, %v6908_v10 }
 0xec1   : > { %v6856_v21 = vrot.slane %v6855_v32, 4  ;;  %v6640_v12 = vpop.permute.xlu0 %6639  ;;  %v6625_v62 = vpop.permute.xlu1 %6624  ;;  %v6844_v63 = vrot.slane %v6843_v34, 2  ;;  %v6933_v16 = vrot.slane %v6932_v36, 4  ;;  %v6928_v6 = vrot.slane %v6927_v59, 2 }
 0xec2   : > { %v6717_v17 = vmul.f32 %v6640_v12, %v13058_v28  ;;  %v6714_v27 = vmul.f32 %v6625_v62, %v13061_v47  ;;  %8577 = vmatpush3.bf16.msra.mxu1 %v13059_v55  ;;  %v12530_v46 = vadd.f32 %v6902_v40, %v6901_v0  ;;  %v6916_v13 = vrot.slane %v12519_v45, 1 }
 0xec3   : > { %v6857_v26 = vadd.f32 %v6856_v21, %v6855_v32  ;;  %v13063_v30 = vmax.f32 %v13062_v14, 0.0  ;;  %v13065_v7 = vmax.f32 %v13064_v61, 0.0  ;;  %v6923_v31 = vrot.slane %v12524_v20, 1 }
 0xec4   : > { %v6869_v5 = vsel %vm940_vm0, %v6717_v17, 0.0  ;;  %v6848_v56 = vsel %vm940_vm0, %v6714_v27, 0.0  ;;  %v6845_v19 = vadd.f32 %v6844_v63, %v6843_v34  ;;  %v6934_v15 = vadd.f32 %v6933_v16, %v6932_v36  ;;  %v13070_v17 = vld [vmem:[#allocation46_spill] sm:$0xff] }
 0xec5   : > { %v6870_v39 = vrot.slane %v6869_v5, 4  ;;  %v6645_v1 = vpop.permute.xlu0 %6644  ;;  %v6635_v50 = vpop.permute.xlu1 %6634  ;;  %v6858_v11 = vrot.slane %v6857_v26, 2  ;;  %v6849_v43 = vrot.slane %v6848_v56, 4  ;;  %v13067_v4 = vmax.f32 %v13066_v23, 0.0 }
 0xec6   : > { %v6718_v60 = vmul.f32 %v6645_v1, %v13063_v30  ;;  %v6716_v38 = vmul.f32 %v6635_v50, %v13065_v7  ;;  %v13069_v3 = vmax.f32 %v13068_v52, 0.0  ;;  %v12544_v53 = vadd.f32 %v6928_v6, %v6927_v59  ;;  %v13072_v30 = vld [vmem:[#allocation55_spill] sm:$0xff] }
 0xec7   : > { %v6871_v51 = vadd.f32 %v6870_v39, %v6869_v5  ;;  %v6850_v35 = vadd.f32 %v6849_v43, %v6848_v56  ;;  %v6859_v0 = vadd.f32 %v6858_v11, %v6857_v26  ;;  %v6846_v34 = vrot.slane %v6845_v19, 1 }
 0xec8   : > { %v6876_v54 = vsel %vm940_vm0, %v6718_v60, 0.0  ;;  %v6862_v10 = vsel %vm940_vm0, %v6716_v38, 0.0  ;;  %v6935_v21 = vrot.slane %v6934_v15, 2  ;;  %v13071_v55 = vmax.f32 %v13070_v17, 0.0 }
 0xec9   : > { %v6650_v29 = vpop.permute.xlu0 %6649  ;;  %v6690_v8 = vpop.permute.xlu1 %6689  ;;  %v6872_v57 = vrot.slane %v6871_v51, 2  ;;  %v6851_v32 = vrot.slane %v6850_v35, 2  ;;  %v6877_v2 = vrot.slane %v6876_v54, 4  ;;  %v6863_v49 = vrot.slane %v6862_v10, 4 }
 0xeca   : > { %v6719_v37 = vmul.f32 %v6650_v29, %v13067_v4  ;;  %v6727_v48 = vmul.f32 %v6690_v8, %v13069_v3  ;;  %v6860_v26 = vrot.slane %v6859_v0, 1  ;;  %v6847_v39 = vadd.f32 %v6846_v34, %v6845_v19 }
 0xecb   : > { %v6852_v12 = vadd.f32 %v6851_v32, %v6850_v35  ;;  %v6878_v36 = vadd.f32 %v6877_v2, %v6876_v54  ;;  %v6864_v24 = vadd.f32 %v6863_v49, %v6862_v10  ;;  %v6873_v40 = vadd.f32 %v6872_v57, %v6871_v51 }
 0xecc   : > { %v6883_v9 = vsel %vm940_vm0, %v6719_v37, 0.0  ;;  %v6939_v41 = vsel %vm940_vm0, %v6727_v48, 0.0  ;;  %v13073_v60 = vmax.f32 %v13072_v30, 0.0  ;;  %v6936_v7 = vadd.f32 %v6935_v21, %v6934_v15 }
 0xecd   : > { %v6884_v62 = vrot.slane %v6883_v9, 4  ;;  %v6655_v44 = vpop.permute.xlu0 %6654  ;;  %v6940_v28 = vrot.slane %v6939_v41, 4  ;;  %v6853_v5 = vrot.slane %v6852_v12, 1  ;;  %v6879_v47 = vrot.slane %v6878_v36, 2 }
 0xece   : > { %v6720_v59 = vmul.f32 %v6655_v44, %v13071_v55  ;;  %v6865_v27 = vrot.slane %v6864_v24, 2  ;;  %v6874_v51 = vrot.slane %v6873_v40, 1  ;;  %v6861_v29 = vadd.f32 %v6860_v26, %v6859_v0 }
 0xecf   : > { %v6885_v25 = vadd.f32 %v6884_v62, %v6883_v9  ;;  %v6941_v63 = vadd.f32 %v6940_v28, %v6939_v41  ;;  %v6854_v1 = vadd.f32 %v6853_v5, %v6852_v12  ;;  %v6880_v11 = vadd.f32 %v6879_v47, %v6878_v36 }
 0xed0   : > { %v6890_v16 = vsel %vm940_vm0, %v6720_v59, 0.0  ;;  %v6866_v43 = vadd.f32 %v6865_v27, %v6864_v24  ;;  %v6917_v52 = vadd.f32 %v6916_v13, %v12519_v45  ;;  %v6930_v3 = vrot.slane %v12544_v53, 1  ;;  %v12581_v27 = vld [vmem:[%s12931_s9] sm:$0xff] }
 0xed1   : > { %v6886_v50 = vrot.slane %v6885_v25, 2  ;;  %v6891_v56 = vrot.slane %v6890_v16, 4  ;;  %v6695_v6 = vpop.permute.xlu0 %6694  ;;  %v6942_v14 = vrot.slane %v6941_v63, 2  ;;  %v7003_v8 = vsel %vm3336_vm2, %v6854_v1, %v6847_v39 }
 0xed2   : > { %v6728_v61 = vmul.f32 %v6695_v6, %v13073_v60  ;;  %v6881_v54 = vrot.slane %v6880_v11, 1  ;;  %v6867_v10 = vrot.slane %v6866_v43, 1  ;;  %v6937_v15 = vrot.slane %v6936_v7, 1 }
 0xed3   : > { %v6887_v38 = vadd.f32 %v6886_v50, %v6885_v25  ;;  %v6892_v35 = vadd.f32 %v6891_v56, %v6890_v16  ;;  %v6943_v23 = vadd.f32 %v6942_v14, %v6941_v63  ;;  %v6875_v32 = vadd.f32 %v6874_v51, %v6873_v40 }
 0xed4   : > { %v6946_v37 = vsel %vm940_vm0, %v6728_v61, 0.0  ;;  %v6868_v48 = vadd.f32 %v6867_v10, %v6866_v43  ;;  %v7004_v2 = vsel %vm3338_vm3, %v6861_v29, %v7003_v8  ;;  %v6882_v49 = vadd.f32 %v6881_v54, %v6880_v11  ;;  %v13075_v61 = vld [vmem:[#allocation59_spill] sm:$0xff]  ;;  %v13077_v8 = vld [vmem:[#allocation61_spill] sm:$0xff] }
 0xed5   : > { %v6888_v19 = vrot.slane %v6887_v38, 1  ;;  %v6893_v4 = vrot.slane %v6892_v35, 2  ;;  %v6947_v57 = vrot.slane %v6946_v37, 4  ;;  %v6944_v21 = vrot.slane %v6943_v23, 1 }
 0xed6   : > { %v7005_v9 = vsel %vm3340_vm4, %v6868_v48, %v7004_v2  ;;  %v7010_v45 = vsel %vm3336_vm2, %v12527_v22, %v12530_v46  ;;  %v6924_v13 = vadd.f32 %v6923_v31, %v12524_v20  ;;  %v6931_v28 = vadd.f32 %v6930_v3, %v12544_v53 }
 0xed7   : > { %v6894_v0 = vadd.f32 %v6893_v4, %v6892_v35  ;;  %v6889_v41 = vadd.f32 %v6888_v19, %v6887_v38  ;;  %v6948_v34 = vadd.f32 %v6947_v57, %v6946_v37  ;;  %v7006_v62 = vsel %vm3342_vm5, %v6875_v32, %v7005_v9  ;;  %v13076_v38 = vld [vmem:[#allocation60_spill] sm:$0xff]  ;;  %v8935_v4 = vld [vmem:[%s9704_s28 + $0x8] sm:$0xff] }
 0xed8   : > { %v7007_v36 = vsel %vm3344_vm6, %v6882_v49, %v7006_v62  ;;  %v7011_v24 = vsel %vm3338_vm3, %v6917_v52, %v7010_v45  ;;  %v6938_v55 = vadd.f32 %v6937_v15, %v6936_v7  ;;  %v6945_v40 = vadd.f32 %v6944_v21, %v6943_v23  ;;  %v8936_v52 = vld [vmem:[%s9704_s28] sm:$0xff]  ;;  %s9270_s28 = smov [#allocation16]  }
 0xed9   : > { %v6895_v12 = vrot.slane %v6894_v0, 1  ;;  %v6949_v44 = vrot.slane %v6948_v34, 2  ;;  %v7008_v26 = vsel %vm3346_vm7, %v6889_v41, %v7007_v36  ;;  %v7012_v22 = vsel %vm3340_vm4, %v6924_v13, %v7011_v24  ;;  %v8937_v57 = vld [vmem:[%s9696_s29] sm:$0xff]  ;;  %s9171_s18 = sshll.u32 %s9270_s28, 4  ;;  %s9172_s18 = int_to_ptr.vmem [resolvable:$false] %s9171_s18 }
 0xeda   : > { %v7013_v20 = vsel %vm3342_vm5, %v6931_v28, %v7012_v22  ;;  %v6956_v63 = vrot.slane %v12581_v27, %v11049_v33  ;;  %v13074_v33 = vld [vmem:[#allocation58_spill] sm:$0xff]  ;;  %s9173_s6 = scalar_lea.vmem %s9172_s18, 512  ;;  %p9174_p8 = scmp.lt.s32.totalorder %s12696_s23, %s9172_s18 }
 0xedb   : > { %v6896_v17 = vadd.f32 %v6895_v12, %v6894_v0  ;;  %v6950_v59 = vadd.f32 %v6949_v44, %v6948_v34  ;;  %v7014_v25 = vsel %vm3344_vm6, %v6938_v55, %v7013_v20  ;;  %v8938_v0 = vld [vmem:[%s9696_s29 + $0x8] sm:$0xff]  ;;  %p9175_p11 = scmp.lt.s32.totalorder %s9173_s6, %s9167_s25 }
 0xedc   : > { %v7015_v53 = vsel %vm3346_vm7, %v6945_v40, %v7014_v25  ;;  %v7285_v25 = vld [vmem:[%s13078_s3] sm:$0xff] }
 0xedd   : > { %v7009_v5 = vsel %vm3348_vm8, %v6896_v17, %v7008_v26  ;;  %v6951_v46 = vrot.slane %v6950_v59, 1  ;;  %p9176_p3 = por %p9175_p11, %p9174_p8 }
 0xede   : > { %8259 = vmatprep.mubr.msk.f32.mxu1 %vm940_vm0, %v7009_v5 }
 0xedf   : > { %v6952_v31 = vadd.f32 %v6951_v46, %v6950_v59  ;;  %p9177_p12 = pnand %p9176_p3, %p9170_p9 }
 0xee1   : > { %v7016_v47 = vsel %vm3348_vm8, %v6952_v31, %v7015_v53  ;;  %v7286_v53 = vld [vmem:[%s13078_s3 + $0x8] sm:$0xff] }
 0xee2   : > { %8260 = vmatmul.mubr.msk.f32.gmra.mrb[46].mxu1 %vm940_vm0, %v7016_v47  ;;  %v7287_v47 = vld [vmem:[%s13078_s3 + $0x10] sm:$0xff] }
 0xf90   : > { %v8258_v16 = vpop.f32.mrb[44].mxu1 }
 0xf91   : > { %v7091_v39 = vpop.f32.mrb[45].mxu1  ;;  %v7097_v50 = vadd.f32 %v8258_v16, %v6956_v63  ;;  %v7288_v16 = vld [vmem:[%s13078_s3 + $0x18] sm:$0xff] }
 0xf92   : > { %v7092_v1 = vadd.f32 %v7091_v39, %v6956_v63  ;;  %v8582_v39 = vpack.c.bf16 %v7288_v16, %v7287_v47 }
 0xf94   : > { %8270 = vmatprep.mubr.msk.f32.mxu1 %vm940_vm0, %v7092_v1  ;;  %v7289_v1 = vld [vmem:[%s13078_s3 + $0x20] sm:$0xff] }
 0xf95   : > { %8271 = vmatmul.mubr.msk.f32.vlgmr.msra.gmra.mrb[48].mxu1 %vm940_vm0, %v7097_v50  ;;  %v7290_v50 = vld [vmem:[%s13078_s3 + $0x28] sm:$0xff] }
 0xfb5   : > { %v8261_v56 = vpop.f32.mrb[46].mxu1 }
 0xfb6   : > { %v7101_v6 = vpop.f32.mrb[47].mxu1  ;;  %v7107_v43 = vadd.f32 %v8261_v56, %v6956_v63  ;;  %v8586_v56 = vpack.c.bf16 %v7290_v50, %v7289_v1 }
 0xfb7   : > { %v7102_v11 = vadd.f32 %v7101_v6, %v6956_v63  ;;  %v8578_v63 = vpack.c.bf16 %v7286_v53, %v7285_v25  ;;  %v7291_v6 = vld [vmem:[%s13078_s3 + $0x30] sm:$0xff] }
 0xfb9   : > { %8273 = vmatprep.mubr.msk.f32.mxu1 %vm940_vm0, %v7102_v11  ;;  %8579 = vmatprep.subr.bf16.mxu1 %v8578_v63  ;;  %v7292_v11 = vld [vmem:[%s13078_s3 + $0x38] sm:$0xff] }
 0xfba   : > { %8274 = vmatmul.mubr.msk.f32.gmra.mrb[50].mxu1 %vm940_vm0, %v7107_v43  ;;  %v8590_v43 = vpack.c.bf16 %v7292_v11, %v7291_v6 }
 0xfbb   : > { %8581 = vmatpush3.bf16.msra.mxu1 %v8578_v63 }
 0xfbc   : > { %8583 = vmatprep.subr.bf16.mxu1 %v8582_v39 }
 0xfbf   : > { %8585 = vmatpush3.bf16.msra.mxu1 %v8582_v39 }
 0xfc0   : > { %8587 = vmatprep.subr.bf16.mxu1 %v8586_v56 }
 0xfc3   : > { %8589 = vmatpush3.bf16.msra.mxu1 %v8586_v56 }
 0xfc4   : > { %8591 = vmatprep.subr.bf16.mxu1 %v8590_v43 }
 0xfc7   : > { %8593 = vmatpush3.bf16.msra.mxu1 %v8590_v43 }
0x1068   : > { %v8272_v14 = vpop.f32.mrb[48].mxu1 }
0x1069   : > { %v7194_v30 = vadd.f32 %v8272_v14, %v13074_v33  ;;  %v7188_v60 = vpop.f32.mrb[49].mxu1 }
0x106a   : > { %v7189_v7 = vadd.f32 %v7188_v60, %v13075_v61 }
0x106b   : > { %v7208_v48 = vmax.f32 %v7194_v30, 0.0 }
0x106c   : > { %v7207_v10 = vmax.f32 %v7189_v7, 0.0 }
0x106d   : > { %v7212_v49 = vadd.f32 %v8938_v0, %v7208_v48  ;;  %v13080_v48 = vld [vmem:[#allocation62_spill] sm:$0xff]  ;;  %v13081_v0 = vld [vmem:[#allocation63_spill] sm:$0xff] }
0x106e   : > { %v7211_v15 = vadd.f32 %v8937_v57, %v7207_v10  ;;  %v7384_v10 = vld [vmem:[%s13079_s15 + $0x20] sm:$0xff] }
0x106f   : > { %v7218_v41 = vsel %vm940_vm0, %v7212_v49, 0.0 }
0x1070   : > { %v7215_v9 = vsel %vm940_vm0, %v7211_v15, 0.0 }
0x108d   : > { %v8275_v51 = vpop.f32.mrb[50].mxu1 }
0x108e   : > { %v7204_v35 = vadd.f32 %v8275_v51, %v13076_v38  ;;  %v7198_v29 = vpop.f32.mrb[51].mxu1  ;;  %v7380_v51 = vld [vmem:[%s13079_s15] sm:$0xff]  ;;  %v7381_v38 = vld [vmem:[%s13079_s15 + $0x8] sm:$0xff] }
0x108f   : > { %v7199_v54 = vadd.f32 %v7198_v29, %v13077_v8  ;;  %v8594_v29 = vpack.c.bf16 %v7381_v38, %v7380_v51  ;;  %v7383_v8 = vld [vmem:[%s13079_s15 + $0x18] sm:$0xff] }
0x1090   : > { %v7210_v19 = vmax.f32 %v7204_v35, 0.0  ;;  %v7382_v35 = vld [vmem:[%s13079_s15 + $0x10] sm:$0xff] }
0x1091   : > { %v7209_v23 = vmax.f32 %v7199_v54, 0.0  ;;  %v8598_v54 = vpack.c.bf16 %v7383_v8, %v7382_v35  ;;  %8595 = vmatprep.subr.bf16.mxu0 %v8594_v29 }
0x1092   : > { %v7214_v37 = vadd.f32 %v8935_v4, %v7210_v19  ;;  %v7385_v19 = vld [vmem:[%s13079_s15 + $0x28] sm:$0xff]  ;;  %8597 = vmatpush3.bf16.msra.mxu0 %v8594_v29 }
0x1093   : > { %v7213_v3 = vadd.f32 %v8936_v52, %v7209_v23  ;;  %8599 = vmatprep.subr.bf16.mxu0 %v8598_v54 }
0x1094   : > { %v7224_v32 = vsel %vm940_vm0, %v7214_v37, 0.0 }
0x1095   : > { %7225 = vadd.xlane.f32.xlu0 %v7224_v32  ;;  %v7221_v2 = vsel %vm940_vm0, %v7213_v3, 0.0  ;;  %v7387_v32 = vld [vmem:[%s13079_s15 + $0x38] sm:$0xff] }
0x1096   : > { %7222 = vadd.xlane.f32.xlu1 %v7221_v2  ;;  %8601 = vmatpush3.bf16.msra.mxu0 %v8598_v54 }
0x1099   : > { %7216 = vadd.xlane.f32.xlu0 %v7215_v9 }
0x109d   : > { %7219 = vadd.xlane.f32.xlu0 %v7218_v41 }
0x1122   : > { %v7226_v34 = vpop.xlane.xlu0 %7225 }
0x1123   : > { %v7230_v21 = vmul.f32 0.03125, %v7226_v34  ;;  %v7223_v12 = vpop.xlane.xlu1 %7222 }
0x1124   : > { %v7229_v62 = vmul.f32 0.03125, %v7223_v12 }
0x1125   : > { %v7234_v45 = vsub.f32 %v7214_v37, %v7230_v21 }
0x1126   : > { %v7233_v13 = vsub.f32 %v7213_v3, %v7229_v62  ;;  %v7217_v44 = vpop.xlane.xlu0 %7216  ;;  %v8602_v3 = vpack.c.bf16 %v7385_v19, %v7384_v10 }
0x1127   : > { %v7227_v36 = vmul.f32 0.03125, %v7217_v44  ;;  %v7238_v24 = vmul.f32 %v7234_v45, %v7234_v45 }
0x1128   : > { %v7237_v28 = vmul.f32 %v7233_v13, %v7233_v13  ;;  %8603 = vmatprep.subr.bf16.mxu0 %v8602_v3 }
0x1129   : > { %v12601_v17 = vsub.f32 %v7211_v15, %v7227_v36  ;;  %v7248_v55 = vsel %vm940_vm0, %v7238_v24, 0.0  ;;  %v7386_v15 = vld [vmem:[%s13079_s15 + $0x30] sm:$0xff]  ;;  %8605 = vmatpush3.bf16.msra.mxu0 %v8602_v3 }
0x112a   : > { %7249 = vadd.xlane.f32.xlu0 %v7248_v55  ;;  %v7220_v59 = vpop.xlane.xlu0 %7219  ;;  %v7245_v26 = vsel %vm940_vm0, %v7237_v28, 0.0  ;;  %v8606_v41 = vpack.c.bf16 %v7387_v32, %v7386_v15 }
0x112b   : > { %v7228_v40 = vmul.f32 0.03125, %v7220_v59  ;;  %7246 = vadd.xlane.f32.xlu1 %v7245_v26  ;;  %v7235_v5 = vmul.f32 %v12601_v17, %v12601_v17 }
0x112c   : > { %8607 = vmatprep.subr.bf16.mxu0 %v8606_v41 }
0x112d   : > { %v12607_v22 = vsub.f32 %v7212_v49, %v7228_v40  ;;  %v7239_v46 = vsel %vm940_vm0, %v7235_v5, 0.0  ;;  %8609 = vmatpush3.bf16.msra.mxu0 %v8606_v41 }
0x112f   : > { %7240 = vadd.xlane.f32.xlu1 %v7239_v46  ;;  %v7236_v20 = vmul.f32 %v12607_v22, %v12607_v22 }
0x1131   : > { %v7242_v31 = vsel %vm940_vm0, %v7236_v20, 0.0 }
0x1132   : > { %7243 = vadd.xlane.f32.xlu0 %v7242_v31 }
0x11b7   : > { %v7250_v14 = vpop.xlane.xlu0 %7249 }
0x11b8   : > { %v7254_v33 = vmul.f32 0.03125, %v7250_v14  ;;  %v7247_v30 = vpop.xlane.xlu1 %7246 }
0x11b9   : > { %v7253_v60 = vmul.f32 0.03125, %v7247_v30 }
0x11ba   : > { %v7258_v61 = vadd.f32 1e-05, %v7254_v33 }
0x11bb   : > { %v7257_v7 = vadd.f32 1e-05, %v7253_v60 }
0x11bc   : > { %8885 = vrsqrt.f32 %v7258_v61  ;;  %v7241_v34 = vpop.xlane.xlu1 %7240 }
0x11bd   : > { %8887 = vrsqrt.f32 %v7257_v7  ;;  %v7251_v12 = vmul.f32 0.03125, %v7241_v34 }
0x11bf   : > { %v7244_v21 = vpop.xlane.xlu0 %7243 }
0x11c0   : > { %v7252_v62 = vmul.f32 0.03125, %v7244_v21 }
0x11c6   : > { %v8886_v23 = vpop.eup %8885 }
0x11c7   : > { %v8888_v4 = vpop.eup %8887  ;;  %v7266_v37 = vmul.f32 %v8886_v23, %v7234_v45  ;;  %v7255_v45 = vadd.f32 1e-05, %v7251_v12  ;;  %v7499_v23 = vrot.slane %v12581_v27, %v11033_v58 }
0x11c8   : > { %v7265_v52 = vmul.f32 %v8888_v4, %v7233_v13  ;;  %v7256_v13 = vadd.f32 1e-05, %v7252_v62 }
0x11c9   : > { %v7270_v57 = vmul.f32 %v7266_v37, %v13080_v48  ;;  %8889 = vrsqrt.f32 %v7255_v45 }
0x11ca   : > { %v7269_v2 = vmul.f32 %v7265_v52, %v13080_v48  ;;  %8891 = vrsqrt.f32 %v7256_v13  ;;  %v7505_v52 = vrot.slane %v12581_v27, %v11066_v42 }
0x11cb   : > { %v7274_v49 = vadd.f32 %v7270_v57, %v13081_v0 }
0x11cc   : > { %v7273_v9 = vadd.f32 %v7269_v2, %v13081_v0 }
0x11cd   : > { %7279 = vrot.lane.b32.xlu0 %v7274_v49, %s12909_s14 }
0x11ce   : > { %7277 = vrot.lane.b32.xlu1 %v7273_v9, %s12909_s14  ;;  %s7845_s14 = sshll.u32 %s9394_s2, 8  ;;  %s7511_s2 = scalar_lea.sflag [#allocation4], %s9689_s11 }
0x11cf   : > { %s12694_s29 = scalar_lea.hbm %s13082_s16, %s7845_s14 }
0x11d3   : > { %v8890_v44 = vpop.eup %8889 }
0x11d4   : > { %v8892_v36 = vpop.eup %8891  ;;  %v7263_v24 = vmul.f32 %v8890_v44, %v12601_v17  ;;  %v7296_v17 = vrot.slane %v12581_v27, %v11056_v18 }
0x11d5   : > { %v7264_v28 = vmul.f32 %v8892_v36, %v12607_v22 }
0x11d6   : > { %v7267_v55 = vmul.f32 %v7263_v24, %v13080_v48 }
0x11d7   : > { %v7268_v59 = vmul.f32 %v7264_v28, %v13080_v48 }
0x11d8   : > { %v7271_v40 = vadd.f32 %v7267_v55, %v13081_v0 }
0x11d9   : > { %v7272_v5 = vadd.f32 %v7268_v59, %v13081_v0 }
0x123f   : > { %v7280_v26 = vpop.permute.xlu0 %7279 }
0x1240   : > { %v7278_v46 = vpop.permute.xlu1 %7277  ;;  %v7284_v31 = vsel %vm940_vm0, %v7272_v5, %v7280_v26 }
0x1241   : > { %v7283_v20 = vsel %vm940_vm0, %v7271_v40, %v7278_v46 }
0x1242   : > { %8292 = vmatprep.mubr.msk.f32.mxu1 %vm2223_vm1, %v7283_v20 }
0x1243   : > { %8293 = vmatmul.mubr.msk.f32.vlgmr.msra.gmra.mrb[52].mxu1 %vm2223_vm1, %v7284_v31 }
0x1316   : > { %v8294_v22 = vpop.f32.mrb[52].mxu1 }
0x1317   : > { %v7375_v25 = vadd.f32 %v8294_v22, %v7296_v17  ;;  %v7369_v53 = vpop.f32.mrb[53].mxu1 }
0x1318   : > { %v7370_v47 = vadd.f32 %v7369_v53, %v7296_v17 }
0x1319   : > { %v7379_v16 = vmax.f32 %v7375_v25, 0.0 }
0x131a   : > { %v7378_v63 = vmax.f32 %v7370_v47, 0.0 }
0x131c   : > { %8311 = vmatprep.mubr.msk.f32.mxu0 %vm2223_vm1, %v7378_v63 }
0x131d   : > { %8312 = vmatmul.mubr.msk.f32.vlgmr.msra.gmra.mrb[56].mxu0 %vm2223_vm1, %v7379_v16 }
0x13f0   : > { %v8313_v39 = vpop.f32.mrb[56].mxu0 }
0x13f1   : > { %v7466_v1 = vadd.f32 %v8313_v39, %v7284_v31  ;;  %v7460_v50 = vpop.f32.mrb[57].mxu0 }
0x13f2   : > { %v7461_v56 = vadd.f32 %v7460_v50, %v7283_v20 }
0x13f3   : > { %v7472_v6 = vsel %vm2223_vm1, %v7466_v1, 0.0 }
0x13f4   : > { %7473 = vadd.xlane.f32.xlu0 %v7472_v6  ;;  %v7469_v11 = vsel %vm2223_vm1, %v7461_v56, 0.0 }
0x13f5   : > { %7470 = vadd.xlane.f32.xlu1 %v7469_v11 }
0x1481   : > { %v7474_v18 = vpop.xlane.xlu0 %7473 }
0x1482   : > { %v7477_v43 = vmul.f32 0.015625, %v7474_v18  ;;  %v7471_v14 = vpop.xlane.xlu1 %7470 }
0x1483   : > { %v7476_v33 = vmul.f32 0.015625, %v7471_v14 }
0x1484   : > { %v7479_v30 = vsub.f32 %v7466_v1, %v7477_v43 }
0x1485   : > { %v7478_v60 = vsub.f32 %v7461_v56, %v7476_v33 }
0x1486   : > { %v7481_v61 = vmul.f32 %v7479_v30, %v7479_v30 }
0x1487   : > { %v7480_v7 = vmul.f32 %v7478_v60, %v7478_v60 }
0x1488   : > { %v7485_v51 = vsel %vm2223_vm1, %v7481_v61, 0.0 }
0x1489   : > { %7486 = vadd.xlane.f32.xlu0 %v7485_v51  ;;  %v7482_v38 = vsel %vm2223_vm1, %v7480_v7, 0.0 }
0x148a   : > { %7483 = vadd.xlane.f32.xlu1 %v7482_v38 }
0x1516   : > { %v7487_v35 = vpop.xlane.xlu0 %7486 }
0x1517   : > { %v7489_v29 = vmul.f32 0.015625, %v7487_v35  ;;  %v7484_v8 = vpop.xlane.xlu1 %7483 }
0x1518   : > { %v7488_v54 = vmul.f32 0.015625, %v7484_v8 }
0x1519   : > { %v7491_v10 = vadd.f32 1e-05, %v7489_v29 }
0x151a   : > { %v7490_v19 = vadd.f32 1e-05, %v7488_v54 }
0x151b   : > { %8893 = vrsqrt.f32 %v7491_v10 }
0x151c   : > { %8895 = vrsqrt.f32 %v7490_v19 }
0x1525   : > { %v8894_v4 = vpop.eup %8893 }
0x1526   : > { %v8896_v37 = vpop.eup %8895  ;;  %v7495_v3 = vmul.f32 %v8894_v4, %v7479_v30 }
0x1527   : > { %v7494_v48 = vmul.f32 %v8896_v37, %v7478_v60 }
0x1528   : > { %v7501_v57 = vmul.f32 %v7499_v23, %v7495_v3 }
0x1529   : > { %v7500_v15 = vmul.f32 %v7499_v23, %v7494_v48 }
0x152a   : > { %v7507_v32 = vadd.f32 %v7505_v52, %v7501_v57 }
0x152b   : > { %v7506_v58 = vadd.f32 %v7505_v52, %v7500_v15 }
0x152c   : > { %7509 = vst.msk [vmem:[%s811_s10 + $0x8] sm:$0xff] %vm2223_vm1, %v7507_v32 }
0x152d   : > { %7508 = vst.msk [vmem:[%s811_s10] sm:$0xff] %vm2223_vm1, %v7506_v58 }
0x152e   : > { %9180 = shalt.err (!%p9177_p12)
}
0x152f   : > { %s9181_s13 = scalar_lea.hbm %s12694_s29, 256  ;;  %s9185_s14 = scalar_lea.hbm %s13082_s16, 512 }
0x1530   : > { %p9182_p1 = scmp.ne.s32.totalorder %s12694_s29, %s9181_s13  ;;  %p9186_p6 = scmp.lt.u32.totalorder %s12694_s29, %s13082_s16 }
0x1531   : > { %p9187_p2 = scmp.lt.u32.totalorder %s9185_s14, %s9181_s13  ;;  %p9189_p10 = scmp.lt.u32.totalorder %s9181_s13, %s12694_s29 }
0x1532   : > { %p9183_p13 = pnand %p9182_p1, %p13083_p5 }
0x1533   : > { %p9188_p4 = por %p9187_p2, %p9186_p6 }
0x1534   : > { %p9184_p0 = pneg %p9183_p13 }
0x1535   : > { %p9190_p7 = por %p9189_p10, %p9188_p4 }
0x1537   : > { %p9191_p9 = pnand %p9190_p7, %p9184_p0 }
0x1539   : > { %9194 = shalt.err (!%p9191_p9)
}
0x153a   : > { %s9271_s19 = smov 128   ;;  %s9272_s25 = smov 8  }
0x153b   : > { %8638 = dma.vmem_to_hbm [thread:$0]  (%p13083_p5), %s12696_s23, 256, %s12694_s29, %s7511_s2, %s9271_s19, %s9271_s19, %s9272_s25  }
0x153c PF: > { %s7539_s28 = sand.u32 1, %s9241_s0   ;;  %p13084_p8 = scmp.ne.s32.totalorder %s12879_s26, 0 }
0x153d   : > { %p13085_p11 = scmp.ge.s32.totalorder %s9253_s21, 2  ;;  %s7540_s18 = scalar_lea.sflag [#allocation4], %s7539_s28 }
0x153f   : > { %p8667_p3 = pnand %p13085_p11, %p13084_p8 }
0x1541   : > { %9236 = dma.done.wait (!%p8667_p3), %s7540_s18, 256  }
0x1542   : > { %9238 = vsyncadd (!%p8667_p3), %s7540_s18, 4294967040  ;;  %p38_p12 = scmp.ge.s32.totalorder %s9567_s24, 4   ;;  %s13086_s0 = smov %s9245_s30 }
0x1543   : > { %s13087_s30 = smov %s9249_s20  ;;  %s13088_s20 = smov %s9578_s5 }
0x1544   : > { %s13089_s21 = smov %s9567_s24  ;;  %40 = sbr.rel (!%p38_p12) target bundleno = 29 (0x1d), region = 190 }
0x154b   :  { %7545 = vsyncpa [#allocation3], 1 }
0x154c   :  { %7547 = vsyncpa [#allocation3 + $0x1], 1 }
0x154d   :  { %7548 = vsyncpa [#allocation6], 1 }
0x154e   :  { %7550 = vsyncpa [#allocation6 + $0x1], 1 }
0x154f   :  { %7551 = vsyncpa [#allocation9], 1 }
0x1550   :  { %7552 = vsyncpa [#allocation12], 1 }
0x1551   :  { %7553 = vsyncpa [#allocation15], 1 }
0x1552   :  { %7554 = vsyncpa [#allocation4], 1 }
0x1553   :  { %7556 = vsyncpa [#allocation4 + $0x1], 1 }

</bundles_post_ra>
